<compile_context>
chip_gen: v7x
topology: tpu7x:2x2x1
jax: 0.10.0
libtpu: 0.0.40
codegen_flags: <defaults>
</compile_context>

<pallas_src>
import functools

import jax
import jax.numpy as jnp
from jax.experimental import pallas as pl
from jax.experimental.pallas import tpu as pltpu


# ----------------------------- Pallas kernels ------------------------------

def _conv_bn_relu_kernel(p_ref, w_ref, s_ref, b_ref, o_ref):
    # One full-depth matmul per M-tile (bf16 inputs, f32 accumulation),
    # BN scale/bias + ReLU fused in the epilogue.
    acc = jnp.dot(p_ref[...], w_ref[...], preferred_element_type=jnp.float32)
    o_ref[...] = jnp.maximum(acc * s_ref[...] + b_ref[...], 0.0)


def _conv_add_kernel(p_ref, w_ref, r_ref, o_ref):
    # Conv matmul with the residual add fused in the epilogue.
    acc = jnp.dot(p_ref[...], w_ref[...], preferred_element_type=jnp.float32)
    o_ref[...] = acc + r_ref[...]


def _conv_plain_kernel(p_ref, w_ref, o_ref):
    o_ref[...] = jnp.dot(p_ref[...], w_ref[...],
                         preferred_element_type=jnp.float32)


def _bn_relu_kernel(x_ref, s_ref, b_ref, o_ref):
    o_ref[...] = jnp.maximum(x_ref[...] * s_ref[...] + b_ref[...], 0.0)


def _pool_fc_kernel(x_ref, wa_ref, wm_ref, b_ref, o_ref):
    # Fused adaptive avg/max pool -> concat -> linear; the concat is expressed
    # as two matmuls against the split classifier weight.
    x = x_ref[...]                               # (N, H*W, C) f32
    avg = jnp.mean(x, axis=1)                    # (N, C)
    mx = jnp.max(x, axis=1)                      # (N, C)
    o_ref[...] = (jnp.dot(avg, wa_ref[...], preferred_element_type=jnp.float32)
                  + jnp.dot(mx, wm_ref[...], preferred_element_type=jnp.float32)
                  + b_ref[...])


# ------------------------------ op wrappers ---------------------------------

def _pick_m_tile(M, cap=256):
    """Largest M tile <= cap that evenly divides M (keeps VMEM bounded and
    gives v7x a parallel axis to shard across its 2 TensorCores)."""
    if M <= cap:
        return M
    for t in (256, 128, 64, 32, 16, 8):
        if t <= cap and M % t == 0:
            return t
    return M


def _im2col(x, kh, kw, stride):
    """Folded im2col: (N,H,W,Cin) -> (N*Ho*Wo, kh*kw*Cin).  'same' padding for
    3x3, none for 1x1 (matches the PyTorch module).  Pure layout glue in JAX:
    one folded copy is written, not a (kh*kw, M, Cin) stack."""
    N, H, W, Cin = x.shape
    pad = (kh - 1) // 2
    Ho = (H + 2 * pad - kh) // stride + 1
    Wo = (W + 2 * pad - kw) // stride + 1
    xp = jnp.pad(x, ((0, 0), (pad, pad), (pad, pad), (0, 0)))
    cols = []
    for ky in range(kh):
        for kx in range(kw):
            patch = xp[:, ky:ky + (Ho - 1) * stride + 1:stride,
                          kx:kx + (Wo - 1) * stride + 1:stride, :]
            cols.append(patch.reshape(N * Ho * Wo, Cin))
    patches = jnp.concatenate(cols, axis=-1)     # (M, kh*kw*Cin)
    return patches, Ho, Wo


def conv2d_fused(x, w, stride, *, scale=None, bias=None, residual=None):
    """Conv2d as a single full-contraction matmul per M-tile, with an optional
    fused BN(scale,bias)+ReLU epilogue or a fused residual-add epilogue."""
    N, H, W, Cin = x.shape
    kh, kw, _, Cout = w.shape
    patches, Ho, Wo = _im2col(x, kh, kw, stride)
    M, Kf = patches.shape

    patches = patches.astype(jnp.bfloat16)           # MXU-native inputs
    w2 = w.reshape(Kf, Cout).astype(jnp.bfloat16)    # f32 accumulation in-kernel

    tm = _pick_m_tile(M)
    grid = (M // tm,)
    p_spec = pl.BlockSpec((tm, Kf), lambda i: (i, 0))
    w_spec = pl.BlockSpec((Kf, Cout), lambda i: (0, 0))
    o_spec = pl.BlockSpec((tm, Cout), lambda i: (i, 0))
    cparams = pltpu.CompilerParams(dimension_semantics=("parallel",))
    flops = 2 * M * Kf * Cout
    bytes_acc = patches.size * 2 + w2.size * 2 + M * Cout * 4

    if residual is not None:
        r2 = residual.reshape(M, Cout)
        out = pl.pallas_call(
            _conv_add_kernel,
            out_shape=jax.ShapeDtypeStruct((M, Cout), jnp.float32),
            grid_spec=pltpu.PrefetchScalarGridSpec(
                num_scalar_prefetch=0, grid=grid,
                in_specs=[p_spec, w_spec,
                          pl.BlockSpec((tm, Cout), lambda i: (i, 0))],
                out_specs=o_spec),
            compiler_params=cparams,
            cost_estimate=pl.CostEstimate(
                flops=flops, transcendentals=0,
                bytes_accessed=bytes_acc + M * Cout * 4),
        )(patches, w2, r2)
    elif scale is not None:
        out = pl.pallas_call(
            _conv_bn_relu_kernel,
            out_shape=jax.ShapeDtypeStruct((M, Cout), jnp.float32),
            grid_spec=pltpu.PrefetchScalarGridSpec(
                num_scalar_prefetch=0, grid=grid,
                in_specs=[p_spec, w_spec,
                          pl.BlockSpec((1, Cout), lambda i: (0, 0)),
                          pl.BlockSpec((1, Cout), lambda i: (0, 0))],
                out_specs=o_spec),
            compiler_params=cparams,
            cost_estimate=pl.CostEstimate(
                flops=flops + 2 * M * Cout, transcendentals=0,
                bytes_accessed=bytes_acc),
        )(patches, w2,
          scale.reshape(1, Cout).astype(jnp.float32),
          bias.reshape(1, Cout).astype(jnp.float32))
    else:
        out = pl.pallas_call(
            _conv_plain_kernel,
            out_shape=jax.ShapeDtypeStruct((M, Cout), jnp.float32),
            grid_spec=pltpu.PrefetchScalarGridSpec(
                num_scalar_prefetch=0, grid=grid,
                in_specs=[p_spec, w_spec],
                out_specs=o_spec),
            compiler_params=cparams,
            cost_estimate=pl.CostEstimate(
                flops=flops, transcendentals=0, bytes_accessed=bytes_acc),
        )(patches, w2)
    return out.reshape(N, Ho, Wo, Cout)


def _fold_bn(bn, eps=1e-5):
    scale = bn['gamma'] / jnp.sqrt(bn['var'] + eps)
    bias = bn['beta'] - bn['mean'] * scale
    return scale, bias


def bn_relu(x, bn):
    """Standalone inference-mode BN+ReLU, used for each block's bn1 (its output
    feeds both conv1 and the shortcut conv).  Lane-dense: the flat activation
    is reshaped so the last dim is a multiple of 128 when C < 128."""
    scale, bias = _fold_bn(bn)
    N, H, W, C = x.shape
    M = N * H * W
    rep = 1
    if C < 128 and 128 % C == 0 and M % (128 // C) == 0:
        rep = 128 // C
    x2 = x.reshape(M // rep, C * rep)
    s2 = jnp.tile(scale, rep).reshape(1, C * rep)
    b2 = jnp.tile(bias, rep).reshape(1, C * rep)
    out = pl.pallas_call(
        _bn_relu_kernel,
        out_shape=jax.ShapeDtypeStruct(x2.shape, jnp.float32),
    )(x2, s2, b2)
    return out.reshape(N, H, W, C)


def pool_concat_fc(x, w, b):
    """Fused adaptive_avg_pool2d(1) + adaptive_max_pool2d(1) + concat + Linear."""
    N, H, W, C = x.shape
    x3 = x.reshape(N, H * W, C)
    wa = w[:C]            # classifier weight half applied to avg-pooled feats
    wm = w[C:]            # classifier weight half applied to max-pooled feats
    return pl.pallas_call(
        _pool_fc_kernel,
        out_shape=jax.ShapeDtypeStruct((N, w.shape[1]), jnp.float32),
    )(x3, wa, wm, b.reshape(1, -1))


# ------------------------------- model ---------------------------------------

def init_params(key):
    keys = iter(jax.random.split(key, 128))

    def conv_w(kh, kw, cin, cout):
        fan = kh * kw * cin
        return jax.random.normal(next(keys), (kh, kw, cin, cout),
                                 jnp.float32) * (2.0 / fan) ** 0.5

    def bn_p(c):
        return dict(
            gamma=1.0 + 0.1 * jax.random.normal(next(keys), (c,), jnp.float32),
            beta=0.1 * jax.random.normal(next(keys), (c,), jnp.float32),
            mean=0.1 * jax.random.normal(next(keys), (c,), jnp.float32),
            var=jnp.abs(1.0 + 0.1 * jax.random.normal(next(keys), (c,),
                                                      jnp.float32)),
        )

    params = {
        'prep_conv': conv_w(3, 3, 3, 64),
        'prep_bn': bn_p(64),
    }

    def make_block(cin, cout, stride):
        blk = dict(
            bn1=bn_p(cin),
            conv1=conv_w(3, 3, cin, cout),
            bn2=bn_p(cout),
            conv2=conv_w(3, 3, cout, cout),
            stride=stride,
        )
        if stride != 1 or cin != cout:
            blk['shortcut'] = conv_w(1, 1, cin, cout)
        return blk

    # _make_layer(64,64,2,1), _make_layer(64,128,2,2), _make_layer(128,128,2,2)
    layer_cfg = [(64, 64, 1), (64, 64, 1),
                 (64, 128, 2), (128, 128, 1),
                 (128, 128, 2), (128, 128, 1)]
    params['blocks'] = [make_block(ci, co, s) for ci, co, s in layer_cfg]

    params['fc_w'] = 0.05 * jax.random.normal(next(keys), (256, 10),
                                              jnp.float32)
    params['fc_b'] = 0.05 * jax.random.normal(next(keys), (10,), jnp.float32)
    return params


def preact_block(x, p):
    # out = relu(bn1(x))
    out = bn_relu(x, p['bn1'])
    # shortcut = conv1x1(out) if needed else x
    if 'shortcut' in p:
        shortcut = conv2d_fused(out, p['shortcut'], p['stride'])
    else:
        shortcut = x
    # h = relu(bn2(conv1(out)))  — bn2+relu fused into conv1 epilogue
    s2, b2 = _fold_bn(p['bn2'])
    h = conv2d_fused(out, p['conv1'], p['stride'], scale=s2, bias=b2)
    # y = conv2(h) + shortcut    — residual add fused into conv2 epilogue
    return conv2d_fused(h, p['conv2'], 1, residual=shortcut)


def my_resnet_forward(params, x_nchw):
    # x.float() + NCHW -> NHWC layout transpose (glue)
    x = jnp.transpose(x_nchw.astype(jnp.float32), (0, 2, 3, 1))
    # prep: conv3x3 with fused BN+ReLU epilogue
    s, b = _fold_bn(params['prep_bn'])
    x = conv2d_fused(x, params['prep_conv'], 1, scale=s, bias=b)
    # residual layers
    for p in params['blocks']:
        x = preact_block(x, p)
    # fused adaptive avg/max pool + concat + classifier
    return pool_concat_fc(x, params['fc_w'], params['fc_b'])


if __name__ == "__main__":
    key = jax.random.PRNGKey(0)
    pkey, xkey = jax.random.split(key)
    params = init_params(pkey)

    # PyTorch conv input convention: NCHW, here (batch=2, channels=3, 16x16)
    x = jax.random.normal(xkey, (2, 3, 16, 16), jnp.float32)

    fwd = jax.jit(functools.partial(my_resnet_forward, params))
    logits = fwd(x)
    jax.block_until_ready(logits)
    assert logits.shape == (2, 10) and logits.dtype == jnp.float32
    print("KERNEL_OK")
</pallas_src>

<mosaic_0001>
module attributes {stable_mosaic.version = 11 : i64} {
  func.func @_conv_bn_relu_kernel(%arg0: i32, %arg1: memref<256x27xbf16, #tpu.memory_space<vmem>>, %arg2: memref<27x64xbf16, #tpu.memory_space<vmem>>, %arg3: memref<1x64xf32, #tpu.memory_space<vmem>>, %arg4: memref<1x64xf32, #tpu.memory_space<vmem>>, %arg5: memref<256x64xf32, #tpu.memory_space<vmem>>) attributes {dimension_semantics = [#tpu.dimension_semantics<parallel>], iteration_bounds = array<i64: 2>, scalar_prefetch = 0 : i64, scratch_operands = 0 : i64, tpu.core_type = #tpu.core_type<tc>, window_params = [{transform_indices = @transform_0, window_bounds = array<i64: 256, 27>}, {pipeline_mode = #tpu.pipeline_mode<synchronous>, transform_indices = @transform_1, window_bounds = array<i64: 27, 64>}, {pipeline_mode = #tpu.pipeline_mode<synchronous>, transform_indices = @transform_2, window_bounds = array<i64: 1, 64>}, {pipeline_mode = #tpu.pipeline_mode<synchronous>, transform_indices = @transform_3, window_bounds = array<i64: 1, 64>}, {transform_indices = @transform_4, window_bounds = array<i64: 256, 64>}]} {
    %c0 = arith.constant 0 : index
    %c0_0 = arith.constant 0 : index
    %0 = vector.load %arg1[%c0, %c0_0] : memref<256x27xbf16, #tpu.memory_space<vmem>>, vector<256x27xbf16>
    %c0_1 = arith.constant 0 : index
    %c0_2 = arith.constant 0 : index
    %1 = vector.load %arg2[%c0_1, %c0_2] : memref<27x64xbf16, #tpu.memory_space<vmem>>, vector<27x64xbf16>
    %cst = arith.constant dense<0.000000e+00> : vector<256x64xf32>
    %2 = tpu.matmul %0, %1, %cst {dimension_numbers = #tpu.dot_dimension_numbers<[1], [0], [0], [1], [0, 0, 1, 1], [], []>} : vector<256x27xbf16>, vector<27x64xbf16>, vector<256x64xf32> -> vector<256x64xf32>
    %c0_3 = arith.constant 0 : index
    %c0_4 = arith.constant 0 : index
    %3 = vector.load %arg3[%c0_3, %c0_4] : memref<1x64xf32, #tpu.memory_space<vmem>>, vector<1x64xf32>
    %4 = vector.broadcast %3 : vector<1x64xf32> to vector<256x64xf32>
    %5 = arith.mulf %2, %4 : vector<256x64xf32>
    %c0_5 = arith.constant 0 : index
    %c0_6 = arith.constant 0 : index
    %6 = vector.load %arg4[%c0_5, %c0_6] : memref<1x64xf32, #tpu.memory_space<vmem>>, vector<1x64xf32>
    %7 = vector.broadcast %6 : vector<1x64xf32> to vector<256x64xf32>
    %8 = arith.addf %5, %7 : vector<256x64xf32>
    %cst_7 = arith.constant 0.000000e+00 : f32
    %9 = vector.broadcast %cst_7 : f32 to vector<256x64xf32>
    %10 = arith.maximumf %8, %9 : vector<256x64xf32>
    %c0_8 = arith.constant 0 : index
    %c0_9 = arith.constant 0 : index
    %11 = vector.load %arg5[%c0_8, %c0_9] : memref<256x64xf32, #tpu.memory_space<vmem>>, vector<256x64xf32>
    tpu.vector_store %arg5[%c0_8, %c0_9], %10 {strides = array<i32>} : memref<256x64xf32, #tpu.memory_space<vmem>>, vector<256x64xf32>,
    return
  }
  func.func @transform_0(%arg0: i32) -> (i32, i32) {
    %c0_i32 = arith.constant 0 : i32
    %c0_i32_0 = arith.constant 0 : i32
    return %arg0, %c0_i32 : i32, i32
  }
  func.func @transform_1(%arg0: i32) -> (i32, i32) {
    %c0_i32 = arith.constant 0 : i32
    %c0_i32_0 = arith.constant 0 : i32
    %c0_i32_1 = arith.constant 0 : i32
    return %c0_i32, %c0_i32_0 : i32, i32
  }
  func.func @transform_2(%arg0: i32) -> (i32, i32) {
    %c0_i32 = arith.constant 0 : i32
    %c0_i32_0 = arith.constant 0 : i32
    %c0_i32_1 = arith.constant 0 : i32
    return %c0_i32, %c0_i32_0 : i32, i32
  }
  func.func @transform_3(%arg0: i32) -> (i32, i32) {
    %c0_i32 = arith.constant 0 : i32
    %c0_i32_0 = arith.constant 0 : i32
    %c0_i32_1 = arith.constant 0 : i32
    return %c0_i32, %c0_i32_0 : i32, i32
  }
  func.func @transform_4(%arg0: i32) -> (i32, i32) {
    %c0_i32 = arith.constant 0 : i32
    %c0_i32_0 = arith.constant 0 : i32
    return %arg0, %c0_i32 : i32, i32
  }
}

module attributes {stable_mosaic.version = 11 : i64} {
  func.func @_bn_relu_kernel(%arg0: memref<256x128xf32, #tpu.memory_space<vmem>>, %arg1: memref<1x128xf32, #tpu.memory_space<vmem>>, %arg2: memref<1x128xf32, #tpu.memory_space<vmem>>, %arg3: memref<256x128xf32, #tpu.memory_space<vmem>>) attributes {dimension_semantics = [], scalar_prefetch = 0 : i64, scratch_operands = 0 : i64, tpu.core_type = #tpu.core_type<tc>} {
    %c0 = arith.constant 0 : index
    %c0_0 = arith.constant 0 : index
    %0 = vector.load %arg0[%c0, %c0_0] : memref<256x128xf32, #tpu.memory_space<vmem>>, vector<256x128xf32>
    %c0_1 = arith.constant 0 : index
    %c0_2 = arith.constant 0 : index
    %1 = vector.load %arg1[%c0_1, %c0_2] : memref<1x128xf32, #tpu.memory_space<vmem>>, vector<1x128xf32>
    %2 = vector.broadcast %1 : vector<1x128xf32> to vector<256x128xf32>
    %3 = arith.mulf %0, %2 : vector<256x128xf32>
    %c0_3 = arith.constant 0 : index
    %c0_4 = arith.constant 0 : index
    %4 = vector.load %arg2[%c0_3, %c0_4] : memref<1x128xf32, #tpu.memory_space<vmem>>, vector<1x128xf32>
    %5 = vector.broadcast %4 : vector<1x128xf32> to vector<256x128xf32>
    %6 = arith.addf %3, %5 : vector<256x128xf32>
    %cst = arith.constant 0.000000e+00 : f32
    %7 = vector.broadcast %cst : f32 to vector<256x128xf32>
    %8 = arith.maximumf %6, %7 : vector<256x128xf32>
    %c0_5 = arith.constant 0 : index
    %c0_6 = arith.constant 0 : index
    %9 = vector.load %arg3[%c0_5, %c0_6] : memref<256x128xf32, #tpu.memory_space<vmem>>, vector<256x128xf32>
    tpu.vector_store %arg3[%c0_5, %c0_6], %8 {strides = array<i32>} : memref<256x128xf32, #tpu.memory_space<vmem>>, vector<256x128xf32>,
    return
  }
}

module attributes {stable_mosaic.version = 11 : i64} {
  func.func @_conv_bn_relu_kernel(%arg0: i32, %arg1: memref<256x576xbf16, #tpu.memory_space<vmem>>, %arg2: memref<576x64xbf16, #tpu.memory_space<vmem>>, %arg3: memref<1x64xf32, #tpu.memory_space<vmem>>, %arg4: memref<1x64xf32, #tpu.memory_space<vmem>>, %arg5: memref<256x64xf32, #tpu.memory_space<vmem>>) attributes {dimension_semantics = [#tpu.dimension_semantics<parallel>], iteration_bounds = array<i64: 2>, scalar_prefetch = 0 : i64, scratch_operands = 0 : i64, tpu.core_type = #tpu.core_type<tc>, window_params = [{transform_indices = @transform_0, window_bounds = array<i64: 256, 576>}, {pipeline_mode = #tpu.pipeline_mode<synchronous>, transform_indices = @transform_1, window_bounds = array<i64: 576, 64>}, {pipeline_mode = #tpu.pipeline_mode<synchronous>, transform_indices = @transform_2, window_bounds = array<i64: 1, 64>}, {pipeline_mode = #tpu.pipeline_mode<synchronous>, transform_indices = @transform_3, window_bounds = array<i64: 1, 64>}, {transform_indices = @transform_4, window_bounds = array<i64: 256, 64>}]} {
    %c0 = arith.constant 0 : index
    %c0_0 = arith.constant 0 : index
    %0 = vector.load %arg1[%c0, %c0_0] : memref<256x576xbf16, #tpu.memory_space<vmem>>, vector<256x576xbf16>
    %c0_1 = arith.constant 0 : index
    %c0_2 = arith.constant 0 : index
    %1 = vector.load %arg2[%c0_1, %c0_2] : memref<576x64xbf16, #tpu.memory_space<vmem>>, vector<576x64xbf16>
    %cst = arith.constant dense<0.000000e+00> : vector<256x64xf32>
    %2 = tpu.matmul %0, %1, %cst {dimension_numbers = #tpu.dot_dimension_numbers<[1], [0], [0], [1], [0, 0, 1, 1], [], []>} : vector<256x576xbf16>, vector<576x64xbf16>, vector<256x64xf32> -> vector<256x64xf32>
    %c0_3 = arith.constant 0 : index
    %c0_4 = arith.constant 0 : index
    %3 = vector.load %arg3[%c0_3, %c0_4] : memref<1x64xf32, #tpu.memory_space<vmem>>, vector<1x64xf32>
    %4 = vector.broadcast %3 : vector<1x64xf32> to vector<256x64xf32>
    %5 = arith.mulf %2, %4 : vector<256x64xf32>
    %c0_5 = arith.constant 0 : index
    %c0_6 = arith.constant 0 : index
    %6 = vector.load %arg4[%c0_5, %c0_6] : memref<1x64xf32, #tpu.memory_space<vmem>>, vector<1x64xf32>
    %7 = vector.broadcast %6 : vector<1x64xf32> to vector<256x64xf32>
    %8 = arith.addf %5, %7 : vector<256x64xf32>
    %cst_7 = arith.constant 0.000000e+00 : f32
    %9 = vector.broadcast %cst_7 : f32 to vector<256x64xf32>
    %10 = arith.maximumf %8, %9 : vector<256x64xf32>
    %c0_8 = arith.constant 0 : index
    %c0_9 = arith.constant 0 : index
    %11 = vector.load %arg5[%c0_8, %c0_9] : memref<256x64xf32, #tpu.memory_space<vmem>>, vector<256x64xf32>
    tpu.vector_store %arg5[%c0_8, %c0_9], %10 {strides = array<i32>} : memref<256x64xf32, #tpu.memory_space<vmem>>, vector<256x64xf32>,
    return
  }
  func.func @transform_0(%arg0: i32) -> (i32, i32) {
    %c0_i32 = arith.constant 0 : i32
    %c0_i32_0 = arith.constant 0 : i32
    return %arg0, %c0_i32 : i32, i32
  }
  func.func @transform_1(%arg0: i32) -> (i32, i32) {
    %c0_i32 = arith.constant 0 : i32
    %c0_i32_0 = arith.constant 0 : i32
    %c0_i32_1 = arith.constant 0 : i32
    return %c0_i32, %c0_i32_0 : i32, i32
  }
  func.func @transform_2(%arg0: i32) -> (i32, i32) {
    %c0_i32 = arith.constant 0 : i32
    %c0_i32_0 = arith.constant 0 : i32
    %c0_i32_1 = arith.constant 0 : i32
    return %c0_i32, %c0_i32_0 : i32, i32
  }
  func.func @transform_3(%arg0: i32) -> (i32, i32) {
    %c0_i32 = arith.constant 0 : i32
    %c0_i32_0 = arith.constant 0 : i32
    %c0_i32_1 = arith.constant 0 : i32
    return %c0_i32, %c0_i32_0 : i32, i32
  }
  func.func @transform_4(%arg0: i32) -> (i32, i32) {
    %c0_i32 = arith.constant 0 : i32
    %c0_i32_0 = arith.constant 0 : i32
    return %arg0, %c0_i32 : i32, i32
  }
}

module attributes {stable_mosaic.version = 11 : i64} {
  func.func @_conv_add_kernel(%arg0: i32, %arg1: memref<256x576xbf16, #tpu.memory_space<vmem>>, %arg2: memref<576x64xbf16, #tpu.memory_space<vmem>>, %arg3: memref<256x64xf32, #tpu.memory_space<vmem>>, %arg4: memref<256x64xf32, #tpu.memory_space<vmem>>) attributes {dimension_semantics = [#tpu.dimension_semantics<parallel>], iteration_bounds = array<i64: 2>, scalar_prefetch = 0 : i64, scratch_operands = 0 : i64, tpu.core_type = #tpu.core_type<tc>, window_params = [{transform_indices = @transform_0, window_bounds = array<i64: 256, 576>}, {pipeline_mode = #tpu.pipeline_mode<synchronous>, transform_indices = @transform_1, window_bounds = array<i64: 576, 64>}, {transform_indices = @transform_2, window_bounds = array<i64: 256, 64>}, {transform_indices = @transform_3, window_bounds = array<i64: 256, 64>}]} {
    %c0 = arith.constant 0 : index
    %c0_0 = arith.constant 0 : index
    %0 = vector.load %arg1[%c0, %c0_0] : memref<256x576xbf16, #tpu.memory_space<vmem>>, vector<256x576xbf16>
    %c0_1 = arith.constant 0 : index
    %c0_2 = arith.constant 0 : index
    %1 = vector.load %arg2[%c0_1, %c0_2] : memref<576x64xbf16, #tpu.memory_space<vmem>>, vector<576x64xbf16>
    %cst = arith.constant dense<0.000000e+00> : vector<256x64xf32>
    %2 = tpu.matmul %0, %1, %cst {dimension_numbers = #tpu.dot_dimension_numbers<[1], [0], [0], [1], [0, 0, 1, 1], [], []>} : vector<256x576xbf16>, vector<576x64xbf16>, vector<256x64xf32> -> vector<256x64xf32>
    %c0_3 = arith.constant 0 : index
    %c0_4 = arith.constant 0 : index
    %3 = vector.load %arg3[%c0_3, %c0_4] : memref<256x64xf32, #tpu.memory_space<vmem>>, vector<256x64xf32>
    %4 = arith.addf %2, %3 : vector<256x64xf32>
    %c0_5 = arith.constant 0 : index
    %c0_6 = arith.constant 0 : index
    %5 = vector.load %arg4[%c0_5, %c0_6] : memref<256x64xf32, #tpu.memory_space<vmem>>, vector<256x64xf32>
    tpu.vector_store %arg4[%c0_5, %c0_6], %4 {strides = array<i32>} : memref<256x64xf32, #tpu.memory_space<vmem>>, vector<256x64xf32>,
    return
  }
  func.func @transform_0(%arg0: i32) -> (i32, i32) {
    %c0_i32 = arith.constant 0 : i32
    %c0_i32_0 = arith.constant 0 : i32
    return %arg0, %c0_i32 : i32, i32
  }
  func.func @transform_1(%arg0: i32) -> (i32, i32) {
    %c0_i32 = arith.constant 0 : i32
    %c0_i32_0 = arith.constant 0 : i32
    %c0_i32_1 = arith.constant 0 : i32
    return %c0_i32, %c0_i32_0 : i32, i32
  }
  func.func @transform_2(%arg0: i32) -> (i32, i32) {
    %c0_i32 = arith.constant 0 : i32
    %c0_i32_0 = arith.constant 0 : i32
    return %arg0, %c0_i32 : i32, i32
  }
  func.func @transform_3(%arg0: i32) -> (i32, i32) {
    %c0_i32 = arith.constant 0 : i32
    %c0_i32_0 = arith.constant 0 : i32
    return %arg0, %c0_i32 : i32, i32
  }
}

module attributes {stable_mosaic.version = 11 : i64} {
  func.func @_conv_bn_relu_kernel(%arg0: i32, %arg1: memref<128x576xbf16, #tpu.memory_space<vmem>>, %arg2: memref<576x128xbf16, #tpu.memory_space<vmem>>, %arg3: memref<1x128xf32, #tpu.memory_space<vmem>>, %arg4: memref<1x128xf32, #tpu.memory_space<vmem>>, %arg5: memref<128x128xf32, #tpu.memory_space<vmem>>) attributes {dimension_semantics = [#tpu.dimension_semantics<parallel>], iteration_bounds = array<i64: 1>, scalar_prefetch = 0 : i64, scratch_operands = 0 : i64, tpu.core_type = #tpu.core_type<tc>, window_params = [{transform_indices = @transform_0, window_bounds = array<i64: 128, 576>}, {pipeline_mode = #tpu.pipeline_mode<synchronous>, transform_indices = @transform_1, window_bounds = array<i64: 576, 128>}, {pipeline_mode = #tpu.pipeline_mode<synchronous>, transform_indices = @transform_2, window_bounds = array<i64: 1, 128>}, {pipeline_mode = #tpu.pipeline_mode<synchronous>, transform_indices = @transform_3, window_bounds = array<i64: 1, 128>}, {transform_indices = @transform_4, window_bounds = array<i64: 128, 128>}]} {
    %c0 = arith.constant 0 : index
    %c0_0 = arith.constant 0 : index
    %0 = vector.load %arg1[%c0, %c0_0] : memref<128x576xbf16, #tpu.memory_space<vmem>>, vector<128x576xbf16>
    %c0_1 = arith.constant 0 : index
    %c0_2 = arith.constant 0 : index
    %1 = vector.load %arg2[%c0_1, %c0_2] : memref<576x128xbf16, #tpu.memory_space<vmem>>, vector<576x128xbf16>
    %cst = arith.constant dense<0.000000e+00> : vector<128x128xf32>
    %2 = tpu.matmul %0, %1, %cst {dimension_numbers = #tpu.dot_dimension_numbers<[1], [0], [0], [1], [0, 0, 1, 1], [], []>} : vector<128x576xbf16>, vector<576x128xbf16>, vector<128x128xf32> -> vector<128x128xf32>
    %c0_3 = arith.constant 0 : index
    %c0_4 = arith.constant 0 : index
    %3 = vector.load %arg3[%c0_3, %c0_4] : memref<1x128xf32, #tpu.memory_space<vmem>>, vector<1x128xf32>
    %4 = vector.broadcast %3 : vector<1x128xf32> to vector<128x128xf32>
    %5 = arith.mulf %2, %4 : vector<128x128xf32>
    %c0_5 = arith.constant 0 : index
    %c0_6 = arith.constant 0 : index
    %6 = vector.load %arg4[%c0_5, %c0_6] : memref<1x128xf32, #tpu.memory_space<vmem>>, vector<1x128xf32>
    %7 = vector.broadcast %6 : vector<1x128xf32> to vector<128x128xf32>
    %8 = arith.addf %5, %7 : vector<128x128xf32>
    %cst_7 = arith.constant 0.000000e+00 : f32
    %9 = vector.broadcast %cst_7 : f32 to vector<128x128xf32>
    %10 = arith.maximumf %8, %9 : vector<128x128xf32>
    %c0_8 = arith.constant 0 : index
    %c0_9 = arith.constant 0 : index
    %11 = vector.load %arg5[%c0_8, %c0_9] : memref<128x128xf32, #tpu.memory_space<vmem>>, vector<128x128xf32>
    tpu.vector_store %arg5[%c0_8, %c0_9], %10 {strides = array<i32>} : memref<128x128xf32, #tpu.memory_space<vmem>>, vector<128x128xf32>,
    return
  }
  func.func @transform_0(%arg0: i32) -> (i32, i32) {
    %c0_i32 = arith.constant 0 : i32
    %c0_i32_0 = arith.constant 0 : i32
    return %arg0, %c0_i32 : i32, i32
  }
  func.func @transform_1(%arg0: i32) -> (i32, i32) {
    %c0_i32 = arith.constant 0 : i32
    %c0_i32_0 = arith.constant 0 : i32
    %c0_i32_1 = arith.constant 0 : i32
    return %c0_i32, %c0_i32_0 : i32, i32
  }
  func.func @transform_2(%arg0: i32) -> (i32, i32) {
    %c0_i32 = arith.constant 0 : i32
    %c0_i32_0 = arith.constant 0 : i32
    %c0_i32_1 = arith.constant 0 : i32
    return %c0_i32, %c0_i32_0 : i32, i32
  }
  func.func @transform_3(%arg0: i32) -> (i32, i32) {
    %c0_i32 = arith.constant 0 : i32
    %c0_i32_0 = arith.constant 0 : i32
    %c0_i32_1 = arith.constant 0 : i32
    return %c0_i32, %c0_i32_0 : i32, i32
  }
  func.func @transform_4(%arg0: i32) -> (i32, i32) {
    %c0_i32 = arith.constant 0 : i32
    %c0_i32_0 = arith.constant 0 : i32
    return %arg0, %c0_i32 : i32, i32
  }
}

module attributes {stable_mosaic.version = 11 : i64} {
  func.func @_conv_add_kernel(%arg0: i32, %arg1: memref<128x1152xbf16, #tpu.memory_space<vmem>>, %arg2: memref<1152x128xbf16, #tpu.memory_space<vmem>>, %arg3: memref<128x128xf32, #tpu.memory_space<vmem>>, %arg4: memref<128x128xf32, #tpu.memory_space<vmem>>) attributes {dimension_semantics = [#tpu.dimension_semantics<parallel>], iteration_bounds = array<i64: 1>, scalar_prefetch = 0 : i64, scratch_operands = 0 : i64, tpu.core_type = #tpu.core_type<tc>, window_params = [{transform_indices = @transform_0, window_bounds = array<i64: 128, 1152>}, {pipeline_mode = #tpu.pipeline_mode<synchronous>, transform_indices = @transform_1, window_bounds = array<i64: 1152, 128>}, {transform_indices = @transform_2, window_bounds = array<i64: 128, 128>}, {transform_indices = @transform_3, window_bounds = array<i64: 128, 128>}]} {
    %c0 = arith.constant 0 : index
    %c0_0 = arith.constant 0 : index
    %0 = vector.load %arg1[%c0, %c0_0] : memref<128x1152xbf16, #tpu.memory_space<vmem>>, vector<128x1152xbf16>
    %c0_1 = arith.constant 0 : index
    %c0_2 = arith.constant 0 : index
    %1 = vector.load %arg2[%c0_1, %c0_2] : memref<1152x128xbf16, #tpu.memory_space<vmem>>, vector<1152x128xbf16>
    %cst = arith.constant dense<0.000000e+00> : vector<128x128xf32>
    %2 = tpu.matmul %0, %1, %cst {dimension_numbers = #tpu.dot_dimension_numbers<[1], [0], [0], [1], [0, 0, 1, 1], [], []>} : vector<128x1152xbf16>, vector<1152x128xbf16>, vector<128x128xf32> -> vector<128x128xf32>
    %c0_3 = arith.constant 0 : index
    %c0_4 = arith.constant 0 : index
    %3 = vector.load %arg3[%c0_3, %c0_4] : memref<128x128xf32, #tpu.memory_space<vmem>>, vector<128x128xf32>
    %4 = arith.addf %2, %3 : vector<128x128xf32>
    %c0_5 = arith.constant 0 : index
    %c0_6 = arith.constant 0 : index
    %5 = vector.load %arg4[%c0_5, %c0_6] : memref<128x128xf32, #tpu.memory_space<vmem>>, vector<128x128xf32>
    tpu.vector_store %arg4[%c0_5, %c0_6], %4 {strides = array<i32>} : memref<128x128xf32, #tpu.memory_space<vmem>>, vector<128x128xf32>,
    return
  }
  func.func @transform_0(%arg0: i32) -> (i32, i32) {
    %c0_i32 = arith.constant 0 : i32
    %c0_i32_0 = arith.constant 0 : i32
    return %arg0, %c0_i32 : i32, i32
  }
  func.func @transform_1(%arg0: i32) -> (i32, i32) {
    %c0_i32 = arith.constant 0 : i32
    %c0_i32_0 = arith.constant 0 : i32
    %c0_i32_1 = arith.constant 0 : i32
    return %c0_i32, %c0_i32_0 : i32, i32
  }
  func.func @transform_2(%arg0: i32) -> (i32, i32) {
    %c0_i32 = arith.constant 0 : i32
    %c0_i32_0 = arith.constant 0 : i32
    return %arg0, %c0_i32 : i32, i32
  }
  func.func @transform_3(%arg0: i32) -> (i32, i32) {
    %c0_i32 = arith.constant 0 : i32
    %c0_i32_0 = arith.constant 0 : i32
    return %arg0, %c0_i32 : i32, i32
  }
}

module attributes {stable_mosaic.version = 11 : i64} {
  func.func @_conv_plain_kernel(%arg0: i32, %arg1: memref<128x64xbf16, #tpu.memory_space<vmem>>, %arg2: memref<64x128xbf16, #tpu.memory_space<vmem>>, %arg3: memref<128x128xf32, #tpu.memory_space<vmem>>) attributes {dimension_semantics = [#tpu.dimension_semantics<parallel>], iteration_bounds = array<i64: 1>, scalar_prefetch = 0 : i64, scratch_operands = 0 : i64, tpu.core_type = #tpu.core_type<tc>, window_params = [{transform_indices = @transform_0, window_bounds = array<i64: 128, 64>}, {pipeline_mode = #tpu.pipeline_mode<synchronous>, transform_indices = @transform_1, window_bounds = array<i64: 64, 128>}, {transform_indices = @transform_2, window_bounds = array<i64: 128, 128>}]} {
    %c0 = arith.constant 0 : index
    %c0_0 = arith.constant 0 : index
    %0 = vector.load %arg1[%c0, %c0_0] : memref<128x64xbf16, #tpu.memory_space<vmem>>, vector<128x64xbf16>
    %c0_1 = arith.constant 0 : index
    %c0_2 = arith.constant 0 : index
    %1 = vector.load %arg2[%c0_1, %c0_2] : memref<64x128xbf16, #tpu.memory_space<vmem>>, vector<64x128xbf16>
    %cst = arith.constant dense<0.000000e+00> : vector<128x128xf32>
    %2 = tpu.matmul %0, %1, %cst {dimension_numbers = #tpu.dot_dimension_numbers<[1], [0], [0], [1], [0, 0, 1, 1], [], []>} : vector<128x64xbf16>, vector<64x128xbf16>, vector<128x128xf32> -> vector<128x128xf32>
    %c0_3 = arith.constant 0 : index
    %c0_4 = arith.constant 0 : index
    %3 = vector.load %arg3[%c0_3, %c0_4] : memref<128x128xf32, #tpu.memory_space<vmem>>, vector<128x128xf32>
    tpu.vector_store %arg3[%c0_3, %c0_4], %2 {strides = array<i32>} : memref<128x128xf32, #tpu.memory_space<vmem>>, vector<128x128xf32>,
    return
  }
  func.func @transform_0(%arg0: i32) -> (i32, i32) {
    %c0_i32 = arith.constant 0 : i32
    %c0_i32_0 = arith.constant 0 : i32
    return %arg0, %c0_i32 : i32, i32
  }
  func.func @transform_1(%arg0: i32) -> (i32, i32) {
    %c0_i32 = arith.constant 0 : i32
    %c0_i32_0 = arith.constant 0 : i32
    %c0_i32_1 = arith.constant 0 : i32
    return %c0_i32, %c0_i32_0 : i32, i32
  }
  func.func @transform_2(%arg0: i32) -> (i32, i32) {
    %c0_i32 = arith.constant 0 : i32
    %c0_i32_0 = arith.constant 0 : i32
    return %arg0, %c0_i32 : i32, i32
  }
}

module attributes {stable_mosaic.version = 11 : i64} {
  func.func @_bn_relu_kernel(%arg0: memref<128x128xf32, #tpu.memory_space<vmem>>, %arg1: memref<1x128xf32, #tpu.memory_space<vmem>>, %arg2: memref<1x128xf32, #tpu.memory_space<vmem>>, %arg3: memref<128x128xf32, #tpu.memory_space<vmem>>) attributes {dimension_semantics = [], scalar_prefetch = 0 : i64, scratch_operands = 0 : i64, tpu.core_type = #tpu.core_type<tc>} {
    %c0 = arith.constant 0 : index
    %c0_0 = arith.constant 0 : index
    %0 = vector.load %arg0[%c0, %c0_0] : memref<128x128xf32, #tpu.memory_space<vmem>>, vector<128x128xf32>
    %c0_1 = arith.constant 0 : index
    %c0_2 = arith.constant 0 : index
    %1 = vector.load %arg1[%c0_1, %c0_2] : memref<1x128xf32, #tpu.memory_space<vmem>>, vector<1x128xf32>
    %2 = vector.broadcast %1 : vector<1x128xf32> to vector<128x128xf32>
    %3 = arith.mulf %0, %2 : vector<128x128xf32>
    %c0_3 = arith.constant 0 : index
    %c0_4 = arith.constant 0 : index
    %4 = vector.load %arg2[%c0_3, %c0_4] : memref<1x128xf32, #tpu.memory_space<vmem>>, vector<1x128xf32>
    %5 = vector.broadcast %4 : vector<1x128xf32> to vector<128x128xf32>
    %6 = arith.addf %3, %5 : vector<128x128xf32>
    %cst = arith.constant 0.000000e+00 : f32
    %7 = vector.broadcast %cst : f32 to vector<128x128xf32>
    %8 = arith.maximumf %6, %7 : vector<128x128xf32>
    %c0_5 = arith.constant 0 : index
    %c0_6 = arith.constant 0 : index
    %9 = vector.load %arg3[%c0_5, %c0_6] : memref<128x128xf32, #tpu.memory_space<vmem>>, vector<128x128xf32>
    tpu.vector_store %arg3[%c0_5, %c0_6], %8 {strides = array<i32>} : memref<128x128xf32, #tpu.memory_space<vmem>>, vector<128x128xf32>,
    return
  }
}

module attributes {stable_mosaic.version = 11 : i64} {
  func.func @_conv_bn_relu_kernel(%arg0: i32, %arg1: memref<128x1152xbf16, #tpu.memory_space<vmem>>, %arg2: memref<1152x128xbf16, #tpu.memory_space<vmem>>, %arg3: memref<1x128xf32, #tpu.memory_space<vmem>>, %arg4: memref<1x128xf32, #tpu.memory_space<vmem>>, %arg5: memref<128x128xf32, #tpu.memory_space<vmem>>) attributes {dimension_semantics = [#tpu.dimension_semantics<parallel>], iteration_bounds = array<i64: 1>, scalar_prefetch = 0 : i64, scratch_operands = 0 : i64, tpu.core_type = #tpu.core_type<tc>, window_params = [{transform_indices = @transform_0, window_bounds = array<i64: 128, 1152>}, {pipeline_mode = #tpu.pipeline_mode<synchronous>, transform_indices = @transform_1, window_bounds = array<i64: 1152, 128>}, {pipeline_mode = #tpu.pipeline_mode<synchronous>, transform_indices = @transform_2, window_bounds = array<i64: 1, 128>}, {pipeline_mode = #tpu.pipeline_mode<synchronous>, transform_indices = @transform_3, window_bounds = array<i64: 1, 128>}, {transform_indices = @transform_4, window_bounds = array<i64: 128, 128>}]} {
    %c0 = arith.constant 0 : index
    %c0_0 = arith.constant 0 : index
    %0 = vector.load %arg1[%c0, %c0_0] : memref<128x1152xbf16, #tpu.memory_space<vmem>>, vector<128x1152xbf16>
    %c0_1 = arith.constant 0 : index
    %c0_2 = arith.constant 0 : index
    %1 = vector.load %arg2[%c0_1, %c0_2] : memref<1152x128xbf16, #tpu.memory_space<vmem>>, vector<1152x128xbf16>
    %cst = arith.constant dense<0.000000e+00> : vector<128x128xf32>
    %2 = tpu.matmul %0, %1, %cst {dimension_numbers = #tpu.dot_dimension_numbers<[1], [0], [0], [1], [0, 0, 1, 1], [], []>} : vector<128x1152xbf16>, vector<1152x128xbf16>, vector<128x128xf32> -> vector<128x128xf32>
    %c0_3 = arith.constant 0 : index
    %c0_4 = arith.constant 0 : index
    %3 = vector.load %arg3[%c0_3, %c0_4] : memref<1x128xf32, #tpu.memory_space<vmem>>, vector<1x128xf32>
    %4 = vector.broadcast %3 : vector<1x128xf32> to vector<128x128xf32>
    %5 = arith.mulf %2, %4 : vector<128x128xf32>
    %c0_5 = arith.constant 0 : index
    %c0_6 = arith.constant 0 : index
    %6 = vector.load %arg4[%c0_5, %c0_6] : memref<1x128xf32, #tpu.memory_space<vmem>>, vector<1x128xf32>
    %7 = vector.broadcast %6 : vector<1x128xf32> to vector<128x128xf32>
    %8 = arith.addf %5, %7 : vector<128x128xf32>
    %cst_7 = arith.constant 0.000000e+00 : f32
    %9 = vector.broadcast %cst_7 : f32 to vector<128x128xf32>
    %10 = arith.maximumf %8, %9 : vector<128x128xf32>
    %c0_8 = arith.constant 0 : index
    %c0_9 = arith.constant 0 : index
    %11 = vector.load %arg5[%c0_8, %c0_9] : memref<128x128xf32, #tpu.memory_space<vmem>>, vector<128x128xf32>
    tpu.vector_store %arg5[%c0_8, %c0_9], %10 {strides = array<i32>} : memref<128x128xf32, #tpu.memory_space<vmem>>, vector<128x128xf32>,
    return
  }
  func.func @transform_0(%arg0: i32) -> (i32, i32) {
    %c0_i32 = arith.constant 0 : i32
    %c0_i32_0 = arith.constant 0 : i32
    return %arg0, %c0_i32 : i32, i32
  }
  func.func @transform_1(%arg0: i32) -> (i32, i32) {
    %c0_i32 = arith.constant 0 : i32
    %c0_i32_0 = arith.constant 0 : i32
    %c0_i32_1 = arith.constant 0 : i32
    return %c0_i32, %c0_i32_0 : i32, i32
  }
  func.func @transform_2(%arg0: i32) -> (i32, i32) {
    %c0_i32 = arith.constant 0 : i32
    %c0_i32_0 = arith.constant 0 : i32
    %c0_i32_1 = arith.constant 0 : i32
    return %c0_i32, %c0_i32_0 : i32, i32
  }
  func.func @transform_3(%arg0: i32) -> (i32, i32) {
    %c0_i32 = arith.constant 0 : i32
    %c0_i32_0 = arith.constant 0 : i32
    %c0_i32_1 = arith.constant 0 : i32
    return %c0_i32, %c0_i32_0 : i32, i32
  }
  func.func @transform_4(%arg0: i32) -> (i32, i32) {
    %c0_i32 = arith.constant 0 : i32
    %c0_i32_0 = arith.constant 0 : i32
    return %arg0, %c0_i32 : i32, i32
  }
}

module attributes {stable_mosaic.version = 11 : i64} {
  func.func @_conv_bn_relu_kernel(%arg0: i32, %arg1: memref<32x1152xbf16, #tpu.memory_space<vmem>>, %arg2: memref<1152x128xbf16, #tpu.memory_space<vmem>>, %arg3: memref<1x128xf32, #tpu.memory_space<vmem>>, %arg4: memref<1x128xf32, #tpu.memory_space<vmem>>, %arg5: memref<32x128xf32, #tpu.memory_space<vmem>>) attributes {dimension_semantics = [#tpu.dimension_semantics<parallel>], iteration_bounds = array<i64: 1>, scalar_prefetch = 0 : i64, scratch_operands = 0 : i64, tpu.core_type = #tpu.core_type<tc>, window_params = [{transform_indices = @transform_0, window_bounds = array<i64: 32, 1152>}, {pipeline_mode = #tpu.pipeline_mode<synchronous>, transform_indices = @transform_1, window_bounds = array<i64: 1152, 128>}, {pipeline_mode = #tpu.pipeline_mode<synchronous>, transform_indices = @transform_2, window_bounds = array<i64: 1, 128>}, {pipeline_mode = #tpu.pipeline_mode<synchronous>, transform_indices = @transform_3, window_bounds = array<i64: 1, 128>}, {transform_indices = @transform_4, window_bounds = array<i64: 32, 128>}]} {
    %c0 = arith.constant 0 : index
    %c0_0 = arith.constant 0 : index
    %0 = vector.load %arg1[%c0, %c0_0] : memref<32x1152xbf16, #tpu.memory_space<vmem>>, vector<32x1152xbf16>
    %c0_1 = arith.constant 0 : index
    %c0_2 = arith.constant 0 : index
    %1 = vector.load %arg2[%c0_1, %c0_2] : memref<1152x128xbf16, #tpu.memory_space<vmem>>, vector<1152x128xbf16>
    %cst = arith.constant dense<0.000000e+00> : vector<32x128xf32>
    %2 = tpu.matmul %0, %1, %cst {dimension_numbers = #tpu.dot_dimension_numbers<[1], [0], [0], [1], [0, 0, 1, 1], [], []>} : vector<32x1152xbf16>, vector<1152x128xbf16>, vector<32x128xf32> -> vector<32x128xf32>
    %c0_3 = arith.constant 0 : index
    %c0_4 = arith.constant 0 : index
    %3 = vector.load %arg3[%c0_3, %c0_4] : memref<1x128xf32, #tpu.memory_space<vmem>>, vector<1x128xf32>
    %4 = vector.broadcast %3 : vector<1x128xf32> to vector<32x128xf32>
    %5 = arith.mulf %2, %4 : vector<32x128xf32>
    %c0_5 = arith.constant 0 : index
    %c0_6 = arith.constant 0 : index
    %6 = vector.load %arg4[%c0_5, %c0_6] : memref<1x128xf32, #tpu.memory_space<vmem>>, vector<1x128xf32>
    %7 = vector.broadcast %6 : vector<1x128xf32> to vector<32x128xf32>
    %8 = arith.addf %5, %7 : vector<32x128xf32>
    %cst_7 = arith.constant 0.000000e+00 : f32
    %9 = vector.broadcast %cst_7 : f32 to vector<32x128xf32>
    %10 = arith.maximumf %8, %9 : vector<32x128xf32>
    %c0_8 = arith.constant 0 : index
    %c0_9 = arith.constant 0 : index
    %11 = vector.load %arg5[%c0_8, %c0_9] : memref<32x128xf32, #tpu.memory_space<vmem>>, vector<32x128xf32>
    tpu.vector_store %arg5[%c0_8, %c0_9], %10 {strides = array<i32>} : memref<32x128xf32, #tpu.memory_space<vmem>>, vector<32x128xf32>,
    return
  }
  func.func @transform_0(%arg0: i32) -> (i32, i32) {
    %c0_i32 = arith.constant 0 : i32
    %c0_i32_0 = arith.constant 0 : i32
    return %arg0, %c0_i32 : i32, i32
  }
  func.func @transform_1(%arg0: i32) -> (i32, i32) {
    %c0_i32 = arith.constant 0 : i32
    %c0_i32_0 = arith.constant 0 : i32
    %c0_i32_1 = arith.constant 0 : i32
    return %c0_i32, %c0_i32_0 : i32, i32
  }
  func.func @transform_2(%arg0: i32) -> (i32, i32) {
    %c0_i32 = arith.constant 0 : i32
    %c0_i32_0 = arith.constant 0 : i32
    %c0_i32_1 = arith.constant 0 : i32
    return %c0_i32, %c0_i32_0 : i32, i32
  }
  func.func @transform_3(%arg0: i32) -> (i32, i32) {
    %c0_i32 = arith.constant 0 : i32
    %c0_i32_0 = arith.constant 0 : i32
    %c0_i32_1 = arith.constant 0 : i32
    return %c0_i32, %c0_i32_0 : i32, i32
  }
  func.func @transform_4(%arg0: i32) -> (i32, i32) {
    %c0_i32 = arith.constant 0 : i32
    %c0_i32_0 = arith.constant 0 : i32
    return %arg0, %c0_i32 : i32, i32
  }
}

module attributes {stable_mosaic.version = 11 : i64} {
  func.func @_conv_plain_kernel(%arg0: i32, %arg1: memref<32x128xbf16, #tpu.memory_space<vmem>>, %arg2: memref<128x128xbf16, #tpu.memory_space<vmem>>, %arg3: memref<32x128xf32, #tpu.memory_space<vmem>>) attributes {dimension_semantics = [#tpu.dimension_semantics<parallel>], iteration_bounds = array<i64: 1>, scalar_prefetch = 0 : i64, scratch_operands = 0 : i64, tpu.core_type = #tpu.core_type<tc>, window_params = [{transform_indices = @transform_0, window_bounds = array<i64: 32, 128>}, {pipeline_mode = #tpu.pipeline_mode<synchronous>, transform_indices = @transform_1, window_bounds = array<i64: 128, 128>}, {transform_indices = @transform_2, window_bounds = array<i64: 32, 128>}]} {
    %c0 = arith.constant 0 : index
    %c0_0 = arith.constant 0 : index
    %0 = vector.load %arg1[%c0, %c0_0] : memref<32x128xbf16, #tpu.memory_space<vmem>>, vector<32x128xbf16>
    %c0_1 = arith.constant 0 : index
    %c0_2 = arith.constant 0 : index
    %1 = vector.load %arg2[%c0_1, %c0_2] : memref<128x128xbf16, #tpu.memory_space<vmem>>, vector<128x128xbf16>
    %cst = arith.constant dense<0.000000e+00> : vector<32x128xf32>
    %2 = tpu.matmul %0, %1, %cst {dimension_numbers = #tpu.dot_dimension_numbers<[1], [0], [0], [1], [0, 0, 1, 1], [], []>} : vector<32x128xbf16>, vector<128x128xbf16>, vector<32x128xf32> -> vector<32x128xf32>
    %c0_3 = arith.constant 0 : index
    %c0_4 = arith.constant 0 : index
    %3 = vector.load %arg3[%c0_3, %c0_4] : memref<32x128xf32, #tpu.memory_space<vmem>>, vector<32x128xf32>
    tpu.vector_store %arg3[%c0_3, %c0_4], %2 {strides = array<i32>} : memref<32x128xf32, #tpu.memory_space<vmem>>, vector<32x128xf32>,
    return
  }
  func.func @transform_0(%arg0: i32) -> (i32, i32) {
    %c0_i32 = arith.constant 0 : i32
    %c0_i32_0 = arith.constant 0 : i32
    return %arg0, %c0_i32 : i32, i32
  }
  func.func @transform_1(%arg0: i32) -> (i32, i32) {
    %c0_i32 = arith.constant 0 : i32
    %c0_i32_0 = arith.constant 0 : i32
    %c0_i32_1 = arith.constant 0 : i32
    return %c0_i32, %c0_i32_0 : i32, i32
  }
  func.func @transform_2(%arg0: i32) -> (i32, i32) {
    %c0_i32 = arith.constant 0 : i32
    %c0_i32_0 = arith.constant 0 : i32
    return %arg0, %c0_i32 : i32, i32
  }
}

module attributes {stable_mosaic.version = 11 : i64} {
  func.func @_conv_add_kernel(%arg0: i32, %arg1: memref<32x1152xbf16, #tpu.memory_space<vmem>>, %arg2: memref<1152x128xbf16, #tpu.memory_space<vmem>>, %arg3: memref<32x128xf32, #tpu.memory_space<vmem>>, %arg4: memref<32x128xf32, #tpu.memory_space<vmem>>) attributes {dimension_semantics = [#tpu.dimension_semantics<parallel>], iteration_bounds = array<i64: 1>, scalar_prefetch = 0 : i64, scratch_operands = 0 : i64, tpu.core_type = #tpu.core_type<tc>, window_params = [{transform_indices = @transform_0, window_bounds = array<i64: 32, 1152>}, {pipeline_mode = #tpu.pipeline_mode<synchronous>, transform_indices = @transform_1, window_bounds = array<i64: 1152, 128>}, {transform_indices = @transform_2, window_bounds = array<i64: 32, 128>}, {transform_indices = @transform_3, window_bounds = array<i64: 32, 128>}]} {
    %c0 = arith.constant 0 : index
    %c0_0 = arith.constant 0 : index
    %0 = vector.load %arg1[%c0, %c0_0] : memref<32x1152xbf16, #tpu.memory_space<vmem>>, vector<32x1152xbf16>
    %c0_1 = arith.constant 0 : index
    %c0_2 = arith.constant 0 : index
    %1 = vector.load %arg2[%c0_1, %c0_2] : memref<1152x128xbf16, #tpu.memory_space<vmem>>, vector<1152x128xbf16>
    %cst = arith.constant dense<0.000000e+00> : vector<32x128xf32>
    %2 = tpu.matmul %0, %1, %cst {dimension_numbers = #tpu.dot_dimension_numbers<[1], [0], [0], [1], [0, 0, 1, 1], [], []>} : vector<32x1152xbf16>, vector<1152x128xbf16>, vector<32x128xf32> -> vector<32x128xf32>
    %c0_3 = arith.constant 0 : index
    %c0_4 = arith.constant 0 : index
    %3 = vector.load %arg3[%c0_3, %c0_4] : memref<32x128xf32, #tpu.memory_space<vmem>>, vector<32x128xf32>
    %4 = arith.addf %2, %3 : vector<32x128xf32>
    %c0_5 = arith.constant 0 : index
    %c0_6 = arith.constant 0 : index
    %5 = vector.load %arg4[%c0_5, %c0_6] : memref<32x128xf32, #tpu.memory_space<vmem>>, vector<32x128xf32>
    tpu.vector_store %arg4[%c0_5, %c0_6], %4 {strides = array<i32>} : memref<32x128xf32, #tpu.memory_space<vmem>>, vector<32x128xf32>,
    return
  }
  func.func @transform_0(%arg0: i32) -> (i32, i32) {
    %c0_i32 = arith.constant 0 : i32
    %c0_i32_0 = arith.constant 0 : i32
    return %arg0, %c0_i32 : i32, i32
  }
  func.func @transform_1(%arg0: i32) -> (i32, i32) {
    %c0_i32 = arith.constant 0 : i32
    %c0_i32_0 = arith.constant 0 : i32
    %c0_i32_1 = arith.constant 0 : i32
    return %c0_i32, %c0_i32_0 : i32, i32
  }
  func.func @transform_2(%arg0: i32) -> (i32, i32) {
    %c0_i32 = arith.constant 0 : i32
    %c0_i32_0 = arith.constant 0 : i32
    return %arg0, %c0_i32 : i32, i32
  }
  func.func @transform_3(%arg0: i32) -> (i32, i32) {
    %c0_i32 = arith.constant 0 : i32
    %c0_i32_0 = arith.constant 0 : i32
    return %arg0, %c0_i32 : i32, i32
  }
}

module attributes {stable_mosaic.version = 11 : i64} {
  func.func @_bn_relu_kernel(%arg0: memref<32x128xf32, #tpu.memory_space<vmem>>, %arg1: memref<1x128xf32, #tpu.memory_space<vmem>>, %arg2: memref<1x128xf32, #tpu.memory_space<vmem>>, %arg3: memref<32x128xf32, #tpu.memory_space<vmem>>) attributes {dimension_semantics = [], scalar_prefetch = 0 : i64, scratch_operands = 0 : i64, tpu.core_type = #tpu.core_type<tc>} {
    %c0 = arith.constant 0 : index
    %c0_0 = arith.constant 0 : index
    %0 = vector.load %arg0[%c0, %c0_0] : memref<32x128xf32, #tpu.memory_space<vmem>>, vector<32x128xf32>
    %c0_1 = arith.constant 0 : index
    %c0_2 = arith.constant 0 : index
    %1 = vector.load %arg1[%c0_1, %c0_2] : memref<1x128xf32, #tpu.memory_space<vmem>>, vector<1x128xf32>
    %2 = vector.broadcast %1 : vector<1x128xf32> to vector<32x128xf32>
    %3 = arith.mulf %0, %2 : vector<32x128xf32>
    %c0_3 = arith.constant 0 : index
    %c0_4 = arith.constant 0 : index
    %4 = vector.load %arg2[%c0_3, %c0_4] : memref<1x128xf32, #tpu.memory_space<vmem>>, vector<1x128xf32>
    %5 = vector.broadcast %4 : vector<1x128xf32> to vector<32x128xf32>
    %6 = arith.addf %3, %5 : vector<32x128xf32>
    %cst = arith.constant 0.000000e+00 : f32
    %7 = vector.broadcast %cst : f32 to vector<32x128xf32>
    %8 = arith.maximumf %6, %7 : vector<32x128xf32>
    %c0_5 = arith.constant 0 : index
    %c0_6 = arith.constant 0 : index
    %9 = vector.load %arg3[%c0_5, %c0_6] : memref<32x128xf32, #tpu.memory_space<vmem>>, vector<32x128xf32>
    tpu.vector_store %arg3[%c0_5, %c0_6], %8 {strides = array<i32>} : memref<32x128xf32, #tpu.memory_space<vmem>>, vector<32x128xf32>,
    return
  }
}

module attributes {stable_mosaic.version = 11 : i64} {
  func.func @_pool_fc_kernel(%arg0: memref<2x16x128xf32, #tpu.memory_space<vmem>>, %arg1: memref<128x10xf32, #tpu.memory_space<vmem>>, %arg2: memref<128x10xf32, #tpu.memory_space<vmem>>, %arg3: memref<1x10xf32, #tpu.memory_space<vmem>>, %arg4: memref<2x10xf32, #tpu.memory_space<vmem>>) attributes {dimension_semantics = [], scalar_prefetch = 0 : i64, scratch_operands = 0 : i64, tpu.core_type = #tpu.core_type<tc>} {
    %c0 = arith.constant 0 : index
    %c0_0 = arith.constant 0 : index
    %c0_1 = arith.constant 0 : index
    %0 = vector.load %arg0[%c0, %c0_0, %c0_1] : memref<2x16x128xf32, #tpu.memory_space<vmem>>, vector<2x16x128xf32>
    %cst = arith.constant dense<0.000000e+00> : vector<2x128xf32>
    %1 = vector.multi_reduction <add>, %0, %cst [1] : vector<2x16x128xf32> to vector<2x128xf32>
    %cst_2 = arith.constant 1.600000e+01 : f32
    %2 = vector.broadcast %cst_2 : f32 to vector<2x128xf32>
    %3 = arith.divf %1, %2 : vector<2x128xf32>
    %cst_3 = arith.constant dense<0xFF800000> : vector<2x128xf32>
    %4 = vector.multi_reduction <maximumf>, %0, %cst_3 [1] : vector<2x16x128xf32> to vector<2x128xf32>
    %c0_4 = arith.constant 0 : index
    %c0_5 = arith.constant 0 : index
    %5 = vector.load %arg1[%c0_4, %c0_5] : memref<128x10xf32, #tpu.memory_space<vmem>>, vector<128x10xf32>
    %cst_6 = arith.constant dense<0.000000e+00> : vector<2x10xf32>
    %6 = tpu.matmul %3, %5, %cst_6 {dimension_numbers = #tpu.dot_dimension_numbers<[1], [0], [0], [1], [0, 0, 1, 1], [], []>} : vector<2x128xf32>, vector<128x10xf32>, vector<2x10xf32> -> vector<2x10xf32>
    %c0_7 = arith.constant 0 : index
    %c0_8 = arith.constant 0 : index
    %7 = vector.load %arg2[%c0_7, %c0_8] : memref<128x10xf32, #tpu.memory_space<vmem>>, vector<128x10xf32>
    %cst_9 = arith.constant dense<0.000000e+00> : vector<2x10xf32>
    %8 = tpu.matmul %4, %7, %cst_9 {dimension_numbers = #tpu.dot_dimension_numbers<[1], [0], [0], [1], [0, 0, 1, 1], [], []>} : vector<2x128xf32>, vector<128x10xf32>, vector<2x10xf32> -> vector<2x10xf32>
    %9 = arith.addf %6, %8 : vector<2x10xf32>
    %c0_10 = arith.constant 0 : index
    %c0_11 = arith.constant 0 : index
    %10 = vector.load %arg3[%c0_10, %c0_11] : memref<1x10xf32, #tpu.memory_space<vmem>>, vector<1x10xf32>
    %11 = vector.broadcast %10 : vector<1x10xf32> to vector<2x10xf32>
    %12 = arith.addf %9, %11 : vector<2x10xf32>
    %c0_12 = arith.constant 0 : index
    %c0_13 = arith.constant 0 : index
    %13 = vector.load %arg4[%c0_12, %c0_13] : memref<2x10xf32, #tpu.memory_space<vmem>>, vector<2x10xf32>
    tpu.vector_store %arg4[%c0_12, %c0_13], %12 {strides = array<i32>} : memref<2x10xf32, #tpu.memory_space<vmem>>, vector<2x10xf32>,
    return
  }
}

</mosaic_0001>

<bundles_post_ra>
// kernel: tile.26
= control target key start
LH: loop header
LB: loop body
LE: loop exit
PB: predicated region body
PF: predicated region fallthrough
CT: control target
= control target key end

     0   :  { %s22_s0 = inlined_call_operand.vmem [shape: f32[64], index: 0, kind: input, shape index: {}]   ;;  %s23_s1 = inlined_call_operand.vmem [shape: f32[2,64], index: 1, kind: output, shape index: {}]  }
   0x1   :  { %v4_v0 = vld [vmem:[%s22_s0] ss:$0 sm:$0xff] }
   0x2   :  { %5 = vst [vmem:[%s23_s1] sm:$0x3] %v4_v0 }

// kernel: tile.27
= control target key start
LH: loop header
LB: loop body
LE: loop exit
PB: predicated region body
PF: predicated region fallthrough
CT: control target
= control target key end

     0   :  { %vm7_vm0 = vcmask 523264   ;;  %vm13_vm1 = vcmask 1048064   ;;  %s39_s0 = inlined_call_operand.vmem [shape: f32[2,64], index: 0, kind: input, shape index: {}]   ;;  %s40_s1 = inlined_call_operand.vmem [shape: f32[1,128], index: 1, kind: output, shape index: {}]  }
   0x1   :  { %v4_v0 = vld [vmem:[%s39_s0] sm:$0x3]  ;;  %s22_s0 = smov 64  }
   0x2   :  { %5 = vst [vmem:[#allocation1] sm:$0x3] %v4_v0 }
   0x9   :  { %v10_v1 = vld [vmem:[#allocation1 + $0x1] sm:$0x1]   ;;  %v6_v2 = vld [vmem:[#allocation1] sm:$0x1]  }
   0xa   :  { %11 = vrot.lane.b32.xlu0 %v10_v1, %s22_s0  ;;  %8 = vst.msk [vmem:[#allocation0] sm:$0x1] %vm7_vm0, %v6_v2  }
  0x7c   :  { %v12_v3 = vpop.permute.xlu0 %11  }
  0x7d   :  { %14 = vst.msk [vmem:[#allocation0] sm:$0x1] %vm13_vm1, %v12_v3  }
  0x84   :  { %v18_v4 = vld [vmem:[#allocation0] sm:$0x1] }
  0x85   :  { %20 = vst [vmem:[%s40_s1] sm:$0x1] %v18_v4 }

// kernel: my_resnet_forward.23
= control target key start
LH: loop header
LB: loop body
LE: loop exit
PB: predicated region body
PF: predicated region fallthrough
CT: control target
= control target key end

     0   :  { %s480_s0 = inlined_call_operand.vmem [shape: f32[256,128], index: 0, kind: input, shape index: {}]   ;;  %s481_s1 = inlined_call_operand.vmem [shape: f32[1,128], index: 1, kind: input, shape index: {}]   ;;  %s482_s2 = inlined_call_operand.vmem [shape: f32[1,128], index: 2, kind: input, shape index: {}]   ;;  %s483_s3 = inlined_call_operand.vmem [shape: f32[256,128], index: 3, kind: output, shape index: {}]  }
   0x1   :  { %v14_v0 = vld [vmem:[%s480_s0] sm:$0xff]  ;;  %v15_v4 = vld [vmem:[%s480_s0 + $0x8] sm:$0xff]  ;;  %v16_v5 = vld [vmem:[%s480_s0 + $0x10] sm:$0xff] }
   0x2   :  { %v220_v1 = vld [vmem:[%s481_s1] ss:$0 sm:$0xff]  ;;  %v17_v6 = vld [vmem:[%s480_s0 + $0x18] sm:$0xff]  ;;  %v19_v11 = vld [vmem:[%s480_s0 + $0x28] sm:$0xff] }
   0x3   :  { %v225_v2 = vld [vmem:[%s482_s2] ss:$0 sm:$0xff]  ;;  %v53_v3 = vmul.f32 %v220_v1, %v14_v0  ;;  %v54_v7 = vmul.f32 %v220_v1, %v15_v4  ;;  %v55_v8 = vmul.f32 %v220_v1, %v16_v5  ;;  %v56_v9 = vmul.f32 %v220_v1, %v17_v6  ;;  %v20_v12 = vld [vmem:[%s480_s0 + $0x30] sm:$0xff]  ;;  %v21_v17 = vld [vmem:[%s480_s0 + $0x38] sm:$0xff] }
   0x4   :  { %v18_v10 = vld [vmem:[%s480_s0 + $0x20] sm:$0xff]  ;;  %v58_v15 = vmul.f32 %v220_v1, %v19_v11  ;;  %v59_v16 = vmul.f32 %v220_v1, %v20_v12  ;;  %v60_v21 = vmul.f32 %v220_v1, %v21_v17  ;;  %v23_v27 = vld [vmem:[%s480_s0 + $0x48] sm:$0xff]  ;;  %v24_v28 = vld [vmem:[%s480_s0 + $0x50] sm:$0xff] }
   0x5   :  { %v92_v13 = vadd.f32 %v225_v2, %v53_v3  ;;  %v57_v14 = vmul.f32 %v220_v1, %v18_v10  ;;  %v93_v18 = vadd.f32 %v225_v2, %v54_v7  ;;  %v94_v19 = vadd.f32 %v225_v2, %v55_v8  ;;  %v22_v22 = vld [vmem:[%s480_s0 + $0x40] sm:$0xff]  ;;  %v25_v29 = vld [vmem:[%s480_s0 + $0x58] sm:$0xff]  ;;  %v27_v35 = vld [vmem:[%s480_s0 + $0x68] sm:$0xff] }
   0x6   :  { %v95_v20 = vadd.f32 %v225_v2, %v56_v9  ;;  %v97_v25 = vadd.f32 %v225_v2, %v58_v15  ;;  %v98_v26 = vadd.f32 %v225_v2, %v59_v16  ;;  %v99_v33 = vadd.f32 %v225_v2, %v60_v21  ;;  %v26_v34 = vld [vmem:[%s480_s0 + $0x60] sm:$0xff]  ;;  %v28_v36 = vld [vmem:[%s480_s0 + $0x70] sm:$0xff]  ;;  %v29_v41 = vld [vmem:[%s480_s0 + $0x78] sm:$0xff] }
   0x7   :  { %v124_v23 = vmax.f32 %v92_v13, 0.0  ;;  %v96_v24 = vadd.f32 %v225_v2, %v57_v14  ;;  %v125_v30 = vmax.f32 %v93_v18, 0.0  ;;  %v126_v31 = vmax.f32 %v94_v19, 0.0  ;;  %v30_v54 = vld [vmem:[%s480_s0 + $0x80] sm:$0xff]  ;;  %v31_v59 = vld [vmem:[%s480_s0 + $0x88] sm:$0xff]  ;;  %v32_v60 = vld [vmem:[%s480_s0 + $0x90] sm:$0xff] }
   0x8   :  { %v127_v32 = vmax.f32 %v95_v20, 0.0  ;;  %v129_v38 = vmax.f32 %v97_v25, 0.0  ;;  %v130_v39 = vmax.f32 %v98_v26, 0.0  ;;  %v61_v40 = vmul.f32 %v220_v1, %v22_v22  ;;  %v33_v61 = vld [vmem:[%s480_s0 + $0x98] sm:$0xff]  ;;  %v34_v4 = vld [vmem:[%s480_s0 + $0xa0] sm:$0xff]  ;;  %v35_v5 = vld [vmem:[%s480_s0 + $0xa8] sm:$0xff] }
   0x9   :  { %156 = vst [vmem:[%s483_s3] sm:$0xff] %v124_v23  ;;  %v128_v37 = vmax.f32 %v96_v24, 0.0  ;;  %157 = vst [vmem:[%s483_s3 + $0x8] sm:$0xff] %v125_v30  ;;  %v131_v42 = vmax.f32 %v99_v33, 0.0  ;;  %v62_v43 = vmul.f32 %v220_v1, %v23_v27  ;;  %v63_v44 = vmul.f32 %v220_v1, %v24_v28  ;;  %v36_v6 = vld [vmem:[%s480_s0 + $0xb0] sm:$0xff]  ;;  %v37_v11 = vld [vmem:[%s480_s0 + $0xb8] sm:$0xff] }
   0xa   :  { %158 = vst [vmem:[%s483_s3 + $0x10] sm:$0xff] %v126_v31  ;;  %159 = vst [vmem:[%s483_s3 + $0x18] sm:$0xff] %v127_v32  ;;  %v64_v45 = vmul.f32 %v220_v1, %v25_v29  ;;  %v100_v46 = vadd.f32 %v225_v2, %v61_v40  ;;  %v65_v47 = vmul.f32 %v220_v1, %v26_v34  ;;  %v38_v24 = vld [vmem:[%s480_s0 + $0xc0] sm:$0xff]  ;;  %v39_v29 = vld [vmem:[%s480_s0 + $0xc8] sm:$0xff] }
   0xb   :  { %160 = vst [vmem:[%s483_s3 + $0x20] sm:$0xff] %v128_v37  ;;  %161 = vst [vmem:[%s483_s3 + $0x28] sm:$0xff] %v129_v38  ;;  %v66_v48 = vmul.f32 %v220_v1, %v27_v35  ;;  %v67_v49 = vmul.f32 %v220_v1, %v28_v36  ;;  %v101_v50 = vadd.f32 %v225_v2, %v62_v43  ;;  %v40_v30 = vld [vmem:[%s480_s0 + $0xd0] sm:$0xff]  ;;  %v41_v31 = vld [vmem:[%s480_s0 + $0xd8] sm:$0xff] }
   0xc   :  { %162 = vst [vmem:[%s483_s3 + $0x30] sm:$0xff] %v130_v39  ;;  %163 = vst [vmem:[%s483_s3 + $0x38] sm:$0xff] %v131_v42  ;;  %v102_v51 = vadd.f32 %v225_v2, %v63_v44  ;;  %v103_v52 = vadd.f32 %v225_v2, %v64_v45  ;;  %v68_v53 = vmul.f32 %v220_v1, %v29_v41  ;;  %v132_v55 = vmax.f32 %v100_v46, 0.0  ;;  %v42_v36 = vld [vmem:[%s480_s0 + $0xe0] sm:$0xff]  ;;  %v43_v37 = vld [vmem:[%s480_s0 + $0xe8] sm:$0xff] }
   0xd   :  { %v104_v56 = vadd.f32 %v225_v2, %v65_v47  ;;  %v105_v57 = vadd.f32 %v225_v2, %v66_v48  ;;  %v106_v58 = vadd.f32 %v225_v2, %v67_v49  ;;  %v133_v62 = vmax.f32 %v101_v50, 0.0  ;;  %v44_v38 = vld [vmem:[%s480_s0 + $0xf0] sm:$0xff]  ;;  %v45_v43 = vld [vmem:[%s480_s0 + $0xf8] sm:$0xff] }
   0xe   :  { %v134_v63 = vmax.f32 %v102_v51, 0.0  ;;  %v135_v0 = vmax.f32 %v103_v52, 0.0  ;;  %v107_v3 = vadd.f32 %v225_v2, %v68_v53  ;;  %164 = vst [vmem:[%s483_s3 + $0x40] sm:$0xff] %v132_v55  ;;  %v69_v10 = vmul.f32 %v220_v1, %v30_v54 }
   0xf   :  { %v136_v7 = vmax.f32 %v104_v56, 0.0  ;;  %v137_v8 = vmax.f32 %v105_v57, 0.0  ;;  %v138_v9 = vmax.f32 %v106_v58, 0.0  ;;  %165 = vst [vmem:[%s483_s3 + $0x48] sm:$0xff] %v133_v62  ;;  %v70_v13 = vmul.f32 %v220_v1, %v31_v59 }
  0x10   :  { %166 = vst [vmem:[%s483_s3 + $0x50] sm:$0xff] %v134_v63  ;;  %167 = vst [vmem:[%s483_s3 + $0x58] sm:$0xff] %v135_v0  ;;  %v139_v12 = vmax.f32 %v107_v3, 0.0  ;;  %v71_v14 = vmul.f32 %v220_v1, %v32_v60  ;;  %v72_v15 = vmul.f32 %v220_v1, %v33_v61  ;;  %v108_v16 = vadd.f32 %v225_v2, %v69_v10 }
  0x11   :  { %168 = vst [vmem:[%s483_s3 + $0x60] sm:$0xff] %v136_v7  ;;  %169 = vst [vmem:[%s483_s3 + $0x68] sm:$0xff] %v137_v8  ;;  %v73_v17 = vmul.f32 %v220_v1, %v34_v4  ;;  %v74_v18 = vmul.f32 %v220_v1, %v35_v5  ;;  %v75_v19 = vmul.f32 %v220_v1, %v36_v6 }
  0x12   :  { %170 = vst [vmem:[%s483_s3 + $0x70] sm:$0xff] %v138_v9  ;;  %171 = vst [vmem:[%s483_s3 + $0x78] sm:$0xff] %v139_v12  ;;  %v109_v20 = vadd.f32 %v225_v2, %v70_v13  ;;  %v110_v21 = vadd.f32 %v225_v2, %v71_v14  ;;  %v111_v22 = vadd.f32 %v225_v2, %v72_v15  ;;  %v140_v25 = vmax.f32 %v108_v16, 0.0 }
  0x13   :  { %v76_v23 = vmul.f32 %v220_v1, %v37_v11  ;;  %v112_v26 = vadd.f32 %v225_v2, %v73_v17  ;;  %v113_v27 = vadd.f32 %v225_v2, %v74_v18  ;;  %v114_v28 = vadd.f32 %v225_v2, %v75_v19 }
  0x14   :  { %v141_v32 = vmax.f32 %v109_v20, 0.0  ;;  %v142_v33 = vmax.f32 %v110_v21, 0.0  ;;  %v143_v34 = vmax.f32 %v111_v22, 0.0  ;;  %172 = vst [vmem:[%s483_s3 + $0x80] sm:$0xff] %v140_v25  ;;  %v77_v42 = vmul.f32 %v220_v1, %v38_v24 }
  0x15   :  { %v115_v35 = vadd.f32 %v225_v2, %v76_v23  ;;  %v144_v39 = vmax.f32 %v112_v26, 0.0  ;;  %v145_v40 = vmax.f32 %v113_v27, 0.0  ;;  %v146_v41 = vmax.f32 %v114_v28, 0.0 }
  0x16   :  { %173 = vst [vmem:[%s483_s3 + $0x88] sm:$0xff] %v141_v32  ;;  %174 = vst [vmem:[%s483_s3 + $0x90] sm:$0xff] %v142_v33  ;;  %v78_v45 = vmul.f32 %v220_v1, %v39_v29  ;;  %v79_v46 = vmul.f32 %v220_v1, %v40_v30  ;;  %v80_v47 = vmul.f32 %v220_v1, %v41_v31 }
  0x17   :  { %175 = vst [vmem:[%s483_s3 + $0x98] sm:$0xff] %v143_v34  ;;  %v147_v44 = vmax.f32 %v115_v35, 0.0  ;;  %176 = vst [vmem:[%s483_s3 + $0xa0] sm:$0xff] %v144_v39  ;;  %v116_v48 = vadd.f32 %v225_v2, %v77_v42  ;;  %v81_v49 = vmul.f32 %v220_v1, %v42_v36  ;;  %v82_v50 = vmul.f32 %v220_v1, %v43_v37 }
  0x18   :  { %177 = vst [vmem:[%s483_s3 + $0xa8] sm:$0xff] %v145_v40  ;;  %178 = vst [vmem:[%s483_s3 + $0xb0] sm:$0xff] %v146_v41  ;;  %v83_v51 = vmul.f32 %v220_v1, %v44_v38  ;;  %v117_v52 = vadd.f32 %v225_v2, %v78_v45  ;;  %v118_v53 = vadd.f32 %v225_v2, %v79_v46 }
  0x19   :  { %179 = vst [vmem:[%s483_s3 + $0xb8] sm:$0xff] %v147_v44  ;;  %v119_v54 = vadd.f32 %v225_v2, %v80_v47  ;;  %v84_v55 = vmul.f32 %v220_v1, %v45_v43  ;;  %v148_v56 = vmax.f32 %v116_v48, 0.0  ;;  %v120_v57 = vadd.f32 %v225_v2, %v81_v49 }
  0x1a   :  { %v121_v58 = vadd.f32 %v225_v2, %v82_v50  ;;  %v122_v59 = vadd.f32 %v225_v2, %v83_v51  ;;  %v149_v60 = vmax.f32 %v117_v52, 0.0  ;;  %v150_v61 = vmax.f32 %v118_v53, 0.0 }
  0x1b   :  { %v151_v62 = vmax.f32 %v119_v54, 0.0  ;;  %v123_v63 = vadd.f32 %v225_v2, %v84_v55  ;;  %180 = vst [vmem:[%s483_s3 + $0xc0] sm:$0xff] %v148_v56  ;;  %v152_v0 = vmax.f32 %v120_v57, 0.0 }
  0x1c   :  { %v153_v3 = vmax.f32 %v121_v58, 0.0  ;;  %v154_v4 = vmax.f32 %v122_v59, 0.0  ;;  %181 = vst [vmem:[%s483_s3 + $0xc8] sm:$0xff] %v149_v60  ;;  %182 = vst [vmem:[%s483_s3 + $0xd0] sm:$0xff] %v150_v61 }
  0x1d   :  { %183 = vst [vmem:[%s483_s3 + $0xd8] sm:$0xff] %v151_v62  ;;  %v155_v1 = vmax.f32 %v123_v63, 0.0  ;;  %184 = vst [vmem:[%s483_s3 + $0xe0] sm:$0xff] %v152_v0 }
  0x1e   :  { %185 = vst [vmem:[%s483_s3 + $0xe8] sm:$0xff] %v153_v3  ;;  %186 = vst [vmem:[%s483_s3 + $0xf0] sm:$0xff] %v154_v4 }
  0x1f   :  { %187 = vst [vmem:[%s483_s3 + $0xf8] sm:$0xff] %v155_v1 }

// kernel: my_resnet_forward.22
= control target key start
LH: loop header
LB: loop body
LE: loop exit
PB: predicated region body
PF: predicated region fallthrough
CT: control target
= control target key end

     0   :  { %s911_s15 = smov 0   ;;  %s1112_s0 = inlined_call_operand.vmem [shape: bf16[512,27], index: 0, kind: input, shape index: {}]   ;;  %s1113_s1 = inlined_call_operand.vmem [shape: bf16[27,64], index: 1, kind: input, shape index: {}]   ;;  %s1114_s2 = inlined_call_operand.vmem [shape: f32[1,64], index: 2, kind: input, shape index: {}]   ;;  %s1115_s3 = inlined_call_operand.vmem [shape: f32[1,64], index: 3, kind: input, shape index: {}]   ;;  %s1116_s4 = inlined_call_operand.vmem [shape: f32[512,64], index: 4, kind: output, shape index: {}]  }
   0x1 LB: > { %s745_s16 = sadd.s32 4294967295, %s883_s15   ;;  %p749_p0 = scmp.ge.s32.totalorder %s883_s15, 1  ;;  %s883_s15 = sphi %s911_s15, %s14_s15  }
   0x2   : > { %p163_p1 = scmp.lt.s32.totalorder %s883_s15, 3 }
   0x4   : > { %p164_p2 = pnand %p749_p0, %p163_p1 }
   0x5   : > { %v859_v0 = vld [vmem:[%s1113_s1] sm:$0xff] (!%p164_p2)   ;;  %vm378_vm0 = vcmask (!%p164_p2), 1044480   ;;  %v860_v1 = vld [vmem:[%s1113_s1 + $0x8] sm:$0x3f] (!%p164_p2)   ;;  %vm379_vm1 = vcmask (!%p164_p2), 1045504   ;;  %s750_s21 = sshll.u32 (!%p164_p2), %s745_s16, 5 }
   0x6   : > { %167 = sbr.rel (%p164_p2) target bundleno = 265 (0x109), region = 36  ;;  %810 = vmatprep.subr.bf16.mxu0 (!%p164_p2), %v859_v0  ;;  %846 = vmatprep.subr.bf16.mxu1 (!%p164_p2), %v859_v0  ;;  %v885_v2 = vmov (!%p164_p2), 65535   ;;  %p190_p3 = scmp.lt.s32.totalorder (!%p164_p2), %s750_s21, 63  ;;  %vm329_vm2 = vcmask (!%p164_p2), 220160   ;;  %v968_v22 = vld [vmem:[%s1114_s2] ss:$0 sm:$0xff] (!%p164_p2) }
   0x7   : > { %811 = vmatpush3.bf16.msra.mxu0 (!%p164_p2), %v859_v0  ;;  %848 = vmatpush3.bf16.msra.mxu1 (!%p164_p2), %v859_v0  ;;  %v380_v3 = vsel (!%p164_p2), %vm378_vm0, 4294967295, %v885_v2  ;;  %v973_v24 = vld [vmem:[%s1115_s3] ss:$0 sm:$0xff] (!%p164_p2)  ;;  %vm656_vm3 = vcmask (!%p164_p2), 523264  }
   0x8   : > { %v381_v4 = vsel (!%p164_p2), %vm379_vm1, %v380_v3, 0 }
   0x9   : > { %v383_v5 = vand.u32 (!%p164_p2), %v860_v1, %v381_v4 }
   0xb   : > { %812 = vmatprep.subr.bf16.mxu0 (!%p164_p2), %v383_v5  ;;  %847 = vmatprep.subr.bf16.mxu1 (!%p164_p2), %v383_v5 }
   0xc   : > { %813 = vmatpush3.bf16.msra.mxu0 (!%p164_p2), %v383_v5  ;;  %849 = vmatpush3.bf16.msra.mxu1 (!%p164_p2), %v383_v5 }
   0xd   : > { %s1118_s21 = smov (!%p190_p3, %s750_s21), 63 }
   0xe   : > { %s751_s22 = sshll.u32 %s1118_s21, 2  ;;  %s753_s30 = sshll.u32 %s1118_s21, 3 }
   0xf   : > { %s931_s25 = scalar_lea.vmem %s1112_s0, %s751_s22  ;;  %s985_s7 = scalar_lea.vmem %s1116_s4, %s753_s30 }
  0x10   : > { %v861_v6 = vld [vmem:[%s931_s25] sm:$0xff]   ;;  %v863_v8 = vld [vmem:[%s931_s25 + $0x8] sm:$0xff]   ;;  %v865_v10 = vld [vmem:[%s931_s25 + $0x10] sm:$0xff]  }
  0x11   : > { %v862_v7 = vld [vmem:[%s931_s25 + $0x40] sm:$0xff]   ;;  %814 = vmatprep.mubr.msk.bf16.mxu0 %vm329_vm2, %v861_v6  ;;  %v864_v9 = vld [vmem:[%s931_s25 + $0x48] sm:$0xff]   ;;  %v866_v11 = vld [vmem:[%s931_s25 + $0x50] sm:$0xff]  }
  0x12   : > { %830 = vmatprep.mubr.msk.bf16.mxu1 %vm329_vm2, %v862_v7  ;;  %815 = vmatmul.mubr.msk.bf16.vlgmr.msra.gmra.mrb[0].mxu0 %vm329_vm2, %v863_v8  ;;  %v867_v12 = vld [vmem:[%s931_s25 + $0x18] sm:$0xff]   ;;  %v869_v14 = vld [vmem:[%s931_s25 + $0x20] sm:$0xff]   ;;  %v871_v16 = vld [vmem:[%s931_s25 + $0x28] sm:$0xff]  }
  0x13   : > { %831 = vmatmul.mubr.msk.bf16.vlgmr.msra.gmra.mrb[0].mxu1 %vm329_vm2, %v864_v9  ;;  %818 = vmatprep.mubr.msk.bf16.mxu0 %vm329_vm2, %v865_v10  ;;  %v868_v13 = vld [vmem:[%s931_s25 + $0x58] sm:$0xff]   ;;  %v870_v15 = vld [vmem:[%s931_s25 + $0x60] sm:$0xff]   ;;  %v872_v17 = vld [vmem:[%s931_s25 + $0x68] sm:$0xff]  }
  0x14   : > { %834 = vmatprep.mubr.msk.bf16.mxu1 %vm329_vm2, %v866_v11  ;;  %v873_v18 = vld [vmem:[%s931_s25 + $0x30] sm:$0xff]   ;;  %v875_v20 = vld [vmem:[%s931_s25 + $0x38] sm:$0xff]  }
  0x15   : > { %v874_v19 = vld [vmem:[%s931_s25 + $0x70] sm:$0xff]   ;;  %v876_v21 = vld [vmem:[%s931_s25 + $0x78] sm:$0xff]  }
  0x1a   : > { %819 = vmatmul.mubr.msk.bf16.gmra.mrb[4].mxu0 %vm329_vm2, %v867_v12 }
  0x1b   : > { %835 = vmatmul.mubr.msk.bf16.gmra.mrb[4].mxu1 %vm329_vm2, %v868_v13  ;;  %822 = vmatprep.mubr.msk.bf16.mxu0 %vm329_vm2, %v869_v14 }
  0x1c   : > { %838 = vmatprep.mubr.msk.bf16.mxu1 %vm329_vm2, %v870_v15 }
  0x22   : > { %823 = vmatmul.mubr.msk.bf16.gmra.mrb[8].mxu0 %vm329_vm2, %v871_v16 }
  0x23   : > { %839 = vmatmul.mubr.msk.bf16.gmra.mrb[8].mxu1 %vm329_vm2, %v872_v17  ;;  %826 = vmatprep.mubr.msk.bf16.mxu0 %vm329_vm2, %v873_v18 }
  0x24   : > { %842 = vmatprep.mubr.msk.bf16.mxu1 %vm329_vm2, %v874_v19 }
  0x2a   : > { %827 = vmatmul.mubr.msk.bf16.gmra.mrb[12].mxu0 %vm329_vm2, %v875_v20 }
  0x2b   : > { %843 = vmatmul.mubr.msk.bf16.gmra.mrb[12].mxu1 %vm329_vm2, %v876_v21 }
  0xe5   : > { %v816_v23 = vpop.f32.mrb[0].mxu0 }
  0xe6   : > { %v555_v25 = vmul.f32 %v816_v23, %v968_v22  ;;  %v832_v26 = vpop.f32.mrb[0].mxu1  ;;  %v419_v27 = vpop.f32.mrb[1].mxu0 }
  0xe7   : > { %v571_v28 = vmul.f32 %v832_v26, %v968_v22  ;;  %v553_v29 = vmul.f32 %v968_v22, %v419_v27  ;;  %v483_v30 = vpop.f32.mrb[1].mxu1  ;;  %v817_v31 = vpop.f32.mrb[2].mxu0 }
  0xe8   : > { %v594_v32 = vadd.f32 %v973_v24, %v555_v25  ;;  %v569_v33 = vmul.f32 %v968_v22, %v483_v30  ;;  %v556_v34 = vmul.f32 %v817_v31, %v968_v22  ;;  %v833_v35 = vpop.f32.mrb[2].mxu1  ;;  %v422_v36 = vpop.f32.mrb[3].mxu0 }
  0xe9   : > { %v610_v37 = vadd.f32 %v973_v24, %v571_v28  ;;  %v592_v38 = vadd.f32 %v973_v24, %v553_v29  ;;  %v572_v39 = vmul.f32 %v833_v35, %v968_v22  ;;  %v554_v40 = vmul.f32 %v968_v22, %v422_v36  ;;  %v486_v41 = vpop.f32.mrb[3].mxu1 }
  0xea   : > { %v626_v42 = vmax.f32 %v594_v32, 0.0  ;;  %v608_v43 = vadd.f32 %v973_v24, %v569_v33  ;;  %v595_v44 = vadd.f32 %v973_v24, %v556_v34  ;;  %v570_v45 = vmul.f32 %v968_v22, %v486_v41 }
  0xeb   : > { %v642_v46 = vmax.f32 %v610_v37, 0.0  ;;  %v624_v47 = vmax.f32 %v592_v38, 0.0  ;;  %v611_v48 = vadd.f32 %v973_v24, %v572_v39  ;;  %v593_v49 = vadd.f32 %v973_v24, %v554_v40 }
  0xec   : > { %659 = vst.msk [vmem:[%s985_s7 + $0x10] sm:$0xff] %vm656_vm3, %v626_v42  ;;  %v640_v50 = vmax.f32 %v608_v43, 0.0  ;;  %v627_v51 = vmax.f32 %v595_v44, 0.0  ;;  %v609_v52 = vadd.f32 %v973_v24, %v570_v45 }
  0xed   : > { %675 = vst.msk [vmem:[%s985_s7 + $0x90] sm:$0xff] %vm656_vm3, %v642_v46  ;;  %657 = vst.msk [vmem:[%s985_s7] sm:$0xff] %vm656_vm3, %v624_v47  ;;  %v643_v53 = vmax.f32 %v611_v48, 0.0  ;;  %v625_v54 = vmax.f32 %v593_v49, 0.0  ;;  %v820_v55 = vpop.f32.mrb[4].mxu0 }
  0xee   : > { %673 = vst.msk [vmem:[%s985_s7 + $0x80] sm:$0xff] %vm656_vm3, %v640_v50  ;;  %660 = vst.msk [vmem:[%s985_s7 + $0x18] sm:$0xff] %vm656_vm3, %v627_v51  ;;  %v641_v56 = vmax.f32 %v609_v52, 0.0  ;;  %v559_v57 = vmul.f32 %v820_v55, %v968_v22  ;;  %v836_v58 = vpop.f32.mrb[4].mxu1  ;;  %v435_v59 = vpop.f32.mrb[5].mxu0 }
  0xef   : > { %676 = vst.msk [vmem:[%s985_s7 + $0x98] sm:$0xff] %vm656_vm3, %v643_v53  ;;  %658 = vst.msk [vmem:[%s985_s7 + $0x8] sm:$0xff] %vm656_vm3, %v625_v54  ;;  %v575_v60 = vmul.f32 %v836_v58, %v968_v22  ;;  %v557_v61 = vmul.f32 %v968_v22, %v435_v59  ;;  %v499_v62 = vpop.f32.mrb[5].mxu1  ;;  %v821_v63 = vpop.f32.mrb[6].mxu0 }
  0xf0   : > { %674 = vst.msk [vmem:[%s985_s7 + $0x88] sm:$0xff] %vm656_vm3, %v641_v56  ;;  %v598_v0 = vadd.f32 %v973_v24, %v559_v57  ;;  %v573_v1 = vmul.f32 %v968_v22, %v499_v62  ;;  %v560_v2 = vmul.f32 %v821_v63, %v968_v22  ;;  %v837_v3 = vpop.f32.mrb[6].mxu1  ;;  %v438_v4 = vpop.f32.mrb[7].mxu0 }
  0xf1   : > { %v614_v5 = vadd.f32 %v973_v24, %v575_v60  ;;  %v596_v6 = vadd.f32 %v973_v24, %v557_v61  ;;  %v576_v7 = vmul.f32 %v837_v3, %v968_v22  ;;  %v558_v8 = vmul.f32 %v968_v22, %v438_v4  ;;  %v502_v9 = vpop.f32.mrb[7].mxu1 }
  0xf2   : > { %v630_v10 = vmax.f32 %v598_v0, 0.0  ;;  %v612_v11 = vadd.f32 %v973_v24, %v573_v1  ;;  %v599_v12 = vadd.f32 %v973_v24, %v560_v2  ;;  %v574_v13 = vmul.f32 %v968_v22, %v502_v9 }
  0xf3   : > { %v646_v14 = vmax.f32 %v614_v5, 0.0  ;;  %v628_v15 = vmax.f32 %v596_v6, 0.0  ;;  %v615_v16 = vadd.f32 %v973_v24, %v576_v7  ;;  %v597_v17 = vadd.f32 %v973_v24, %v558_v8 }
  0xf4   : > { %663 = vst.msk [vmem:[%s985_s7 + $0x30] sm:$0xff] %vm656_vm3, %v630_v10  ;;  %v644_v18 = vmax.f32 %v612_v11, 0.0  ;;  %v631_v19 = vmax.f32 %v599_v12, 0.0  ;;  %v613_v20 = vadd.f32 %v973_v24, %v574_v13 }
  0xf5   : > { %679 = vst.msk [vmem:[%s985_s7 + $0xb0] sm:$0xff] %vm656_vm3, %v646_v14  ;;  %661 = vst.msk [vmem:[%s985_s7 + $0x20] sm:$0xff] %vm656_vm3, %v628_v15  ;;  %v647_v21 = vmax.f32 %v615_v16, 0.0  ;;  %v629_v23 = vmax.f32 %v597_v17, 0.0  ;;  %v824_v25 = vpop.f32.mrb[8].mxu0 }
  0xf6   : > { %677 = vst.msk [vmem:[%s985_s7 + $0xa0] sm:$0xff] %vm656_vm3, %v644_v18  ;;  %664 = vst.msk [vmem:[%s985_s7 + $0x38] sm:$0xff] %vm656_vm3, %v631_v19  ;;  %v645_v26 = vmax.f32 %v613_v20, 0.0  ;;  %v563_v27 = vmul.f32 %v824_v25, %v968_v22  ;;  %v840_v28 = vpop.f32.mrb[8].mxu1  ;;  %v451_v29 = vpop.f32.mrb[9].mxu0 }
  0xf7   : > { %680 = vst.msk [vmem:[%s985_s7 + $0xb8] sm:$0xff] %vm656_vm3, %v647_v21  ;;  %662 = vst.msk [vmem:[%s985_s7 + $0x28] sm:$0xff] %vm656_vm3, %v629_v23  ;;  %v579_v30 = vmul.f32 %v840_v28, %v968_v22  ;;  %v561_v31 = vmul.f32 %v968_v22, %v451_v29  ;;  %v515_v32 = vpop.f32.mrb[9].mxu1  ;;  %v825_v33 = vpop.f32.mrb[10].mxu0 }
  0xf8   : > { %678 = vst.msk [vmem:[%s985_s7 + $0xa8] sm:$0xff] %vm656_vm3, %v645_v26  ;;  %v602_v34 = vadd.f32 %v973_v24, %v563_v27  ;;  %v577_v35 = vmul.f32 %v968_v22, %v515_v32  ;;  %v564_v36 = vmul.f32 %v825_v33, %v968_v22  ;;  %v841_v37 = vpop.f32.mrb[10].mxu1  ;;  %v454_v38 = vpop.f32.mrb[11].mxu0 }
  0xf9   : > { %v618_v39 = vadd.f32 %v973_v24, %v579_v30  ;;  %v600_v40 = vadd.f32 %v973_v24, %v561_v31  ;;  %v580_v41 = vmul.f32 %v841_v37, %v968_v22  ;;  %v562_v42 = vmul.f32 %v968_v22, %v454_v38  ;;  %v518_v43 = vpop.f32.mrb[11].mxu1 }
  0xfa   : > { %v634_v44 = vmax.f32 %v602_v34, 0.0  ;;  %v616_v45 = vadd.f32 %v973_v24, %v577_v35  ;;  %v603_v46 = vadd.f32 %v973_v24, %v564_v36  ;;  %v578_v47 = vmul.f32 %v968_v22, %v518_v43 }
  0xfb   : > { %v650_v48 = vmax.f32 %v618_v39, 0.0  ;;  %v632_v49 = vmax.f32 %v600_v40, 0.0  ;;  %v619_v50 = vadd.f32 %v973_v24, %v580_v41  ;;  %v601_v51 = vadd.f32 %v973_v24, %v562_v42 }
  0xfc   : > { %667 = vst.msk [vmem:[%s985_s7 + $0x50] sm:$0xff] %vm656_vm3, %v634_v44  ;;  %v648_v52 = vmax.f32 %v616_v45, 0.0  ;;  %v635_v53 = vmax.f32 %v603_v46, 0.0  ;;  %v617_v54 = vadd.f32 %v973_v24, %v578_v47 }
  0xfd   : > { %683 = vst.msk [vmem:[%s985_s7 + $0xd0] sm:$0xff] %vm656_vm3, %v650_v48  ;;  %665 = vst.msk [vmem:[%s985_s7 + $0x40] sm:$0xff] %vm656_vm3, %v632_v49  ;;  %v651_v55 = vmax.f32 %v619_v50, 0.0  ;;  %v633_v56 = vmax.f32 %v601_v51, 0.0  ;;  %v828_v57 = vpop.f32.mrb[12].mxu0 }
  0xfe   : > { %681 = vst.msk [vmem:[%s985_s7 + $0xc0] sm:$0xff] %vm656_vm3, %v648_v52  ;;  %668 = vst.msk [vmem:[%s985_s7 + $0x58] sm:$0xff] %vm656_vm3, %v635_v53  ;;  %v649_v58 = vmax.f32 %v617_v54, 0.0  ;;  %v567_v59 = vmul.f32 %v828_v57, %v968_v22  ;;  %v844_v60 = vpop.f32.mrb[12].mxu1  ;;  %v467_v61 = vpop.f32.mrb[13].mxu0 }
  0xff   : > { %684 = vst.msk [vmem:[%s985_s7 + $0xd8] sm:$0xff] %vm656_vm3, %v651_v55  ;;  %666 = vst.msk [vmem:[%s985_s7 + $0x48] sm:$0xff] %vm656_vm3, %v633_v56  ;;  %v583_v62 = vmul.f32 %v844_v60, %v968_v22  ;;  %v565_v63 = vmul.f32 %v968_v22, %v467_v61  ;;  %v531_v0 = vpop.f32.mrb[13].mxu1  ;;  %v829_v1 = vpop.f32.mrb[14].mxu0 }
 0x100   : > { %682 = vst.msk [vmem:[%s985_s7 + $0xc8] sm:$0xff] %vm656_vm3, %v649_v58  ;;  %v606_v2 = vadd.f32 %v973_v24, %v567_v59  ;;  %v581_v3 = vmul.f32 %v968_v22, %v531_v0  ;;  %v568_v4 = vmul.f32 %v829_v1, %v968_v22  ;;  %v845_v5 = vpop.f32.mrb[14].mxu1  ;;  %v470_v6 = vpop.f32.mrb[15].mxu0 }
 0x101   : > { %v622_v7 = vadd.f32 %v973_v24, %v583_v62  ;;  %v604_v8 = vadd.f32 %v973_v24, %v565_v63  ;;  %v584_v9 = vmul.f32 %v845_v5, %v968_v22  ;;  %v566_v10 = vmul.f32 %v968_v22, %v470_v6  ;;  %v534_v11 = vpop.f32.mrb[15].mxu1 }
 0x102   : > { %v638_v12 = vmax.f32 %v606_v2, 0.0  ;;  %v620_v13 = vadd.f32 %v973_v24, %v581_v3  ;;  %v607_v14 = vadd.f32 %v973_v24, %v568_v4  ;;  %v582_v15 = vmul.f32 %v968_v22, %v534_v11 }
 0x103   : > { %v654_v16 = vmax.f32 %v622_v7, 0.0  ;;  %v636_v17 = vmax.f32 %v604_v8, 0.0  ;;  %v623_v18 = vadd.f32 %v973_v24, %v584_v9  ;;  %v605_v19 = vadd.f32 %v973_v24, %v566_v10 }
 0x104   : > { %671 = vst.msk [vmem:[%s985_s7 + $0x70] sm:$0xff] %vm656_vm3, %v638_v12  ;;  %v652_v20 = vmax.f32 %v620_v13, 0.0  ;;  %v639_v21 = vmax.f32 %v607_v14, 0.0  ;;  %v621_v23 = vadd.f32 %v973_v24, %v582_v15 }
 0x105   : > { %687 = vst.msk [vmem:[%s985_s7 + $0xf0] sm:$0xff] %vm656_vm3, %v654_v16  ;;  %669 = vst.msk [vmem:[%s985_s7 + $0x60] sm:$0xff] %vm656_vm3, %v636_v17  ;;  %v655_v22 = vmax.f32 %v623_v18, 0.0  ;;  %v637_v25 = vmax.f32 %v605_v19, 0.0 }
 0x106   : > { %685 = vst.msk [vmem:[%s985_s7 + $0xe0] sm:$0xff] %vm656_vm3, %v652_v20  ;;  %672 = vst.msk [vmem:[%s985_s7 + $0x78] sm:$0xff] %vm656_vm3, %v639_v21  ;;  %v653_v26 = vmax.f32 %v621_v23, 0.0 }
 0x107   : > { %688 = vst.msk [vmem:[%s985_s7 + $0xf8] sm:$0xff] %vm656_vm3, %v655_v22  ;;  %670 = vst.msk [vmem:[%s985_s7 + $0x68] sm:$0xff] %vm656_vm3, %v637_v25 }
 0x108   : > { %686 = vst.msk [vmem:[%s985_s7 + $0xe8] sm:$0xff] %vm656_vm3, %v653_v26 }
 0x109 PF: > { %s14_s15 = sadd.s32 1, %s883_s15  }
 0x10a   : > { %p11_p4 = scmp.ge.s32.totalorder %s14_s15, 4  }
 0x10c   :  { %13 = sbr.rel (!%p11_p4) target bundleno = 1 (0x1), region = 66 }

// kernel: my_resnet_forward.24
= control target key start
LH: loop header
LB: loop body
LE: loop exit
PB: predicated region body
PF: predicated region fallthrough
CT: control target
= control target key end

     0   :  { %s2354_s15 = smov 0   ;;  %s2835_s0 = inlined_call_operand.vmem [shape: bf16[512,576], index: 0, kind: input, shape index: {}]   ;;  %s2836_s1 = inlined_call_operand.vmem [shape: bf16[576,64], index: 1, kind: input, shape index: {}]   ;;  %s2837_s2 = inlined_call_operand.vmem [shape: f32[1,64], index: 2, kind: input, shape index: {}]   ;;  %s2838_s3 = inlined_call_operand.vmem [shape: f32[1,64], index: 3, kind: input, shape index: {}]   ;;  %s2839_s4 = inlined_call_operand.vmem [shape: f32[512,64], index: 4, kind: output, shape index: {}]  }
   0x1 LB: > { %s1719_s16 = sadd.s32 4294967295, %s2327_s15   ;;  %p1723_p0 = scmp.ge.s32.totalorder %s2327_s15, 1  ;;  %s2327_s15 = sphi %s2354_s15, %s14_s15  }
   0x2   : > { %p164_p1 = scmp.lt.s32.totalorder %s2327_s15, 3 }
   0x4   : > { %p165_p2 = pnand %p1723_p0, %p164_p1 }
   0x5   : > { %v2173_v0 = vld [vmem:[%s2836_s1 + $0x40] sm:$0xff] (!%p165_p2)   ;;  %s1724_s19 = sshll.u32 (!%p165_p2), %s1719_s16, 5  ;;  %v2175_v2 = vld [vmem:[%s2836_s1 + $0x48] sm:$0xff] (!%p165_p2)   ;;  %v2177_v4 = vld [vmem:[%s2836_s1 + $0x50] sm:$0xff] (!%p165_p2)   ;;  %vm989_vm0 = vcmask (!%p165_p2), 523264  }
   0x6   : > { %168 = sbr.rel (%p165_p2) target bundleno = 418 (0x1a2), region = 36  ;;  %v2174_v1 = vld [vmem:[%s2836_s1] sm:$0xff] (!%p165_p2)   ;;  %1864 = vmatprep.subr.bf16.mxu0 (!%p165_p2), %v2173_v0  ;;  %2148 = vmatprep.subr.bf16.mxu1 (!%p165_p2), %v2173_v0  ;;  %p192_p3 = scmp.lt.s32.totalorder (!%p165_p2), %s1724_s19, 63  ;;  %v2176_v3 = vld [vmem:[%s2836_s1 + $0x8] sm:$0xff] (!%p165_p2)   ;;  %v2178_v5 = vld [vmem:[%s2836_s1 + $0x10] sm:$0xff] (!%p165_p2)  }
   0x7   : > { %1865 = vmatpush3.bf16.msra.mxu0 (!%p165_p2), %v2174_v1  ;;  %2156 = vmatpush3.bf16.msra.mxu1 (!%p165_p2), %v2174_v1  ;;  %v2179_v6 = vld [vmem:[%s2836_s1 + $0x58] sm:$0xff] (!%p165_p2)   ;;  %v2181_v8 = vld [vmem:[%s2836_s1 + $0x60] sm:$0xff] (!%p165_p2)   ;;  %v2183_v10 = vld [vmem:[%s2836_s1 + $0x68] sm:$0xff] (!%p165_p2)  }
   0x8   : > { %1866 = vmatprep.subr.bf16.mxu0 (!%p165_p2), %v2175_v2  ;;  %2149 = vmatprep.subr.bf16.mxu1 (!%p165_p2), %v2175_v2  ;;  %v2180_v7 = vld [vmem:[%s2836_s1 + $0x18] sm:$0xff] (!%p165_p2)   ;;  %v2182_v9 = vld [vmem:[%s2836_s1 + $0x20] sm:$0xff] (!%p165_p2)   ;;  %v2184_v13 = vld [vmem:[%s2836_s1 + $0x28] sm:$0xff] (!%p165_p2)  }
   0x9   : > { %v2185_v14 = vld [vmem:[%s2836_s1 + $0x70] sm:$0xff] (!%p165_p2)   ;;  %v2187_v16 = vld [vmem:[%s2836_s1 + $0x78] sm:$0xff] (!%p165_p2)   ;;  %v2195_v18 = vld [vmem:[%s2836_s1 + $0xc0] sm:$0xff] (!%p165_p2)  }
   0xa   : > { %v2186_v15 = vld [vmem:[%s2836_s1 + $0x30] sm:$0xff] (!%p165_p2)   ;;  %v2188_v17 = vld [vmem:[%s2836_s1 + $0x38] sm:$0xff] (!%p165_p2)   ;;  %v2198_v19 = vld [vmem:[%s2836_s1 + $0x100] sm:$0xff] (!%p165_p2)  }
   0xb   : > { %1867 = vmatpush3.bf16.msra.mxu0 (!%p165_p2), %v2176_v3  ;;  %2157 = vmatpush3.bf16.msra.mxu1 (!%p165_p2), %v2176_v3  ;;  %v2196_v22 = vld [vmem:[%s2836_s1 + $0x80] sm:$0xff] (!%p165_p2)   ;;  %v2197_v23 = vld [vmem:[%s2836_s1 + $0xc8] sm:$0xff] (!%p165_p2)   ;;  %v2206_v28 = vld [vmem:[%s2836_s1 + $0xd0] sm:$0xff] (!%p165_p2)  }
   0xc   : > { %1868 = vmatprep.subr.bf16.mxu0 (!%p165_p2), %v2177_v4  ;;  %2150 = vmatprep.subr.bf16.mxu1 (!%p165_p2), %v2177_v4  ;;  %v2199_v26 = vld [vmem:[%s2836_s1 + $0x88] sm:$0xff] (!%p165_p2)   ;;  %v2207_v30 = vld [vmem:[%s2836_s1 + $0x90] sm:$0xff] (!%p165_p2)   ;;  %v2208_v31 = vld [vmem:[%s2836_s1 + $0xd8] sm:$0xff] (!%p165_p2)  }
   0xd   : > { %s2841_s19 = smov (!%p192_p3, %s1724_s19), 63  ;;  %v2209_v34 = vld [vmem:[%s2836_s1 + $0x98] sm:$0xff]   ;;  %v2229_v35 = vld [vmem:[%s2836_s1 + $0x108] sm:$0xff]   ;;  %v2216_v37 = vld [vmem:[%s2836_s1 + $0xe0] sm:$0xff]  }
   0xe   : > { %s2164_s6 = smul.u32 20, %s2841_s19  ;;  %v2217_v39 = vld [vmem:[%s2836_s1 + $0xa0] sm:$0xff]   ;;  %v2218_v40 = vld [vmem:[%s2836_s1 + $0xe8] sm:$0xff]   ;;  %v2226_v46 = vld [vmem:[%s2836_s1 + $0xf0] sm:$0xff]   ;;  %s1727_s27 = sshll.u32 %s2841_s19, 3 }
   0xf   : > { %1869 = vmatpush3.bf16.msra.mxu0 %v2178_v5  ;;  %2158 = vmatpush3.bf16.msra.mxu1 %v2178_v5  ;;  %v2219_v43 = vld [vmem:[%s2836_s1 + $0xa8] sm:$0xff]   ;;  %v2249_v47 = vld [vmem:[%s2836_s1 + $0x110] sm:$0xff]   ;;  %v2228_v49 = vld [vmem:[%s2836_s1 + $0xf8] sm:$0xff]   ;;  %s2663_s29 = scalar_lea.vmem %s2839_s4, %s1727_s27 }
  0x10   : > { %1870 = vmatprep.subr.bf16.mxu0 %v2179_v6  ;;  %2151 = vmatprep.subr.bf16.mxu1 %v2179_v6  ;;  %s2395_s13 = scalar_lea.vmem %s2835_s0, %s2164_s6  ;;  %v2227_v48 = vld [vmem:[%s2836_s1 + $0xb0] sm:$0xff]   ;;  %v2230_v52 = vld [vmem:[%s2836_s1 + $0xb8] sm:$0xff]  }
  0x11   : > { %v2191_v11 = vld [vmem:[%s2395_s13 + $0x4] ss:$20 sps:$4 sm:$0xff]   ;;  %v2189_v20 = vld [vmem:[%s2395_s13] ss:$20 sps:$4 sm:$0xff]   ;;  %v2204_v27 = vld [vmem:[%s2395_s13 + $0x28] ss:$20 sps:$4 sm:$0xff]  }
  0x12   : > { %v2194_v12 = vld [vmem:[%s2395_s13 + $0x1e4] ss:$20 sps:$4 sm:$0xff]   ;;  %1070 = vmatprep.mubr.bf16.mxu0 %v2191_v11  ;;  %v2192_v21 = vld [vmem:[%s2395_s13 + $0x1e0] ss:$20 sps:$4 sm:$0xff]   ;;  %v2205_v29 = vld [vmem:[%s2395_s13 + $0x208] ss:$20 sps:$4 sm:$0xff]  }
  0x13   : > { %1871 = vmatpush3.bf16.msra.mxu0 %v2180_v7  ;;  %2159 = vmatpush3.bf16.msra.mxu1 %v2180_v7  ;;  %v2200_v24 = vld [vmem:[%s2395_s13 + $0x2c] ss:$20 sps:$4 sm:$0xff]   ;;  %v2210_v32 = vld [vmem:[%s2395_s13 + $0x54] ss:$20 sps:$4 sm:$0xff]   ;;  %v2214_v36 = vld [vmem:[%s2395_s13 + $0x50] ss:$20 sps:$4 sm:$0xff]  }
  0x14   : > { %1872 = vmatprep.subr.bf16.mxu0 %v2181_v8  ;;  %2152 = vmatprep.subr.bf16.mxu1 %v2181_v8  ;;  %v2202_v25 = vld [vmem:[%s2395_s13 + $0x20c] ss:$20 sps:$4 sm:$0xff]   ;;  %v2212_v33 = vld [vmem:[%s2395_s13 + $0x234] ss:$20 sps:$4 sm:$0xff]   ;;  %v2215_v38 = vld [vmem:[%s2395_s13 + $0x230] ss:$20 sps:$4 sm:$0xff]  }
  0x15   : > { %1166 = vmatprep.mubr.bf16.mxu1 %v2194_v12  ;;  %v2220_v41 = vld [vmem:[%s2395_s13 + $0x7c] ss:$20 sps:$4 sm:$0xff]   ;;  %v2224_v44 = vld [vmem:[%s2395_s13 + $0x78] ss:$20 sps:$4 sm:$0xff]   ;;  %v2236_v54 = vld [vmem:[%s2395_s13 + $0xa0] ss:$20 sps:$4 sm:$0xff]  }
  0x16   : > { %v2222_v42 = vld [vmem:[%s2395_s13 + $0x25c] ss:$20 sps:$4 sm:$0xff]   ;;  %v2225_v45 = vld [vmem:[%s2395_s13 + $0x258] ss:$20 sps:$4 sm:$0xff]   ;;  %v2239_v57 = vld [vmem:[%s2395_s13 + $0x34] ss:$20 sps:$4 sm:$0xff]  }
  0x17   : > { %1873 = vmatpush3.bf16.msra.mxu0 %v2182_v9  ;;  %2160 = vmatpush3.bf16.msra.mxu1 %v2182_v9  ;;  %v2231_v50 = vld [vmem:[%s2395_s13 + $0xa4] ss:$20 sps:$4 sm:$0xff]   ;;  %v2235_v51 = vld [vmem:[%s2395_s13 + $0xc] ss:$20 sps:$4 sm:$0xff]   ;;  %v2233_v53 = vld [vmem:[%s2395_s13 + $0x8] ss:$20 sps:$4 sm:$0xff]  }
  0x18   : > { %1874 = vmatprep.subr.bf16.mxu0 %v2183_v10  ;;  %2153 = vmatprep.subr.bf16.mxu1 %v2183_v10  ;;  %v2237_v55 = vld [vmem:[%s2395_s13 + $0xcc] ss:$20 sps:$4 sm:$0xff]   ;;  %v2268_v56 = vld [vmem:[%s2836_s1 + $0x118] sm:$0xff]   ;;  %v2242_v59 = vld [vmem:[%s2395_s13 + $0x30] ss:$20 sps:$4 sm:$0xff]  }
  0x19   : > { %v2241_v58 = vld [vmem:[%s2395_s13 + $0xc8] ss:$20 sps:$4 sm:$0xff]   ;;  %v2247_v62 = vld [vmem:[%s2395_s13 + $0xf0] ss:$20 sps:$4 sm:$0xff]   ;;  %v2248_v63 = vld [vmem:[%s2395_s13 + $0x58] ss:$20 sps:$4 sm:$0xff]  }
  0x1a   : > { %v2243_v60 = vld [vmem:[%s2395_s13 + $0xf4] ss:$20 sps:$4 sm:$0xff]   ;;  %v2245_v61 = vld [vmem:[%s2395_s13 + $0x5c] ss:$20 sps:$4 sm:$0xff]   ;;  %v2252_v1 = vld [vmem:[%s2395_s13 + $0x84] ss:$20 sps:$4 sm:$0xff]  }
  0x1b   : > { %1875 = vmatpush3.bf16.msra.mxu0 %v2184_v13  ;;  %2161 = vmatpush3.bf16.msra.mxu1 %v2184_v13  ;;  %v2250_v0 = vld [vmem:[%s2395_s13 + $0x11c] ss:$20 sps:$4 sm:$0xff]   ;;  %v2254_v2 = vld [vmem:[%s2395_s13 + $0x118] ss:$20 sps:$4 sm:$0xff]   ;;  %v2255_v3 = vld [vmem:[%s2395_s13 + $0x80] ss:$20 sps:$4 sm:$0xff]  }
  0x1c   : > { %1876 = vmatprep.subr.bf16.mxu0 %v2185_v14  ;;  %2154 = vmatprep.subr.bf16.mxu1 %v2185_v14  ;;  %v2256_v4 = vld [vmem:[%s2395_s13 + $0x144] ss:$20 sps:$4 sm:$0xff]   ;;  %v2258_v5 = vld [vmem:[%s2395_s13 + $0xac] ss:$20 sps:$4 sm:$0xff]   ;;  %v2261_v7 = vld [vmem:[%s2395_s13 + $0xa8] ss:$20 sps:$4 sm:$0xff]  }
  0x1d   : > { %v2260_v6 = vld [vmem:[%s2395_s13 + $0x140] ss:$20 sps:$4 sm:$0xff]   ;;  %v2266_v10 = vld [vmem:[%s2395_s13 + $0x168] ss:$20 sps:$4 sm:$0xff]   ;;  %v2267_v11 = vld [vmem:[%s2395_s13 + $0xd0] ss:$20 sps:$4 sm:$0xff]  }
  0x1e   : > { %v2262_v8 = vld [vmem:[%s2395_s13 + $0x16c] ss:$20 sps:$4 sm:$0xff]   ;;  %v2264_v9 = vld [vmem:[%s2395_s13 + $0xd4] ss:$20 sps:$4 sm:$0xff]   ;;  %v2271_v13 = vld [vmem:[%s2395_s13 + $0xfc] ss:$20 sps:$4 sm:$0xff]  }
  0x1f   : > { %1877 = vmatpush3.bf16.msra.mxu0 %v2186_v15  ;;  %2162 = vmatpush3.bf16.msra.mxu1 %v2186_v15  ;;  %v2269_v12 = vld [vmem:[%s2395_s13 + $0x194] ss:$20 sps:$4 sm:$0xff]   ;;  %v2273_v14 = vld [vmem:[%s2395_s13 + $0x190] ss:$20 sps:$4 sm:$0xff]   ;;  %v2274_v15 = vld [vmem:[%s2395_s13 + $0xf8] ss:$20 sps:$4 sm:$0xff]  }
  0x20   : > { %1878 = vmatprep.subr.bf16.mxu0 %v2187_v16  ;;  %2155 = vmatprep.subr.bf16.mxu1 %v2187_v16  ;;  %v2275_v16 = vld [vmem:[%s2395_s13 + $0x1bc] ss:$20 sps:$4 sm:$0xff]  }
  0x23   : > { %1879 = vmatpush3.bf16.msra.mxu0 %v2188_v17  ;;  %2163 = vmatpush3.bf16.msra.mxu1 %v2188_v17  ;;  %v2277_v17 = vld [vmem:[%s2395_s13 + $0x124] ss:$20 sps:$4 sm:$0xff]  }
  0x24   : > { %1976 = vmatprep.subr.bf16.mxu1 %v2195_v18  ;;  %2108 = vmatprep.subr.bf16.mxu0 %v2198_v19  ;;  %v2279_v18 = vld [vmem:[%s2395_s13 + $0x1b8] ss:$20 sps:$4 sm:$0xff]  }
  0x26   : > { %1071 = vmatmul.mubr.bf16.vlgmr.msra.gmra.mrb[0].mxu0 %v2189_v20  ;;  %1167 = vmatmul.mubr.bf16.vlgmr.msra.gmra.mrb[0].mxu1 %v2192_v21  ;;  %v2281_v20 = vld [vmem:[%s2395_s13 + $0x14c] ss:$20 sps:$4 sm:$0xff]   ;;  %v2283_v21 = vld [vmem:[%s2395_s13 + $0x10] ss:$20 sps:$4 sm:$0xff]  }
  0x27   : > { %1977 = vmatpush3.bf16.msra.mxu1 %v2196_v22  ;;  %2109 = vmatpush3.bf16.msra.mxu0 %v2198_v19  ;;  %v2280_v19 = vld [vmem:[%s2395_s13 + $0x120] ss:$20 sps:$4 sm:$0xff]   ;;  %v2284_v22 = vld [vmem:[%s2395_s13 + $0x148] ss:$20 sps:$4 sm:$0xff]  }
  0x28   : > { %1978 = vmatprep.subr.bf16.mxu1 %v2197_v23  ;;  %1078 = vmatprep.mubr.bf16.mxu0 %v2200_v24  ;;  %v2285_v23 = vld [vmem:[%s2395_s13 + $0x38] ss:$20 sps:$4 sm:$0xff]   ;;  %v2286_v24 = vld [vmem:[%s2395_s13 + $0x174] ss:$20 sps:$4 sm:$0xff]  }
  0x29   : > { %1174 = vmatprep.mubr.bf16.mxu1 %v2202_v25  ;;  %2110 = vmatprep.subr.bf16.mxu0 %v2229_v35  ;;  %v2288_v25 = vld [vmem:[%s2395_s13 + $0x60] ss:$20 sps:$4 sm:$0xff]  }
  0x2b   : > { %1979 = vmatpush3.bf16.msra.mxu1 %v2199_v26  ;;  %2111 = vmatpush3.bf16.msra.mxu0 %v2229_v35  ;;  %v2289_v26 = vld [vmem:[%s2395_s13 + $0x170] ss:$20 sps:$4 sm:$0xff]   ;;  %v2300_v35 = vld [vmem:[%s2395_s13 + $0x128] ss:$20 sps:$4 sm:$0xff]  }
  0x2c   : > { %1980 = vmatprep.subr.bf16.mxu1 %v2206_v28  ;;  %2112 = vmatprep.subr.bf16.mxu0 %v2249_v47  ;;  %v2291_v28 = vld [vmem:[%s2395_s13 + $0x19c] ss:$20 sps:$4 sm:$0xff]  }
  0x2e   : > { %1079 = vmatmul.mubr.bf16.gmra.mrb[4].mxu0 %v2204_v27  ;;  %1175 = vmatmul.mubr.bf16.gmra.mrb[4].mxu1 %v2205_v29  ;;  %v2290_v27 = vld [vmem:[%s2395_s13 + $0x88] ss:$20 sps:$4 sm:$0xff]   ;;  %v2293_v29 = vld [vmem:[%s2395_s13 + $0xb0] ss:$20 sps:$4 sm:$0xff]  }
  0x2f   : > { %1981 = vmatpush3.bf16.msra.mxu1 %v2207_v30  ;;  %1086 = vmatprep.mubr.bf16.mxu0 %v2210_v32  ;;  %v2294_v30 = vld [vmem:[%s2395_s13 + $0x198] ss:$20 sps:$4 sm:$0xff]  }
  0x30   : > { %1982 = vmatprep.subr.bf16.mxu1 %v2208_v31  ;;  %1182 = vmatprep.mubr.bf16.mxu1 %v2212_v33  ;;  %v2295_v31 = vld [vmem:[%s2395_s13 + $0xd8] ss:$20 sps:$4 sm:$0xff]   ;;  %v2298_v33 = vld [vmem:[%s2395_s13 + $0x100] ss:$20 sps:$4 sm:$0xff]  }
  0x31   : > { %2113 = vmatpush3.bf16.msra.mxu0 %v2249_v47  ;;  %v2296_v32 = vld [vmem:[%s2395_s13 + $0x1c4] ss:$20 sps:$4 sm:$0xff]  }
  0x32   : > { %2114 = vmatprep.subr.bf16.mxu0 %v2268_v56  ;;  %v2315_v47 = vld [vmem:[%s2395_s13 + $0x218] ss:$20 sps:$4 sm:$0xff]  }
  0x33   : > { %1983 = vmatpush3.bf16.msra.mxu1 %v2209_v34  ;;  %v2299_v34 = vld [vmem:[%s2395_s13 + $0x1c0] ss:$20 sps:$4 sm:$0xff]  }
  0x34   : > { %1984 = vmatprep.subr.bf16.mxu1 %v2216_v37  ;;  %v2303_v37 = vld [vmem:[%s2395_s13 + $0x150] ss:$20 sps:$4 sm:$0xff]  }
  0x35   : > { %2115 = vmatpush3.bf16.msra.mxu0 %v2268_v56 }
  0x36   : > { %1087 = vmatmul.mubr.bf16.gmra.mrb[8].mxu0 %v2214_v36  ;;  %1183 = vmatmul.mubr.bf16.gmra.mrb[8].mxu1 %v2215_v38  ;;  %v2301_v36 = vld [vmem:[%s2395_s13 + $0x1ec] ss:$20 sps:$4 sm:$0xff]   ;;  %v2304_v38 = vld [vmem:[%s2395_s13 + $0x1e8] ss:$20 sps:$4 sm:$0xff]  }
  0x37   : > { %1985 = vmatpush3.bf16.msra.mxu1 %v2217_v39  ;;  %1094 = vmatprep.mubr.bf16.mxu0 %v2220_v41  ;;  %v2305_v39 = vld [vmem:[%s2395_s13 + $0x178] ss:$20 sps:$4 sm:$0xff]   ;;  %v2308_v41 = vld [vmem:[%s2395_s13 + $0x1a0] ss:$20 sps:$4 sm:$0xff]  }
  0x38   : > { %1986 = vmatprep.subr.bf16.mxu1 %v2218_v40  ;;  %1190 = vmatprep.mubr.bf16.mxu1 %v2222_v42  ;;  %v2306_v40 = vld [vmem:[%s2395_s13 + $0x214] ss:$20 sps:$4 sm:$0xff]   ;;  %v2309_v42 = vld [vmem:[%s2395_s13 + $0x210] ss:$20 sps:$4 sm:$0xff]  }
  0x3b   : > { %1987 = vmatpush3.bf16.msra.mxu1 %v2219_v43  ;;  %v2310_v43 = vld [vmem:[%s2395_s13 + $0x1c8] ss:$20 sps:$4 sm:$0xff]  }
  0x3c   : > { %1988 = vmatprep.subr.bf16.mxu1 %v2226_v46  ;;  %v2314_v46 = vld [vmem:[%s2395_s13 + $0x238] ss:$20 sps:$4 sm:$0xff]  }
  0x3e   : > { %1095 = vmatmul.mubr.bf16.gmra.mrb[12].mxu0 %v2224_v44  ;;  %1191 = vmatmul.mubr.bf16.gmra.mrb[12].mxu1 %v2225_v45  ;;  %v2311_v44 = vld [vmem:[%s2395_s13 + $0x23c] ss:$20 sps:$4 sm:$0xff]  }
  0x3f   : > { %1989 = vmatpush3.bf16.msra.mxu1 %v2227_v48  ;;  %1102 = vmatprep.mubr.bf16.mxu0 %v2231_v50  ;;  %v2313_v45 = vld [vmem:[%s2395_s13 + $0x1f0] ss:$20 sps:$4 sm:$0xff]   ;;  %v2319_v50 = vld [vmem:[%s2395_s13 + $0x260] ss:$20 sps:$4 sm:$0xff]  }
  0x40   : > { %1990 = vmatprep.subr.bf16.mxu1 %v2228_v49  ;;  %1231 = vmatprep.mubr.bf16.mxu1 %v2235_v51  ;;  %v2316_v48 = vld [vmem:[%s2395_s13 + $0x264] ss:$20 sps:$4 sm:$0xff]   ;;  %v2318_v49 = vld [vmem:[%s2395_s13 + $0x240] ss:$20 sps:$4 sm:$0xff]   ;;  %v2320_v51 = vld [vmem:[%s2395_s13 + $0x268] ss:$20 sps:$4 sm:$0xff]  }
  0x43   : > { %1991 = vmatpush3.bf16.msra.mxu1 %v2230_v52 }
  0x46   : > { %1103 = vmatmul.mubr.bf16.gmra.mrb[16].mxu0 %v2236_v54  ;;  %1232 = vmatmul.mubr.bf16.vlgmr.msra.gmra.mrb[16].mxu1 %v2233_v53 }
  0x47   : > { %1110 = vmatprep.mubr.bf16.mxu0 %v2237_v55  ;;  %1239 = vmatprep.mubr.bf16.mxu1 %v2239_v57 }
  0x4e   : > { %1111 = vmatmul.mubr.bf16.gmra.mrb[20].mxu0 %v2241_v58  ;;  %1240 = vmatmul.mubr.bf16.gmra.mrb[20].mxu1 %v2242_v59 }
  0x4f   : > { %1118 = vmatprep.mubr.bf16.mxu0 %v2243_v60  ;;  %1247 = vmatprep.mubr.bf16.mxu1 %v2245_v61 }
  0x56   : > { %1119 = vmatmul.mubr.bf16.gmra.mrb[24].mxu0 %v2247_v62  ;;  %1248 = vmatmul.mubr.bf16.gmra.mrb[24].mxu1 %v2248_v63 }
  0x57   : > { %1126 = vmatprep.mubr.bf16.mxu0 %v2250_v0  ;;  %1255 = vmatprep.mubr.bf16.mxu1 %v2252_v1 }
  0x5e   : > { %1127 = vmatmul.mubr.bf16.gmra.mrb[28].mxu0 %v2254_v2  ;;  %1256 = vmatmul.mubr.bf16.gmra.mrb[28].mxu1 %v2255_v3 }
  0x5f   : > { %1134 = vmatprep.mubr.bf16.mxu0 %v2256_v4  ;;  %1263 = vmatprep.mubr.bf16.mxu1 %v2258_v5 }
  0x66   : > { %1135 = vmatmul.mubr.bf16.gmra.mrb[32].mxu0 %v2260_v6  ;;  %1264 = vmatmul.mubr.bf16.gmra.mrb[32].mxu1 %v2261_v7 }
  0x67   : > { %1142 = vmatprep.mubr.bf16.mxu0 %v2262_v8  ;;  %1271 = vmatprep.mubr.bf16.mxu1 %v2264_v9 }
  0x6e   : > { %1143 = vmatmul.mubr.bf16.gmra.mrb[36].mxu0 %v2266_v10  ;;  %1272 = vmatmul.mubr.bf16.gmra.mrb[36].mxu1 %v2267_v11 }
  0x6f   : > { %1150 = vmatprep.mubr.bf16.mxu0 %v2269_v12  ;;  %1279 = vmatprep.mubr.bf16.mxu1 %v2271_v13 }
  0x76   : > { %1151 = vmatmul.mubr.bf16.gmra.mrb[40].mxu0 %v2273_v14  ;;  %1280 = vmatmul.mubr.bf16.gmra.mrb[40].mxu1 %v2274_v15 }
  0x77   : > { %1158 = vmatprep.mubr.bf16.mxu0 %v2275_v16  ;;  %1287 = vmatprep.mubr.bf16.mxu1 %v2277_v17 }
  0x7e   : > { %1159 = vmatmul.mubr.bf16.gmra.mrb[44].mxu0 %v2279_v18  ;;  %1288 = vmatmul.mubr.bf16.gmra.mrb[44].mxu1 %v2280_v19 }
  0x7f   : > { %1295 = vmatprep.mubr.bf16.mxu1 %v2281_v20  ;;  %2116 = vmatprep.mubr.msk.bf16.mxu0 %vm989_vm0, %v2283_v21 }
  0x86   : > { %1296 = vmatmul.mubr.bf16.gmra.mrb[48].mxu1 %v2284_v22  ;;  %2117 = vmatmul.mubr.msk.bf16.vlgmr.msra.gmra.mrb[48].mxu0 %vm989_vm0, %v2285_v23 }
  0x87   : > { %1303 = vmatprep.mubr.bf16.mxu1 %v2286_v24  ;;  %2120 = vmatprep.mubr.msk.bf16.mxu0 %vm989_vm0, %v2288_v25 }
  0x8e   : > { %1304 = vmatmul.mubr.bf16.gmra.mrb[52].mxu1 %v2289_v26  ;;  %2121 = vmatmul.mubr.msk.bf16.gmra.mrb[52].mxu0 %vm989_vm0, %v2290_v27 }
  0x8f   : > { %1311 = vmatprep.mubr.bf16.mxu1 %v2291_v28  ;;  %2124 = vmatprep.mubr.msk.bf16.mxu0 %vm989_vm0, %v2293_v29 }
  0x96   : > { %1312 = vmatmul.mubr.bf16.gmra.mrb[56].mxu1 %v2294_v30  ;;  %2125 = vmatmul.mubr.msk.bf16.gmra.mrb[56].mxu0 %vm989_vm0, %v2295_v31 }
  0x97   : > { %1319 = vmatprep.mubr.bf16.mxu1 %v2296_v32  ;;  %2128 = vmatprep.mubr.msk.bf16.mxu0 %vm989_vm0, %v2298_v33 }
  0x9e   : > { %1320 = vmatmul.mubr.bf16.gmra.mrb[60].mxu1 %v2299_v34  ;;  %2129 = vmatmul.mubr.msk.bf16.gmra.mrb[60].mxu0 %vm989_vm0, %v2300_v35 }
  0x9f   : > { %1327 = vmatprep.mubr.bf16.mxu1 %v2301_v36  ;;  %2132 = vmatprep.mubr.msk.bf16.mxu0 %vm989_vm0, %v2303_v37 }
  0xa6   : > { %1328 = vmatmul.mubr.bf16.gmra.mrb[64].mxu1 %v2304_v38  ;;  %2133 = vmatmul.mubr.msk.bf16.gmra.mrb[64].mxu0 %vm989_vm0, %v2305_v39 }
  0xa7   : > { %1335 = vmatprep.mubr.bf16.mxu1 %v2306_v40  ;;  %2136 = vmatprep.mubr.msk.bf16.mxu0 %vm989_vm0, %v2308_v41 }
  0xae   : > { %1336 = vmatmul.mubr.bf16.gmra.mrb[68].mxu1 %v2309_v42  ;;  %2137 = vmatmul.mubr.msk.bf16.gmra.mrb[68].mxu0 %vm989_vm0, %v2310_v43 }
  0xaf   : > { %1343 = vmatprep.mubr.bf16.mxu1 %v2311_v44  ;;  %2140 = vmatprep.mubr.msk.bf16.mxu0 %vm989_vm0, %v2313_v45 }
  0xb6   : > { %1344 = vmatmul.mubr.bf16.gmra.mrb[72].mxu1 %v2314_v46  ;;  %2141 = vmatmul.mubr.msk.bf16.gmra.mrb[72].mxu0 %vm989_vm0, %v2315_v47 }
  0xb7   : > { %1351 = vmatprep.mubr.bf16.mxu1 %v2316_v48  ;;  %2144 = vmatprep.mubr.msk.bf16.mxu0 %vm989_vm0, %v2318_v49 }
  0xbe   : > { %1352 = vmatmul.mubr.bf16.gmra.mrb[76].mxu1 %v2319_v50  ;;  %2145 = vmatmul.mubr.msk.bf16.gmra.mrb[76].mxu0 %vm989_vm0, %v2320_v51 }
  0xf9   : > { %v1952_v52 = vpop.f32.mrb[0].mxu1  ;;  %v1880_v53 = vpop.f32.mrb[0].mxu0 }
  0xfa   : > { %v1953_v54 = vpop.f32.mrb[1].mxu1  ;;  %v1881_v55 = vpop.f32.mrb[1].mxu0 }
  0xfb   : > { %v2574_v56 = vadd.f32 %v1953_v54, %v1952_v52  ;;  %v1955_v57 = vpop.f32.mrb[2].mxu1  ;;  %v1882_v58 = vadd.f32 %v1881_v55, %v1880_v53  ;;  %v1883_v59 = vpop.f32.mrb[2].mxu0 }
  0xfc   : > { %v1956_v60 = vpop.f32.mrb[3].mxu1  ;;  %v1884_v61 = vpop.f32.mrb[3].mxu0 }
  0xfd   : > { %v2576_v62 = vadd.f32 %v1956_v60, %v1955_v57  ;;  %v1885_v63 = vadd.f32 %v1884_v61, %v1883_v59 }
 0x101   : > { %v1958_v0 = vpop.f32.mrb[4].mxu1  ;;  %v1886_v1 = vpop.f32.mrb[4].mxu0 }
 0x102   : > { %v1959_v2 = vpop.f32.mrb[5].mxu1  ;;  %v1887_v3 = vpop.f32.mrb[5].mxu0 }
 0x103   : > { %v2578_v4 = vadd.f32 %v1959_v2, %v1958_v0  ;;  %v1961_v5 = vpop.f32.mrb[6].mxu1  ;;  %v1888_v6 = vadd.f32 %v1887_v3, %v1886_v1  ;;  %v1889_v7 = vpop.f32.mrb[6].mxu0 }
 0x104   : > { %v1962_v8 = vpop.f32.mrb[7].mxu1  ;;  %v1890_v9 = vpop.f32.mrb[7].mxu0 }
 0x105   : > { %v2580_v10 = vadd.f32 %v1962_v8, %v1961_v5  ;;  %v1891_v11 = vadd.f32 %v1890_v9, %v1889_v7 }
 0x109   : > { %v1964_v12 = vpop.f32.mrb[8].mxu1  ;;  %v1892_v13 = vpop.f32.mrb[8].mxu0 }
 0x10a   : > { %v1965_v14 = vpop.f32.mrb[9].mxu1  ;;  %v1893_v15 = vpop.f32.mrb[9].mxu0 }
 0x10b   : > { %v2582_v16 = vadd.f32 %v1965_v14, %v1964_v12  ;;  %v1967_v17 = vpop.f32.mrb[10].mxu1  ;;  %v1894_v18 = vadd.f32 %v1893_v15, %v1892_v13  ;;  %v1895_v19 = vpop.f32.mrb[10].mxu0 }
 0x10c   : > { %v1968_v20 = vpop.f32.mrb[11].mxu1  ;;  %v1896_v21 = vpop.f32.mrb[11].mxu0 }
 0x10d   : > { %v2584_v22 = vadd.f32 %v1968_v20, %v1967_v17  ;;  %v1897_v23 = vadd.f32 %v1896_v21, %v1895_v19 }
 0x111   : > { %v1970_v24 = vpop.f32.mrb[12].mxu1  ;;  %v1898_v25 = vpop.f32.mrb[12].mxu0 }
 0x112   : > { %v1971_v26 = vpop.f32.mrb[13].mxu1  ;;  %v1899_v27 = vpop.f32.mrb[13].mxu0 }
 0x113   : > { %v2586_v28 = vadd.f32 %v1971_v26, %v1970_v24  ;;  %v1973_v29 = vpop.f32.mrb[14].mxu1  ;;  %v1900_v30 = vadd.f32 %v1899_v27, %v1898_v25  ;;  %v1901_v31 = vpop.f32.mrb[14].mxu0 }
 0x114   : > { %v1974_v32 = vpop.f32.mrb[15].mxu1  ;;  %v1902_v33 = vpop.f32.mrb[15].mxu0 }
 0x115   : > { %v2588_v34 = vadd.f32 %v1974_v32, %v1973_v29  ;;  %v1903_v35 = vadd.f32 %v1902_v33, %v1901_v31 }
 0x119   : > { %v1992_v36 = vpop.f32.mrb[16].mxu1  ;;  %v1904_v37 = vpop.f32.mrb[16].mxu0 }
 0x11a   : > { %v1993_v38 = vpop.f32.mrb[17].mxu1  ;;  %v1905_v39 = vpop.f32.mrb[17].mxu0 }
 0x11b   : > { %v1994_v40 = vadd.f32 %v1993_v38, %v1992_v36  ;;  %v1995_v41 = vpop.f32.mrb[18].mxu1  ;;  %v1906_v42 = vadd.f32 %v1905_v39, %v1904_v37  ;;  %v1907_v43 = vpop.f32.mrb[18].mxu0 }
 0x11c   : > { %v1996_v44 = vpop.f32.mrb[19].mxu1  ;;  %v1908_v45 = vpop.f32.mrb[19].mxu0 }
 0x11d   : > { %v1997_v46 = vadd.f32 %v1996_v44, %v1995_v41  ;;  %v1909_v47 = vadd.f32 %v1908_v45, %v1907_v43  ;;  %v2590_v48 = vadd.f32 %v1994_v40, %v1882_v58 }
 0x11f   : > { %v2592_v49 = vadd.f32 %v1997_v46, %v1885_v63 }
 0x121   : > { %v1998_v50 = vpop.f32.mrb[20].mxu1  ;;  %v1910_v51 = vpop.f32.mrb[20].mxu0 }
 0x122   : > { %v1999_v52 = vpop.f32.mrb[21].mxu1  ;;  %v1911_v53 = vpop.f32.mrb[21].mxu0 }
 0x123   : > { %v2000_v54 = vadd.f32 %v1999_v52, %v1998_v50  ;;  %v2001_v55 = vpop.f32.mrb[22].mxu1  ;;  %v1912_v57 = vadd.f32 %v1911_v53, %v1910_v51  ;;  %v1913_v59 = vpop.f32.mrb[22].mxu0 }
 0x124   : > { %v2002_v60 = vpop.f32.mrb[23].mxu1  ;;  %v1914_v61 = vpop.f32.mrb[23].mxu0 }
 0x125   : > { %v2003_v0 = vadd.f32 %v2002_v60, %v2001_v55  ;;  %v1915_v1 = vadd.f32 %v1914_v61, %v1913_v59  ;;  %v2594_v2 = vadd.f32 %v2000_v54, %v1888_v6 }
 0x127   : > { %v2596_v3 = vadd.f32 %v2003_v0, %v1891_v11 }
 0x129   : > { %v2004_v58 = vpop.f32.mrb[24].mxu1  ;;  %v1916_v5 = vpop.f32.mrb[24].mxu0 }
 0x12a   : > { %v2005_v63 = vpop.f32.mrb[25].mxu1  ;;  %v1917_v7 = vpop.f32.mrb[25].mxu0 }
 0x12b   : > { %v2006_v8 = vadd.f32 %v2005_v63, %v2004_v58  ;;  %v2007_v9 = vpop.f32.mrb[26].mxu1  ;;  %v1918_v12 = vadd.f32 %v1917_v7, %v1916_v5  ;;  %v1919_v13 = vpop.f32.mrb[26].mxu0 }
 0x12c   : > { %v2008_v14 = vpop.f32.mrb[27].mxu1  ;;  %v1920_v15 = vpop.f32.mrb[27].mxu0 }
 0x12d   : > { %v2009_v17 = vadd.f32 %v2008_v14, %v2007_v9  ;;  %v1921_v19 = vadd.f32 %v1920_v15, %v1919_v13  ;;  %v2598_v20 = vadd.f32 %v2006_v8, %v1894_v18 }
 0x12f   : > { %v2600_v21 = vadd.f32 %v2009_v17, %v1897_v23 }
 0x131   : > { %v2010_v6 = vpop.f32.mrb[28].mxu1  ;;  %v1922_v24 = vpop.f32.mrb[28].mxu0 }
 0x132   : > { %v2011_v11 = vpop.f32.mrb[29].mxu1  ;;  %v1923_v25 = vpop.f32.mrb[29].mxu0 }
 0x133   : > { %v2012_v26 = vadd.f32 %v2011_v11, %v2010_v6  ;;  %v2013_v27 = vpop.f32.mrb[30].mxu1  ;;  %v1924_v29 = vadd.f32 %v1923_v25, %v1922_v24  ;;  %v1925_v31 = vpop.f32.mrb[30].mxu0 }
 0x134   : > { %v2014_v32 = vpop.f32.mrb[31].mxu1  ;;  %v1926_v33 = vpop.f32.mrb[31].mxu0 }
 0x135   : > { %v2015_v36 = vadd.f32 %v2014_v32, %v2013_v27  ;;  %v1927_v37 = vadd.f32 %v1926_v33, %v1925_v31  ;;  %v2602_v38 = vadd.f32 %v2012_v26, %v1900_v30 }
 0x137   : > { %v2604_v39 = vadd.f32 %v2015_v36, %v1903_v35 }
 0x139   : > { %v2016_v18 = vpop.f32.mrb[32].mxu1  ;;  %v1928_v40 = vpop.f32.mrb[32].mxu0 }
 0x13a   : > { %v2017_v23 = vpop.f32.mrb[33].mxu1  ;;  %v1929_v41 = vpop.f32.mrb[33].mxu0 }
 0x13b   : > { %v2018_v43 = vadd.f32 %v2017_v23, %v2016_v18  ;;  %v2019_v44 = vpop.f32.mrb[34].mxu1  ;;  %v2606_v45 = vadd.f32 %v1929_v41, %v1928_v40  ;;  %v1931_v46 = vpop.f32.mrb[34].mxu0 }
 0x13c   : > { %v2020_v50 = vpop.f32.mrb[35].mxu1  ;;  %v1932_v51 = vpop.f32.mrb[35].mxu0 }
 0x13d   : > { %v2021_v52 = vadd.f32 %v2020_v50, %v2019_v44  ;;  %v2608_v53 = vadd.f32 %v1932_v51, %v1931_v46  ;;  %v2610_v54 = vadd.f32 %v2018_v43, %v1906_v42 }
 0x13f   : > { %v2612_v30 = vadd.f32 %v2021_v52, %v1909_v47 }
 0x141   : > { %v2022_v35 = vpop.f32.mrb[36].mxu1  ;;  %v1934_v55 = vpop.f32.mrb[36].mxu0 }
 0x142   : > { %v2023_v59 = vpop.f32.mrb[37].mxu1  ;;  %v1935_v60 = vpop.f32.mrb[37].mxu0 }
 0x143   : > { %v2024_v61 = vadd.f32 %v2023_v59, %v2022_v35  ;;  %v2025_v0 = vpop.f32.mrb[38].mxu1  ;;  %v2614_v58 = vadd.f32 %v1935_v60, %v1934_v55  ;;  %v1937_v5 = vpop.f32.mrb[38].mxu0  ;;  %v2641_v59 = vld [vmem:[%s2837_s2] ss:$0 sm:$0xff] }
 0x144   : > { %v2026_v63 = vpop.f32.mrb[39].mxu1  ;;  %v1938_v7 = vpop.f32.mrb[39].mxu0 }
 0x145   : > { %v2027_v8 = vadd.f32 %v2026_v63, %v2025_v0  ;;  %v2616_v9 = vadd.f32 %v1938_v7, %v1937_v5  ;;  %v2618_v13 = vadd.f32 %v2024_v61, %v1912_v57  ;;  %v2647_v5 = vld [vmem:[%s2838_s3] ss:$0 sm:$0xff] }
 0x147   : > { %v2620_v42 = vadd.f32 %v2027_v8, %v1915_v1 }
 0x149   : > { %v2028_v47 = vpop.f32.mrb[40].mxu1  ;;  %v1940_v14 = vpop.f32.mrb[40].mxu0 }
 0x14a   : > { %v2029_v15 = vpop.f32.mrb[41].mxu1  ;;  %v1941_v17 = vpop.f32.mrb[41].mxu0 }
 0x14b   : > { %v2030_v6 = vadd.f32 %v2029_v15, %v2028_v47  ;;  %v2031_v24 = vpop.f32.mrb[42].mxu1  ;;  %v2622_v11 = vadd.f32 %v1941_v17, %v1940_v14  ;;  %v1943_v25 = vpop.f32.mrb[42].mxu0 }
 0x14c   : > { %v2032_v26 = vpop.f32.mrb[43].mxu1  ;;  %v1944_v27 = vpop.f32.mrb[43].mxu0 }
 0x14d   : > { %v2033_v31 = vadd.f32 %v2032_v26, %v2031_v24  ;;  %v2624_v32 = vadd.f32 %v1944_v27, %v1943_v25  ;;  %v2626_v33 = vadd.f32 %v2030_v6, %v1918_v12 }
 0x14f   : > { %v2628_v57 = vadd.f32 %v2033_v31, %v1921_v19 }
 0x151   : > { %v2034_v1 = vpop.f32.mrb[44].mxu1  ;;  %v1946_v36 = vpop.f32.mrb[44].mxu0 }
 0x152   : > { %v2035_v18 = vpop.f32.mrb[45].mxu1  ;;  %v1947_v40 = vpop.f32.mrb[45].mxu0 }
 0x153   : > { %v2036_v23 = vadd.f32 %v2035_v18, %v2034_v1  ;;  %v2037_v41 = vpop.f32.mrb[46].mxu1  ;;  %v2630_v43 = vadd.f32 %v1947_v40, %v1946_v36  ;;  %v1949_v44 = vpop.f32.mrb[46].mxu0 }
 0x154   : > { %v2038_v46 = vpop.f32.mrb[47].mxu1  ;;  %v1950_v50 = vpop.f32.mrb[47].mxu0 }
 0x155   : > { %v2039_v51 = vadd.f32 %v2038_v46, %v2037_v41  ;;  %v2632_v52 = vadd.f32 %v1950_v50, %v1949_v44  ;;  %v2634_v35 = vadd.f32 %v2036_v23, %v1924_v29 }
 0x157   : > { %v2636_v12 = vadd.f32 %v2039_v51, %v1927_v37 }
 0x159   : > { %v2040_v19 = vpop.f32.mrb[48].mxu1  ;;  %v2118_v55 = vpop.f32.mrb[48].mxu0 }
 0x15a   : > { %v1403_v60 = vadd.f32 %v2118_v55, %v2594_v2  ;;  %v2041_v61 = vpop.f32.mrb[49].mxu1  ;;  %v1394_v0 = vpop.f32.mrb[49].mxu0 }
 0x15b   : > { %v2042_v29 = vadd.f32 %v2041_v61, %v2040_v19  ;;  %v1395_v37 = vadd.f32 %v1394_v0, %v2590_v48  ;;  %v2043_v63 = vpop.f32.mrb[50].mxu1  ;;  %v2119_v7 = vpop.f32.mrb[50].mxu0 }
 0x15c   : > { %v1530_v8 = vmul.f32 %v2641_v59, %v1403_v60  ;;  %v1406_v47 = vadd.f32 %v2119_v7, %v2596_v3  ;;  %v2044_v14 = vpop.f32.mrb[51].mxu1  ;;  %v1397_v15 = vpop.f32.mrb[51].mxu0 }
 0x15d   : > { %v1528_v2 = vmul.f32 %v2641_v59, %v1395_v37  ;;  %v2045_v17 = vadd.f32 %v2044_v14, %v2043_v63  ;;  %v1398_v6 = vadd.f32 %v1397_v15, %v2592_v49  ;;  %v2656_v24 = vadd.f32 %v2042_v29, %v2606_v45 }
 0x15e   : > { %v1569_v25 = vadd.f32 %v2647_v5, %v1530_v8  ;;  %v1531_v48 = vmul.f32 %v2641_v59, %v1406_v47 }
 0x15f   : > { %v1567_v3 = vadd.f32 %v2647_v5, %v1528_v2  ;;  %v1529_v26 = vmul.f32 %v2641_v59, %v1398_v6  ;;  %v2668_v49 = vadd.f32 %v2045_v17, %v2608_v53 }
 0x160   : > { %v1601_v45 = vmax.f32 %v1569_v25, 0.0  ;;  %v1570_v27 = vadd.f32 %v2647_v5, %v1531_v48 }
 0x161   : > { %v1599_v31 = vmax.f32 %v1567_v3, 0.0  ;;  %v1568_v1 = vadd.f32 %v2647_v5, %v1529_v26  ;;  %v2046_v36 = vpop.f32.mrb[52].mxu1  ;;  %v2122_v18 = vpop.f32.mrb[52].mxu0 }
 0x162   : > { %1633 = vst.msk [vmem:[%s2663_s29 + $0x10] sm:$0xff] %vm989_vm0, %v1601_v45  ;;  %v1602_v40 = vmax.f32 %v1570_v27, 0.0  ;;  %v1419_v23 = vadd.f32 %v2122_v18, %v2602_v38  ;;  %v2047_v41 = vpop.f32.mrb[53].mxu1  ;;  %v1410_v44 = vpop.f32.mrb[53].mxu0 }
 0x163   : > { %1631 = vst.msk [vmem:[%s2663_s29] sm:$0xff] %vm989_vm0, %v1599_v31  ;;  %v1600_v53 = vmax.f32 %v1568_v1, 0.0  ;;  %v2048_v46 = vadd.f32 %v2047_v41, %v2046_v36  ;;  %v1411_v50 = vadd.f32 %v1410_v44, %v2598_v20  ;;  %v2049_v51 = vpop.f32.mrb[54].mxu1  ;;  %v2123_v19 = vpop.f32.mrb[54].mxu0 }
 0x164   : > { %1634 = vst.msk [vmem:[%s2663_s29 + $0x18] sm:$0xff] %vm989_vm0, %v1602_v40  ;;  %v1534_v55 = vmul.f32 %v2641_v59, %v1419_v23  ;;  %v1422_v60 = vadd.f32 %v2123_v19, %v2604_v39  ;;  %v2050_v61 = vpop.f32.mrb[55].mxu1  ;;  %v1413_v0 = vpop.f32.mrb[55].mxu0 }
 0x165   : > { %1632 = vst.msk [vmem:[%s2663_s29 + $0x8] sm:$0xff] %vm989_vm0, %v1600_v53  ;;  %v1532_v38 = vmul.f32 %v2641_v59, %v1411_v50  ;;  %v2051_v29 = vadd.f32 %v2050_v61, %v2049_v51  ;;  %v1414_v37 = vadd.f32 %v1413_v0, %v2600_v21  ;;  %v2687_v20 = vadd.f32 %v2048_v46, %v2614_v58 }
 0x166   : > { %v1573_v63 = vadd.f32 %v2647_v5, %v1534_v55  ;;  %v1535_v7 = vmul.f32 %v2641_v59, %v1422_v60 }
 0x167   : > { %v1571_v39 = vadd.f32 %v2647_v5, %v1532_v38  ;;  %v1533_v8 = vmul.f32 %v2641_v59, %v1414_v37  ;;  %v2694_v47 = vadd.f32 %v2051_v29, %v2616_v9 }
 0x168   : > { %v1605_v14 = vmax.f32 %v1573_v63, 0.0  ;;  %v1574_v15 = vadd.f32 %v2647_v5, %v1535_v7 }
 0x169   : > { %v1603_v21 = vmax.f32 %v1571_v39, 0.0  ;;  %v1572_v58 = vadd.f32 %v2647_v5, %v1533_v8  ;;  %v2052_v2 = vpop.f32.mrb[56].mxu1  ;;  %v2126_v17 = vpop.f32.mrb[56].mxu0 }
 0x16a   : > { %1637 = vst.msk [vmem:[%s2663_s29 + $0x30] sm:$0xff] %vm989_vm0, %v1605_v14  ;;  %v1606_v6 = vmax.f32 %v1574_v15, 0.0  ;;  %v1435_v25 = vadd.f32 %v2126_v17, %v2618_v13  ;;  %v2053_v48 = vpop.f32.mrb[57].mxu1  ;;  %v1426_v3 = vpop.f32.mrb[57].mxu0 }
 0x16b   : > { %1635 = vst.msk [vmem:[%s2663_s29 + $0x20] sm:$0xff] %vm989_vm0, %v1603_v21  ;;  %v1604_v9 = vmax.f32 %v1572_v58, 0.0  ;;  %v2054_v26 = vadd.f32 %v2053_v48, %v2052_v2  ;;  %v1427_v45 = vadd.f32 %v1426_v3, %v2610_v54  ;;  %v2055_v27 = vpop.f32.mrb[58].mxu1  ;;  %v2127_v31 = vpop.f32.mrb[58].mxu0 }
 0x16c   : > { %1638 = vst.msk [vmem:[%s2663_s29 + $0x38] sm:$0xff] %vm989_vm0, %v1606_v6  ;;  %v1538_v1 = vmul.f32 %v2641_v59, %v1435_v25  ;;  %v1438_v36 = vadd.f32 %v2127_v31, %v2620_v42  ;;  %v2056_v18 = vpop.f32.mrb[59].mxu1  ;;  %v1429_v40 = vpop.f32.mrb[59].mxu0 }
 0x16d   : > { %1636 = vst.msk [vmem:[%s2663_s29 + $0x28] sm:$0xff] %vm989_vm0, %v1604_v9  ;;  %v1536_v13 = vmul.f32 %v2641_v59, %v1427_v45  ;;  %v2057_v23 = vadd.f32 %v2056_v18, %v2055_v27  ;;  %v1430_v41 = vadd.f32 %v1429_v40, %v2612_v30  ;;  %v2713_v54 = vadd.f32 %v2054_v26, %v2622_v11 }
 0x16e   : > { %v1577_v44 = vadd.f32 %v2647_v5, %v1538_v1  ;;  %v1539_v53 = vmul.f32 %v2641_v59, %v1438_v36 }
 0x16f   : > { %v1575_v42 = vadd.f32 %v2647_v5, %v1536_v13  ;;  %v1537_v46 = vmul.f32 %v2641_v59, %v1430_v41  ;;  %v2720_v50 = vadd.f32 %v2057_v23, %v2624_v32 }
 0x170   : > { %v1609_v51 = vmax.f32 %v1577_v44, 0.0  ;;  %v1578_v19 = vadd.f32 %v2647_v5, %v1539_v53 }
 0x171   : > { %v1607_v30 = vmax.f32 %v1575_v42, 0.0  ;;  %v1576_v11 = vadd.f32 %v2647_v5, %v1537_v46  ;;  %v2058_v55 = vpop.f32.mrb[60].mxu1  ;;  %v2130_v60 = vpop.f32.mrb[60].mxu0 }
 0x172   : > { %1641 = vst.msk [vmem:[%s2663_s29 + $0x50] sm:$0xff] %vm989_vm0, %v1609_v51  ;;  %v1610_v61 = vmax.f32 %v1578_v19, 0.0  ;;  %v1451_v0 = vadd.f32 %v2130_v60, %v2634_v35  ;;  %v2059_v38 = vpop.f32.mrb[61].mxu1  ;;  %v1442_v29 = vpop.f32.mrb[61].mxu0 }
 0x173   : > { %1639 = vst.msk [vmem:[%s2663_s29 + $0x40] sm:$0xff] %vm989_vm0, %v1607_v30  ;;  %v1608_v32 = vmax.f32 %v1576_v11, 0.0  ;;  %v2060_v37 = vadd.f32 %v2059_v38, %v2058_v55  ;;  %v1443_v63 = vadd.f32 %v1442_v29, %v2626_v33  ;;  %v2061_v7 = vpop.f32.mrb[62].mxu1  ;;  %v2131_v39 = vpop.f32.mrb[62].mxu0 }
 0x174   : > { %1642 = vst.msk [vmem:[%s2663_s29 + $0x58] sm:$0xff] %vm989_vm0, %v1610_v61  ;;  %v1542_v8 = vmul.f32 %v2641_v59, %v1451_v0  ;;  %v1454_v14 = vadd.f32 %v2131_v39, %v2636_v12  ;;  %v2062_v15 = vpop.f32.mrb[63].mxu1  ;;  %v1445_v21 = vpop.f32.mrb[63].mxu0 }
 0x175   : > { %1640 = vst.msk [vmem:[%s2663_s29 + $0x48] sm:$0xff] %vm989_vm0, %v1608_v32  ;;  %v1540_v35 = vmul.f32 %v2641_v59, %v1443_v63  ;;  %v2063_v58 = vadd.f32 %v2062_v15, %v2061_v7  ;;  %v1446_v2 = vadd.f32 %v1445_v21, %v2628_v57  ;;  %v1322_v33 = vadd.f32 %v2060_v37, %v2630_v43 }
 0x176   : > { %v1581_v17 = vadd.f32 %v2647_v5, %v1542_v8  ;;  %v1543_v6 = vmul.f32 %v2641_v59, %v1454_v14 }
 0x177   : > { %v1579_v25 = vadd.f32 %v2647_v5, %v1540_v35  ;;  %v1541_v12 = vmul.f32 %v2641_v59, %v1446_v2  ;;  %v1325_v48 = vadd.f32 %v2063_v58, %v2632_v52 }
 0x178   : > { %v1613_v3 = vmax.f32 %v1581_v17, 0.0  ;;  %v1582_v9 = vadd.f32 %v2647_v5, %v1543_v6 }
 0x179   : > { %v1611_v26 = vmax.f32 %v1579_v25, 0.0  ;;  %v1580_v57 = vadd.f32 %v2647_v5, %v1541_v12  ;;  %v2064_v45 = vpop.f32.mrb[64].mxu1  ;;  %v2134_v43 = vpop.f32.mrb[64].mxu0 }
 0x17a   : > { %1645 = vst.msk [vmem:[%s2663_s29 + $0x70] sm:$0xff] %vm989_vm0, %v1613_v3  ;;  %v1614_v27 = vmax.f32 %v1582_v9, 0.0  ;;  %v1467_v31 = vadd.f32 %v2134_v43, %v2687_v20  ;;  %v2065_v1 = vpop.f32.mrb[65].mxu1  ;;  %v1458_v36 = vpop.f32.mrb[65].mxu0 }
 0x17b   : > { %1643 = vst.msk [vmem:[%s2663_s29 + $0x60] sm:$0xff] %vm989_vm0, %v1611_v26  ;;  %v1612_v52 = vmax.f32 %v1580_v57, 0.0  ;;  %v2066_v18 = vadd.f32 %v2065_v1, %v2064_v45  ;;  %v1459_v40 = vadd.f32 %v1458_v36, %v2656_v24  ;;  %v2067_v13 = vpop.f32.mrb[66].mxu1  ;;  %v2135_v23 = vpop.f32.mrb[66].mxu0 }
 0x17c   : > { %1646 = vst.msk [vmem:[%s2663_s29 + $0x78] sm:$0xff] %vm989_vm0, %v1614_v27  ;;  %v1546_v41 = vmul.f32 %v2641_v59, %v1467_v31  ;;  %v1470_v44 = vadd.f32 %v2135_v23, %v2694_v47  ;;  %v2068_v53 = vpop.f32.mrb[67].mxu1  ;;  %v1461_v42 = vpop.f32.mrb[67].mxu0 }
 0x17d   : > { %1644 = vst.msk [vmem:[%s2663_s29 + $0x68] sm:$0xff] %vm989_vm0, %v1612_v52  ;;  %v1544_v20 = vmul.f32 %v2641_v59, %v1459_v40  ;;  %v2069_v46 = vadd.f32 %v2068_v53, %v2067_v13  ;;  %v1462_v51 = vadd.f32 %v1461_v42, %v2668_v49  ;;  %v1330_v24 = vadd.f32 %v2066_v18, %v2574_v56 }
 0x17e   : > { %v1585_v19 = vadd.f32 %v2647_v5, %v1546_v41  ;;  %v1547_v30 = vmul.f32 %v2641_v59, %v1470_v44 }
 0x17f   : > { %v1583_v11 = vadd.f32 %v2647_v5, %v1544_v20  ;;  %v1545_v47 = vmul.f32 %v2641_v59, %v1462_v51  ;;  %v1333_v55 = vadd.f32 %v2069_v46, %v2576_v62 }
 0x180   : > { %v1617_v60 = vmax.f32 %v1585_v19, 0.0  ;;  %v1586_v61 = vadd.f32 %v2647_v5, %v1547_v30 }
 0x181   : > { %v1615_v0 = vmax.f32 %v1583_v11, 0.0  ;;  %v1584_v49 = vadd.f32 %v2647_v5, %v1545_v47  ;;  %v2070_v38 = vpop.f32.mrb[68].mxu1  ;;  %v2138_v56 = vpop.f32.mrb[68].mxu0 }
 0x182   : > { %1649 = vst.msk [vmem:[%s2663_s29 + $0x90] sm:$0xff] %vm989_vm0, %v1617_v60  ;;  %v1618_v29 = vmax.f32 %v1586_v61, 0.0  ;;  %v1483_v32 = vadd.f32 %v2138_v56, %v1322_v33  ;;  %v2071_v37 = vpop.f32.mrb[69].mxu1  ;;  %v1474_v63 = vpop.f32.mrb[69].mxu0 }
 0x183   : > { %1647 = vst.msk [vmem:[%s2663_s29 + $0x80] sm:$0xff] %vm989_vm0, %v1615_v0  ;;  %v1616_v7 = vmax.f32 %v1584_v49, 0.0  ;;  %v2072_v62 = vadd.f32 %v2071_v37, %v2070_v38  ;;  %v1475_v39 = vadd.f32 %v1474_v63, %v2713_v54  ;;  %v2073_v8 = vpop.f32.mrb[70].mxu1  ;;  %v2139_v14 = vpop.f32.mrb[70].mxu0 }
 0x184   : > { %1650 = vst.msk [vmem:[%s2663_s29 + $0x98] sm:$0xff] %vm989_vm0, %v1618_v29  ;;  %v1550_v15 = vmul.f32 %v2641_v59, %v1483_v32  ;;  %v1486_v21 = vadd.f32 %v2139_v14, %v1325_v48  ;;  %v2074_v35 = vpop.f32.mrb[71].mxu1  ;;  %v1477_v58 = vpop.f32.mrb[71].mxu0 }
 0x185   : > { %1648 = vst.msk [vmem:[%s2663_s29 + $0x88] sm:$0xff] %vm989_vm0, %v1616_v7  ;;  %v1548_v2 = vmul.f32 %v2641_v59, %v1475_v39  ;;  %v2075_v33 = vadd.f32 %v2074_v35, %v2073_v8  ;;  %v1478_v17 = vadd.f32 %v1477_v58, %v2720_v50  ;;  %v1338_v6 = vadd.f32 %v2072_v62, %v2578_v4 }
 0x186   : > { %v1589_v54 = vadd.f32 %v2647_v5, %v1550_v15  ;;  %v1551_v25 = vmul.f32 %v2641_v59, %v1486_v21 }
 0x187   : > { %v1587_v12 = vadd.f32 %v2647_v5, %v1548_v2  ;;  %v1549_v48 = vmul.f32 %v2641_v59, %v1478_v17  ;;  %v1341_v3 = vadd.f32 %v2075_v33, %v2580_v10 }
 0x188   : > { %v1621_v9 = vmax.f32 %v1589_v54, 0.0  ;;  %v1590_v26 = vadd.f32 %v2647_v5, %v1551_v25 }
 0x189   : > { %v1619_v57 = vmax.f32 %v1587_v12, 0.0  ;;  %v1588_v50 = vadd.f32 %v2647_v5, %v1549_v48  ;;  %v2076_v45 = vpop.f32.mrb[72].mxu1  ;;  %v2142_v4 = vpop.f32.mrb[72].mxu0 }
 0x18a   : > { %1653 = vst.msk [vmem:[%s2663_s29 + $0xb0] sm:$0xff] %vm989_vm0, %v1621_v9  ;;  %v1622_v43 = vmax.f32 %v1590_v26, 0.0  ;;  %v1499_v27 = vadd.f32 %v2142_v4, %v1338_v6  ;;  %v2077_v31 = vpop.f32.mrb[73].mxu1  ;;  %v1490_v1 = vpop.f32.mrb[73].mxu0 }
 0x18b   : > { %1651 = vst.msk [vmem:[%s2663_s29 + $0xa0] sm:$0xff] %vm989_vm0, %v1619_v57  ;;  %v1620_v36 = vmax.f32 %v1588_v50, 0.0  ;;  %v2078_v10 = vadd.f32 %v2077_v31, %v2076_v45  ;;  %v1491_v52 = vadd.f32 %v1490_v1, %v1330_v24  ;;  %v2079_v18 = vpop.f32.mrb[74].mxu1  ;;  %v2143_v40 = vpop.f32.mrb[74].mxu0 }
 0x18c   : > { %1654 = vst.msk [vmem:[%s2663_s29 + $0xb8] sm:$0xff] %vm989_vm0, %v1622_v43  ;;  %v1554_v13 = vmul.f32 %v2641_v59, %v1499_v27  ;;  %v1502_v23 = vadd.f32 %v2143_v40, %v1341_v3  ;;  %v2080_v41 = vpop.f32.mrb[75].mxu1  ;;  %v1493_v44 = vpop.f32.mrb[75].mxu0 }
 0x18d   : > { %1652 = vst.msk [vmem:[%s2663_s29 + $0xa8] sm:$0xff] %vm989_vm0, %v1620_v36  ;;  %v1552_v53 = vmul.f32 %v2641_v59, %v1491_v52  ;;  %v2081_v42 = vadd.f32 %v2080_v41, %v2079_v18  ;;  %v1494_v20 = vadd.f32 %v1493_v44, %v1333_v55  ;;  %v1346_v46 = vadd.f32 %v2078_v10, %v2582_v16 }
 0x18e   : > { %v1593_v51 = vadd.f32 %v2647_v5, %v1554_v13  ;;  %v1555_v24 = vmul.f32 %v2641_v59, %v1502_v23 }
 0x18f   : > { %v1591_v19 = vadd.f32 %v2647_v5, %v1552_v53  ;;  %v1553_v30 = vmul.f32 %v2641_v59, %v1494_v20  ;;  %v1349_v11 = vadd.f32 %v2081_v42, %v2584_v22 }
 0x190   : > { %v1625_v47 = vmax.f32 %v1593_v51, 0.0  ;;  %v1594_v60 = vadd.f32 %v2647_v5, %v1555_v24 }
 0x191   : > { %v1623_v61 = vmax.f32 %v1591_v19, 0.0  ;;  %v1592_v55 = vadd.f32 %v2647_v5, %v1553_v30  ;;  %v2082_v16 = vpop.f32.mrb[76].mxu1  ;;  %v2146_v0 = vpop.f32.mrb[76].mxu0 }
 0x192   : > { %1657 = vst.msk [vmem:[%s2663_s29 + $0xd0] sm:$0xff] %vm989_vm0, %v1625_v47  ;;  %v1626_v49 = vmax.f32 %v1594_v60, 0.0  ;;  %v2083_v38 = vpop.f32.mrb[77].mxu1  ;;  %v1506_v56 = vpop.f32.mrb[77].mxu0 }
 0x193   : > { %1655 = vst.msk [vmem:[%s2663_s29 + $0xc0] sm:$0xff] %vm989_vm0, %v1623_v61  ;;  %v1624_v29 = vmax.f32 %v1592_v55, 0.0  ;;  %v2084_v32 = vadd.f32 %v2083_v38, %v2082_v16  ;;  %v1507_v22 = vadd.f32 %v1506_v56, %v1346_v46  ;;  %v2085_v37 = vpop.f32.mrb[78].mxu1  ;;  %v2147_v63 = vpop.f32.mrb[78].mxu0 }
 0x194   : > { %1658 = vst.msk [vmem:[%s2663_s29 + $0xd8] sm:$0xff] %vm989_vm0, %v1626_v49  ;;  %v2086_v7 = vpop.f32.mrb[79].mxu1  ;;  %v1509_v62 = vpop.f32.mrb[79].mxu0 }
 0x195   : > { %1656 = vst.msk [vmem:[%s2663_s29 + $0xc8] sm:$0xff] %vm989_vm0, %v1624_v29  ;;  %v1354_v39 = vadd.f32 %v2084_v32, %v2586_v28  ;;  %v1556_v8 = vmul.f32 %v2641_v59, %v1507_v22  ;;  %v2087_v14 = vadd.f32 %v2086_v7, %v2085_v37  ;;  %v1510_v15 = vadd.f32 %v1509_v62, %v1349_v11 }
 0x197   : > { %v1515_v21 = vadd.f32 %v2146_v0, %v1354_v39  ;;  %v1595_v35 = vadd.f32 %v2647_v5, %v1556_v8  ;;  %v1357_v58 = vadd.f32 %v2087_v14, %v2588_v34  ;;  %v1557_v2 = vmul.f32 %v2641_v59, %v1510_v15 }
 0x199   : > { %v1558_v33 = vmul.f32 %v2641_v59, %v1515_v21  ;;  %v1627_v17 = vmax.f32 %v1595_v35, 0.0  ;;  %v1518_v6 = vadd.f32 %v2147_v63, %v1357_v58  ;;  %v1596_v28 = vadd.f32 %v2647_v5, %v1557_v2 }
 0x19b   : > { %v1597_v54 = vadd.f32 %v2647_v5, %v1558_v33  ;;  %1659 = vst.msk [vmem:[%s2663_s29 + $0xe0] sm:$0xff] %vm989_vm0, %v1627_v17  ;;  %v1559_v25 = vmul.f32 %v2641_v59, %v1518_v6  ;;  %v1628_v12 = vmax.f32 %v1596_v28, 0.0 }
 0x19d   : > { %v1629_v48 = vmax.f32 %v1597_v54, 0.0  ;;  %v1598_v3 = vadd.f32 %v2647_v5, %v1559_v25  ;;  %1660 = vst.msk [vmem:[%s2663_s29 + $0xe8] sm:$0xff] %vm989_vm0, %v1628_v12 }
 0x19f   : > { %1661 = vst.msk [vmem:[%s2663_s29 + $0xf0] sm:$0xff] %vm989_vm0, %v1629_v48  ;;  %v1630_v34 = vmax.f32 %v1598_v3, 0.0 }
 0x1a1   : > { %1662 = vst.msk [vmem:[%s2663_s29 + $0xf8] sm:$0xff] %vm989_vm0, %v1630_v34 }
 0x1a2 PF: > { %s14_s15 = sadd.s32 1, %s2327_s15  }
 0x1a3   : > { %p11_p4 = scmp.ge.s32.totalorder %s14_s15, 4  }
 0x1a5   :  { %13 = sbr.rel (!%p11_p4) target bundleno = 1 (0x1), region = 66 }

// kernel: my_resnet_forward.25
= control target key start
LH: loop header
LB: loop body
LE: loop exit
PB: predicated region body
PF: predicated region fallthrough
CT: control target
= control target key end

     0   :  { %s2278_s12 = smov 0   ;;  %s2750_s0 = inlined_call_operand.vmem [shape: bf16[512,576], index: 0, kind: input, shape index: {}]   ;;  %s2751_s1 = inlined_call_operand.vmem [shape: bf16[576,64], index: 1, kind: input, shape index: {}]   ;;  %s2752_s2 = inlined_call_operand.vmem [shape: f32[512,64], index: 2, kind: input, shape index: {}]   ;;  %s2753_s3 = inlined_call_operand.vmem [shape: f32[512,64], index: 3, kind: output, shape index: {}]  }
   0x1 LB: > { %s1648_s13 = sadd.s32 4294967295, %s2256_s12   ;;  %p1652_p0 = scmp.ge.s32.totalorder %s2256_s12, 1  ;;  %s2256_s12 = sphi %s2278_s12, %s13_s12  }
   0x2   : > { %p150_p1 = scmp.lt.s32.totalorder %s2256_s12, 3 }
   0x4   : > { %p151_p2 = pnand %p1652_p0, %p150_p1 }
   0x5   : > { %v2102_v0 = vld [vmem:[%s2751_s1 + $0x40] sm:$0xff] (!%p151_p2)   ;;  %s1653_s16 = sshll.u32 (!%p151_p2), %s1648_s13, 5  ;;  %v2104_v2 = vld [vmem:[%s2751_s1 + $0x48] sm:$0xff] (!%p151_p2)   ;;  %v2106_v4 = vld [vmem:[%s2751_s1 + $0x50] sm:$0xff] (!%p151_p2)   ;;  %vm1016_vm0 = vcmask (!%p151_p2), 523264  }
   0x6   : > { %154 = sbr.rel (%p151_p2) target bundleno = 412 (0x19c), region = 32  ;;  %v2103_v1 = vld [vmem:[%s2751_s1] sm:$0xff] (!%p151_p2)   ;;  %1793 = vmatprep.subr.bf16.mxu0 (!%p151_p2), %v2102_v0  ;;  %2077 = vmatprep.subr.bf16.mxu1 (!%p151_p2), %v2102_v0  ;;  %p181_p3 = scmp.lt.s32.totalorder (!%p151_p2), %s1653_s16, 63  ;;  %v2105_v3 = vld [vmem:[%s2751_s1 + $0x8] sm:$0xff] (!%p151_p2)   ;;  %v2107_v5 = vld [vmem:[%s2751_s1 + $0x10] sm:$0xff] (!%p151_p2)  }
   0x7   : > { %1794 = vmatpush3.bf16.msra.mxu0 (!%p151_p2), %v2103_v1  ;;  %2085 = vmatpush3.bf16.msra.mxu1 (!%p151_p2), %v2103_v1  ;;  %v2108_v6 = vld [vmem:[%s2751_s1 + $0x58] sm:$0xff] (!%p151_p2)   ;;  %v2110_v8 = vld [vmem:[%s2751_s1 + $0x60] sm:$0xff] (!%p151_p2)   ;;  %v2112_v10 = vld [vmem:[%s2751_s1 + $0x68] sm:$0xff] (!%p151_p2)  }
   0x8   : > { %1795 = vmatprep.subr.bf16.mxu0 (!%p151_p2), %v2104_v2  ;;  %2078 = vmatprep.subr.bf16.mxu1 (!%p151_p2), %v2104_v2  ;;  %v2109_v7 = vld [vmem:[%s2751_s1 + $0x18] sm:$0xff] (!%p151_p2)   ;;  %v2111_v9 = vld [vmem:[%s2751_s1 + $0x20] sm:$0xff] (!%p151_p2)   ;;  %v2113_v13 = vld [vmem:[%s2751_s1 + $0x28] sm:$0xff] (!%p151_p2)  }
   0x9   : > { %v2114_v14 = vld [vmem:[%s2751_s1 + $0x70] sm:$0xff] (!%p151_p2)   ;;  %v2116_v16 = vld [vmem:[%s2751_s1 + $0x78] sm:$0xff] (!%p151_p2)   ;;  %v2124_v18 = vld [vmem:[%s2751_s1 + $0xc0] sm:$0xff] (!%p151_p2)  }
   0xa   : > { %v2115_v15 = vld [vmem:[%s2751_s1 + $0x30] sm:$0xff] (!%p151_p2)   ;;  %v2117_v17 = vld [vmem:[%s2751_s1 + $0x38] sm:$0xff] (!%p151_p2)   ;;  %v2127_v19 = vld [vmem:[%s2751_s1 + $0x100] sm:$0xff] (!%p151_p2)  }
   0xb   : > { %1796 = vmatpush3.bf16.msra.mxu0 (!%p151_p2), %v2105_v3  ;;  %2086 = vmatpush3.bf16.msra.mxu1 (!%p151_p2), %v2105_v3  ;;  %v2125_v22 = vld [vmem:[%s2751_s1 + $0x80] sm:$0xff] (!%p151_p2)   ;;  %v2126_v23 = vld [vmem:[%s2751_s1 + $0xc8] sm:$0xff] (!%p151_p2)   ;;  %v2135_v28 = vld [vmem:[%s2751_s1 + $0xd0] sm:$0xff] (!%p151_p2)  }
   0xc   : > { %1797 = vmatprep.subr.bf16.mxu0 (!%p151_p2), %v2106_v4  ;;  %2079 = vmatprep.subr.bf16.mxu1 (!%p151_p2), %v2106_v4  ;;  %v2128_v26 = vld [vmem:[%s2751_s1 + $0x88] sm:$0xff] (!%p151_p2)   ;;  %v2136_v30 = vld [vmem:[%s2751_s1 + $0x90] sm:$0xff] (!%p151_p2)   ;;  %v2137_v31 = vld [vmem:[%s2751_s1 + $0xd8] sm:$0xff] (!%p151_p2)  }
   0xd   : > { %s2755_s16 = smov (!%p181_p3, %s1653_s16), 63  ;;  %v2138_v34 = vld [vmem:[%s2751_s1 + $0x98] sm:$0xff]   ;;  %v2158_v35 = vld [vmem:[%s2751_s1 + $0x108] sm:$0xff]   ;;  %v2145_v37 = vld [vmem:[%s2751_s1 + $0xe0] sm:$0xff]  }
   0xe   : > { %s2093_s29 = smul.u32 20, %s2755_s16  ;;  %v2146_v39 = vld [vmem:[%s2751_s1 + $0xa0] sm:$0xff]   ;;  %v2147_v40 = vld [vmem:[%s2751_s1 + $0xe8] sm:$0xff]   ;;  %v2155_v46 = vld [vmem:[%s2751_s1 + $0xf0] sm:$0xff]  }
   0xf   : > { %1798 = vmatpush3.bf16.msra.mxu0 %v2107_v5  ;;  %2087 = vmatpush3.bf16.msra.mxu1 %v2107_v5  ;;  %v2148_v43 = vld [vmem:[%s2751_s1 + $0xa8] sm:$0xff]   ;;  %v2178_v47 = vld [vmem:[%s2751_s1 + $0x110] sm:$0xff]   ;;  %v2157_v49 = vld [vmem:[%s2751_s1 + $0xf8] sm:$0xff]  }
  0x10   : > { %1799 = vmatprep.subr.bf16.mxu0 %v2108_v6  ;;  %2080 = vmatprep.subr.bf16.mxu1 %v2108_v6  ;;  %s2319_s9 = scalar_lea.vmem %s2750_s0, %s2093_s29  ;;  %v2156_v48 = vld [vmem:[%s2751_s1 + $0xb0] sm:$0xff]   ;;  %v2159_v52 = vld [vmem:[%s2751_s1 + $0xb8] sm:$0xff]  }
  0x11   : > { %v2120_v11 = vld [vmem:[%s2319_s9 + $0x4] ss:$20 sps:$4 sm:$0xff]   ;;  %v2118_v20 = vld [vmem:[%s2319_s9] ss:$20 sps:$4 sm:$0xff]   ;;  %v2133_v27 = vld [vmem:[%s2319_s9 + $0x28] ss:$20 sps:$4 sm:$0xff]  }
  0x12   : > { %v2123_v12 = vld [vmem:[%s2319_s9 + $0x1e4] ss:$20 sps:$4 sm:$0xff]   ;;  %1097 = vmatprep.mubr.bf16.mxu0 %v2120_v11  ;;  %v2121_v21 = vld [vmem:[%s2319_s9 + $0x1e0] ss:$20 sps:$4 sm:$0xff]   ;;  %v2134_v29 = vld [vmem:[%s2319_s9 + $0x208] ss:$20 sps:$4 sm:$0xff]  }
  0x13   : > { %1800 = vmatpush3.bf16.msra.mxu0 %v2109_v7  ;;  %2088 = vmatpush3.bf16.msra.mxu1 %v2109_v7  ;;  %v2129_v24 = vld [vmem:[%s2319_s9 + $0x2c] ss:$20 sps:$4 sm:$0xff]   ;;  %v2139_v32 = vld [vmem:[%s2319_s9 + $0x54] ss:$20 sps:$4 sm:$0xff]   ;;  %v2143_v36 = vld [vmem:[%s2319_s9 + $0x50] ss:$20 sps:$4 sm:$0xff]  }
  0x14   : > { %1801 = vmatprep.subr.bf16.mxu0 %v2110_v8  ;;  %2081 = vmatprep.subr.bf16.mxu1 %v2110_v8  ;;  %v2131_v25 = vld [vmem:[%s2319_s9 + $0x20c] ss:$20 sps:$4 sm:$0xff]   ;;  %v2141_v33 = vld [vmem:[%s2319_s9 + $0x234] ss:$20 sps:$4 sm:$0xff]   ;;  %v2144_v38 = vld [vmem:[%s2319_s9 + $0x230] ss:$20 sps:$4 sm:$0xff]  }
  0x15   : > { %1193 = vmatprep.mubr.bf16.mxu1 %v2123_v12  ;;  %v2149_v41 = vld [vmem:[%s2319_s9 + $0x7c] ss:$20 sps:$4 sm:$0xff]   ;;  %v2153_v44 = vld [vmem:[%s2319_s9 + $0x78] ss:$20 sps:$4 sm:$0xff]   ;;  %v2165_v54 = vld [vmem:[%s2319_s9 + $0xa0] ss:$20 sps:$4 sm:$0xff]  }
  0x16   : > { %v2151_v42 = vld [vmem:[%s2319_s9 + $0x25c] ss:$20 sps:$4 sm:$0xff]   ;;  %v2154_v45 = vld [vmem:[%s2319_s9 + $0x258] ss:$20 sps:$4 sm:$0xff]   ;;  %v2168_v57 = vld [vmem:[%s2319_s9 + $0x34] ss:$20 sps:$4 sm:$0xff]  }
  0x17   : > { %1802 = vmatpush3.bf16.msra.mxu0 %v2111_v9  ;;  %2089 = vmatpush3.bf16.msra.mxu1 %v2111_v9  ;;  %v2160_v50 = vld [vmem:[%s2319_s9 + $0xa4] ss:$20 sps:$4 sm:$0xff]   ;;  %v2164_v51 = vld [vmem:[%s2319_s9 + $0xc] ss:$20 sps:$4 sm:$0xff]   ;;  %v2162_v53 = vld [vmem:[%s2319_s9 + $0x8] ss:$20 sps:$4 sm:$0xff]  }
  0x18   : > { %1803 = vmatprep.subr.bf16.mxu0 %v2112_v10  ;;  %2082 = vmatprep.subr.bf16.mxu1 %v2112_v10  ;;  %v2166_v55 = vld [vmem:[%s2319_s9 + $0xcc] ss:$20 sps:$4 sm:$0xff]   ;;  %v2197_v56 = vld [vmem:[%s2751_s1 + $0x118] sm:$0xff]   ;;  %v2171_v59 = vld [vmem:[%s2319_s9 + $0x30] ss:$20 sps:$4 sm:$0xff]  }
  0x19   : > { %v2170_v58 = vld [vmem:[%s2319_s9 + $0xc8] ss:$20 sps:$4 sm:$0xff]   ;;  %v2176_v62 = vld [vmem:[%s2319_s9 + $0xf0] ss:$20 sps:$4 sm:$0xff]   ;;  %v2177_v63 = vld [vmem:[%s2319_s9 + $0x58] ss:$20 sps:$4 sm:$0xff]  }
  0x1a   : > { %v2172_v60 = vld [vmem:[%s2319_s9 + $0xf4] ss:$20 sps:$4 sm:$0xff]   ;;  %v2174_v61 = vld [vmem:[%s2319_s9 + $0x5c] ss:$20 sps:$4 sm:$0xff]   ;;  %v2181_v1 = vld [vmem:[%s2319_s9 + $0x84] ss:$20 sps:$4 sm:$0xff]  }
  0x1b   : > { %1804 = vmatpush3.bf16.msra.mxu0 %v2113_v13  ;;  %2090 = vmatpush3.bf16.msra.mxu1 %v2113_v13  ;;  %v2179_v0 = vld [vmem:[%s2319_s9 + $0x11c] ss:$20 sps:$4 sm:$0xff]   ;;  %v2183_v2 = vld [vmem:[%s2319_s9 + $0x118] ss:$20 sps:$4 sm:$0xff]   ;;  %v2184_v3 = vld [vmem:[%s2319_s9 + $0x80] ss:$20 sps:$4 sm:$0xff]  }
  0x1c   : > { %1805 = vmatprep.subr.bf16.mxu0 %v2114_v14  ;;  %2083 = vmatprep.subr.bf16.mxu1 %v2114_v14  ;;  %v2185_v4 = vld [vmem:[%s2319_s9 + $0x144] ss:$20 sps:$4 sm:$0xff]   ;;  %v2187_v5 = vld [vmem:[%s2319_s9 + $0xac] ss:$20 sps:$4 sm:$0xff]   ;;  %v2190_v7 = vld [vmem:[%s2319_s9 + $0xa8] ss:$20 sps:$4 sm:$0xff]  }
  0x1d   : > { %v2189_v6 = vld [vmem:[%s2319_s9 + $0x140] ss:$20 sps:$4 sm:$0xff]   ;;  %v2195_v10 = vld [vmem:[%s2319_s9 + $0x168] ss:$20 sps:$4 sm:$0xff]   ;;  %v2196_v11 = vld [vmem:[%s2319_s9 + $0xd0] ss:$20 sps:$4 sm:$0xff]  }
  0x1e   : > { %v2191_v8 = vld [vmem:[%s2319_s9 + $0x16c] ss:$20 sps:$4 sm:$0xff]   ;;  %v2193_v9 = vld [vmem:[%s2319_s9 + $0xd4] ss:$20 sps:$4 sm:$0xff]   ;;  %v2200_v13 = vld [vmem:[%s2319_s9 + $0xfc] ss:$20 sps:$4 sm:$0xff]  }
  0x1f   : > { %1806 = vmatpush3.bf16.msra.mxu0 %v2115_v15  ;;  %2091 = vmatpush3.bf16.msra.mxu1 %v2115_v15  ;;  %v2198_v12 = vld [vmem:[%s2319_s9 + $0x194] ss:$20 sps:$4 sm:$0xff]   ;;  %v2202_v14 = vld [vmem:[%s2319_s9 + $0x190] ss:$20 sps:$4 sm:$0xff]   ;;  %v2203_v15 = vld [vmem:[%s2319_s9 + $0xf8] ss:$20 sps:$4 sm:$0xff]  }
  0x20   : > { %1807 = vmatprep.subr.bf16.mxu0 %v2116_v16  ;;  %2084 = vmatprep.subr.bf16.mxu1 %v2116_v16  ;;  %v2204_v16 = vld [vmem:[%s2319_s9 + $0x1bc] ss:$20 sps:$4 sm:$0xff]  }
  0x23   : > { %1808 = vmatpush3.bf16.msra.mxu0 %v2117_v17  ;;  %2092 = vmatpush3.bf16.msra.mxu1 %v2117_v17  ;;  %v2206_v17 = vld [vmem:[%s2319_s9 + $0x124] ss:$20 sps:$4 sm:$0xff]  }
  0x24   : > { %1905 = vmatprep.subr.bf16.mxu1 %v2124_v18  ;;  %2037 = vmatprep.subr.bf16.mxu0 %v2127_v19  ;;  %v2208_v18 = vld [vmem:[%s2319_s9 + $0x1b8] ss:$20 sps:$4 sm:$0xff]  }
  0x26   : > { %1098 = vmatmul.mubr.bf16.vlgmr.msra.gmra.mrb[0].mxu0 %v2118_v20  ;;  %1194 = vmatmul.mubr.bf16.vlgmr.msra.gmra.mrb[0].mxu1 %v2121_v21  ;;  %v2210_v20 = vld [vmem:[%s2319_s9 + $0x14c] ss:$20 sps:$4 sm:$0xff]   ;;  %v2212_v21 = vld [vmem:[%s2319_s9 + $0x10] ss:$20 sps:$4 sm:$0xff]  }
  0x27   : > { %1906 = vmatpush3.bf16.msra.mxu1 %v2125_v22  ;;  %2038 = vmatpush3.bf16.msra.mxu0 %v2127_v19  ;;  %v2209_v19 = vld [vmem:[%s2319_s9 + $0x120] ss:$20 sps:$4 sm:$0xff]   ;;  %v2213_v22 = vld [vmem:[%s2319_s9 + $0x148] ss:$20 sps:$4 sm:$0xff]  }
  0x28   : > { %1907 = vmatprep.subr.bf16.mxu1 %v2126_v23  ;;  %1105 = vmatprep.mubr.bf16.mxu0 %v2129_v24  ;;  %v2214_v23 = vld [vmem:[%s2319_s9 + $0x38] ss:$20 sps:$4 sm:$0xff]   ;;  %v2215_v24 = vld [vmem:[%s2319_s9 + $0x174] ss:$20 sps:$4 sm:$0xff]  }
  0x29   : > { %1201 = vmatprep.mubr.bf16.mxu1 %v2131_v25  ;;  %2039 = vmatprep.subr.bf16.mxu0 %v2158_v35  ;;  %v2217_v25 = vld [vmem:[%s2319_s9 + $0x60] ss:$20 sps:$4 sm:$0xff]  }
  0x2b   : > { %1908 = vmatpush3.bf16.msra.mxu1 %v2128_v26  ;;  %2040 = vmatpush3.bf16.msra.mxu0 %v2158_v35  ;;  %v2218_v26 = vld [vmem:[%s2319_s9 + $0x170] ss:$20 sps:$4 sm:$0xff]   ;;  %v2229_v35 = vld [vmem:[%s2319_s9 + $0x128] ss:$20 sps:$4 sm:$0xff]  }
  0x2c   : > { %1909 = vmatprep.subr.bf16.mxu1 %v2135_v28  ;;  %2041 = vmatprep.subr.bf16.mxu0 %v2178_v47  ;;  %v2220_v28 = vld [vmem:[%s2319_s9 + $0x19c] ss:$20 sps:$4 sm:$0xff]  }
  0x2e   : > { %1106 = vmatmul.mubr.bf16.gmra.mrb[4].mxu0 %v2133_v27  ;;  %1202 = vmatmul.mubr.bf16.gmra.mrb[4].mxu1 %v2134_v29  ;;  %v2219_v27 = vld [vmem:[%s2319_s9 + $0x88] ss:$20 sps:$4 sm:$0xff]   ;;  %v2222_v29 = vld [vmem:[%s2319_s9 + $0xb0] ss:$20 sps:$4 sm:$0xff]  }
  0x2f   : > { %1910 = vmatpush3.bf16.msra.mxu1 %v2136_v30  ;;  %1113 = vmatprep.mubr.bf16.mxu0 %v2139_v32  ;;  %v2223_v30 = vld [vmem:[%s2319_s9 + $0x198] ss:$20 sps:$4 sm:$0xff]  }
  0x30   : > { %1911 = vmatprep.subr.bf16.mxu1 %v2137_v31  ;;  %1209 = vmatprep.mubr.bf16.mxu1 %v2141_v33  ;;  %v2224_v31 = vld [vmem:[%s2319_s9 + $0xd8] ss:$20 sps:$4 sm:$0xff]   ;;  %v2227_v33 = vld [vmem:[%s2319_s9 + $0x100] ss:$20 sps:$4 sm:$0xff]  }
  0x31   : > { %2042 = vmatpush3.bf16.msra.mxu0 %v2178_v47  ;;  %v2225_v32 = vld [vmem:[%s2319_s9 + $0x1c4] ss:$20 sps:$4 sm:$0xff]  }
  0x32   : > { %2043 = vmatprep.subr.bf16.mxu0 %v2197_v56  ;;  %v2244_v47 = vld [vmem:[%s2319_s9 + $0x218] ss:$20 sps:$4 sm:$0xff]  }
  0x33   : > { %1912 = vmatpush3.bf16.msra.mxu1 %v2138_v34  ;;  %v2228_v34 = vld [vmem:[%s2319_s9 + $0x1c0] ss:$20 sps:$4 sm:$0xff]  }
  0x34   : > { %1913 = vmatprep.subr.bf16.mxu1 %v2145_v37  ;;  %v2232_v37 = vld [vmem:[%s2319_s9 + $0x150] ss:$20 sps:$4 sm:$0xff]  }
  0x35   : > { %2044 = vmatpush3.bf16.msra.mxu0 %v2197_v56 }
  0x36   : > { %1114 = vmatmul.mubr.bf16.gmra.mrb[8].mxu0 %v2143_v36  ;;  %1210 = vmatmul.mubr.bf16.gmra.mrb[8].mxu1 %v2144_v38  ;;  %v2230_v36 = vld [vmem:[%s2319_s9 + $0x1ec] ss:$20 sps:$4 sm:$0xff]   ;;  %v2233_v38 = vld [vmem:[%s2319_s9 + $0x1e8] ss:$20 sps:$4 sm:$0xff]  }
  0x37   : > { %1914 = vmatpush3.bf16.msra.mxu1 %v2146_v39  ;;  %1121 = vmatprep.mubr.bf16.mxu0 %v2149_v41  ;;  %v2234_v39 = vld [vmem:[%s2319_s9 + $0x178] ss:$20 sps:$4 sm:$0xff]   ;;  %v2237_v41 = vld [vmem:[%s2319_s9 + $0x1a0] ss:$20 sps:$4 sm:$0xff]  }
  0x38   : > { %1915 = vmatprep.subr.bf16.mxu1 %v2147_v40  ;;  %1217 = vmatprep.mubr.bf16.mxu1 %v2151_v42  ;;  %v2235_v40 = vld [vmem:[%s2319_s9 + $0x214] ss:$20 sps:$4 sm:$0xff]   ;;  %v2238_v42 = vld [vmem:[%s2319_s9 + $0x210] ss:$20 sps:$4 sm:$0xff]  }
  0x3b   : > { %1916 = vmatpush3.bf16.msra.mxu1 %v2148_v43  ;;  %v2239_v43 = vld [vmem:[%s2319_s9 + $0x1c8] ss:$20 sps:$4 sm:$0xff]  }
  0x3c   : > { %1917 = vmatprep.subr.bf16.mxu1 %v2155_v46  ;;  %v2243_v46 = vld [vmem:[%s2319_s9 + $0x238] ss:$20 sps:$4 sm:$0xff]  }
  0x3e   : > { %1122 = vmatmul.mubr.bf16.gmra.mrb[12].mxu0 %v2153_v44  ;;  %1218 = vmatmul.mubr.bf16.gmra.mrb[12].mxu1 %v2154_v45  ;;  %v2240_v44 = vld [vmem:[%s2319_s9 + $0x23c] ss:$20 sps:$4 sm:$0xff]  }
  0x3f   : > { %1918 = vmatpush3.bf16.msra.mxu1 %v2156_v48  ;;  %1129 = vmatprep.mubr.bf16.mxu0 %v2160_v50  ;;  %v2242_v45 = vld [vmem:[%s2319_s9 + $0x1f0] ss:$20 sps:$4 sm:$0xff]   ;;  %v2248_v50 = vld [vmem:[%s2319_s9 + $0x260] ss:$20 sps:$4 sm:$0xff]  }
  0x40   : > { %1919 = vmatprep.subr.bf16.mxu1 %v2157_v49  ;;  %1258 = vmatprep.mubr.bf16.mxu1 %v2164_v51  ;;  %v2245_v48 = vld [vmem:[%s2319_s9 + $0x264] ss:$20 sps:$4 sm:$0xff]   ;;  %v2247_v49 = vld [vmem:[%s2319_s9 + $0x240] ss:$20 sps:$4 sm:$0xff]   ;;  %v2249_v51 = vld [vmem:[%s2319_s9 + $0x268] ss:$20 sps:$4 sm:$0xff]  }
  0x41   : > { %s1656_s9 = sshll.u32 %s2755_s16, 3 }
  0x42   : > { %s2526_s20 = scalar_lea.vmem %s2752_s2, %s1656_s9  ;;  %s2625_s23 = scalar_lea.vmem %s2753_s3, %s1656_s9 }
  0x43   : > { %1920 = vmatpush3.bf16.msra.mxu1 %v2159_v52 }
  0x46   : > { %1130 = vmatmul.mubr.bf16.gmra.mrb[16].mxu0 %v2165_v54  ;;  %1259 = vmatmul.mubr.bf16.vlgmr.msra.gmra.mrb[16].mxu1 %v2162_v53 }
  0x47   : > { %1137 = vmatprep.mubr.bf16.mxu0 %v2166_v55  ;;  %1266 = vmatprep.mubr.bf16.mxu1 %v2168_v57 }
  0x4e   : > { %1138 = vmatmul.mubr.bf16.gmra.mrb[20].mxu0 %v2170_v58  ;;  %1267 = vmatmul.mubr.bf16.gmra.mrb[20].mxu1 %v2171_v59 }
  0x4f   : > { %1145 = vmatprep.mubr.bf16.mxu0 %v2172_v60  ;;  %1274 = vmatprep.mubr.bf16.mxu1 %v2174_v61 }
  0x56   : > { %1146 = vmatmul.mubr.bf16.gmra.mrb[24].mxu0 %v2176_v62  ;;  %1275 = vmatmul.mubr.bf16.gmra.mrb[24].mxu1 %v2177_v63 }
  0x57   : > { %1153 = vmatprep.mubr.bf16.mxu0 %v2179_v0  ;;  %1282 = vmatprep.mubr.bf16.mxu1 %v2181_v1 }
  0x5e   : > { %1154 = vmatmul.mubr.bf16.gmra.mrb[28].mxu0 %v2183_v2  ;;  %1283 = vmatmul.mubr.bf16.gmra.mrb[28].mxu1 %v2184_v3 }
  0x5f   : > { %1161 = vmatprep.mubr.bf16.mxu0 %v2185_v4  ;;  %1290 = vmatprep.mubr.bf16.mxu1 %v2187_v5 }
  0x66   : > { %1162 = vmatmul.mubr.bf16.gmra.mrb[32].mxu0 %v2189_v6  ;;  %1291 = vmatmul.mubr.bf16.gmra.mrb[32].mxu1 %v2190_v7 }
  0x67   : > { %1169 = vmatprep.mubr.bf16.mxu0 %v2191_v8  ;;  %1298 = vmatprep.mubr.bf16.mxu1 %v2193_v9 }
  0x6e   : > { %1170 = vmatmul.mubr.bf16.gmra.mrb[36].mxu0 %v2195_v10  ;;  %1299 = vmatmul.mubr.bf16.gmra.mrb[36].mxu1 %v2196_v11 }
  0x6f   : > { %1177 = vmatprep.mubr.bf16.mxu0 %v2198_v12  ;;  %1306 = vmatprep.mubr.bf16.mxu1 %v2200_v13 }
  0x76   : > { %1178 = vmatmul.mubr.bf16.gmra.mrb[40].mxu0 %v2202_v14  ;;  %1307 = vmatmul.mubr.bf16.gmra.mrb[40].mxu1 %v2203_v15 }
  0x77   : > { %1185 = vmatprep.mubr.bf16.mxu0 %v2204_v16  ;;  %1314 = vmatprep.mubr.bf16.mxu1 %v2206_v17 }
  0x7e   : > { %1186 = vmatmul.mubr.bf16.gmra.mrb[44].mxu0 %v2208_v18  ;;  %1315 = vmatmul.mubr.bf16.gmra.mrb[44].mxu1 %v2209_v19 }
  0x7f   : > { %1322 = vmatprep.mubr.bf16.mxu1 %v2210_v20  ;;  %2045 = vmatprep.mubr.msk.bf16.mxu0 %vm1016_vm0, %v2212_v21 }
  0x86   : > { %1323 = vmatmul.mubr.bf16.gmra.mrb[48].mxu1 %v2213_v22  ;;  %2046 = vmatmul.mubr.msk.bf16.vlgmr.msra.gmra.mrb[48].mxu0 %vm1016_vm0, %v2214_v23 }
  0x87   : > { %1330 = vmatprep.mubr.bf16.mxu1 %v2215_v24  ;;  %2049 = vmatprep.mubr.msk.bf16.mxu0 %vm1016_vm0, %v2217_v25 }
  0x8e   : > { %1331 = vmatmul.mubr.bf16.gmra.mrb[52].mxu1 %v2218_v26  ;;  %2050 = vmatmul.mubr.msk.bf16.gmra.mrb[52].mxu0 %vm1016_vm0, %v2219_v27 }
  0x8f   : > { %1338 = vmatprep.mubr.bf16.mxu1 %v2220_v28  ;;  %2053 = vmatprep.mubr.msk.bf16.mxu0 %vm1016_vm0, %v2222_v29 }
  0x96   : > { %1339 = vmatmul.mubr.bf16.gmra.mrb[56].mxu1 %v2223_v30  ;;  %2054 = vmatmul.mubr.msk.bf16.gmra.mrb[56].mxu0 %vm1016_vm0, %v2224_v31 }
  0x97   : > { %1346 = vmatprep.mubr.bf16.mxu1 %v2225_v32  ;;  %2057 = vmatprep.mubr.msk.bf16.mxu0 %vm1016_vm0, %v2227_v33 }
  0x9e   : > { %1347 = vmatmul.mubr.bf16.gmra.mrb[60].mxu1 %v2228_v34  ;;  %2058 = vmatmul.mubr.msk.bf16.gmra.mrb[60].mxu0 %vm1016_vm0, %v2229_v35 }
  0x9f   : > { %1354 = vmatprep.mubr.bf16.mxu1 %v2230_v36  ;;  %2061 = vmatprep.mubr.msk.bf16.mxu0 %vm1016_vm0, %v2232_v37  ;;  %v368_v36 = vld [vmem:[%s2526_s20] sm:$0xff] }
  0xa6   : > { %1355 = vmatmul.mubr.bf16.gmra.mrb[64].mxu1 %v2233_v38  ;;  %2062 = vmatmul.mubr.msk.bf16.gmra.mrb[64].mxu0 %vm1016_vm0, %v2234_v39  ;;  %v369_v39 = vld [vmem:[%s2526_s20 + $0x8] sm:$0xff] }
  0xa7   : > { %1362 = vmatprep.mubr.bf16.mxu1 %v2235_v40  ;;  %2065 = vmatprep.mubr.msk.bf16.mxu0 %vm1016_vm0, %v2237_v41 }
  0xae   : > { %1363 = vmatmul.mubr.bf16.gmra.mrb[68].mxu1 %v2238_v42  ;;  %2066 = vmatmul.mubr.msk.bf16.gmra.mrb[68].mxu0 %vm1016_vm0, %v2239_v43 }
  0xaf   : > { %1370 = vmatprep.mubr.bf16.mxu1 %v2240_v44  ;;  %2069 = vmatprep.mubr.msk.bf16.mxu0 %vm1016_vm0, %v2242_v45 }
  0xb6   : > { %1371 = vmatmul.mubr.bf16.gmra.mrb[72].mxu1 %v2243_v46  ;;  %2070 = vmatmul.mubr.msk.bf16.gmra.mrb[72].mxu0 %vm1016_vm0, %v2244_v47 }
  0xb7   : > { %1378 = vmatprep.mubr.bf16.mxu1 %v2245_v48  ;;  %2073 = vmatprep.mubr.msk.bf16.mxu0 %vm1016_vm0, %v2247_v49 }
  0xbe   : > { %1379 = vmatmul.mubr.bf16.gmra.mrb[76].mxu1 %v2248_v50  ;;  %2074 = vmatmul.mubr.msk.bf16.gmra.mrb[76].mxu0 %vm1016_vm0, %v2249_v51 }
  0xf9   : > { %v1881_v52 = vpop.f32.mrb[0].mxu1  ;;  %v1809_v53 = vpop.f32.mrb[0].mxu0 }
  0xfa   : > { %v1882_v54 = vpop.f32.mrb[1].mxu1  ;;  %v1810_v55 = vpop.f32.mrb[1].mxu0 }
  0xfb   : > { %v2498_v56 = vadd.f32 %v1882_v54, %v1881_v52  ;;  %v1884_v57 = vpop.f32.mrb[2].mxu1  ;;  %v1811_v58 = vadd.f32 %v1810_v55, %v1809_v53  ;;  %v1812_v59 = vpop.f32.mrb[2].mxu0  ;;  %v370_v54 = vld [vmem:[%s2526_s20 + $0x10] sm:$0xff] }
  0xfc   : > { %v1885_v60 = vpop.f32.mrb[3].mxu1  ;;  %v1813_v61 = vpop.f32.mrb[3].mxu0 }
  0xfd   : > { %v2500_v62 = vadd.f32 %v1885_v60, %v1884_v57  ;;  %v1814_v63 = vadd.f32 %v1813_v61, %v1812_v59  ;;  %v1100_v42 = vadd.f32 %v1811_v58, %v368_v36  ;;  %v371_v58 = vld [vmem:[%s2526_s20 + $0x18] sm:$0xff] }
  0xff   : > { %v1103_v49 = vadd.f32 %v1814_v63, %v369_v39 }
 0x101   : > { %v1887_v0 = vpop.f32.mrb[4].mxu1  ;;  %v1815_v1 = vpop.f32.mrb[4].mxu0 }
 0x102   : > { %v1888_v2 = vpop.f32.mrb[5].mxu1  ;;  %v1816_v3 = vpop.f32.mrb[5].mxu0 }
 0x103   : > { %v2502_v4 = vadd.f32 %v1888_v2, %v1887_v0  ;;  %v1890_v5 = vpop.f32.mrb[6].mxu1  ;;  %v1817_v6 = vadd.f32 %v1816_v3, %v1815_v1  ;;  %v1818_v7 = vpop.f32.mrb[6].mxu0 }
 0x104   : > { %v1891_v8 = vpop.f32.mrb[7].mxu1  ;;  %v1819_v9 = vpop.f32.mrb[7].mxu0 }
 0x105   : > { %v2504_v10 = vadd.f32 %v1891_v8, %v1890_v5  ;;  %v1820_v11 = vadd.f32 %v1819_v9, %v1818_v7  ;;  %v1108_v61 = vadd.f32 %v1817_v6, %v370_v54  ;;  %v373_v6 = vld [vmem:[%s2526_s20 + $0x28] sm:$0xff] }
 0x107   : > { %v1111_v7 = vadd.f32 %v1820_v11, %v371_v58 }
 0x109   : > { %v1893_v12 = vpop.f32.mrb[8].mxu1  ;;  %v1821_v13 = vpop.f32.mrb[8].mxu0 }
 0x10a   : > { %v1894_v14 = vpop.f32.mrb[9].mxu1  ;;  %v1822_v15 = vpop.f32.mrb[9].mxu0 }
 0x10b   : > { %v2506_v16 = vadd.f32 %v1894_v14, %v1893_v12  ;;  %v1896_v17 = vpop.f32.mrb[10].mxu1  ;;  %v1823_v18 = vadd.f32 %v1822_v15, %v1821_v13  ;;  %v1824_v19 = vpop.f32.mrb[10].mxu0  ;;  %v372_v14 = vld [vmem:[%s2526_s20 + $0x20] sm:$0xff] }
 0x10c   : > { %v1897_v20 = vpop.f32.mrb[11].mxu1  ;;  %v1825_v21 = vpop.f32.mrb[11].mxu0 }
 0x10d   : > { %v2508_v22 = vadd.f32 %v1897_v20, %v1896_v17  ;;  %v2510_v23 = vadd.f32 %v1825_v21, %v1824_v19  ;;  %v1116_v21 = vadd.f32 %v1823_v18, %v372_v14  ;;  %v375_v18 = vld [vmem:[%s2526_s20 + $0x38] sm:$0xff] }
 0x111   : > { %v1899_v24 = vpop.f32.mrb[12].mxu1  ;;  %v1827_v25 = vpop.f32.mrb[12].mxu0 }
 0x112   : > { %v1900_v26 = vpop.f32.mrb[13].mxu1  ;;  %v1828_v27 = vpop.f32.mrb[13].mxu0 }
 0x113   : > { %v2512_v28 = vadd.f32 %v1900_v26, %v1899_v24  ;;  %v1902_v29 = vpop.f32.mrb[14].mxu1  ;;  %v2514_v30 = vadd.f32 %v1828_v27, %v1827_v25  ;;  %v1830_v31 = vpop.f32.mrb[14].mxu0 }
 0x114   : > { %v1903_v32 = vpop.f32.mrb[15].mxu1  ;;  %v1831_v33 = vpop.f32.mrb[15].mxu0 }
 0x115   : > { %v2517_v34 = vadd.f32 %v1903_v32, %v1902_v29  ;;  %v2519_v35 = vadd.f32 %v1831_v33, %v1830_v31  ;;  %v1119_v31 = vadd.f32 %v2510_v23, %v373_v6 }
 0x119   : > { %v1921_v37 = vpop.f32.mrb[16].mxu1  ;;  %v1833_v38 = vpop.f32.mrb[16].mxu0 }
 0x11a   : > { %v1922_v40 = vpop.f32.mrb[17].mxu1  ;;  %v1834_v41 = vpop.f32.mrb[17].mxu0 }
 0x11b   : > { %v1923_v43 = vadd.f32 %v1922_v40, %v1921_v37  ;;  %v1924_v44 = vpop.f32.mrb[18].mxu1  ;;  %v2530_v45 = vadd.f32 %v1834_v41, %v1833_v38  ;;  %v1836_v46 = vpop.f32.mrb[18].mxu0  ;;  %v374_v38 = vld [vmem:[%s2526_s20 + $0x30] sm:$0xff] }
 0x11c   : > { %v1925_v47 = vpop.f32.mrb[19].mxu1  ;;  %v1837_v48 = vpop.f32.mrb[19].mxu0 }
 0x11d   : > { %v1926_v50 = vadd.f32 %v1925_v47, %v1924_v44  ;;  %v2532_v51 = vadd.f32 %v1837_v48, %v1836_v46  ;;  %v2534_v52 = vadd.f32 %v1923_v43, %v1100_v42  ;;  %v1124_v43 = vadd.f32 %v2514_v30, %v374_v38  ;;  %v377_v30 = vld [vmem:[%s2526_s20 + $0x48] sm:$0xff] }
 0x11f   : > { %v2536_v53 = vadd.f32 %v1926_v50, %v1103_v49  ;;  %v1127_v50 = vadd.f32 %v2519_v35, %v375_v18 }
 0x121   : > { %v1927_v55 = vpop.f32.mrb[20].mxu1  ;;  %v1839_v57 = vpop.f32.mrb[20].mxu0 }
 0x122   : > { %v1928_v59 = vpop.f32.mrb[21].mxu1  ;;  %v1840_v60 = vpop.f32.mrb[21].mxu0 }
 0x123   : > { %v1929_v0 = vadd.f32 %v1928_v59, %v1927_v55  ;;  %v1930_v1 = vpop.f32.mrb[22].mxu1  ;;  %v2540_v2 = vadd.f32 %v1840_v60, %v1839_v57  ;;  %v1842_v63 = vpop.f32.mrb[22].mxu0  ;;  %v376_v59 = vld [vmem:[%s2526_s20 + $0x40] sm:$0xff] }
 0x124   : > { %v1931_v3 = vpop.f32.mrb[23].mxu1  ;;  %v1843_v5 = vpop.f32.mrb[23].mxu0 }
 0x125   : > { %v1932_v8 = vadd.f32 %v1931_v3, %v1930_v1  ;;  %v2542_v9 = vadd.f32 %v1843_v5, %v1842_v63  ;;  %v2544_v12 = vadd.f32 %v1929_v0, %v1108_v61  ;;  %v1132_v63 = vadd.f32 %v2530_v45, %v376_v59  ;;  %v379_v45 = vld [vmem:[%s2526_s20 + $0x58] sm:$0xff] }
 0x127   : > { %v2546_v13 = vadd.f32 %v1932_v8, %v1111_v7  ;;  %v1143_v18 = vadd.f32 %v2542_v9, %v379_v45 }
 0x129   : > { %v1933_v15 = vpop.f32.mrb[24].mxu1  ;;  %v1845_v17 = vpop.f32.mrb[24].mxu0 }
 0x12a   : > { %v1934_v19 = vpop.f32.mrb[25].mxu1  ;;  %v1846_v20 = vpop.f32.mrb[25].mxu0 }
 0x12b   : > { %v1935_v24 = vadd.f32 %v1934_v19, %v1933_v15  ;;  %v1936_v25 = vpop.f32.mrb[26].mxu1  ;;  %v2550_v26 = vadd.f32 %v1846_v20, %v1845_v17  ;;  %v1848_v11 = vpop.f32.mrb[26].mxu0  ;;  %v1135_v15 = vadd.f32 %v2532_v51, %v377_v30 }
 0x12c   : > { %v1937_v27 = vpop.f32.mrb[27].mxu1  ;;  %v1849_v29 = vpop.f32.mrb[27].mxu0 }
 0x12d   : > { %v1938_v32 = vadd.f32 %v1937_v27, %v1936_v25  ;;  %v2553_v33 = vadd.f32 %v1849_v29, %v1848_v11  ;;  %v2555_v36 = vadd.f32 %v1935_v24, %v1116_v21  ;;  %v378_v21 = vld [vmem:[%s2526_s20 + $0x50] sm:$0xff] }
 0x12e   : > { %v1140_v29 = vadd.f32 %v2540_v2, %v378_v21  ;;  %v381_v2 = vld [vmem:[%s2526_s20 + $0x68] sm:$0xff] }
 0x12f   : > { %v2557_v37 = vadd.f32 %v1938_v32, %v1119_v31 }
 0x131   : > { %v1939_v39 = vpop.f32.mrb[28].mxu1  ;;  %v1851_v40 = vpop.f32.mrb[28].mxu0 }
 0x132   : > { %v1940_v41 = vpop.f32.mrb[29].mxu1  ;;  %v1852_v42 = vpop.f32.mrb[29].mxu0 }
 0x133   : > { %v1941_v44 = vadd.f32 %v1940_v41, %v1939_v39  ;;  %v1942_v46 = vpop.f32.mrb[30].mxu1  ;;  %v2562_v23 = vadd.f32 %v1852_v42, %v1851_v40  ;;  %v1854_v47 = vpop.f32.mrb[30].mxu0 }
 0x134   : > { %v1943_v48 = vpop.f32.mrb[31].mxu1  ;;  %v1855_v49 = vpop.f32.mrb[31].mxu0 }
 0x135   : > { %v1944_v54 = vadd.f32 %v1943_v48, %v1942_v46  ;;  %v2565_v55 = vadd.f32 %v1855_v49, %v1854_v47  ;;  %v2567_v57 = vadd.f32 %v1941_v44, %v1124_v43  ;;  %v380_v46 = vld [vmem:[%s2526_s20 + $0x60] sm:$0xff] }
 0x137   : > { %v2569_v58 = vadd.f32 %v1944_v54, %v1127_v50  ;;  %v1148_v54 = vadd.f32 %v2550_v26, %v380_v46  ;;  %v383_v26 = vld [vmem:[%s2526_s20 + $0x78] sm:$0xff]  ;;  %v385_v46 = vld [vmem:[%s2526_s20 + $0x88] sm:$0xff] }
 0x139   : > { %v1945_v60 = vpop.f32.mrb[32].mxu1  ;;  %v1857_v61 = vpop.f32.mrb[32].mxu0 }
 0x13a   : > { %v1946_v0 = vpop.f32.mrb[33].mxu1  ;;  %v1858_v1 = vpop.f32.mrb[33].mxu0 }
 0x13b   : > { %v1947_v3 = vadd.f32 %v1946_v0, %v1945_v60  ;;  %v1948_v5 = vpop.f32.mrb[34].mxu1  ;;  %v2574_v35 = vadd.f32 %v1858_v1, %v1857_v61  ;;  %v1860_v7 = vpop.f32.mrb[34].mxu0  ;;  %v1151_v1 = vadd.f32 %v2553_v33, %v381_v2 }
 0x13c   : > { %v1949_v8 = vpop.f32.mrb[35].mxu1  ;;  %v1861_v14 = vpop.f32.mrb[35].mxu0 }
 0x13d   : > { %v1950_v17 = vadd.f32 %v1949_v8, %v1948_v5  ;;  %v2577_v6 = vadd.f32 %v1861_v14, %v1860_v7  ;;  %v2579_v19 = vadd.f32 %v1947_v3, %v1132_v63  ;;  %v382_v8 = vld [vmem:[%s2526_s20 + $0x70] sm:$0xff] }
 0x13f   : > { %v2581_v20 = vadd.f32 %v1950_v17, %v1135_v15 }
 0x141   : > { %v1951_v24 = vpop.f32.mrb[36].mxu1  ;;  %v1863_v25 = vpop.f32.mrb[36].mxu0 }
 0x142   : > { %v1952_v11 = vpop.f32.mrb[37].mxu1  ;;  %v1864_v27 = vpop.f32.mrb[37].mxu0 }
 0x143   : > { %v1953_v31 = vadd.f32 %v1952_v11, %v1951_v24  ;;  %v1954_v32 = vpop.f32.mrb[38].mxu1  ;;  %v2586_v51 = vadd.f32 %v1864_v27, %v1863_v25  ;;  %v1866_v38 = vpop.f32.mrb[38].mxu0  ;;  %v1156_v24 = vadd.f32 %v2562_v23, %v382_v8 }
 0x144   : > { %v1955_v39 = vpop.f32.mrb[39].mxu1  ;;  %v1867_v40 = vpop.f32.mrb[39].mxu0 }
 0x145   : > { %v1956_v41 = vadd.f32 %v1955_v39, %v1954_v32  ;;  %v2589_v42 = vadd.f32 %v1867_v40, %v1866_v38  ;;  %v2591_v43 = vadd.f32 %v1953_v31, %v1140_v29  ;;  %v1159_v31 = vadd.f32 %v2565_v55, %v383_v26 }
 0x147   : > { %v2593_v44 = vadd.f32 %v1956_v41, %v1143_v18  ;;  %v384_v18 = vld [vmem:[%s2526_s20 + $0x80] sm:$0xff] }
 0x148   : > { %v1164_v2 = vadd.f32 %v2574_v35, %v384_v18 }
 0x149   : > { %v1957_v47 = vpop.f32.mrb[40].mxu1  ;;  %v1869_v48 = vpop.f32.mrb[40].mxu0 }
 0x14a   : > { %v1958_v49 = vpop.f32.mrb[41].mxu1  ;;  %v1870_v50 = vpop.f32.mrb[41].mxu0 }
 0x14b   : > { %v1959_v59 = vadd.f32 %v1958_v49, %v1957_v47  ;;  %v1960_v60 = vpop.f32.mrb[42].mxu1  ;;  %v2598_v9 = vadd.f32 %v1870_v50, %v1869_v48  ;;  %v1872_v61 = vpop.f32.mrb[42].mxu0 }
 0x14c   : > { %v1961_v30 = vpop.f32.mrb[43].mxu1  ;;  %v1873_v0 = vpop.f32.mrb[43].mxu0 }
 0x14d   : > { %v1962_v63 = vadd.f32 %v1961_v30, %v1960_v60  ;;  %v2601_v3 = vadd.f32 %v1873_v0, %v1872_v61  ;;  %v2603_v5 = vadd.f32 %v1959_v59, %v1148_v54 }
 0x14f   : > { %v2605_v7 = vadd.f32 %v1962_v63, %v1151_v1  ;;  %v386_v63 = vld [vmem:[%s2526_s20 + $0x90] sm:$0xff] }
 0x151   : > { %v1963_v14 = vpop.f32.mrb[44].mxu1  ;;  %v1875_v15 = vpop.f32.mrb[44].mxu0 }
 0x152   : > { %v1964_v17 = vpop.f32.mrb[45].mxu1  ;;  %v1876_v21 = vpop.f32.mrb[45].mxu0 }
 0x153   : > { %v1965_v25 = vadd.f32 %v1964_v17, %v1963_v14  ;;  %v1966_v33 = vpop.f32.mrb[46].mxu1  ;;  %v2610_v45 = vadd.f32 %v1876_v21, %v1875_v15  ;;  %v1878_v11 = vpop.f32.mrb[46].mxu0  ;;  %v387_v14 = vld [vmem:[%s2526_s20 + $0x98] sm:$0xff] }
 0x154   : > { %v1967_v27 = vpop.f32.mrb[47].mxu1  ;;  %v1879_v29 = vpop.f32.mrb[47].mxu0 }
 0x155   : > { %v1968_v32 = vadd.f32 %v1967_v27, %v1966_v33  ;;  %v2613_v38 = vadd.f32 %v1879_v29, %v1878_v11  ;;  %v2615_v39 = vadd.f32 %v1965_v25, %v1156_v24 }
 0x157   : > { %v2617_v40 = vadd.f32 %v1968_v32, %v1159_v31  ;;  %v388_v32 = vld [vmem:[%s2526_s20 + $0xa0] sm:$0xff] }
 0x159   : > { %v1969_v41 = vpop.f32.mrb[48].mxu1  ;;  %v2047_v23 = vpop.f32.mrb[48].mxu0 }
 0x15a   : > { %v1430_v55 = vadd.f32 %v2047_v23, %v2544_v12  ;;  %v1970_v47 = vpop.f32.mrb[49].mxu1  ;;  %v1421_v48 = vpop.f32.mrb[49].mxu0  ;;  %v1167_v12 = vadd.f32 %v2577_v6, %v385_v46 }
 0x15b   : > { %v1971_v49 = vadd.f32 %v1970_v47, %v1969_v41  ;;  %v1422_v50 = vadd.f32 %v1421_v48, %v2534_v52  ;;  %v1972_v54 = vpop.f32.mrb[50].mxu1  ;;  %v2048_v59 = vpop.f32.mrb[50].mxu0  ;;  %v389_v41 = vld [vmem:[%s2526_s20 + $0xa8] sm:$0xff] }
 0x15c   : > { %1550 = vst.msk [vmem:[%s2625_s23 + $0x10] sm:$0xff] %vm1016_vm0, %v1430_v55  ;;  %v1433_v60 = vadd.f32 %v2048_v59, %v2546_v13  ;;  %v1973_v61 = vpop.f32.mrb[51].mxu1  ;;  %v1424_v30 = vpop.f32.mrb[51].mxu0 }
 0x15d   : > { %1548 = vst.msk [vmem:[%s2625_s23] sm:$0xff] %vm1016_vm0, %v1422_v50  ;;  %v1974_v0 = vadd.f32 %v1973_v61, %v1972_v54  ;;  %v1425_v35 = vadd.f32 %v1424_v30, %v2536_v53  ;;  %v2638_v1 = vadd.f32 %v1971_v49, %v1164_v2  ;;  %v1172_v53 = vadd.f32 %v2586_v51, %v386_v63  ;;  %v390_v61 = vld [vmem:[%s2526_s20 + $0xb0] sm:$0xff] }
 0x15e   : > { %1551 = vst.msk [vmem:[%s2625_s23 + $0x18] sm:$0xff] %vm1016_vm0, %v1433_v60 }
 0x15f   : > { %1549 = vst.msk [vmem:[%s2625_s23 + $0x8] sm:$0xff] %vm1016_vm0, %v1425_v35  ;;  %v2644_v52 = vadd.f32 %v1974_v0, %v1167_v12  ;;  %v391_v12 = vld [vmem:[%s2526_s20 + $0xb8] sm:$0xff] }
 0x161   : > { %v1975_v13 = vpop.f32.mrb[52].mxu1  ;;  %v2051_v8 = vpop.f32.mrb[52].mxu0 }
 0x162   : > { %v1446_v6 = vadd.f32 %v2051_v8, %v2567_v57  ;;  %v1976_v15 = vpop.f32.mrb[53].mxu1  ;;  %v1437_v26 = vpop.f32.mrb[53].mxu0  ;;  %v1175_v57 = vadd.f32 %v2589_v42, %v387_v14 }
 0x163   : > { %v1977_v17 = vadd.f32 %v1976_v15, %v1975_v13  ;;  %v1438_v21 = vadd.f32 %v1437_v26, %v2555_v36  ;;  %v1978_v24 = vpop.f32.mrb[54].mxu1  ;;  %v2052_v25 = vpop.f32.mrb[54].mxu0 }
 0x164   : > { %1554 = vst.msk [vmem:[%s2625_s23 + $0x30] sm:$0xff] %vm1016_vm0, %v1446_v6  ;;  %v1449_v33 = vadd.f32 %v2052_v25, %v2569_v58  ;;  %v1979_v11 = vpop.f32.mrb[55].mxu1  ;;  %v1440_v27 = vpop.f32.mrb[55].mxu0  ;;  %v393_v25 = vld [vmem:[%s2526_s20 + $0xc8] sm:$0xff] }
 0x165   : > { %1552 = vst.msk [vmem:[%s2625_s23 + $0x20] sm:$0xff] %vm1016_vm0, %v1438_v21  ;;  %v1980_v29 = vadd.f32 %v1979_v11, %v1978_v24  ;;  %v1441_v51 = vadd.f32 %v1440_v27, %v2557_v37  ;;  %v1333_v31 = vadd.f32 %v1977_v17, %v1172_v53  ;;  %v1180_v37 = vadd.f32 %v2598_v9, %v388_v32  ;;  %v392_v21 = vld [vmem:[%s2526_s20 + $0xc0] sm:$0xff] }
 0x166   : > { %1555 = vst.msk [vmem:[%s2625_s23 + $0x38] sm:$0xff] %vm1016_vm0, %v1449_v33  ;;  %v1196_v27 = vadd.f32 %v2498_v56, %v392_v21 }
 0x167   : > { %1553 = vst.msk [vmem:[%s2625_s23 + $0x28] sm:$0xff] %vm1016_vm0, %v1441_v51  ;;  %v1336_v36 = vadd.f32 %v1980_v29, %v1175_v57 }
 0x169   : > { %v1981_v18 = vpop.f32.mrb[56].mxu1  ;;  %v2055_v58 = vpop.f32.mrb[56].mxu0 }
 0x16a   : > { %v1462_v23 = vadd.f32 %v2055_v58, %v2591_v43  ;;  %v1982_v42 = vpop.f32.mrb[57].mxu1  ;;  %v1453_v46 = vpop.f32.mrb[57].mxu0  ;;  %v1183_v43 = vadd.f32 %v2601_v3, %v389_v41 }
 0x16b   : > { %v1983_v55 = vadd.f32 %v1982_v42, %v1981_v18  ;;  %v1454_v47 = vadd.f32 %v1453_v46, %v2579_v19  ;;  %v1984_v48 = vpop.f32.mrb[58].mxu1  ;;  %v2056_v2 = vpop.f32.mrb[58].mxu0  ;;  %v394_v42 = vld [vmem:[%s2526_s20 + $0xd0] sm:$0xff] }
 0x16c   : > { %1558 = vst.msk [vmem:[%s2625_s23 + $0x50] sm:$0xff] %vm1016_vm0, %v1462_v23  ;;  %v1465_v49 = vadd.f32 %v2056_v2, %v2593_v44  ;;  %v1985_v50 = vpop.f32.mrb[59].mxu1  ;;  %v1456_v54 = vpop.f32.mrb[59].mxu0 }
 0x16d   : > { %1556 = vst.msk [vmem:[%s2625_s23 + $0x40] sm:$0xff] %vm1016_vm0, %v1454_v47  ;;  %v1986_v59 = vadd.f32 %v1985_v50, %v1984_v48  ;;  %v1457_v9 = vadd.f32 %v1456_v54, %v2581_v20  ;;  %v1341_v60 = vadd.f32 %v1983_v55, %v1180_v37  ;;  %v1188_v20 = vadd.f32 %v2610_v45, %v390_v61  ;;  %v395_v37 = vld [vmem:[%s2526_s20 + $0xd8] sm:$0xff] }
 0x16e   : > { %1559 = vst.msk [vmem:[%s2625_s23 + $0x58] sm:$0xff] %vm1016_vm0, %v1465_v49  ;;  %v1204_v48 = vadd.f32 %v2502_v4, %v394_v42 }
 0x16f   : > { %1557 = vst.msk [vmem:[%s2625_s23 + $0x48] sm:$0xff] %vm1016_vm0, %v1457_v9  ;;  %v2678_v19 = vadd.f32 %v1986_v59, %v1183_v43  ;;  %v1207_v9 = vadd.f32 %v2504_v10, %v395_v37 }
 0x171   : > { %v1987_v30 = vpop.f32.mrb[60].mxu1  ;;  %v2059_v44 = vpop.f32.mrb[60].mxu0 }
 0x172   : > { %v1478_v3 = vadd.f32 %v2059_v44, %v2615_v39  ;;  %v1988_v0 = vpop.f32.mrb[61].mxu1  ;;  %v1469_v35 = vpop.f32.mrb[61].mxu0  ;;  %v1191_v39 = vadd.f32 %v2613_v38, %v391_v12 }
 0x173   : > { %v1989_v63 = vadd.f32 %v1988_v0, %v1987_v30  ;;  %v1470_v13 = vadd.f32 %v1469_v35, %v2603_v5  ;;  %v1990_v8 = vpop.f32.mrb[62].mxu1  ;;  %v2060_v14 = vpop.f32.mrb[62].mxu0  ;;  %v397_v0 = vld [vmem:[%s2526_s20 + $0xe8] sm:$0xff] }
 0x174   : > { %1562 = vst.msk [vmem:[%s2625_s23 + $0x70] sm:$0xff] %vm1016_vm0, %v1478_v3  ;;  %v1481_v6 = vadd.f32 %v2060_v14, %v2617_v40  ;;  %v1991_v15 = vpop.f32.mrb[63].mxu1  ;;  %v1472_v26 = vpop.f32.mrb[63].mxu0 }
 0x175   : > { %1560 = vst.msk [vmem:[%s2625_s23 + $0x60] sm:$0xff] %vm1016_vm0, %v1470_v13  ;;  %v1992_v53 = vadd.f32 %v1991_v15, %v1990_v8  ;;  %v1473_v45 = vadd.f32 %v1472_v26, %v2605_v7  ;;  %v1349_v17 = vadd.f32 %v1989_v63, %v1188_v20 }
 0x176   : > { %1563 = vst.msk [vmem:[%s2625_s23 + $0x78] sm:$0xff] %vm1016_vm0, %v1481_v6 }
 0x177   : > { %1561 = vst.msk [vmem:[%s2625_s23 + $0x68] sm:$0xff] %vm1016_vm0, %v1473_v45  ;;  %v1352_v5 = vadd.f32 %v1992_v53, %v1191_v39  ;;  %v1215_v39 = vadd.f32 %v2508_v22, %v397_v0 }
 0x179   : > { %v1993_v24 = vpop.f32.mrb[64].mxu1  ;;  %v2063_v40 = vpop.f32.mrb[64].mxu0 }
 0x17a   : > { %v1494_v33 = vadd.f32 %v2063_v40, %v1333_v31  ;;  %v1994_v11 = vpop.f32.mrb[65].mxu1  ;;  %v1485_v38 = vpop.f32.mrb[65].mxu0  ;;  %v1199_v31 = vadd.f32 %v2500_v62, %v393_v25  ;;  %v399_v40 = vld [vmem:[%s2526_s20 + $0xf8] sm:$0xff] }
 0x17b   : > { %v1995_v7 = vadd.f32 %v1994_v11, %v1993_v24  ;;  %v1486_v57 = vadd.f32 %v1485_v38, %v2638_v1  ;;  %v1996_v29 = vpop.f32.mrb[66].mxu1  ;;  %v2064_v51 = vpop.f32.mrb[66].mxu0 }
 0x17c   : > { %1566 = vst.msk [vmem:[%s2625_s23 + $0x90] sm:$0xff] %vm1016_vm0, %v1494_v33  ;;  %v1497_v32 = vadd.f32 %v2064_v51, %v1336_v36  ;;  %v1997_v18 = vpop.f32.mrb[67].mxu1  ;;  %v1488_v58 = vpop.f32.mrb[67].mxu0  ;;  %v1223_v51 = vadd.f32 %v2517_v34, %v399_v40 }
 0x17d   : > { %1564 = vst.msk [vmem:[%s2625_s23 + $0x80] sm:$0xff] %vm1016_vm0, %v1486_v57  ;;  %v1998_v41 = vadd.f32 %v1997_v18, %v1996_v29  ;;  %v1489_v23 = vadd.f32 %v1488_v58, %v2644_v52  ;;  %v1357_v56 = vadd.f32 %v1995_v7, %v1196_v27 }
 0x17e   : > { %1567 = vst.msk [vmem:[%s2625_s23 + $0x98] sm:$0xff] %vm1016_vm0, %v1497_v32 }
 0x17f   : > { %1565 = vst.msk [vmem:[%s2625_s23 + $0x88] sm:$0xff] %vm1016_vm0, %v1489_v23  ;;  %v1360_v1 = vadd.f32 %v1998_v41, %v1199_v31 }
 0x181   : > { %v1999_v46 = vpop.f32.mrb[68].mxu1  ;;  %v2067_v36 = vpop.f32.mrb[68].mxu0 }
 0x182   : > { %v1510_v55 = vadd.f32 %v2067_v36, %v1349_v17  ;;  %v2000_v47 = vpop.f32.mrb[69].mxu1  ;;  %v1501_v62 = vpop.f32.mrb[69].mxu0 }
 0x183   : > { %v2001_v52 = vadd.f32 %v2000_v47, %v1999_v46  ;;  %v1502_v2 = vadd.f32 %v1501_v62, %v1341_v60  ;;  %v2002_v49 = vpop.f32.mrb[70].mxu1  ;;  %v2068_v50 = vpop.f32.mrb[70].mxu0  ;;  %v396_v60 = vld [vmem:[%s2526_s20 + $0xe0] sm:$0xff] }
 0x184   : > { %1570 = vst.msk [vmem:[%s2625_s23 + $0xb0] sm:$0xff] %vm1016_vm0, %v1510_v55  ;;  %v1513_v54 = vadd.f32 %v2068_v50, %v1352_v5  ;;  %v2003_v43 = vpop.f32.mrb[71].mxu1  ;;  %v1504_v59 = vpop.f32.mrb[71].mxu0  ;;  %v1212_v63 = vadd.f32 %v2506_v16, %v396_v60  ;;  %v398_v5 = vld [vmem:[%s2526_s20 + $0xf0] sm:$0xff] }
 0x185   : > { %1568 = vst.msk [vmem:[%s2625_s23 + $0xa0] sm:$0xff] %vm1016_vm0, %v1502_v2  ;;  %v2004_v61 = vadd.f32 %v2003_v43, %v2002_v49  ;;  %v1505_v30 = vadd.f32 %v1504_v59, %v2678_v19  ;;  %v1365_v44 = vadd.f32 %v2001_v52, %v1204_v48  ;;  %v1220_v22 = vadd.f32 %v2512_v28, %v398_v5 }
 0x186   : > { %1571 = vst.msk [vmem:[%s2625_s23 + $0xb8] sm:$0xff] %vm1016_vm0, %v1513_v54 }
 0x187   : > { %1569 = vst.msk [vmem:[%s2625_s23 + $0xa8] sm:$0xff] %vm1016_vm0, %v1505_v30  ;;  %v1368_v4 = vadd.f32 %v2004_v61, %v1207_v9 }
 0x189   : > { %v2005_v12 = vpop.f32.mrb[72].mxu1  ;;  %v2071_v3 = vpop.f32.mrb[72].mxu0 }
 0x18a   : > { %v1526_v35 = vadd.f32 %v2071_v3, %v1365_v44  ;;  %v2006_v20 = vpop.f32.mrb[73].mxu1  ;;  %v1517_v10 = vpop.f32.mrb[73].mxu0 }
 0x18b   : > { %v2007_v19 = vadd.f32 %v2006_v20, %v2005_v12  ;;  %v1518_v13 = vadd.f32 %v1517_v10, %v1357_v56  ;;  %v2008_v8 = vpop.f32.mrb[74].mxu1  ;;  %v2072_v14 = vpop.f32.mrb[74].mxu0 }
 0x18c   : > { %1574 = vst.msk [vmem:[%s2625_s23 + $0xd0] sm:$0xff] %vm1016_vm0, %v1526_v35  ;;  %v1529_v6 = vadd.f32 %v2072_v14, %v1368_v4  ;;  %v2009_v15 = vpop.f32.mrb[75].mxu1  ;;  %v1520_v26 = vpop.f32.mrb[75].mxu0 }
 0x18d   : > { %1572 = vst.msk [vmem:[%s2625_s23 + $0xc0] sm:$0xff] %vm1016_vm0, %v1518_v13  ;;  %v2010_v53 = vadd.f32 %v2009_v15, %v2008_v8  ;;  %v1521_v45 = vadd.f32 %v1520_v26, %v1360_v1  ;;  %v1373_v17 = vadd.f32 %v2007_v19, %v1212_v63 }
 0x18e   : > { %1575 = vst.msk [vmem:[%s2625_s23 + $0xd8] sm:$0xff] %vm1016_vm0, %v1529_v6 }
 0x18f   : > { %1573 = vst.msk [vmem:[%s2625_s23 + $0xc8] sm:$0xff] %vm1016_vm0, %v1521_v45  ;;  %v1376_v16 = vadd.f32 %v2010_v53, %v1215_v39 }
 0x191   : > { %v2011_v21 = vpop.f32.mrb[76].mxu1  ;;  %v2075_v24 = vpop.f32.mrb[76].mxu0 }
 0x192   : > { %v2012_v25 = vpop.f32.mrb[77].mxu1  ;;  %v1533_v33 = vpop.f32.mrb[77].mxu0 }
 0x193   : > { %v2013_v11 = vadd.f32 %v2012_v25, %v2011_v21  ;;  %v1534_v38 = vadd.f32 %v1533_v33, %v1373_v17  ;;  %v2014_v27 = vpop.f32.mrb[78].mxu1  ;;  %v2076_v7 = vpop.f32.mrb[78].mxu0 }
 0x194   : > { %v2015_v57 = vpop.f32.mrb[79].mxu1  ;;  %v1536_v29 = vpop.f32.mrb[79].mxu0 }
 0x195   : > { %v1381_v32 = vadd.f32 %v2013_v11, %v1220_v22  ;;  %1576 = vst.msk [vmem:[%s2625_s23 + $0xe0] sm:$0xff] %vm1016_vm0, %v1534_v38  ;;  %v2016_v18 = vadd.f32 %v2015_v57, %v2014_v27  ;;  %v1537_v58 = vadd.f32 %v1536_v29, %v1376_v16 }
 0x197   : > { %v1542_v31 = vadd.f32 %v2075_v24, %v1381_v32  ;;  %v1384_v41 = vadd.f32 %v2016_v18, %v1223_v51  ;;  %1577 = vst.msk [vmem:[%s2625_s23 + $0xe8] sm:$0xff] %vm1016_vm0, %v1537_v58 }
 0x199   : > { %1578 = vst.msk [vmem:[%s2625_s23 + $0xf0] sm:$0xff] %vm1016_vm0, %v1542_v31  ;;  %v1545_v28 = vadd.f32 %v2076_v7, %v1384_v41 }
 0x19b   : > { %1579 = vst.msk [vmem:[%s2625_s23 + $0xf8] sm:$0xff] %vm1016_vm0, %v1545_v28 }
 0x19c PF: > { %s13_s12 = sadd.s32 1, %s2256_s12  }
 0x19d   : > { %p10_p4 = scmp.ge.s32.totalorder %s13_s12, 4  }
 0x19f   :  { %12 = sbr.rel (!%p10_p4) target bundleno = 1 (0x1), region = 65 }

// kernel: my_resnet_forward.31
= control target key start
LH: loop header
LB: loop body
LE: loop exit
PB: predicated region body
PF: predicated region fallthrough
CT: control target
= control target key end

     0   :  { %vm554_vm0 = vcmask 523264   ;;  %s1689_s1 = inlined_call_operand.vmem [shape: bf16[576,128], index: 1, kind: input, shape index: {}]   ;;  %s1690_s0 = inlined_call_operand.vmem [shape: bf16[128,576], index: 0, kind: input, shape index: {}]   ;;  %s1691_s2 = inlined_call_operand.vmem [shape: f32[1,128], index: 2, kind: input, shape index: {}]   ;;  %s1692_s3 = inlined_call_operand.vmem [shape: f32[1,128], index: 3, kind: input, shape index: {}]   ;;  %s1693_s4 = inlined_call_operand.vmem [shape: f32[128,128], index: 4, kind: output, shape index: {}]  }
   0x1   :  { %v1210_v0 = vld [vmem:[%s1689_s1 + $0x40] sm:$0xff]   ;;  %v1214_v4 = vld [vmem:[%s1689_s1 + $0x48] sm:$0xff]   ;;  %v1218_v8 = vld [vmem:[%s1689_s1 + $0x50] sm:$0xff]  }
   0x2   :  { %v1211_v1 = vld [vmem:[%s1689_s1 + $0xc0] sm:$0xff]   ;;  %1038 = vmatprep.subr.bf16.mxu0 %v1210_v0  ;;  %v1215_v5 = vld [vmem:[%s1689_s1 + $0xc8] sm:$0xff]   ;;  %v1219_v9 = vld [vmem:[%s1689_s1 + $0xd0] sm:$0xff]  }
   0x3   :  { %v1212_v2 = vld [vmem:[%s1689_s1] sm:$0xff]   ;;  %1102 = vmatprep.subr.bf16.mxu1 %v1211_v1  ;;  %v1216_v6 = vld [vmem:[%s1689_s1 + $0x8] sm:$0xff]   ;;  %v1220_v10 = vld [vmem:[%s1689_s1 + $0x10] sm:$0xff]  }
   0x4   :  { %v1213_v3 = vld [vmem:[%s1689_s1 + $0x80] sm:$0xff]   ;;  %1039 = vmatpush3.bf16.msra.mxu0 %v1212_v2  ;;  %v1217_v7 = vld [vmem:[%s1689_s1 + $0x88] sm:$0xff]   ;;  %v1221_v11 = vld [vmem:[%s1689_s1 + $0x90] sm:$0xff]  }
   0x5   :  { %1103 = vmatpush3.bf16.msra.mxu1 %v1213_v3  ;;  %1040 = vmatprep.subr.bf16.mxu0 %v1214_v4  ;;  %v1222_v12 = vld [vmem:[%s1689_s1 + $0x58] sm:$0xff]   ;;  %v1226_v16 = vld [vmem:[%s1689_s1 + $0x60] sm:$0xff]   ;;  %v1230_v20 = vld [vmem:[%s1689_s1 + $0x68] sm:$0xff]  }
   0x6   :  { %1104 = vmatprep.subr.bf16.mxu1 %v1215_v5  ;;  %v1223_v13 = vld [vmem:[%s1689_s1 + $0xd8] sm:$0xff]   ;;  %v1227_v17 = vld [vmem:[%s1689_s1 + $0xe0] sm:$0xff]   ;;  %v1231_v21 = vld [vmem:[%s1689_s1 + $0xe8] sm:$0xff]  }
   0x7   :  { %v1224_v14 = vld [vmem:[%s1689_s1 + $0x18] sm:$0xff]   ;;  %v1228_v18 = vld [vmem:[%s1689_s1 + $0x20] sm:$0xff]   ;;  %v1232_v22 = vld [vmem:[%s1689_s1 + $0x28] sm:$0xff]  }
   0x8   :  { %1041 = vmatpush3.bf16.msra.mxu0 %v1216_v6  ;;  %v1225_v15 = vld [vmem:[%s1689_s1 + $0x98] sm:$0xff]   ;;  %v1229_v19 = vld [vmem:[%s1689_s1 + $0xa0] sm:$0xff]   ;;  %v1233_v23 = vld [vmem:[%s1689_s1 + $0xa8] sm:$0xff]  }
   0x9   :  { %1105 = vmatpush3.bf16.msra.mxu1 %v1217_v7  ;;  %1042 = vmatprep.subr.bf16.mxu0 %v1218_v8  ;;  %v1234_v24 = vld [vmem:[%s1689_s1 + $0x70] sm:$0xff]   ;;  %v1238_v28 = vld [vmem:[%s1689_s1 + $0x78] sm:$0xff]   ;;  %v1247_v35 = vld [vmem:[%s1690_s0 + $0xc] ss:$20 sps:$4 sm:$0xff]  }
   0xa   :  { %1106 = vmatprep.subr.bf16.mxu1 %v1219_v9  ;;  %v1235_v25 = vld [vmem:[%s1689_s1 + $0xf0] sm:$0xff]   ;;  %v1239_v29 = vld [vmem:[%s1689_s1 + $0xf8] sm:$0xff]   ;;  %v1248_v36 = vld [vmem:[%s1689_s1 + $0x100] sm:$0xff]   ;;  %708 = vmatprep.mubr.bf16.mxu1 %v1247_v35 }
   0xb   :  { %v1236_v26 = vld [vmem:[%s1689_s1 + $0x30] sm:$0xff]   ;;  %v1240_v30 = vld [vmem:[%s1689_s1 + $0x38] sm:$0xff]   ;;  %v1249_v37 = vld [vmem:[%s1690_s0 + $0x2c] ss:$20 sps:$4 sm:$0xff]  }
   0xc   :  { %1043 = vmatpush3.bf16.msra.mxu0 %v1220_v10  ;;  %v1237_v27 = vld [vmem:[%s1689_s1 + $0xb0] sm:$0xff]   ;;  %v1241_v31 = vld [vmem:[%s1689_s1 + $0xb8] sm:$0xff]   ;;  %v1261_v42 = vld [vmem:[%s1689_s1 + $0x108] sm:$0xff]  }
   0xd   :  { %1107 = vmatpush3.bf16.msra.mxu1 %v1221_v11  ;;  %1044 = vmatprep.subr.bf16.mxu0 %v1222_v12  ;;  %v1242_v32 = vld [vmem:[%s1690_s0] ss:$20 sps:$4 sm:$0xff]   ;;  %v1244_v33 = vld [vmem:[%s1690_s0 + $0x4] ss:$20 sps:$4 sm:$0xff]   ;;  %v1245_v34 = vld [vmem:[%s1690_s0 + $0x8] ss:$20 sps:$4 sm:$0xff]  }
   0xe   :  { %1108 = vmatprep.subr.bf16.mxu1 %v1223_v13  ;;  %611 = vmatprep.mubr.bf16.mxu0 %v1244_v33  ;;  %v1251_v38 = vld [vmem:[%s1690_s0 + $0x34] ss:$20 sps:$4 sm:$0xff]   ;;  %v1254_v40 = vld [vmem:[%s1690_s0 + $0x30] ss:$20 sps:$4 sm:$0xff]   ;;  %v1260_v45 = vld [vmem:[%s1690_s0 + $0x58] ss:$20 sps:$4 sm:$0xff]  }
   0xf   :  { %v1253_v39 = vld [vmem:[%s1690_s0 + $0x28] ss:$20 sps:$4 sm:$0xff]   ;;  %v1259_v44 = vld [vmem:[%s1690_s0 + $0x50] ss:$20 sps:$4 sm:$0xff]   ;;  %v1266_v50 = vld [vmem:[%s1690_s0 + $0x78] ss:$20 sps:$4 sm:$0xff]  }
  0x10   :  { %1045 = vmatpush3.bf16.msra.mxu0 %v1224_v14  ;;  %v1255_v41 = vld [vmem:[%s1690_s0 + $0x54] ss:$20 sps:$4 sm:$0xff]   ;;  %v1257_v43 = vld [vmem:[%s1690_s0 + $0x5c] ss:$20 sps:$4 sm:$0xff]   ;;  %v1264_v48 = vld [vmem:[%s1690_s0 + $0x84] ss:$20 sps:$4 sm:$0xff]  }
  0x11   :  { %1109 = vmatpush3.bf16.msra.mxu1 %v1225_v15  ;;  %1046 = vmatprep.subr.bf16.mxu0 %v1226_v16  ;;  %v1274_v46 = vld [vmem:[%s1689_s1 + $0x110] sm:$0xff]   ;;  %v1287_v49 = vld [vmem:[%s1689_s1 + $0x118] sm:$0xff]   ;;  %v1270_v53 = vld [vmem:[%s1690_s0 + $0xac] ss:$20 sps:$4 sm:$0xff]  }
  0x12   :  { %1110 = vmatprep.subr.bf16.mxu1 %v1227_v17  ;;  %v1262_v47 = vld [vmem:[%s1690_s0 + $0x7c] ss:$20 sps:$4 sm:$0xff]   ;;  %v1267_v51 = vld [vmem:[%s1690_s0 + $0x80] ss:$20 sps:$4 sm:$0xff]   ;;  %v1268_v52 = vld [vmem:[%s1690_s0 + $0xa4] ss:$20 sps:$4 sm:$0xff]  }
  0x13   :  { %v1272_v54 = vld [vmem:[%s1690_s0 + $0xa0] ss:$20 sps:$4 sm:$0xff]   ;;  %v1273_v55 = vld [vmem:[%s1690_s0 + $0xa8] ss:$20 sps:$4 sm:$0xff]   ;;  %v1280_v59 = vld [vmem:[%s1690_s0 + $0xd0] ss:$20 sps:$4 sm:$0xff]  }
  0x14   :  { %1047 = vmatpush3.bf16.msra.mxu0 %v1228_v18  ;;  %v1275_v56 = vld [vmem:[%s1690_s0 + $0xcc] ss:$20 sps:$4 sm:$0xff]   ;;  %v1277_v57 = vld [vmem:[%s1690_s0 + $0xd4] ss:$20 sps:$4 sm:$0xff]   ;;  %v1283_v61 = vld [vmem:[%s1690_s0 + $0xfc] ss:$20 sps:$4 sm:$0xff]  }
  0x15   :  { %1111 = vmatpush3.bf16.msra.mxu1 %v1229_v19  ;;  %1048 = vmatprep.subr.bf16.mxu0 %v1230_v20  ;;  %v1279_v58 = vld [vmem:[%s1690_s0 + $0xc8] ss:$20 sps:$4 sm:$0xff]   ;;  %v1285_v62 = vld [vmem:[%s1690_s0 + $0xf0] ss:$20 sps:$4 sm:$0xff]   ;;  %v1286_v63 = vld [vmem:[%s1690_s0 + $0xf8] ss:$20 sps:$4 sm:$0xff]  }
  0x16   :  { %1112 = vmatprep.subr.bf16.mxu1 %v1231_v21  ;;  %v1281_v60 = vld [vmem:[%s1690_s0 + $0xf4] ss:$20 sps:$4 sm:$0xff]   ;;  %v1288_v0 = vld [vmem:[%s1690_s0 + $0x11c] ss:$20 sps:$4 sm:$0xff]   ;;  %v1290_v1 = vld [vmem:[%s1690_s0 + $0x124] ss:$20 sps:$4 sm:$0xff]  }
  0x17   :  { %v1292_v2 = vld [vmem:[%s1690_s0 + $0x118] ss:$20 sps:$4 sm:$0xff]   ;;  %v1293_v3 = vld [vmem:[%s1690_s0 + $0x120] ss:$20 sps:$4 sm:$0xff]   ;;  %v1294_v4 = vld [vmem:[%s1690_s0 + $0x10] ss:$20 sps:$4 sm:$0xff]  }
  0x18   :  { %1049 = vmatpush3.bf16.msra.mxu0 %v1232_v22  ;;  %v1295_v5 = vld [vmem:[%s1690_s0 + $0xb0] ss:$20 sps:$4 sm:$0xff]   ;;  %v1296_v6 = vld [vmem:[%s1690_s0 + $0x38] ss:$20 sps:$4 sm:$0xff]   ;;  %v1298_v8 = vld [vmem:[%s1690_s0 + $0x60] ss:$20 sps:$4 sm:$0xff]  }
  0x19   :  { %1113 = vmatpush3.bf16.msra.mxu1 %v1233_v23  ;;  %1050 = vmatprep.subr.bf16.mxu0 %v1234_v24  ;;  %v1297_v7 = vld [vmem:[%s1690_s0 + $0xd8] ss:$20 sps:$4 sm:$0xff]   ;;  %v1299_v9 = vld [vmem:[%s1690_s0 + $0x100] ss:$20 sps:$4 sm:$0xff]   ;;  %v1300_v10 = vld [vmem:[%s1690_s0 + $0x88] ss:$20 sps:$4 sm:$0xff]  }
  0x1a   :  { %1114 = vmatprep.subr.bf16.mxu1 %v1235_v25  ;;  %v1301_v11 = vld [vmem:[%s1690_s0 + $0x128] ss:$20 sps:$4 sm:$0xff]  }
  0x1c   :  { %1051 = vmatpush3.bf16.msra.mxu0 %v1236_v26 }
  0x1d   :  { %1115 = vmatpush3.bf16.msra.mxu1 %v1237_v27  ;;  %1052 = vmatprep.subr.bf16.mxu0 %v1238_v28 }
  0x1e   :  { %1116 = vmatprep.subr.bf16.mxu1 %v1239_v29 }
  0x20   :  { %1053 = vmatpush3.bf16.msra.mxu0 %v1240_v30 }
  0x21   :  { %1117 = vmatpush3.bf16.msra.mxu1 %v1241_v31  ;;  %1178 = vmatprep.subr.bf16.mxu0 %v1248_v36 }
  0x22   :  { %1202 = vmatprep.subr.bf16.mxu1 %v1248_v36 }
  0x23   :  { %612 = vmatmul.mubr.bf16.vlgmr.msra.gmra.mrb[0].mxu0 %v1242_v32 }
  0x24   :  { %709 = vmatmul.mubr.bf16.vlgmr.msra.gmra.mrb[0].mxu1 %v1245_v34  ;;  %1179 = vmatpush3.bf16.msra.mxu0 %v1248_v36 }
  0x25   :  { %1206 = vmatpush3.bf16.msra.mxu1 %v1248_v36  ;;  %619 = vmatprep.mubr.bf16.mxu0 %v1249_v37 }
  0x26   :  { %716 = vmatprep.mubr.bf16.mxu1 %v1251_v38  ;;  %1180 = vmatprep.subr.bf16.mxu0 %v1261_v42 }
  0x27   :  { %1203 = vmatprep.subr.bf16.mxu1 %v1261_v42 }
  0x28   :  { %1181 = vmatpush3.bf16.msra.mxu0 %v1261_v42 }
  0x29   :  { %1207 = vmatpush3.bf16.msra.mxu1 %v1261_v42  ;;  %1182 = vmatprep.subr.bf16.mxu0 %v1274_v46 }
  0x2a   :  { %1204 = vmatprep.subr.bf16.mxu1 %v1274_v46 }
  0x2b   :  { %620 = vmatmul.mubr.bf16.gmra.mrb[4].mxu0 %v1253_v39 }
  0x2c   :  { %717 = vmatmul.mubr.bf16.gmra.mrb[4].mxu1 %v1254_v40  ;;  %627 = vmatprep.mubr.bf16.mxu0 %v1255_v41 }
  0x2d   :  { %724 = vmatprep.mubr.bf16.mxu1 %v1257_v43  ;;  %1183 = vmatpush3.bf16.msra.mxu0 %v1274_v46 }
  0x2e   :  { %1208 = vmatpush3.bf16.msra.mxu1 %v1274_v46  ;;  %1184 = vmatprep.subr.bf16.mxu0 %v1287_v49 }
  0x2f   :  { %1205 = vmatprep.subr.bf16.mxu1 %v1287_v49 }
  0x31   :  { %1185 = vmatpush3.bf16.msra.mxu0 %v1287_v49 }
  0x32   :  { %1209 = vmatpush3.bf16.msra.mxu1 %v1287_v49 }
  0x33   :  { %628 = vmatmul.mubr.bf16.gmra.mrb[8].mxu0 %v1259_v44 }
  0x34   :  { %725 = vmatmul.mubr.bf16.gmra.mrb[8].mxu1 %v1260_v45  ;;  %635 = vmatprep.mubr.bf16.mxu0 %v1262_v47 }
  0x35   :  { %732 = vmatprep.mubr.bf16.mxu1 %v1264_v48 }
  0x3b   :  { %636 = vmatmul.mubr.bf16.gmra.mrb[12].mxu0 %v1266_v50 }
  0x3c   :  { %733 = vmatmul.mubr.bf16.gmra.mrb[12].mxu1 %v1267_v51  ;;  %643 = vmatprep.mubr.bf16.mxu0 %v1268_v52 }
  0x3d   :  { %740 = vmatprep.mubr.bf16.mxu1 %v1270_v53 }
  0x43   :  { %644 = vmatmul.mubr.bf16.gmra.mrb[16].mxu0 %v1272_v54 }
  0x44   :  { %741 = vmatmul.mubr.bf16.gmra.mrb[16].mxu1 %v1273_v55  ;;  %651 = vmatprep.mubr.bf16.mxu0 %v1275_v56 }
  0x45   :  { %748 = vmatprep.mubr.bf16.mxu1 %v1277_v57 }
  0x4b   :  { %652 = vmatmul.mubr.bf16.gmra.mrb[20].mxu0 %v1279_v58 }
  0x4c   :  { %749 = vmatmul.mubr.bf16.gmra.mrb[20].mxu1 %v1280_v59  ;;  %659 = vmatprep.mubr.bf16.mxu0 %v1281_v60 }
  0x4d   :  { %756 = vmatprep.mubr.bf16.mxu1 %v1283_v61 }
  0x53   :  { %660 = vmatmul.mubr.bf16.gmra.mrb[24].mxu0 %v1285_v62 }
  0x54   :  { %757 = vmatmul.mubr.bf16.gmra.mrb[24].mxu1 %v1286_v63  ;;  %667 = vmatprep.mubr.bf16.mxu0 %v1288_v0 }
  0x55   :  { %764 = vmatprep.mubr.bf16.mxu1 %v1290_v1 }
  0x5b   :  { %668 = vmatmul.mubr.bf16.gmra.mrb[28].mxu0 %v1292_v2 }
  0x5c   :  { %765 = vmatmul.mubr.bf16.gmra.mrb[28].mxu1 %v1293_v3  ;;  %1186 = vmatprep.mubr.msk.bf16.mxu0 %vm554_vm0, %v1294_v4 }
  0x5d   :  { %1194 = vmatprep.mubr.msk.bf16.mxu1 %vm554_vm0, %v1295_v5 }
  0x63   :  { %1187 = vmatmul.mubr.msk.bf16.vlgmr.msra.gmra.mrb[32].mxu0 %vm554_vm0, %v1296_v6 }
  0x64   :  { %1195 = vmatmul.mubr.msk.bf16.vlgmr.msra.gmra.mrb[32].mxu1 %vm554_vm0, %v1297_v7  ;;  %1190 = vmatprep.mubr.msk.bf16.mxu0 %vm554_vm0, %v1298_v8 }
  0x65   :  { %1198 = vmatprep.mubr.msk.bf16.mxu1 %vm554_vm0, %v1299_v9 }
  0x6b   :  { %1191 = vmatmul.mubr.msk.bf16.gmra.mrb[36].mxu0 %vm554_vm0, %v1300_v10 }
  0x6c   :  { %1199 = vmatmul.mubr.msk.bf16.gmra.mrb[36].mxu1 %vm554_vm0, %v1301_v11 }
  0xf6   :  { %v1054_v12 = vpop.f32.mrb[0].mxu0 }
  0xf7   :  { %v1118_v13 = vpop.f32.mrb[0].mxu1  ;;  %v1055_v14 = vpop.f32.mrb[1].mxu0 }
  0xf8   :  { %v1056_v15 = vadd.f32 %v1055_v14, %v1054_v12  ;;  %v1119_v16 = vpop.f32.mrb[1].mxu1  ;;  %v1057_v17 = vpop.f32.mrb[2].mxu0 }
  0xf9   :  { %v1120_v18 = vadd.f32 %v1119_v16, %v1118_v13  ;;  %v1121_v19 = vpop.f32.mrb[2].mxu1  ;;  %v1058_v20 = vpop.f32.mrb[3].mxu0 }
  0xfa   :  { %v1059_v21 = vadd.f32 %v1058_v20, %v1057_v17  ;;  %v1122_v22 = vpop.f32.mrb[3].mxu1 }
  0xfb   :  { %v1123_v23 = vadd.f32 %v1122_v22, %v1121_v19  ;;  %v1563_v24 = vadd.f32 %v1120_v18, %v1056_v15 }
  0xfd   :  { %v1565_v25 = vadd.f32 %v1123_v23, %v1059_v21 }
  0xfe   :  { %v1060_v26 = vpop.f32.mrb[4].mxu0 }
  0xff   :  { %v1124_v27 = vpop.f32.mrb[4].mxu1  ;;  %v1061_v28 = vpop.f32.mrb[5].mxu0 }
 0x100   :  { %v1062_v29 = vadd.f32 %v1061_v28, %v1060_v26  ;;  %v1125_v30 = vpop.f32.mrb[5].mxu1  ;;  %v1063_v31 = vpop.f32.mrb[6].mxu0 }
 0x101   :  { %v1126_v32 = vadd.f32 %v1125_v30, %v1124_v27  ;;  %v1127_v33 = vpop.f32.mrb[6].mxu1  ;;  %v1064_v34 = vpop.f32.mrb[7].mxu0 }
 0x102   :  { %v1065_v35 = vadd.f32 %v1064_v34, %v1063_v31  ;;  %v1128_v36 = vpop.f32.mrb[7].mxu1 }
 0x103   :  { %v1129_v37 = vadd.f32 %v1128_v36, %v1127_v33  ;;  %v1567_v38 = vadd.f32 %v1126_v32, %v1062_v29 }
 0x105   :  { %v1569_v39 = vadd.f32 %v1129_v37, %v1065_v35 }
 0x106   :  { %v1066_v40 = vpop.f32.mrb[8].mxu0 }
 0x107   :  { %v1130_v41 = vpop.f32.mrb[8].mxu1  ;;  %v1067_v42 = vpop.f32.mrb[9].mxu0 }
 0x108   :  { %v1068_v43 = vadd.f32 %v1067_v42, %v1066_v40  ;;  %v1131_v44 = vpop.f32.mrb[9].mxu1  ;;  %v1069_v45 = vpop.f32.mrb[10].mxu0 }
 0x109   :  { %v1132_v46 = vadd.f32 %v1131_v44, %v1130_v41  ;;  %v1133_v47 = vpop.f32.mrb[10].mxu1  ;;  %v1070_v48 = vpop.f32.mrb[11].mxu0 }
 0x10a   :  { %v1071_v49 = vadd.f32 %v1070_v48, %v1069_v45  ;;  %v1134_v50 = vpop.f32.mrb[11].mxu1 }
 0x10b   :  { %v1135_v51 = vadd.f32 %v1134_v50, %v1133_v47  ;;  %v1571_v52 = vadd.f32 %v1132_v46, %v1068_v43 }
 0x10d   :  { %v1573_v53 = vadd.f32 %v1135_v51, %v1071_v49 }
 0x10e   :  { %v1072_v54 = vpop.f32.mrb[12].mxu0 }
 0x10f   :  { %v1136_v55 = vpop.f32.mrb[12].mxu1  ;;  %v1073_v56 = vpop.f32.mrb[13].mxu0 }
 0x110   :  { %v1074_v57 = vadd.f32 %v1073_v56, %v1072_v54  ;;  %v1137_v58 = vpop.f32.mrb[13].mxu1  ;;  %v1075_v59 = vpop.f32.mrb[14].mxu0 }
 0x111   :  { %v1138_v60 = vadd.f32 %v1137_v58, %v1136_v55  ;;  %v1139_v61 = vpop.f32.mrb[14].mxu1  ;;  %v1076_v62 = vpop.f32.mrb[15].mxu0 }
 0x112   :  { %v1077_v63 = vadd.f32 %v1076_v62, %v1075_v59  ;;  %v1140_v0 = vpop.f32.mrb[15].mxu1 }
 0x113   :  { %v1141_v1 = vadd.f32 %v1140_v0, %v1139_v61  ;;  %v1575_v2 = vadd.f32 %v1138_v60, %v1074_v57 }
 0x115   :  { %v1577_v3 = vadd.f32 %v1141_v1, %v1077_v63 }
 0x116   :  { %v1078_v4 = vpop.f32.mrb[16].mxu0 }
 0x117   :  { %v1142_v5 = vpop.f32.mrb[16].mxu1  ;;  %v1079_v6 = vpop.f32.mrb[17].mxu0 }
 0x118   :  { %v1080_v7 = vadd.f32 %v1079_v6, %v1078_v4  ;;  %v1143_v8 = vpop.f32.mrb[17].mxu1  ;;  %v1081_v9 = vpop.f32.mrb[18].mxu0 }
 0x119   :  { %v1144_v10 = vadd.f32 %v1143_v8, %v1142_v5  ;;  %v1145_v11 = vpop.f32.mrb[18].mxu1  ;;  %v1082_v12 = vpop.f32.mrb[19].mxu0  ;;  %v1590_v5 = vld [vmem:[%s1691_s2] ss:$0 sm:$0xff] }
 0x11a   :  { %v1083_v13 = vadd.f32 %v1082_v12, %v1081_v9  ;;  %v1146_v14 = vpop.f32.mrb[19].mxu1  ;;  %v1596_v9 = vld [vmem:[%s1692_s3] ss:$0 sm:$0xff] }
 0x11b   :  { %v1147_v15 = vadd.f32 %v1146_v14, %v1145_v11  ;;  %v743_v16 = vadd.f32 %v1144_v10, %v1080_v7 }
 0x11d   :  { %v1579_v17 = vadd.f32 %v1147_v15, %v1083_v13 }
 0x11e   :  { %v1084_v18 = vpop.f32.mrb[20].mxu0 }
 0x11f   :  { %v1148_v19 = vpop.f32.mrb[20].mxu1  ;;  %v1085_v20 = vpop.f32.mrb[21].mxu0 }
 0x120   :  { %v1086_v21 = vadd.f32 %v1085_v20, %v1084_v18  ;;  %v1149_v22 = vpop.f32.mrb[21].mxu1  ;;  %v1087_v23 = vpop.f32.mrb[22].mxu0 }
 0x121   :  { %v1150_v26 = vadd.f32 %v1149_v22, %v1148_v19  ;;  %v1151_v27 = vpop.f32.mrb[22].mxu1  ;;  %v1088_v28 = vpop.f32.mrb[23].mxu0 }
 0x122   :  { %v1089_v29 = vadd.f32 %v1088_v28, %v1087_v23  ;;  %v1152_v30 = vpop.f32.mrb[23].mxu1 }
 0x123   :  { %v1153_v31 = vadd.f32 %v1152_v30, %v1151_v27  ;;  %v751_v32 = vadd.f32 %v1150_v26, %v1086_v21 }
 0x125   :  { %v754_v33 = vadd.f32 %v1153_v31, %v1089_v29 }
 0x126   :  { %v1090_v34 = vpop.f32.mrb[24].mxu0 }
 0x127   :  { %v1154_v35 = vpop.f32.mrb[24].mxu1  ;;  %v1091_v36 = vpop.f32.mrb[25].mxu0 }
 0x128   :  { %v1092_v37 = vadd.f32 %v1091_v36, %v1090_v34  ;;  %v1155_v40 = vpop.f32.mrb[25].mxu1  ;;  %v1093_v41 = vpop.f32.mrb[26].mxu0 }
 0x129   :  { %v1156_v42 = vadd.f32 %v1155_v40, %v1154_v35  ;;  %v1157_v43 = vpop.f32.mrb[26].mxu1  ;;  %v1094_v44 = vpop.f32.mrb[27].mxu0 }
 0x12a   :  { %v1095_v45 = vadd.f32 %v1094_v44, %v1093_v41  ;;  %v1158_v46 = vpop.f32.mrb[27].mxu1 }
 0x12b   :  { %v1159_v47 = vadd.f32 %v1158_v46, %v1157_v43  ;;  %v1581_v48 = vadd.f32 %v1156_v42, %v1092_v37 }
 0x12d   :  { %v1583_v49 = vadd.f32 %v1159_v47, %v1095_v45 }
 0x12e   :  { %v1096_v50 = vpop.f32.mrb[28].mxu0 }
 0x12f   :  { %v1160_v51 = vpop.f32.mrb[28].mxu1  ;;  %v1097_v54 = vpop.f32.mrb[29].mxu0 }
 0x130   :  { %v1098_v55 = vadd.f32 %v1097_v54, %v1096_v50  ;;  %v1161_v56 = vpop.f32.mrb[29].mxu1  ;;  %v1099_v57 = vpop.f32.mrb[30].mxu0 }
 0x131   :  { %v1162_v58 = vadd.f32 %v1161_v56, %v1160_v51  ;;  %v1163_v59 = vpop.f32.mrb[30].mxu1  ;;  %v1100_v60 = vpop.f32.mrb[31].mxu0 }
 0x132   :  { %v1101_v61 = vadd.f32 %v1100_v60, %v1099_v57  ;;  %v1164_v62 = vpop.f32.mrb[31].mxu1 }
 0x133   :  { %v1165_v63 = vadd.f32 %v1164_v62, %v1163_v59  ;;  %v767_v0 = vadd.f32 %v1162_v58, %v1098_v55 }
 0x135   :  { %v1585_v1 = vadd.f32 %v1165_v63, %v1101_v61 }
 0x136   :  { %v1188_v4 = vpop.f32.mrb[32].mxu0 }
 0x137   :  { %v816_v6 = vadd.f32 %v1188_v4, %v1567_v38  ;;  %v1196_v7 = vpop.f32.mrb[32].mxu1  ;;  %v807_v8 = vpop.f32.mrb[33].mxu0 }
 0x138   :  { %v848_v10 = vadd.f32 %v1196_v7, %v751_v32  ;;  %v808_v11 = vadd.f32 %v807_v8, %v1563_v24  ;;  %v839_v12 = vpop.f32.mrb[33].mxu1  ;;  %v1189_v13 = vpop.f32.mrb[34].mxu0 }
 0x139   :  { %v879_v14 = vmul.f32 %v1590_v5, %v816_v6  ;;  %v840_v15 = vadd.f32 %v839_v12, %v743_v16  ;;  %v819_v18 = vadd.f32 %v1189_v13, %v1569_v39  ;;  %v1197_v19 = vpop.f32.mrb[34].mxu1  ;;  %v810_v20 = vpop.f32.mrb[35].mxu0 }
 0x13a   :  { %v887_v38 = vmul.f32 %v1590_v5, %v848_v10  ;;  %v877_v21 = vmul.f32 %v1590_v5, %v808_v11  ;;  %v851_v22 = vadd.f32 %v1197_v19, %v754_v33  ;;  %v811_v23 = vadd.f32 %v810_v20, %v1565_v25  ;;  %v842_v26 = vpop.f32.mrb[35].mxu1 }
 0x13b   :  { %v902_v27 = vadd.f32 %v1596_v9, %v879_v14  ;;  %v885_v24 = vmul.f32 %v1590_v5, %v840_v15  ;;  %v880_v28 = vmul.f32 %v1590_v5, %v819_v18  ;;  %v843_v16 = vadd.f32 %v842_v26, %v1579_v17 }
 0x13c   :  { %v910_v39 = vadd.f32 %v1596_v9, %v887_v38  ;;  %v900_v29 = vadd.f32 %v1596_v9, %v877_v21  ;;  %v888_v30 = vmul.f32 %v1590_v5, %v851_v22  ;;  %v878_v31 = vmul.f32 %v1590_v5, %v811_v23 }
 0x13d   :  { %v918_v32 = vmax.f32 %v902_v27, 0.0  ;;  %v908_v25 = vadd.f32 %v1596_v9, %v885_v24  ;;  %v903_v33 = vadd.f32 %v1596_v9, %v880_v28  ;;  %v886_v34 = vmul.f32 %v1590_v5, %v843_v16 }
 0x13e   :  { %v926_v35 = vmax.f32 %v910_v39, 0.0  ;;  %v916_v36 = vmax.f32 %v900_v29, 0.0  ;;  %v911_v37 = vadd.f32 %v1596_v9, %v888_v30  ;;  %v901_v17 = vadd.f32 %v1596_v9, %v878_v31  ;;  %v1192_v40 = vpop.f32.mrb[36].mxu0 }
 0x13f   :  { %934 = vst [vmem:[%s1693_s4 + $0x10] sm:$0xff] %v918_v32  ;;  %v924_v41 = vmax.f32 %v908_v25, 0.0  ;;  %v919_v42 = vmax.f32 %v903_v33, 0.0  ;;  %v909_v43 = vadd.f32 %v1596_v9, %v886_v34  ;;  %v832_v44 = vadd.f32 %v1192_v40, %v1575_v2  ;;  %v1200_v45 = vpop.f32.mrb[36].mxu1  ;;  %v823_v46 = vpop.f32.mrb[37].mxu0 }
 0x140   :  { %942 = vst [vmem:[%s1693_s4 + $0x50] sm:$0xff] %v926_v35  ;;  %932 = vst [vmem:[%s1693_s4] sm:$0xff] %v916_v36  ;;  %v927_v47 = vmax.f32 %v911_v37, 0.0  ;;  %v917_v50 = vmax.f32 %v901_v17, 0.0  ;;  %v864_v51 = vadd.f32 %v1200_v45, %v767_v0  ;;  %v824_v54 = vadd.f32 %v823_v46, %v1571_v52  ;;  %v855_v55 = vpop.f32.mrb[37].mxu1  ;;  %v1193_v56 = vpop.f32.mrb[38].mxu0 }
 0x141   :  { %940 = vst [vmem:[%s1693_s4 + $0x40] sm:$0xff] %v924_v41  ;;  %935 = vst [vmem:[%s1693_s4 + $0x18] sm:$0xff] %v919_v42  ;;  %v925_v2 = vmax.f32 %v909_v43, 0.0  ;;  %v883_v57 = vmul.f32 %v1590_v5, %v832_v44  ;;  %v856_v58 = vadd.f32 %v855_v55, %v1581_v48  ;;  %v835_v59 = vadd.f32 %v1193_v56, %v1577_v3  ;;  %v1201_v60 = vpop.f32.mrb[38].mxu1  ;;  %v826_v61 = vpop.f32.mrb[39].mxu0 }
 0x142   :  { %943 = vst [vmem:[%s1693_s4 + $0x58] sm:$0xff] %v927_v47  ;;  %933 = vst [vmem:[%s1693_s4 + $0x8] sm:$0xff] %v917_v50  ;;  %v891_v52 = vmul.f32 %v1590_v5, %v864_v51  ;;  %v881_v62 = vmul.f32 %v1590_v5, %v824_v54  ;;  %v867_v63 = vadd.f32 %v1201_v60, %v1585_v1  ;;  %v858_v0 = vpop.f32.mrb[39].mxu1 }
 0x143   :  { %v827_v48 = vadd.f32 %v826_v61, %v1573_v53  ;;  %941 = vst [vmem:[%s1693_s4 + $0x48] sm:$0xff] %v925_v2  ;;  %v906_v3 = vadd.f32 %v1596_v9, %v883_v57  ;;  %v889_v4 = vmul.f32 %v1590_v5, %v856_v58  ;;  %v884_v6 = vmul.f32 %v1590_v5, %v835_v59 }
 0x144   :  { %v859_v7 = vadd.f32 %v858_v0, %v1583_v49  ;;  %v914_v8 = vadd.f32 %v1596_v9, %v891_v52  ;;  %v904_v10 = vadd.f32 %v1596_v9, %v881_v62  ;;  %v892_v1 = vmul.f32 %v1590_v5, %v867_v63 }
 0x145   :  { %v882_v53 = vmul.f32 %v1590_v5, %v827_v48  ;;  %v922_v11 = vmax.f32 %v906_v3, 0.0  ;;  %v912_v12 = vadd.f32 %v1596_v9, %v889_v4  ;;  %v907_v13 = vadd.f32 %v1596_v9, %v884_v6 }
 0x146   :  { %v890_v14 = vmul.f32 %v1590_v5, %v859_v7  ;;  %v930_v15 = vmax.f32 %v914_v8, 0.0  ;;  %v920_v18 = vmax.f32 %v904_v10, 0.0  ;;  %v915_v19 = vadd.f32 %v1596_v9, %v892_v1 }
 0x147   :  { %v905_v49 = vadd.f32 %v1596_v9, %v882_v53  ;;  %938 = vst [vmem:[%s1693_s4 + $0x30] sm:$0xff] %v922_v11  ;;  %v928_v20 = vmax.f32 %v912_v12, 0.0  ;;  %v923_v38 = vmax.f32 %v907_v13, 0.0 }
 0x148   :  { %v913_v21 = vadd.f32 %v1596_v9, %v890_v14  ;;  %946 = vst [vmem:[%s1693_s4 + $0x70] sm:$0xff] %v930_v15  ;;  %936 = vst [vmem:[%s1693_s4 + $0x20] sm:$0xff] %v920_v18  ;;  %v931_v5 = vmax.f32 %v915_v19, 0.0 }
 0x149   :  { %v921_v22 = vmax.f32 %v905_v49, 0.0  ;;  %944 = vst [vmem:[%s1693_s4 + $0x60] sm:$0xff] %v928_v20  ;;  %939 = vst [vmem:[%s1693_s4 + $0x38] sm:$0xff] %v923_v38 }
 0x14a   :  { %v929_v23 = vmax.f32 %v913_v21, 0.0  ;;  %947 = vst [vmem:[%s1693_s4 + $0x78] sm:$0xff] %v931_v5 }
 0x14b   :  { %937 = vst [vmem:[%s1693_s4 + $0x28] sm:$0xff] %v921_v22 }
 0x14c   :  { %945 = vst [vmem:[%s1693_s4 + $0x68] sm:$0xff] %v929_v23 }

// kernel: my_resnet_forward.30
= control target key start
LH: loop header
LB: loop body
LE: loop exit
PB: predicated region body
PF: predicated region fallthrough
CT: control target
= control target key end

     0   :  { %vm100_vm0 = vcmask 523264   ;;  %s425_s1 = inlined_call_operand.vmem [shape: bf16[64,128], index: 1, kind: input, shape index: {}]   ;;  %s426_s0 = inlined_call_operand.vmem [shape: bf16[128,64], index: 0, kind: input, shape index: {}]   ;;  %s427_s2 = inlined_call_operand.vmem [shape: f32[128,128], index: 2, kind: output, shape index: {}]  }
   0x1   :  { %v306_v0 = vld [vmem:[%s425_s1] sm:$0xff]   ;;  %v307_v1 = vld [vmem:[%s425_s1 + $0x8] sm:$0xff]   ;;  %v308_v2 = vld [vmem:[%s425_s1 + $0x10] sm:$0xff]  }
   0x2   :  { %274 = vmatprep.subr.bf16.mxu0 %v306_v0  ;;  %298 = vmatprep.subr.bf16.mxu1 %v306_v0  ;;  %v310_v3 = vld [vmem:[%s426_s0] sm:$0xff]   ;;  %v309_v5 = vld [vmem:[%s425_s1 + $0x18] sm:$0xff]   ;;  %v312_v6 = vld [vmem:[%s426_s0 + $0x8] sm:$0xff]  }
   0x3   :  { %275 = vmatpush3.bf16.msra.mxu0 %v306_v0  ;;  %302 = vmatpush3.bf16.msra.mxu1 %v306_v0  ;;  %v311_v4 = vld [vmem:[%s426_s0 + $0x20] sm:$0xff]   ;;  %v313_v7 = vld [vmem:[%s426_s0 + $0x28] sm:$0xff]   ;;  %v314_v8 = vld [vmem:[%s426_s0 + $0x10] sm:$0xff]  }
   0x4   :  { %276 = vmatprep.subr.bf16.mxu0 %v307_v1  ;;  %299 = vmatprep.subr.bf16.mxu1 %v307_v1  ;;  %v315_v9 = vld [vmem:[%s426_s0 + $0x30] sm:$0xff]   ;;  %v316_v10 = vld [vmem:[%s426_s0 + $0x18] sm:$0xff]  }
   0x5   :  { %282 = vmatprep.mubr.msk.bf16.mxu0 %vm100_vm0, %v310_v3  ;;  %290 = vmatprep.mubr.msk.bf16.mxu1 %vm100_vm0, %v311_v4  ;;  %v317_v11 = vld [vmem:[%s426_s0 + $0x38] sm:$0xff]  }
   0x7   :  { %277 = vmatpush3.bf16.msra.mxu0 %v307_v1  ;;  %303 = vmatpush3.bf16.msra.mxu1 %v307_v1 }
   0x8   :  { %278 = vmatprep.subr.bf16.mxu0 %v308_v2  ;;  %300 = vmatprep.subr.bf16.mxu1 %v308_v2 }
   0xb   :  { %279 = vmatpush3.bf16.msra.mxu0 %v308_v2  ;;  %304 = vmatpush3.bf16.msra.mxu1 %v308_v2 }
   0xc   :  { %280 = vmatprep.subr.bf16.mxu0 %v309_v5  ;;  %301 = vmatprep.subr.bf16.mxu1 %v309_v5 }
   0xf   :  { %281 = vmatpush3.bf16.msra.mxu0 %v309_v5  ;;  %305 = vmatpush3.bf16.msra.mxu1 %v309_v5 }
  0x12   :  { %283 = vmatmul.mubr.msk.bf16.vlgmr.msra.gmra.mrb[0].mxu0 %vm100_vm0, %v312_v6  ;;  %291 = vmatmul.mubr.msk.bf16.vlgmr.msra.gmra.mrb[0].mxu1 %vm100_vm0, %v313_v7 }
  0x13   :  { %286 = vmatprep.mubr.msk.bf16.mxu0 %vm100_vm0, %v314_v8  ;;  %294 = vmatprep.mubr.msk.bf16.mxu1 %vm100_vm0, %v315_v9 }
  0x1a   :  { %287 = vmatmul.mubr.msk.bf16.gmra.mrb[4].mxu0 %vm100_vm0, %v316_v10  ;;  %295 = vmatmul.mubr.msk.bf16.gmra.mrb[4].mxu1 %vm100_vm0, %v317_v11 }
  0xe5   :  { %v284_v12 = vpop.f32.mrb[0].mxu0  ;;  %v292_v13 = vpop.f32.mrb[0].mxu1 }
  0xe6   :  { %224 = vst [vmem:[%s427_s2 + $0x10] sm:$0xff] %v284_v12  ;;  %232 = vst [vmem:[%s427_s2 + $0x50] sm:$0xff] %v292_v13  ;;  %v159_v14 = vpop.f32.mrb[1].mxu0  ;;  %v191_v15 = vpop.f32.mrb[1].mxu1 }
  0xe7   :  { %222 = vst [vmem:[%s427_s2] sm:$0xff] %v159_v14  ;;  %230 = vst [vmem:[%s427_s2 + $0x40] sm:$0xff] %v191_v15  ;;  %v285_v16 = vpop.f32.mrb[2].mxu0  ;;  %v293_v17 = vpop.f32.mrb[2].mxu1 }
  0xe8   :  { %225 = vst [vmem:[%s427_s2 + $0x18] sm:$0xff] %v285_v16  ;;  %233 = vst [vmem:[%s427_s2 + $0x58] sm:$0xff] %v293_v17  ;;  %v162_v18 = vpop.f32.mrb[3].mxu0  ;;  %v194_v19 = vpop.f32.mrb[3].mxu1 }
  0xe9   :  { %223 = vst [vmem:[%s427_s2 + $0x8] sm:$0xff] %v162_v18  ;;  %231 = vst [vmem:[%s427_s2 + $0x48] sm:$0xff] %v194_v19 }
  0xed   :  { %v288_v20 = vpop.f32.mrb[4].mxu0  ;;  %v296_v21 = vpop.f32.mrb[4].mxu1 }
  0xee   :  { %228 = vst [vmem:[%s427_s2 + $0x30] sm:$0xff] %v288_v20  ;;  %236 = vst [vmem:[%s427_s2 + $0x70] sm:$0xff] %v296_v21  ;;  %v175_v22 = vpop.f32.mrb[5].mxu0  ;;  %v207_v23 = vpop.f32.mrb[5].mxu1 }
  0xef   :  { %226 = vst [vmem:[%s427_s2 + $0x20] sm:$0xff] %v175_v22  ;;  %234 = vst [vmem:[%s427_s2 + $0x60] sm:$0xff] %v207_v23  ;;  %v289_v24 = vpop.f32.mrb[6].mxu0  ;;  %v297_v25 = vpop.f32.mrb[6].mxu1 }
  0xf0   :  { %229 = vst [vmem:[%s427_s2 + $0x38] sm:$0xff] %v289_v24  ;;  %237 = vst [vmem:[%s427_s2 + $0x78] sm:$0xff] %v297_v25  ;;  %v178_v26 = vpop.f32.mrb[7].mxu0  ;;  %v210_v27 = vpop.f32.mrb[7].mxu1 }
  0xf1   :  { %227 = vst [vmem:[%s427_s2 + $0x28] sm:$0xff] %v178_v26  ;;  %235 = vst [vmem:[%s427_s2 + $0x68] sm:$0xff] %v210_v27 }

// kernel: my_resnet_forward.33
= control target key start
LH: loop header
LB: loop body
LE: loop exit
PB: predicated region body
PF: predicated region fallthrough
CT: control target
= control target key end

     0   :  { %s254_s0 = inlined_call_operand.vmem [shape: f32[128,128], index: 0, kind: input, shape index: {}]   ;;  %s255_s1 = inlined_call_operand.vmem [shape: f32[1,128], index: 1, kind: input, shape index: {}]   ;;  %s256_s2 = inlined_call_operand.vmem [shape: f32[1,128], index: 2, kind: input, shape index: {}]   ;;  %s257_s3 = inlined_call_operand.vmem [shape: f32[128,128], index: 3, kind: output, shape index: {}]  }
   0x1   :  { %v14_v0 = vld [vmem:[%s254_s0] sm:$0xff]  ;;  %v15_v4 = vld [vmem:[%s254_s0 + $0x8] sm:$0xff]  ;;  %v16_v5 = vld [vmem:[%s254_s0 + $0x10] sm:$0xff] }
   0x2   :  { %v112_v1 = vld [vmem:[%s255_s1] ss:$0 sm:$0xff]  ;;  %v17_v6 = vld [vmem:[%s254_s0 + $0x18] sm:$0xff]  ;;  %v19_v11 = vld [vmem:[%s254_s0 + $0x28] sm:$0xff] }
   0x3   :  { %v143_v2 = vld [vmem:[%s256_s2] ss:$0 sm:$0xff]  ;;  %v37_v3 = vmul.f32 %v112_v1, %v14_v0  ;;  %v38_v7 = vmul.f32 %v112_v1, %v15_v4  ;;  %v39_v8 = vmul.f32 %v112_v1, %v16_v5  ;;  %v40_v9 = vmul.f32 %v112_v1, %v17_v6  ;;  %v20_v12 = vld [vmem:[%s254_s0 + $0x30] sm:$0xff]  ;;  %v21_v17 = vld [vmem:[%s254_s0 + $0x38] sm:$0xff] }
   0x4   :  { %v18_v10 = vld [vmem:[%s254_s0 + $0x20] sm:$0xff]  ;;  %v42_v15 = vmul.f32 %v112_v1, %v19_v11  ;;  %v43_v16 = vmul.f32 %v112_v1, %v20_v12  ;;  %v44_v21 = vmul.f32 %v112_v1, %v21_v17  ;;  %v23_v27 = vld [vmem:[%s254_s0 + $0x48] sm:$0xff]  ;;  %v24_v28 = vld [vmem:[%s254_s0 + $0x50] sm:$0xff] }
   0x5   :  { %v60_v13 = vadd.f32 %v143_v2, %v37_v3  ;;  %v41_v14 = vmul.f32 %v112_v1, %v18_v10  ;;  %v61_v18 = vadd.f32 %v143_v2, %v38_v7  ;;  %v62_v19 = vadd.f32 %v143_v2, %v39_v8  ;;  %v22_v22 = vld [vmem:[%s254_s0 + $0x40] sm:$0xff]  ;;  %v25_v29 = vld [vmem:[%s254_s0 + $0x58] sm:$0xff]  ;;  %v27_v35 = vld [vmem:[%s254_s0 + $0x68] sm:$0xff] }
   0x6   :  { %v63_v20 = vadd.f32 %v143_v2, %v40_v9  ;;  %v65_v25 = vadd.f32 %v143_v2, %v42_v15  ;;  %v66_v26 = vadd.f32 %v143_v2, %v43_v16  ;;  %v67_v33 = vadd.f32 %v143_v2, %v44_v21  ;;  %v26_v34 = vld [vmem:[%s254_s0 + $0x60] sm:$0xff]  ;;  %v28_v36 = vld [vmem:[%s254_s0 + $0x70] sm:$0xff]  ;;  %v29_v41 = vld [vmem:[%s254_s0 + $0x78] sm:$0xff] }
   0x7   :  { %v76_v23 = vmax.f32 %v60_v13, 0.0  ;;  %v64_v24 = vadd.f32 %v143_v2, %v41_v14  ;;  %v77_v30 = vmax.f32 %v61_v18, 0.0  ;;  %v78_v31 = vmax.f32 %v62_v19, 0.0 }
   0x8   :  { %v79_v32 = vmax.f32 %v63_v20, 0.0  ;;  %v81_v38 = vmax.f32 %v65_v25, 0.0  ;;  %v82_v39 = vmax.f32 %v66_v26, 0.0  ;;  %v45_v40 = vmul.f32 %v112_v1, %v22_v22 }
   0x9   :  { %92 = vst [vmem:[%s257_s3] sm:$0xff] %v76_v23  ;;  %v80_v37 = vmax.f32 %v64_v24, 0.0  ;;  %93 = vst [vmem:[%s257_s3 + $0x8] sm:$0xff] %v77_v30  ;;  %v83_v42 = vmax.f32 %v67_v33, 0.0  ;;  %v46_v43 = vmul.f32 %v112_v1, %v23_v27  ;;  %v47_v44 = vmul.f32 %v112_v1, %v24_v28 }
   0xa   :  { %94 = vst [vmem:[%s257_s3 + $0x10] sm:$0xff] %v78_v31  ;;  %95 = vst [vmem:[%s257_s3 + $0x18] sm:$0xff] %v79_v32  ;;  %v48_v45 = vmul.f32 %v112_v1, %v25_v29  ;;  %v68_v46 = vadd.f32 %v143_v2, %v45_v40  ;;  %v49_v47 = vmul.f32 %v112_v1, %v26_v34 }
   0xb   :  { %96 = vst [vmem:[%s257_s3 + $0x20] sm:$0xff] %v80_v37  ;;  %97 = vst [vmem:[%s257_s3 + $0x28] sm:$0xff] %v81_v38  ;;  %v50_v48 = vmul.f32 %v112_v1, %v27_v35  ;;  %v51_v49 = vmul.f32 %v112_v1, %v28_v36  ;;  %v69_v50 = vadd.f32 %v143_v2, %v46_v43 }
   0xc   :  { %98 = vst [vmem:[%s257_s3 + $0x30] sm:$0xff] %v82_v39  ;;  %99 = vst [vmem:[%s257_s3 + $0x38] sm:$0xff] %v83_v42  ;;  %v70_v51 = vadd.f32 %v143_v2, %v47_v44  ;;  %v71_v52 = vadd.f32 %v143_v2, %v48_v45  ;;  %v52_v53 = vmul.f32 %v112_v1, %v29_v41  ;;  %v84_v54 = vmax.f32 %v68_v46, 0.0 }
   0xd   :  { %v72_v55 = vadd.f32 %v143_v2, %v49_v47  ;;  %v73_v56 = vadd.f32 %v143_v2, %v50_v48  ;;  %v74_v57 = vadd.f32 %v143_v2, %v51_v49  ;;  %v85_v58 = vmax.f32 %v69_v50, 0.0 }
   0xe   :  { %v86_v59 = vmax.f32 %v70_v51, 0.0  ;;  %v87_v60 = vmax.f32 %v71_v52, 0.0  ;;  %v75_v61 = vadd.f32 %v143_v2, %v52_v53  ;;  %100 = vst [vmem:[%s257_s3 + $0x40] sm:$0xff] %v84_v54 }
   0xf   :  { %v88_v62 = vmax.f32 %v72_v55, 0.0  ;;  %v89_v63 = vmax.f32 %v73_v56, 0.0  ;;  %v90_v0 = vmax.f32 %v74_v57, 0.0  ;;  %101 = vst [vmem:[%s257_s3 + $0x48] sm:$0xff] %v85_v58 }
  0x10   :  { %102 = vst [vmem:[%s257_s3 + $0x50] sm:$0xff] %v86_v59  ;;  %103 = vst [vmem:[%s257_s3 + $0x58] sm:$0xff] %v87_v60  ;;  %v91_v1 = vmax.f32 %v75_v61, 0.0 }
  0x11   :  { %104 = vst [vmem:[%s257_s3 + $0x60] sm:$0xff] %v88_v62  ;;  %105 = vst [vmem:[%s257_s3 + $0x68] sm:$0xff] %v89_v63 }
  0x12   :  { %106 = vst [vmem:[%s257_s3 + $0x70] sm:$0xff] %v90_v0  ;;  %107 = vst [vmem:[%s257_s3 + $0x78] sm:$0xff] %v91_v1 }

// kernel: my_resnet_forward.32
= control target key start
LH: loop header
LB: loop body
LE: loop exit
PB: predicated region body
PF: predicated region fallthrough
CT: control target
= control target key end

     0   :  { %s2823_s1 = inlined_call_operand.vmem [shape: bf16[1152,128], index: 1, kind: input, shape index: {}]   ;;  %s2824_s0 = inlined_call_operand.vmem [shape: bf16[128,1152], index: 0, kind: input, shape index: {}]   ;;  %s2825_s2 = inlined_call_operand.vmem [shape: f32[128,128], index: 2, kind: input, shape index: {}]   ;;  %s2826_s3 = inlined_call_operand.vmem [shape: f32[128,128], index: 3, kind: output, shape index: {}]  }
   0x1   :  { %v2024_v0 = vld [vmem:[%s2823_s1 + $0x40] sm:$0xff]   ;;  %v2028_v4 = vld [vmem:[%s2823_s1 + $0x48] sm:$0xff]   ;;  %v2032_v8 = vld [vmem:[%s2823_s1 + $0x50] sm:$0xff]  }
   0x2   :  { %v2025_v1 = vld [vmem:[%s2823_s1 + $0xc0] sm:$0xff]   ;;  %1704 = vmatprep.subr.bf16.mxu0 %v2024_v0  ;;  %v2029_v5 = vld [vmem:[%s2823_s1 + $0xc8] sm:$0xff]   ;;  %v2033_v9 = vld [vmem:[%s2823_s1 + $0xd0] sm:$0xff]  }
   0x3   :  { %v2026_v2 = vld [vmem:[%s2823_s1] sm:$0xff]   ;;  %1768 = vmatprep.subr.bf16.mxu1 %v2025_v1  ;;  %v2030_v6 = vld [vmem:[%s2823_s1 + $0x8] sm:$0xff]   ;;  %v2034_v10 = vld [vmem:[%s2823_s1 + $0x10] sm:$0xff]  }
   0x4   :  { %v2027_v3 = vld [vmem:[%s2823_s1 + $0x80] sm:$0xff]   ;;  %1705 = vmatpush3.bf16.msra.mxu0 %v2026_v2  ;;  %v2031_v7 = vld [vmem:[%s2823_s1 + $0x88] sm:$0xff]   ;;  %v2035_v11 = vld [vmem:[%s2823_s1 + $0x90] sm:$0xff]  }
   0x5   :  { %1769 = vmatpush3.bf16.msra.mxu1 %v2027_v3  ;;  %1706 = vmatprep.subr.bf16.mxu0 %v2028_v4  ;;  %v2036_v12 = vld [vmem:[%s2823_s1 + $0x58] sm:$0xff]   ;;  %v2040_v16 = vld [vmem:[%s2823_s1 + $0x60] sm:$0xff]   ;;  %v2044_v20 = vld [vmem:[%s2823_s1 + $0x68] sm:$0xff]  }
   0x6   :  { %1770 = vmatprep.subr.bf16.mxu1 %v2029_v5  ;;  %v2037_v13 = vld [vmem:[%s2823_s1 + $0xd8] sm:$0xff]   ;;  %v2041_v17 = vld [vmem:[%s2823_s1 + $0xe0] sm:$0xff]   ;;  %v2045_v21 = vld [vmem:[%s2823_s1 + $0xe8] sm:$0xff]  }
   0x7   :  { %v2038_v14 = vld [vmem:[%s2823_s1 + $0x18] sm:$0xff]   ;;  %v2042_v18 = vld [vmem:[%s2823_s1 + $0x20] sm:$0xff]   ;;  %v2046_v22 = vld [vmem:[%s2823_s1 + $0x28] sm:$0xff]  }
   0x8   :  { %1707 = vmatpush3.bf16.msra.mxu0 %v2030_v6  ;;  %v2039_v15 = vld [vmem:[%s2823_s1 + $0x98] sm:$0xff]   ;;  %v2043_v19 = vld [vmem:[%s2823_s1 + $0xa0] sm:$0xff]   ;;  %v2047_v23 = vld [vmem:[%s2823_s1 + $0xa8] sm:$0xff]  }
   0x9   :  { %1771 = vmatpush3.bf16.msra.mxu1 %v2031_v7  ;;  %1708 = vmatprep.subr.bf16.mxu0 %v2032_v8  ;;  %v2048_v24 = vld [vmem:[%s2823_s1 + $0x70] sm:$0xff]   ;;  %v2052_v28 = vld [vmem:[%s2823_s1 + $0x78] sm:$0xff]   ;;  %v2056_v32 = vld [vmem:[%s2824_s0] ss:$36 sps:$4 sm:$0xff]  }
   0xa   :  { %1772 = vmatprep.subr.bf16.mxu1 %v2033_v9  ;;  %v2049_v25 = vld [vmem:[%s2823_s1 + $0xf0] sm:$0xff]   ;;  %v2053_v29 = vld [vmem:[%s2823_s1 + $0xf8] sm:$0xff]   ;;  %v2058_v33 = vld [vmem:[%s2824_s0 + $0x4] ss:$36 sps:$4 sm:$0xff]  }
   0xb   :  { %v2050_v26 = vld [vmem:[%s2823_s1 + $0x30] sm:$0xff]   ;;  %v2054_v30 = vld [vmem:[%s2823_s1 + $0x38] sm:$0xff]   ;;  %v2059_v34 = vld [vmem:[%s2824_s0 + $0x8] ss:$36 sps:$4 sm:$0xff]   ;;  %1087 = vmatprep.mubr.bf16.mxu0 %v2058_v33 }
   0xc   :  { %1709 = vmatpush3.bf16.msra.mxu0 %v2034_v10  ;;  %v2051_v27 = vld [vmem:[%s2823_s1 + $0xb0] sm:$0xff]   ;;  %v2055_v31 = vld [vmem:[%s2823_s1 + $0xb8] sm:$0xff]   ;;  %v2062_v36 = vld [vmem:[%s2823_s1 + $0x140] sm:$0xff]  }
   0xd   :  { %1773 = vmatpush3.bf16.msra.mxu1 %v2035_v11  ;;  %1710 = vmatprep.subr.bf16.mxu0 %v2036_v12  ;;  %v2061_v35 = vld [vmem:[%s2824_s0 + $0xc] ss:$36 sps:$4 sm:$0xff]   ;;  %v2063_v37 = vld [vmem:[%s2823_s1 + $0x1c0] sm:$0xff]   ;;  %v2068_v41 = vld [vmem:[%s2824_s0 + $0x54] ss:$36 sps:$4 sm:$0xff]  }
   0xe   :  { %1774 = vmatprep.subr.bf16.mxu1 %v2037_v13  ;;  %1184 = vmatprep.mubr.bf16.mxu1 %v2061_v35  ;;  %v2064_v38 = vld [vmem:[%s2823_s1 + $0x100] sm:$0xff]   ;;  %v2066_v40 = vld [vmem:[%s2824_s0 + $0x4c] ss:$36 sps:$4 sm:$0xff]   ;;  %v2076_v48 = vld [vmem:[%s2824_s0 + $0x94] ss:$36 sps:$4 sm:$0xff]  }
   0xf   :  { %v2065_v39 = vld [vmem:[%s2823_s1 + $0x180] sm:$0xff]   ;;  %v2070_v42 = vld [vmem:[%s2824_s0 + $0x48] ss:$36 sps:$4 sm:$0xff]   ;;  %v2071_v43 = vld [vmem:[%s2824_s0 + $0x50] ss:$36 sps:$4 sm:$0xff]  }
  0x10   :  { %1711 = vmatpush3.bf16.msra.mxu0 %v2038_v14  ;;  %v2072_v44 = vld [vmem:[%s2823_s1 + $0x148] sm:$0xff]   ;;  %v2078_v49 = vld [vmem:[%s2824_s0 + $0x9c] ss:$36 sps:$4 sm:$0xff]   ;;  %v2080_v50 = vld [vmem:[%s2824_s0 + $0x90] ss:$36 sps:$4 sm:$0xff]  }
  0x11   :  { %1775 = vmatpush3.bf16.msra.mxu1 %v2039_v15  ;;  %1712 = vmatprep.subr.bf16.mxu0 %v2040_v16  ;;  %v2073_v45 = vld [vmem:[%s2823_s1 + $0x1c8] sm:$0xff]   ;;  %v2081_v51 = vld [vmem:[%s2824_s0 + $0x98] ss:$36 sps:$4 sm:$0xff]   ;;  %v2082_v52 = vld [vmem:[%s2823_s1 + $0x150] sm:$0xff]  }
  0x12   :  { %1776 = vmatprep.subr.bf16.mxu1 %v2041_v17  ;;  %v2074_v46 = vld [vmem:[%s2823_s1 + $0x108] sm:$0xff]   ;;  %v2083_v53 = vld [vmem:[%s2823_s1 + $0x1d0] sm:$0xff]   ;;  %v2086_v56 = vld [vmem:[%s2824_s0 + $0xdc] ss:$36 sps:$4 sm:$0xff]  }
  0x13   :  { %v2075_v47 = vld [vmem:[%s2823_s1 + $0x188] sm:$0xff]   ;;  %v2084_v54 = vld [vmem:[%s2823_s1 + $0x110] sm:$0xff]   ;;  %v2090_v58 = vld [vmem:[%s2824_s0 + $0xd8] ss:$36 sps:$4 sm:$0xff]  }
  0x14   :  { %1713 = vmatpush3.bf16.msra.mxu0 %v2042_v18  ;;  %v2085_v55 = vld [vmem:[%s2823_s1 + $0x190] sm:$0xff]   ;;  %v2088_v57 = vld [vmem:[%s2824_s0 + $0xe4] ss:$36 sps:$4 sm:$0xff]   ;;  %v2092_v60 = vld [vmem:[%s2823_s1 + $0x158] sm:$0xff]  }
  0x15   :  { %1777 = vmatpush3.bf16.msra.mxu1 %v2043_v19  ;;  %1714 = vmatprep.subr.bf16.mxu0 %v2044_v20  ;;  %v2091_v59 = vld [vmem:[%s2824_s0 + $0xe0] ss:$36 sps:$4 sm:$0xff]   ;;  %v2093_v61 = vld [vmem:[%s2823_s1 + $0x1d8] sm:$0xff]   ;;  %v2098_v1 = vld [vmem:[%s2824_s0 + $0x12c] ss:$36 sps:$4 sm:$0xff]  }
  0x16   :  { %1778 = vmatprep.subr.bf16.mxu1 %v2045_v21  ;;  %v2094_v62 = vld [vmem:[%s2823_s1 + $0x118] sm:$0xff]   ;;  %v2096_v0 = vld [vmem:[%s2824_s0 + $0x124] ss:$36 sps:$4 sm:$0xff]   ;;  %v2106_v8 = vld [vmem:[%s2824_s0 + $0x16c] ss:$36 sps:$4 sm:$0xff]  }
  0x17   :  { %v2095_v63 = vld [vmem:[%s2823_s1 + $0x198] sm:$0xff]   ;;  %v2100_v2 = vld [vmem:[%s2824_s0 + $0x120] ss:$36 sps:$4 sm:$0xff]   ;;  %v2101_v4 = vld [vmem:[%s2824_s0 + $0x128] ss:$36 sps:$4 sm:$0xff]  }
  0x18   :  { %1715 = vmatpush3.bf16.msra.mxu0 %v2046_v22  ;;  %v2102_v3 = vld [vmem:[%s2823_s1 + $0x160] sm:$0xff]   ;;  %v2108_v9 = vld [vmem:[%s2824_s0 + $0x174] ss:$36 sps:$4 sm:$0xff]   ;;  %v2112_v10 = vld [vmem:[%s2823_s1 + $0x168] sm:$0xff]  }
  0x19   :  { %1779 = vmatpush3.bf16.msra.mxu1 %v2047_v23  ;;  %1716 = vmatprep.subr.bf16.mxu0 %v2048_v24  ;;  %v2103_v5 = vld [vmem:[%s2823_s1 + $0x1e0] sm:$0xff]   ;;  %v2113_v11 = vld [vmem:[%s2823_s1 + $0x1e8] sm:$0xff]   ;;  %v2111_v15 = vld [vmem:[%s2824_s0 + $0x170] ss:$36 sps:$4 sm:$0xff]  }
  0x1a   :  { %1780 = vmatprep.subr.bf16.mxu1 %v2049_v25  ;;  %v2104_v6 = vld [vmem:[%s2823_s1 + $0x120] sm:$0xff]   ;;  %v2110_v12 = vld [vmem:[%s2824_s0 + $0x168] ss:$36 sps:$4 sm:$0xff]   ;;  %v2116_v16 = vld [vmem:[%s2824_s0 + $0x1b4] ss:$36 sps:$4 sm:$0xff]  }
  0x1b   :  { %v2105_v7 = vld [vmem:[%s2823_s1 + $0x1a0] sm:$0xff]   ;;  %v2114_v13 = vld [vmem:[%s2823_s1 + $0x128] sm:$0xff]   ;;  %v2122_v18 = vld [vmem:[%s2823_s1 + $0x170] sm:$0xff]  }
  0x1c   :  { %1717 = vmatpush3.bf16.msra.mxu0 %v2050_v26  ;;  %v2115_v14 = vld [vmem:[%s2823_s1 + $0x1a8] sm:$0xff]   ;;  %v2118_v17 = vld [vmem:[%s2824_s0 + $0x1bc] ss:$36 sps:$4 sm:$0xff]   ;;  %v2123_v19 = vld [vmem:[%s2823_s1 + $0x1f0] sm:$0xff]  }
  0x1d   :  { %1781 = vmatpush3.bf16.msra.mxu1 %v2051_v27  ;;  %1718 = vmatprep.subr.bf16.mxu0 %v2052_v28  ;;  %v2124_v20 = vld [vmem:[%s2823_s1 + $0x130] sm:$0xff]   ;;  %v2121_v23 = vld [vmem:[%s2824_s0 + $0x1b8] ss:$36 sps:$4 sm:$0xff]   ;;  %v2128_v25 = vld [vmem:[%s2824_s0 + $0x204] ss:$36 sps:$4 sm:$0xff]  }
  0x1e   :  { %1782 = vmatprep.subr.bf16.mxu1 %v2053_v29  ;;  %v2125_v21 = vld [vmem:[%s2823_s1 + $0x1b0] sm:$0xff]   ;;  %v2126_v24 = vld [vmem:[%s2824_s0 + $0x1fc] ss:$36 sps:$4 sm:$0xff]  }
  0x1f   :  { %v2120_v22 = vld [vmem:[%s2824_s0 + $0x1b0] ss:$36 sps:$4 sm:$0xff]   ;;  %v2132_v26 = vld [vmem:[%s2823_s1 + $0x178] sm:$0xff]  }
  0x20   :  { %1719 = vmatpush3.bf16.msra.mxu0 %v2054_v30  ;;  %v2133_v27 = vld [vmem:[%s2823_s1 + $0x1f8] sm:$0xff]   ;;  %v2136_v35 = vld [vmem:[%s2824_s0 + $0x10] ss:$36 sps:$4 sm:$0xff]  }
  0x21   :  { %1783 = vmatpush3.bf16.msra.mxu1 %v2055_v31  ;;  %1832 = vmatprep.subr.bf16.mxu0 %v2062_v36  ;;  %v2134_v28 = vld [vmem:[%s2823_s1 + $0x138] sm:$0xff]   ;;  %v2131_v31 = vld [vmem:[%s2824_s0 + $0x200] ss:$36 sps:$4 sm:$0xff]  }
  0x22   :  { %1896 = vmatprep.subr.bf16.mxu1 %v2063_v37  ;;  %v2135_v29 = vld [vmem:[%s2823_s1 + $0x1b8] sm:$0xff]  }
  0x23   :  { %1088 = vmatmul.mubr.bf16.vlgmr.msra.gmra.mrb[0].mxu0 %v2056_v32  ;;  %v2130_v30 = vld [vmem:[%s2824_s0 + $0x1f8] ss:$36 sps:$4 sm:$0xff]   ;;  %v2142_v32 = vld [vmem:[%s2823_s1 + $0x200] sm:$0xff]  }
  0x24   :  { %1185 = vmatmul.mubr.bf16.vlgmr.msra.gmra.mrb[0].mxu1 %v2059_v34  ;;  %1833 = vmatpush3.bf16.msra.mxu0 %v2064_v38  ;;  %v2138_v33 = vld [vmem:[%s2824_s0 + $0x14] ss:$36 sps:$4 sm:$0xff]   ;;  %v2141_v34 = vld [vmem:[%s2824_s0 + $0x1c] ss:$36 sps:$4 sm:$0xff]   ;;  %v2145_v38 = vld [vmem:[%s2824_s0 + $0x64] ss:$36 sps:$4 sm:$0xff]  }
  0x25   :  { %1897 = vmatpush3.bf16.msra.mxu1 %v2065_v39  ;;  %1095 = vmatprep.mubr.bf16.mxu0 %v2066_v40  ;;  %v2139_v36 = vld [vmem:[%s2824_s0 + $0x18] ss:$36 sps:$4 sm:$0xff]   ;;  %v2149_v39 = vld [vmem:[%s2823_s1 + $0x208] sm:$0xff]   ;;  %v2156_v40 = vld [vmem:[%s2823_s1 + $0x210] sm:$0xff]  }
  0x26   :  { %1192 = vmatprep.mubr.bf16.mxu1 %v2068_v41  ;;  %1834 = vmatprep.subr.bf16.mxu0 %v2072_v44  ;;  %v2143_v37 = vld [vmem:[%s2824_s0 + $0x5c] ss:$36 sps:$4 sm:$0xff]   ;;  %v2152_v44 = vld [vmem:[%s2824_s0 + $0xac] ss:$36 sps:$4 sm:$0xff]  }
  0x27   :  { %1898 = vmatprep.subr.bf16.mxu1 %v2073_v45  ;;  %v2147_v41 = vld [vmem:[%s2824_s0 + $0x58] ss:$36 sps:$4 sm:$0xff]  }
  0x28   :  { %1835 = vmatpush3.bf16.msra.mxu0 %v2074_v46  ;;  %v2163_v45 = vld [vmem:[%s2823_s1 + $0x218] sm:$0xff]   ;;  %v2170_v46 = vld [vmem:[%s2823_s1 + $0x220] sm:$0xff]  }
  0x29   :  { %1899 = vmatpush3.bf16.msra.mxu1 %v2075_v47  ;;  %1836 = vmatprep.subr.bf16.mxu0 %v2082_v52  ;;  %v2154_v47 = vld [vmem:[%s2824_s0 + $0xa0] ss:$36 sps:$4 sm:$0xff]   ;;  %v2161_v52 = vld [vmem:[%s2824_s0 + $0xe8] ss:$36 sps:$4 sm:$0xff]  }
  0x2a   :  { %1900 = vmatprep.subr.bf16.mxu1 %v2083_v53  ;;  %v2184_v53 = vld [vmem:[%s2823_s1 + $0x230] sm:$0xff]  }
  0x2b   :  { %1096 = vmatmul.mubr.bf16.gmra.mrb[4].mxu0 %v2070_v42  ;;  %v2148_v42 = vld [vmem:[%s2824_s0 + $0x60] ss:$36 sps:$4 sm:$0xff]  }
  0x2c   :  { %1193 = vmatmul.mubr.bf16.gmra.mrb[4].mxu1 %v2071_v43  ;;  %1103 = vmatprep.mubr.bf16.mxu0 %v2076_v48  ;;  %v2150_v43 = vld [vmem:[%s2824_s0 + $0xa4] ss:$36 sps:$4 sm:$0xff]  }
  0x2d   :  { %1200 = vmatprep.mubr.bf16.mxu1 %v2078_v49  ;;  %1837 = vmatpush3.bf16.msra.mxu0 %v2084_v54  ;;  %v2155_v48 = vld [vmem:[%s2824_s0 + $0xa8] ss:$36 sps:$4 sm:$0xff]   ;;  %v2162_v54 = vld [vmem:[%s2824_s0 + $0xf0] ss:$36 sps:$4 sm:$0xff]  }
  0x2e   :  { %1901 = vmatpush3.bf16.msra.mxu1 %v2085_v55  ;;  %1838 = vmatprep.subr.bf16.mxu0 %v2092_v60  ;;  %v2157_v49 = vld [vmem:[%s2824_s0 + $0xec] ss:$36 sps:$4 sm:$0xff]   ;;  %v2164_v55 = vld [vmem:[%s2824_s0 + $0x134] ss:$36 sps:$4 sm:$0xff]   ;;  %v2171_v60 = vld [vmem:[%s2824_s0 + $0x17c] ss:$36 sps:$4 sm:$0xff]  }
  0x2f   :  { %1902 = vmatprep.subr.bf16.mxu1 %v2093_v61  ;;  %v2173_v61 = vld [vmem:[%s2824_s0 + $0x184] ss:$36 sps:$4 sm:$0xff]  }
  0x31   :  { %1839 = vmatpush3.bf16.msra.mxu0 %v2094_v62  ;;  %v2175_v62 = vld [vmem:[%s2824_s0 + $0x178] ss:$36 sps:$4 sm:$0xff]  }
  0x32   :  { %1903 = vmatpush3.bf16.msra.mxu1 %v2095_v63  ;;  %1840 = vmatprep.subr.bf16.mxu0 %v2102_v3  ;;  %v2176_v63 = vld [vmem:[%s2824_s0 + $0x180] ss:$36 sps:$4 sm:$0xff]   ;;  %v2183_v3 = vld [vmem:[%s2824_s0 + $0x1c8] ss:$36 sps:$4 sm:$0xff]  }
  0x33   :  { %1104 = vmatmul.mubr.bf16.gmra.mrb[8].mxu0 %v2080_v50  ;;  %1904 = vmatprep.subr.bf16.mxu1 %v2103_v5  ;;  %v2159_v50 = vld [vmem:[%s2824_s0 + $0xf4] ss:$36 sps:$4 sm:$0xff]  }
  0x34   :  { %1201 = vmatmul.mubr.bf16.gmra.mrb[8].mxu1 %v2081_v51  ;;  %1111 = vmatprep.mubr.bf16.mxu0 %v2086_v56  ;;  %v2177_v51 = vld [vmem:[%s2823_s1 + $0x228] sm:$0xff]   ;;  %v2166_v56 = vld [vmem:[%s2824_s0 + $0x13c] ss:$36 sps:$4 sm:$0xff]   ;;  %v2187_v5 = vld [vmem:[%s2824_s0 + $0x214] ss:$36 sps:$4 sm:$0xff]  }
  0x35   :  { %1208 = vmatprep.mubr.bf16.mxu1 %v2088_v57  ;;  %1841 = vmatpush3.bf16.msra.mxu0 %v2104_v6  ;;  %v2191_v57 = vld [vmem:[%s2823_s1 + $0x238] sm:$0xff]   ;;  %v2189_v6 = vld [vmem:[%s2824_s0 + $0x208] ss:$36 sps:$4 sm:$0xff]  }
  0x36   :  { %1905 = vmatpush3.bf16.msra.mxu1 %v2105_v7  ;;  %1842 = vmatprep.subr.bf16.mxu0 %v2112_v10  ;;  %v2190_v7 = vld [vmem:[%s2824_s0 + $0x210] ss:$36 sps:$4 sm:$0xff]   ;;  %v2194_v10 = vld [vmem:[%s2824_s0 + $0x68] ss:$36 sps:$4 sm:$0xff]  }
  0x37   :  { %1906 = vmatprep.subr.bf16.mxu1 %v2113_v11  ;;  %v2195_v11 = vld [vmem:[%s2824_s0 + $0x188] ss:$36 sps:$4 sm:$0xff]  }
  0x39   :  { %1843 = vmatpush3.bf16.msra.mxu0 %v2114_v13  ;;  %v2197_v13 = vld [vmem:[%s2824_s0 + $0x1d0] ss:$36 sps:$4 sm:$0xff]  }
  0x3a   :  { %1907 = vmatpush3.bf16.msra.mxu1 %v2115_v14  ;;  %1844 = vmatprep.subr.bf16.mxu0 %v2122_v18  ;;  %v2198_v14 = vld [vmem:[%s2824_s0 + $0xf8] ss:$36 sps:$4 sm:$0xff]   ;;  %v239_v18 = vld [vmem:[%s2825_s2] sm:$0xff] }
  0x3b   :  { %1112 = vmatmul.mubr.bf16.gmra.mrb[12].mxu0 %v2090_v58  ;;  %1908 = vmatprep.subr.bf16.mxu1 %v2123_v19  ;;  %v2168_v58 = vld [vmem:[%s2824_s0 + $0x130] ss:$36 sps:$4 sm:$0xff]  }
  0x3c   :  { %1209 = vmatmul.mubr.bf16.gmra.mrb[12].mxu1 %v2091_v59  ;;  %1119 = vmatprep.mubr.bf16.mxu0 %v2096_v0  ;;  %v2169_v59 = vld [vmem:[%s2824_s0 + $0x138] ss:$36 sps:$4 sm:$0xff]   ;;  %v2178_v0 = vld [vmem:[%s2824_s0 + $0x1c4] ss:$36 sps:$4 sm:$0xff]  }
  0x3d   :  { %1216 = vmatprep.mubr.bf16.mxu1 %v2098_v1  ;;  %1845 = vmatpush3.bf16.msra.mxu0 %v2124_v20  ;;  %v2180_v1 = vld [vmem:[%s2824_s0 + $0x1cc] ss:$36 sps:$4 sm:$0xff]  }
  0x3e   :  { %1909 = vmatpush3.bf16.msra.mxu1 %v2125_v21  ;;  %1846 = vmatprep.subr.bf16.mxu0 %v2132_v26 }
  0x3f   :  { %1910 = vmatprep.subr.bf16.mxu1 %v2133_v27 }
  0x41   :  { %1847 = vmatpush3.bf16.msra.mxu0 %v2134_v28 }
  0x42   :  { %1911 = vmatpush3.bf16.msra.mxu1 %v2135_v29  ;;  %1976 = vmatprep.subr.bf16.mxu0 %v2142_v32 }
  0x43   :  { %1120 = vmatmul.mubr.bf16.gmra.mrb[16].mxu0 %v2100_v2  ;;  %2008 = vmatprep.subr.bf16.mxu1 %v2142_v32  ;;  %v2182_v2 = vld [vmem:[%s2824_s0 + $0x1c0] ss:$36 sps:$4 sm:$0xff]  }
  0x44   :  { %1217 = vmatmul.mubr.bf16.gmra.mrb[16].mxu1 %v2101_v4  ;;  %1127 = vmatprep.mubr.bf16.mxu0 %v2106_v8  ;;  %v2185_v4 = vld [vmem:[%s2824_s0 + $0x20c] ss:$36 sps:$4 sm:$0xff]   ;;  %v2192_v8 = vld [vmem:[%s2824_s0 + $0x20] ss:$36 sps:$4 sm:$0xff]  }
  0x45   :  { %1224 = vmatprep.mubr.bf16.mxu1 %v2108_v9  ;;  %v2193_v9 = vld [vmem:[%s2824_s0 + $0x140] ss:$36 sps:$4 sm:$0xff]  }
  0x4b   :  { %1128 = vmatmul.mubr.bf16.gmra.mrb[20].mxu0 %v2110_v12  ;;  %v2196_v12 = vld [vmem:[%s2824_s0 + $0xb0] ss:$36 sps:$4 sm:$0xff]  }
  0x4c   :  { %1225 = vmatmul.mubr.bf16.gmra.mrb[20].mxu1 %v2111_v15  ;;  %1135 = vmatprep.mubr.bf16.mxu0 %v2116_v16  ;;  %v2199_v15 = vld [vmem:[%s2824_s0 + $0x218] ss:$36 sps:$4 sm:$0xff]  }
  0x4d   :  { %1232 = vmatprep.mubr.bf16.mxu1 %v2118_v17 }
  0x53   :  { %1136 = vmatmul.mubr.bf16.gmra.mrb[24].mxu0 %v2120_v22 }
  0x54   :  { %1233 = vmatmul.mubr.bf16.gmra.mrb[24].mxu1 %v2121_v23  ;;  %1143 = vmatprep.mubr.bf16.mxu0 %v2126_v24 }
  0x55   :  { %1240 = vmatprep.mubr.bf16.mxu1 %v2128_v25  ;;  %v240_v25 = vld [vmem:[%s2825_s2 + $0x8] sm:$0xff] }
  0x5b   :  { %1144 = vmatmul.mubr.bf16.gmra.mrb[28].mxu0 %v2130_v30 }
  0x5c   :  { %1241 = vmatmul.mubr.bf16.gmra.mrb[28].mxu1 %v2131_v31  ;;  %1281 = vmatprep.mubr.bf16.mxu0 %v2138_v33 }
  0x5d   :  { %1378 = vmatprep.mubr.bf16.mxu1 %v2141_v34 }
  0x63   :  { %1282 = vmatmul.mubr.bf16.vlgmr.msra.gmra.mrb[32].mxu0 %v2136_v35 }
  0x64   :  { %1379 = vmatmul.mubr.bf16.vlgmr.msra.gmra.mrb[32].mxu1 %v2139_v36  ;;  %1977 = vmatpush3.bf16.msra.mxu0 %v2142_v32  ;;  %v241_v36 = vld [vmem:[%s2825_s2 + $0x10] sm:$0xff] }
  0x65   :  { %2016 = vmatpush3.bf16.msra.mxu1 %v2142_v32  ;;  %1289 = vmatprep.mubr.bf16.mxu0 %v2143_v37 }
  0x66   :  { %1386 = vmatprep.mubr.bf16.mxu1 %v2145_v38  ;;  %1978 = vmatprep.subr.bf16.mxu0 %v2149_v39 }
  0x67   :  { %2009 = vmatprep.subr.bf16.mxu1 %v2149_v39 }
  0x68   :  { %1979 = vmatpush3.bf16.msra.mxu0 %v2149_v39 }
  0x69   :  { %2017 = vmatpush3.bf16.msra.mxu1 %v2149_v39  ;;  %1980 = vmatprep.subr.bf16.mxu0 %v2156_v40 }
  0x6a   :  { %2010 = vmatprep.subr.bf16.mxu1 %v2156_v40 }
  0x6b   :  { %1290 = vmatmul.mubr.bf16.gmra.mrb[36].mxu0 %v2147_v41 }
  0x6c   :  { %1387 = vmatmul.mubr.bf16.gmra.mrb[36].mxu1 %v2148_v42  ;;  %1297 = vmatprep.mubr.bf16.mxu0 %v2150_v43  ;;  %v242_v43 = vld [vmem:[%s2825_s2 + $0x18] sm:$0xff] }
  0x6d   :  { %1394 = vmatprep.mubr.bf16.mxu1 %v2152_v44  ;;  %1981 = vmatpush3.bf16.msra.mxu0 %v2156_v40 }
  0x6e   :  { %2018 = vmatpush3.bf16.msra.mxu1 %v2156_v40  ;;  %1982 = vmatprep.subr.bf16.mxu0 %v2163_v45 }
  0x6f   :  { %2011 = vmatprep.subr.bf16.mxu1 %v2163_v45 }
  0x71   :  { %1983 = vmatpush3.bf16.msra.mxu0 %v2163_v45 }
  0x72   :  { %2019 = vmatpush3.bf16.msra.mxu1 %v2163_v45  ;;  %1984 = vmatprep.subr.bf16.mxu0 %v2170_v46 }
  0x73   :  { %1298 = vmatmul.mubr.bf16.gmra.mrb[40].mxu0 %v2154_v47  ;;  %2012 = vmatprep.subr.bf16.mxu1 %v2170_v46 }
  0x74   :  { %1395 = vmatmul.mubr.bf16.gmra.mrb[40].mxu1 %v2155_v48  ;;  %1305 = vmatprep.mubr.bf16.mxu0 %v2157_v49 }
  0x75   :  { %1402 = vmatprep.mubr.bf16.mxu1 %v2159_v50  ;;  %1985 = vmatpush3.bf16.msra.mxu0 %v2170_v46 }
  0x76   :  { %2020 = vmatpush3.bf16.msra.mxu1 %v2170_v46  ;;  %1986 = vmatprep.subr.bf16.mxu0 %v2177_v51 }
  0x77   :  { %2013 = vmatprep.subr.bf16.mxu1 %v2177_v51 }
  0x79   :  { %1987 = vmatpush3.bf16.msra.mxu0 %v2177_v51 }
  0x7a   :  { %2021 = vmatpush3.bf16.msra.mxu1 %v2177_v51  ;;  %1988 = vmatprep.subr.bf16.mxu0 %v2184_v53 }
  0x7b   :  { %1306 = vmatmul.mubr.bf16.gmra.mrb[44].mxu0 %v2161_v52  ;;  %2014 = vmatprep.subr.bf16.mxu1 %v2184_v53 }
  0x7c   :  { %1403 = vmatmul.mubr.bf16.gmra.mrb[44].mxu1 %v2162_v54  ;;  %1313 = vmatprep.mubr.bf16.mxu0 %v2164_v55  ;;  %v243_v54 = vld [vmem:[%s2825_s2 + $0x20] sm:$0xff] }
  0x7d   :  { %1410 = vmatprep.mubr.bf16.mxu1 %v2166_v56  ;;  %1989 = vmatpush3.bf16.msra.mxu0 %v2184_v53 }
  0x7e   :  { %2022 = vmatpush3.bf16.msra.mxu1 %v2184_v53  ;;  %1990 = vmatprep.subr.bf16.mxu0 %v2191_v57 }
  0x7f   :  { %2015 = vmatprep.subr.bf16.mxu1 %v2191_v57 }
  0x81   :  { %1991 = vmatpush3.bf16.msra.mxu0 %v2191_v57 }
  0x82   :  { %2023 = vmatpush3.bf16.msra.mxu1 %v2191_v57 }
  0x83   :  { %1314 = vmatmul.mubr.bf16.gmra.mrb[48].mxu0 %v2168_v58 }
  0x84   :  { %1411 = vmatmul.mubr.bf16.gmra.mrb[48].mxu1 %v2169_v59  ;;  %1321 = vmatprep.mubr.bf16.mxu0 %v2171_v60 }
  0x85   :  { %1418 = vmatprep.mubr.bf16.mxu1 %v2173_v61  ;;  %v244_v61 = vld [vmem:[%s2825_s2 + $0x28] sm:$0xff] }
  0x8b   :  { %1322 = vmatmul.mubr.bf16.gmra.mrb[52].mxu0 %v2175_v62 }
  0x8c   :  { %1419 = vmatmul.mubr.bf16.gmra.mrb[52].mxu1 %v2176_v63  ;;  %1329 = vmatprep.mubr.bf16.mxu0 %v2178_v0 }
  0x8d   :  { %1426 = vmatprep.mubr.bf16.mxu1 %v2180_v1 }
  0x93   :  { %1330 = vmatmul.mubr.bf16.gmra.mrb[56].mxu0 %v2182_v2 }
  0x94   :  { %1427 = vmatmul.mubr.bf16.gmra.mrb[56].mxu1 %v2183_v3  ;;  %1337 = vmatprep.mubr.bf16.mxu0 %v2185_v4 }
  0x95   :  { %1434 = vmatprep.mubr.bf16.mxu1 %v2187_v5 }
  0x9b   :  { %1338 = vmatmul.mubr.bf16.gmra.mrb[60].mxu0 %v2189_v6 }
  0x9c   :  { %1435 = vmatmul.mubr.bf16.gmra.mrb[60].mxu1 %v2190_v7  ;;  %1992 = vmatprep.mubr.bf16.mxu0 %v2192_v8  ;;  %v245_v8 = vld [vmem:[%s2825_s2 + $0x30] sm:$0xff] }
  0x9d   :  { %2000 = vmatprep.mubr.bf16.mxu1 %v2193_v9 }
  0xa3   :  { %1993 = vmatmul.mubr.bf16.vlgmr.msra.gmra.mrb[64].mxu0 %v2194_v10 }
  0xa4   :  { %2001 = vmatmul.mubr.bf16.vlgmr.msra.gmra.mrb[64].mxu1 %v2195_v11  ;;  %1996 = vmatprep.mubr.bf16.mxu0 %v2196_v12 }
  0xa5   :  { %2004 = vmatprep.mubr.bf16.mxu1 %v2197_v13 }
  0xab   :  { %1997 = vmatmul.mubr.bf16.gmra.mrb[68].mxu0 %v2198_v14 }
  0xac   :  { %2005 = vmatmul.mubr.bf16.gmra.mrb[68].mxu1 %v2199_v15  ;;  %v246_v15 = vld [vmem:[%s2825_s2 + $0x38] sm:$0xff] }
  0xf6   :  { %v1720_v16 = vpop.f32.mrb[0].mxu0 }
  0xf7   :  { %v1784_v17 = vpop.f32.mrb[0].mxu1  ;;  %v1721_v19 = vpop.f32.mrb[1].mxu0 }
  0xf8   :  { %v1722_v20 = vadd.f32 %v1721_v19, %v1720_v16  ;;  %v1785_v21 = vpop.f32.mrb[1].mxu1  ;;  %v1723_v22 = vpop.f32.mrb[2].mxu0 }
  0xf9   :  { %v1786_v23 = vadd.f32 %v1785_v21, %v1784_v17  ;;  %v1787_v24 = vpop.f32.mrb[2].mxu1  ;;  %v1724_v26 = vpop.f32.mrb[3].mxu0 }
  0xfa   :  { %v1090_v27 = vadd.f32 %v1722_v20, %v239_v18  ;;  %v1725_v28 = vadd.f32 %v1724_v26, %v1723_v22  ;;  %v1788_v29 = vpop.f32.mrb[3].mxu1  ;;  %v247_v26 = vld [vmem:[%s2825_s2 + $0x40] sm:$0xff] }
  0xfb   :  { %v1789_v30 = vadd.f32 %v1788_v29, %v1787_v24 }
  0xfc   :  { %v2658_v31 = vadd.f32 %v1786_v23, %v1090_v27  ;;  %v1093_v32 = vadd.f32 %v1725_v28, %v240_v25 }
  0xfe   :  { %v2660_v33 = vadd.f32 %v1789_v30, %v1093_v32  ;;  %v1726_v34 = vpop.f32.mrb[4].mxu0 }
  0xff   :  { %v1790_v35 = vpop.f32.mrb[4].mxu1  ;;  %v1727_v37 = vpop.f32.mrb[5].mxu0 }
 0x100   :  { %v1728_v38 = vadd.f32 %v1727_v37, %v1726_v34  ;;  %v1791_v39 = vpop.f32.mrb[5].mxu1  ;;  %v1729_v40 = vpop.f32.mrb[6].mxu0 }
 0x101   :  { %v1792_v41 = vadd.f32 %v1791_v39, %v1790_v35  ;;  %v1793_v42 = vpop.f32.mrb[6].mxu1  ;;  %v1730_v44 = vpop.f32.mrb[7].mxu0  ;;  %v248_v35 = vld [vmem:[%s2825_s2 + $0x48] sm:$0xff] }
 0x102   :  { %v1098_v45 = vadd.f32 %v1728_v38, %v241_v36  ;;  %v1731_v46 = vadd.f32 %v1730_v44, %v1729_v40  ;;  %v1794_v47 = vpop.f32.mrb[7].mxu1 }
 0x103   :  { %v1795_v48 = vadd.f32 %v1794_v47, %v1793_v42 }
 0x104   :  { %v2668_v49 = vadd.f32 %v1792_v41, %v1098_v45  ;;  %v1101_v50 = vadd.f32 %v1731_v46, %v242_v43  ;;  %v249_v46 = vld [vmem:[%s2825_s2 + $0x50] sm:$0xff] }
 0x106   :  { %v2670_v51 = vadd.f32 %v1795_v48, %v1101_v50  ;;  %v1732_v52 = vpop.f32.mrb[8].mxu0 }
 0x107   :  { %v1796_v53 = vpop.f32.mrb[8].mxu1  ;;  %v1733_v55 = vpop.f32.mrb[9].mxu0 }
 0x108   :  { %v1734_v56 = vadd.f32 %v1733_v55, %v1732_v52  ;;  %v1797_v57 = vpop.f32.mrb[9].mxu1  ;;  %v1735_v58 = vpop.f32.mrb[10].mxu0  ;;  %v250_v55 = vld [vmem:[%s2825_s2 + $0x58] sm:$0xff] }
 0x109   :  { %v1798_v59 = vadd.f32 %v1797_v57, %v1796_v53  ;;  %v1799_v60 = vpop.f32.mrb[10].mxu1  ;;  %v1736_v62 = vpop.f32.mrb[11].mxu0 }
 0x10a   :  { %v1106_v63 = vadd.f32 %v1734_v56, %v243_v54  ;;  %v1737_v0 = vadd.f32 %v1736_v62, %v1735_v58  ;;  %v1800_v1 = vpop.f32.mrb[11].mxu1 }
 0x10b   :  { %v1801_v2 = vadd.f32 %v1800_v1, %v1799_v60 }
 0x10c   :  { %v2678_v3 = vadd.f32 %v1798_v59, %v1106_v63  ;;  %v1109_v4 = vadd.f32 %v1737_v0, %v244_v61 }
 0x10e   :  { %v2680_v5 = vadd.f32 %v1801_v2, %v1109_v4  ;;  %v1738_v6 = vpop.f32.mrb[12].mxu0  ;;  %v251_v2 = vld [vmem:[%s2825_s2 + $0x60] sm:$0xff] }
 0x10f   :  { %v1802_v7 = vpop.f32.mrb[12].mxu1  ;;  %v1739_v9 = vpop.f32.mrb[13].mxu0 }
 0x110   :  { %v1740_v10 = vadd.f32 %v1739_v9, %v1738_v6  ;;  %v1803_v11 = vpop.f32.mrb[13].mxu1  ;;  %v1741_v12 = vpop.f32.mrb[14].mxu0 }
 0x111   :  { %v1804_v13 = vadd.f32 %v1803_v11, %v1802_v7  ;;  %v1805_v14 = vpop.f32.mrb[14].mxu1  ;;  %v1742_v16 = vpop.f32.mrb[15].mxu0  ;;  %v252_v11 = vld [vmem:[%s2825_s2 + $0x68] sm:$0xff] }
 0x112   :  { %v1114_v17 = vadd.f32 %v1740_v10, %v245_v8  ;;  %v1743_v18 = vadd.f32 %v1742_v16, %v1741_v12  ;;  %v1806_v19 = vpop.f32.mrb[15].mxu1 }
 0x113   :  { %v1807_v20 = vadd.f32 %v1806_v19, %v1805_v14 }
 0x114   :  { %v2688_v21 = vadd.f32 %v1804_v13, %v1114_v17  ;;  %v1117_v22 = vadd.f32 %v1743_v18, %v246_v15 }
 0x116   :  { %v2690_v23 = vadd.f32 %v1807_v20, %v1117_v22  ;;  %v1744_v24 = vpop.f32.mrb[16].mxu0 }
 0x117   :  { %v1808_v25 = vpop.f32.mrb[16].mxu1  ;;  %v1745_v27 = vpop.f32.mrb[17].mxu0 }
 0x118   :  { %v1746_v28 = vadd.f32 %v1745_v27, %v1744_v24  ;;  %v1809_v29 = vpop.f32.mrb[17].mxu1  ;;  %v1747_v30 = vpop.f32.mrb[18].mxu0  ;;  %v253_v24 = vld [vmem:[%s2825_s2 + $0x70] sm:$0xff] }
 0x119   :  { %v1810_v32 = vadd.f32 %v1809_v29, %v1808_v25  ;;  %v1811_v34 = vpop.f32.mrb[18].mxu1  ;;  %v1748_v36 = vpop.f32.mrb[19].mxu0 }
 0x11a   :  { %v1122_v37 = vadd.f32 %v1746_v28, %v247_v26  ;;  %v1749_v38 = vadd.f32 %v1748_v36, %v1747_v30  ;;  %v1812_v39 = vpop.f32.mrb[19].mxu1 }
 0x11b   :  { %v1813_v40 = vadd.f32 %v1812_v39, %v1811_v34 }
 0x11c   :  { %v2698_v41 = vadd.f32 %v1810_v32, %v1122_v37  ;;  %v1125_v42 = vadd.f32 %v1749_v38, %v248_v35  ;;  %v254_v32 = vld [vmem:[%s2825_s2 + $0x78] sm:$0xff] }
 0x11e   :  { %v2700_v43 = vadd.f32 %v1813_v40, %v1125_v42  ;;  %v1750_v44 = vpop.f32.mrb[20].mxu0 }
 0x11f   :  { %v1814_v45 = vpop.f32.mrb[20].mxu1  ;;  %v1751_v47 = vpop.f32.mrb[21].mxu0 }
 0x120   :  { %v1752_v48 = vadd.f32 %v1751_v47, %v1750_v44  ;;  %v1815_v50 = vpop.f32.mrb[21].mxu1  ;;  %v1753_v52 = vpop.f32.mrb[22].mxu0 }
 0x121   :  { %v1816_v53 = vadd.f32 %v1815_v50, %v1814_v45  ;;  %v1817_v54 = vpop.f32.mrb[22].mxu1  ;;  %v1754_v56 = vpop.f32.mrb[23].mxu0 }
 0x122   :  { %v1130_v57 = vadd.f32 %v1752_v48, %v249_v46  ;;  %v1755_v58 = vadd.f32 %v1754_v56, %v1753_v52  ;;  %v1818_v59 = vpop.f32.mrb[23].mxu1 }
 0x123   :  { %v1819_v60 = vadd.f32 %v1818_v59, %v1817_v54 }
 0x124   :  { %v2708_v61 = vadd.f32 %v1816_v53, %v1130_v57  ;;  %v1133_v62 = vadd.f32 %v1755_v58, %v250_v55 }
 0x126   :  { %v2710_v63 = vadd.f32 %v1819_v60, %v1133_v62  ;;  %v1756_v0 = vpop.f32.mrb[24].mxu0 }
 0x127   :  { %v1820_v1 = vpop.f32.mrb[24].mxu1  ;;  %v1757_v4 = vpop.f32.mrb[25].mxu0 }
 0x128   :  { %v1758_v6 = vadd.f32 %v1757_v4, %v1756_v0  ;;  %v1821_v7 = vpop.f32.mrb[25].mxu1  ;;  %v1759_v8 = vpop.f32.mrb[26].mxu0 }
 0x129   :  { %v1822_v9 = vadd.f32 %v1821_v7, %v1820_v1  ;;  %v1823_v10 = vpop.f32.mrb[26].mxu1  ;;  %v1760_v12 = vpop.f32.mrb[27].mxu0 }
 0x12a   :  { %v1138_v13 = vadd.f32 %v1758_v6, %v251_v2  ;;  %v1761_v14 = vadd.f32 %v1760_v12, %v1759_v8  ;;  %v1824_v15 = vpop.f32.mrb[27].mxu1 }
 0x12b   :  { %v1825_v16 = vadd.f32 %v1824_v15, %v1823_v10 }
 0x12c   :  { %v2718_v17 = vadd.f32 %v1822_v9, %v1138_v13  ;;  %v1141_v18 = vadd.f32 %v1761_v14, %v252_v11 }
 0x12e   :  { %v2720_v19 = vadd.f32 %v1825_v16, %v1141_v18  ;;  %v1762_v20 = vpop.f32.mrb[28].mxu0 }
 0x12f   :  { %v1826_v22 = vpop.f32.mrb[28].mxu1  ;;  %v1763_v25 = vpop.f32.mrb[29].mxu0 }
 0x130   :  { %v1764_v26 = vadd.f32 %v1763_v25, %v1762_v20  ;;  %v1827_v27 = vpop.f32.mrb[29].mxu1  ;;  %v1765_v28 = vpop.f32.mrb[30].mxu0 }
 0x131   :  { %v1828_v29 = vadd.f32 %v1827_v27, %v1826_v22  ;;  %v1829_v30 = vpop.f32.mrb[30].mxu1  ;;  %v1766_v34 = vpop.f32.mrb[31].mxu0 }
 0x132   :  { %v1146_v35 = vadd.f32 %v1764_v26, %v253_v24  ;;  %v1767_v36 = vadd.f32 %v1766_v34, %v1765_v28  ;;  %v1830_v37 = vpop.f32.mrb[31].mxu1 }
 0x133   :  { %v1831_v38 = vadd.f32 %v1830_v37, %v1829_v30 }
 0x134   :  { %v2728_v39 = vadd.f32 %v1828_v29, %v1146_v35  ;;  %v1149_v40 = vadd.f32 %v1767_v36, %v254_v32 }
 0x136   :  { %v2730_v42 = vadd.f32 %v1831_v38, %v1149_v40  ;;  %v1848_v44 = vpop.f32.mrb[32].mxu0 }
 0x137   :  { %v1912_v45 = vpop.f32.mrb[32].mxu1  ;;  %v1849_v46 = vpop.f32.mrb[33].mxu0 }
 0x138   :  { %v1850_v47 = vadd.f32 %v1849_v46, %v1848_v44  ;;  %v1913_v48 = vpop.f32.mrb[33].mxu1  ;;  %v1851_v50 = vpop.f32.mrb[34].mxu0 }
 0x139   :  { %v1914_v52 = vadd.f32 %v1913_v48, %v1912_v45  ;;  %v1915_v53 = vpop.f32.mrb[34].mxu1  ;;  %v1852_v54 = vpop.f32.mrb[35].mxu0 }
 0x13a   :  { %v1284_v55 = vadd.f32 %v1850_v47, %v2658_v31  ;;  %v1853_v56 = vadd.f32 %v1852_v54, %v1851_v50  ;;  %v1916_v57 = vpop.f32.mrb[35].mxu1 }
 0x13b   :  { %v1917_v58 = vadd.f32 %v1916_v57, %v1915_v53 }
 0x13c   :  { %v1287_v59 = vadd.f32 %v1853_v56, %v2660_v33  ;;  %v2734_v60 = vadd.f32 %v1914_v52, %v1284_v55 }
 0x13e   :  { %v1854_v62 = vpop.f32.mrb[36].mxu0  ;;  %v2736_v0 = vadd.f32 %v1917_v58, %v1287_v59 }
 0x13f   :  { %v1918_v1 = vpop.f32.mrb[36].mxu1  ;;  %v1855_v2 = vpop.f32.mrb[37].mxu0 }
 0x140   :  { %v1856_v4 = vadd.f32 %v1855_v2, %v1854_v62  ;;  %v1919_v6 = vpop.f32.mrb[37].mxu1  ;;  %v1857_v7 = vpop.f32.mrb[38].mxu0 }
 0x141   :  { %v1920_v8 = vadd.f32 %v1919_v6, %v1918_v1  ;;  %v1921_v9 = vpop.f32.mrb[38].mxu1  ;;  %v1858_v10 = vpop.f32.mrb[39].mxu0 }
 0x142   :  { %v1292_v31 = vadd.f32 %v1856_v4, %v2668_v49  ;;  %v1859_v11 = vadd.f32 %v1858_v10, %v1857_v7  ;;  %v1922_v12 = vpop.f32.mrb[39].mxu1 }
 0x143   :  { %v1923_v13 = vadd.f32 %v1922_v12, %v1921_v9 }
 0x144   :  { %v1295_v33 = vadd.f32 %v1859_v11, %v2670_v51  ;;  %v2740_v14 = vadd.f32 %v1920_v8, %v1292_v31 }
 0x146   :  { %v1860_v15 = vpop.f32.mrb[40].mxu0  ;;  %v2742_v16 = vadd.f32 %v1923_v13, %v1295_v33 }
 0x147   :  { %v1924_v18 = vpop.f32.mrb[40].mxu1  ;;  %v1861_v20 = vpop.f32.mrb[41].mxu0 }
 0x148   :  { %v1862_v22 = vadd.f32 %v1861_v20, %v1860_v15  ;;  %v1925_v24 = vpop.f32.mrb[41].mxu1  ;;  %v1863_v25 = vpop.f32.mrb[42].mxu0 }
 0x149   :  { %v1926_v26 = vadd.f32 %v1925_v24, %v1924_v18  ;;  %v1927_v27 = vpop.f32.mrb[42].mxu1  ;;  %v1864_v28 = vpop.f32.mrb[43].mxu0 }
 0x14a   :  { %v1300_v49 = vadd.f32 %v1862_v22, %v2678_v3  ;;  %v1865_v29 = vadd.f32 %v1864_v28, %v1863_v25  ;;  %v1928_v30 = vpop.f32.mrb[43].mxu1 }
 0x14b   :  { %v1929_v32 = vadd.f32 %v1928_v30, %v1927_v27 }
 0x14c   :  { %v1303_v51 = vadd.f32 %v1865_v29, %v2680_v5  ;;  %v2746_v34 = vadd.f32 %v1926_v26, %v1300_v49 }
 0x14e   :  { %v1866_v35 = vpop.f32.mrb[44].mxu0  ;;  %v2748_v36 = vadd.f32 %v1929_v32, %v1303_v51 }
 0x14f   :  { %v1930_v37 = vpop.f32.mrb[44].mxu1  ;;  %v1867_v38 = vpop.f32.mrb[45].mxu0 }
 0x150   :  { %v1868_v40 = vadd.f32 %v1867_v38, %v1866_v35  ;;  %v1931_v44 = vpop.f32.mrb[45].mxu1  ;;  %v1869_v45 = vpop.f32.mrb[46].mxu0 }
 0x151   :  { %v1932_v46 = vadd.f32 %v1931_v44, %v1930_v37  ;;  %v1933_v47 = vpop.f32.mrb[46].mxu1  ;;  %v1870_v48 = vpop.f32.mrb[47].mxu0 }
 0x152   :  { %v1308_v3 = vadd.f32 %v1868_v40, %v2688_v21  ;;  %v1871_v50 = vadd.f32 %v1870_v48, %v1869_v45  ;;  %v1934_v52 = vpop.f32.mrb[47].mxu1 }
 0x153   :  { %v1935_v53 = vadd.f32 %v1934_v52, %v1933_v47 }
 0x154   :  { %v1311_v5 = vadd.f32 %v1871_v50, %v2690_v23  ;;  %v2752_v54 = vadd.f32 %v1932_v46, %v1308_v3 }
 0x156   :  { %v1872_v55 = vpop.f32.mrb[48].mxu0  ;;  %v2754_v56 = vadd.f32 %v1935_v53, %v1311_v5 }
 0x157   :  { %v1936_v57 = vpop.f32.mrb[48].mxu1  ;;  %v1873_v58 = vpop.f32.mrb[49].mxu0 }
 0x158   :  { %v1874_v59 = vadd.f32 %v1873_v58, %v1872_v55  ;;  %v1937_v62 = vpop.f32.mrb[49].mxu1  ;;  %v1875_v1 = vpop.f32.mrb[50].mxu0 }
 0x159   :  { %v1938_v2 = vadd.f32 %v1937_v62, %v1936_v57  ;;  %v1939_v4 = vpop.f32.mrb[50].mxu1  ;;  %v1876_v6 = vpop.f32.mrb[51].mxu0 }
 0x15a   :  { %v1316_v21 = vadd.f32 %v1874_v59, %v2698_v41  ;;  %v1877_v7 = vadd.f32 %v1876_v6, %v1875_v1  ;;  %v1940_v8 = vpop.f32.mrb[51].mxu1 }
 0x15b   :  { %v1941_v9 = vadd.f32 %v1940_v8, %v1939_v4 }
 0x15c   :  { %v1319_v23 = vadd.f32 %v1877_v7, %v2700_v43  ;;  %v1413_v10 = vadd.f32 %v1938_v2, %v1316_v21 }
 0x15e   :  { %v1878_v31 = vpop.f32.mrb[52].mxu0  ;;  %v2758_v11 = vadd.f32 %v1941_v9, %v1319_v23 }
 0x15f   :  { %v1942_v12 = vpop.f32.mrb[52].mxu1  ;;  %v1879_v13 = vpop.f32.mrb[53].mxu0 }
 0x160   :  { %v1880_v33 = vadd.f32 %v1879_v13, %v1878_v31  ;;  %v1943_v15 = vpop.f32.mrb[53].mxu1  ;;  %v1881_v18 = vpop.f32.mrb[54].mxu0 }
 0x161   :  { %v1944_v20 = vadd.f32 %v1943_v15, %v1942_v12  ;;  %v1945_v22 = vpop.f32.mrb[54].mxu1  ;;  %v1882_v24 = vpop.f32.mrb[55].mxu0 }
 0x162   :  { %v1324_v25 = vadd.f32 %v1880_v33, %v2708_v61  ;;  %v1883_v41 = vadd.f32 %v1882_v24, %v1881_v18  ;;  %v1946_v26 = vpop.f32.mrb[55].mxu1 }
 0x163   :  { %v1947_v27 = vadd.f32 %v1946_v26, %v1945_v22 }
 0x164   :  { %v1327_v28 = vadd.f32 %v1883_v41, %v2710_v63  ;;  %v1421_v43 = vadd.f32 %v1944_v20, %v1324_v25 }
 0x166   :  { %v1884_v49 = vpop.f32.mrb[56].mxu0  ;;  %v1424_v29 = vadd.f32 %v1947_v27, %v1327_v28 }
 0x167   :  { %v1948_v30 = vpop.f32.mrb[56].mxu1  ;;  %v1885_v32 = vpop.f32.mrb[57].mxu0 }
 0x168   :  { %v1886_v51 = vadd.f32 %v1885_v32, %v1884_v49  ;;  %v1949_v35 = vpop.f32.mrb[57].mxu1  ;;  %v1887_v37 = vpop.f32.mrb[58].mxu0 }
 0x169   :  { %v1950_v38 = vadd.f32 %v1949_v35, %v1948_v30  ;;  %v1951_v40 = vpop.f32.mrb[58].mxu1  ;;  %v1888_v44 = vpop.f32.mrb[59].mxu0 }
 0x16a   :  { %v1332_v45 = vadd.f32 %v1886_v51, %v2718_v17  ;;  %v1889_v46 = vadd.f32 %v1888_v44, %v1887_v37  ;;  %v1952_v61 = vpop.f32.mrb[59].mxu1 }
 0x16b   :  { %v1953_v47 = vadd.f32 %v1952_v61, %v1951_v40 }
 0x16c   :  { %v1335_v48 = vadd.f32 %v1889_v46, %v2720_v19  ;;  %v1429_v3 = vadd.f32 %v1950_v38, %v1332_v45 }
 0x16e   :  { %v1890_v63 = vpop.f32.mrb[60].mxu0  ;;  %v1432_v50 = vadd.f32 %v1953_v47, %v1335_v48 }
 0x16f   :  { %v1954_v52 = vpop.f32.mrb[60].mxu1  ;;  %v1891_v53 = vpop.f32.mrb[61].mxu0 }
 0x170   :  { %v1892_v5 = vadd.f32 %v1891_v53, %v1890_v63  ;;  %v1955_v55 = vpop.f32.mrb[61].mxu1  ;;  %v1893_v57 = vpop.f32.mrb[62].mxu0 }
 0x171   :  { %v1956_v58 = vadd.f32 %v1955_v55, %v1954_v52  ;;  %v1957_v59 = vpop.f32.mrb[62].mxu1  ;;  %v1894_v62 = vpop.f32.mrb[63].mxu0 }
 0x172   :  { %v1340_v1 = vadd.f32 %v1892_v5, %v2728_v39  ;;  %v1895_v2 = vadd.f32 %v1894_v62, %v1893_v57  ;;  %v1958_v17 = vpop.f32.mrb[63].mxu1 }
 0x173   :  { %v1959_v4 = vadd.f32 %v1958_v17, %v1957_v59 }
 0x174   :  { %v1343_v6 = vadd.f32 %v1895_v2, %v2730_v42  ;;  %v1437_v21 = vadd.f32 %v1956_v58, %v1340_v1 }
 0x176   :  { %v1994_v19 = vpop.f32.mrb[64].mxu0  ;;  %v1440_v7 = vadd.f32 %v1959_v4, %v1343_v6 }
 0x177   :  { %v1486_v8 = vadd.f32 %v1994_v19, %v2740_v14  ;;  %v2002_v9 = vpop.f32.mrb[64].mxu1  ;;  %v1477_v23 = vpop.f32.mrb[65].mxu0 }
 0x178   :  { %v1518_v31 = vadd.f32 %v2002_v9, %v1421_v43  ;;  %v1478_v12 = vadd.f32 %v1477_v23, %v2734_v60  ;;  %v1509_v13 = vpop.f32.mrb[65].mxu1  ;;  %v1995_v33 = vpop.f32.mrb[66].mxu0 }
 0x179   :  { %1542 = vst [vmem:[%s2826_s3 + $0x10] sm:$0xff] %v1486_v8  ;;  %v1510_v39 = vadd.f32 %v1509_v13, %v1413_v10  ;;  %v1489_v15 = vadd.f32 %v1995_v33, %v2742_v16  ;;  %v2003_v42 = vpop.f32.mrb[66].mxu1  ;;  %v1480_v18 = vpop.f32.mrb[67].mxu0 }
 0x17a   :  { %1550 = vst [vmem:[%s2826_s3 + $0x50] sm:$0xff] %v1518_v31  ;;  %1540 = vst [vmem:[%s2826_s3] sm:$0xff] %v1478_v12  ;;  %v1521_v60 = vadd.f32 %v2003_v42, %v1424_v29  ;;  %v1481_v14 = vadd.f32 %v1480_v18, %v2736_v0  ;;  %v1512_v20 = vpop.f32.mrb[67].mxu1 }
 0x17b   :  { %1548 = vst [vmem:[%s2826_s3 + $0x40] sm:$0xff] %v1510_v39  ;;  %1543 = vst [vmem:[%s2826_s3 + $0x18] sm:$0xff] %v1489_v15  ;;  %v1513_v16 = vadd.f32 %v1512_v20, %v2758_v11 }
 0x17c   :  { %1551 = vst [vmem:[%s2826_s3 + $0x58] sm:$0xff] %v1521_v60  ;;  %1541 = vst [vmem:[%s2826_s3 + $0x8] sm:$0xff] %v1481_v14 }
 0x17d   :  { %1549 = vst [vmem:[%s2826_s3 + $0x48] sm:$0xff] %v1513_v16 }
 0x17e   :  { %v1998_v0 = vpop.f32.mrb[68].mxu0 }
 0x17f   :  { %v1502_v10 = vadd.f32 %v1998_v0, %v2752_v54  ;;  %v2006_v22 = vpop.f32.mrb[68].mxu1  ;;  %v1493_v24 = vpop.f32.mrb[69].mxu0 }
 0x180   :  { %v1534_v25 = vadd.f32 %v2006_v22, %v1437_v21  ;;  %v1494_v11 = vadd.f32 %v1493_v24, %v2746_v34  ;;  %v1525_v41 = vpop.f32.mrb[69].mxu1  ;;  %v1999_v26 = vpop.f32.mrb[70].mxu0 }
 0x181   :  { %1546 = vst [vmem:[%s2826_s3 + $0x30] sm:$0xff] %v1502_v10  ;;  %v1526_v27 = vadd.f32 %v1525_v41, %v1429_v3  ;;  %v1505_v28 = vadd.f32 %v1999_v26, %v2754_v56  ;;  %v2007_v43 = vpop.f32.mrb[70].mxu1  ;;  %v1496_v49 = vpop.f32.mrb[71].mxu0 }
 0x182   :  { %1554 = vst [vmem:[%s2826_s3 + $0x70] sm:$0xff] %v1534_v25  ;;  %1544 = vst [vmem:[%s2826_s3 + $0x20] sm:$0xff] %v1494_v11  ;;  %v1537_v34 = vadd.f32 %v2007_v43, %v1440_v7  ;;  %v1497_v54 = vadd.f32 %v1496_v49, %v2748_v36  ;;  %v1528_v29 = vpop.f32.mrb[71].mxu1 }
 0x183   :  { %1552 = vst [vmem:[%s2826_s3 + $0x60] sm:$0xff] %v1526_v27  ;;  %1547 = vst [vmem:[%s2826_s3 + $0x38] sm:$0xff] %v1505_v28  ;;  %v1529_v56 = vadd.f32 %v1528_v29, %v1432_v50 }
 0x184   :  { %1555 = vst [vmem:[%s2826_s3 + $0x78] sm:$0xff] %v1537_v34  ;;  %1545 = vst [vmem:[%s2826_s3 + $0x28] sm:$0xff] %v1497_v54 }
 0x185   :  { %1553 = vst [vmem:[%s2826_s3 + $0x68] sm:$0xff] %v1529_v56 }

// kernel: my_resnet_forward.34
= control target key start
LH: loop header
LB: loop body
LE: loop exit
PB: predicated region body
PF: predicated region fallthrough
CT: control target
= control target key end

     0   :  { %s2885_s1 = inlined_call_operand.vmem [shape: bf16[1152,128], index: 1, kind: input, shape index: {}]   ;;  %s2886_s0 = inlined_call_operand.vmem [shape: bf16[128,1152], index: 0, kind: input, shape index: {}]   ;;  %s2887_s2 = inlined_call_operand.vmem [shape: f32[1,128], index: 2, kind: input, shape index: {}]   ;;  %s2888_s3 = inlined_call_operand.vmem [shape: f32[1,128], index: 3, kind: input, shape index: {}]   ;;  %s2889_s4 = inlined_call_operand.vmem [shape: f32[128,128], index: 4, kind: output, shape index: {}]  }
   0x1   :  { %v2075_v0 = vld [vmem:[%s2885_s1 + $0x40] sm:$0xff]   ;;  %v2079_v4 = vld [vmem:[%s2885_s1 + $0x48] sm:$0xff]   ;;  %v2083_v8 = vld [vmem:[%s2885_s1 + $0x50] sm:$0xff]  }
   0x2   :  { %v2076_v1 = vld [vmem:[%s2885_s1 + $0xc0] sm:$0xff]   ;;  %1755 = vmatprep.subr.bf16.mxu0 %v2075_v0  ;;  %v2080_v5 = vld [vmem:[%s2885_s1 + $0xc8] sm:$0xff]   ;;  %v2084_v9 = vld [vmem:[%s2885_s1 + $0xd0] sm:$0xff]  }
   0x3   :  { %v2077_v2 = vld [vmem:[%s2885_s1] sm:$0xff]   ;;  %1819 = vmatprep.subr.bf16.mxu1 %v2076_v1  ;;  %v2081_v6 = vld [vmem:[%s2885_s1 + $0x8] sm:$0xff]   ;;  %v2085_v10 = vld [vmem:[%s2885_s1 + $0x10] sm:$0xff]  }
   0x4   :  { %v2078_v3 = vld [vmem:[%s2885_s1 + $0x80] sm:$0xff]   ;;  %1756 = vmatpush3.bf16.msra.mxu0 %v2077_v2  ;;  %v2082_v7 = vld [vmem:[%s2885_s1 + $0x88] sm:$0xff]   ;;  %v2086_v11 = vld [vmem:[%s2885_s1 + $0x90] sm:$0xff]  }
   0x5   :  { %1820 = vmatpush3.bf16.msra.mxu1 %v2078_v3  ;;  %1757 = vmatprep.subr.bf16.mxu0 %v2079_v4  ;;  %v2087_v12 = vld [vmem:[%s2885_s1 + $0x58] sm:$0xff]   ;;  %v2091_v16 = vld [vmem:[%s2885_s1 + $0x60] sm:$0xff]   ;;  %v2095_v20 = vld [vmem:[%s2885_s1 + $0x68] sm:$0xff]  }
   0x6   :  { %1821 = vmatprep.subr.bf16.mxu1 %v2080_v5  ;;  %v2088_v13 = vld [vmem:[%s2885_s1 + $0xd8] sm:$0xff]   ;;  %v2092_v17 = vld [vmem:[%s2885_s1 + $0xe0] sm:$0xff]   ;;  %v2096_v21 = vld [vmem:[%s2885_s1 + $0xe8] sm:$0xff]  }
   0x7   :  { %v2089_v14 = vld [vmem:[%s2885_s1 + $0x18] sm:$0xff]   ;;  %v2093_v18 = vld [vmem:[%s2885_s1 + $0x20] sm:$0xff]   ;;  %v2097_v22 = vld [vmem:[%s2885_s1 + $0x28] sm:$0xff]  }
   0x8   :  { %1758 = vmatpush3.bf16.msra.mxu0 %v2081_v6  ;;  %v2090_v15 = vld [vmem:[%s2885_s1 + $0x98] sm:$0xff]   ;;  %v2094_v19 = vld [vmem:[%s2885_s1 + $0xa0] sm:$0xff]   ;;  %v2098_v23 = vld [vmem:[%s2885_s1 + $0xa8] sm:$0xff]  }
   0x9   :  { %1822 = vmatpush3.bf16.msra.mxu1 %v2082_v7  ;;  %1759 = vmatprep.subr.bf16.mxu0 %v2083_v8  ;;  %v2099_v24 = vld [vmem:[%s2885_s1 + $0x70] sm:$0xff]   ;;  %v2103_v28 = vld [vmem:[%s2885_s1 + $0x78] sm:$0xff]   ;;  %v2107_v32 = vld [vmem:[%s2886_s0] ss:$36 sps:$4 sm:$0xff]  }
   0xa   :  { %1823 = vmatprep.subr.bf16.mxu1 %v2084_v9  ;;  %v2100_v25 = vld [vmem:[%s2885_s1 + $0xf0] sm:$0xff]   ;;  %v2104_v29 = vld [vmem:[%s2885_s1 + $0xf8] sm:$0xff]   ;;  %v2109_v33 = vld [vmem:[%s2886_s0 + $0x4] ss:$36 sps:$4 sm:$0xff]  }
   0xb   :  { %v2101_v26 = vld [vmem:[%s2885_s1 + $0x30] sm:$0xff]   ;;  %v2105_v30 = vld [vmem:[%s2885_s1 + $0x38] sm:$0xff]   ;;  %v2110_v34 = vld [vmem:[%s2886_s0 + $0x8] ss:$36 sps:$4 sm:$0xff]   ;;  %1074 = vmatprep.mubr.bf16.mxu0 %v2109_v33 }
   0xc   :  { %1760 = vmatpush3.bf16.msra.mxu0 %v2085_v10  ;;  %v2102_v27 = vld [vmem:[%s2885_s1 + $0xb0] sm:$0xff]   ;;  %v2106_v31 = vld [vmem:[%s2885_s1 + $0xb8] sm:$0xff]   ;;  %v2113_v36 = vld [vmem:[%s2885_s1 + $0x140] sm:$0xff]  }
   0xd   :  { %1824 = vmatpush3.bf16.msra.mxu1 %v2086_v11  ;;  %1761 = vmatprep.subr.bf16.mxu0 %v2087_v12  ;;  %v2112_v35 = vld [vmem:[%s2886_s0 + $0xc] ss:$36 sps:$4 sm:$0xff]   ;;  %v2114_v37 = vld [vmem:[%s2885_s1 + $0x1c0] sm:$0xff]   ;;  %v2119_v41 = vld [vmem:[%s2886_s0 + $0x54] ss:$36 sps:$4 sm:$0xff]  }
   0xe   :  { %1825 = vmatprep.subr.bf16.mxu1 %v2088_v13  ;;  %1171 = vmatprep.mubr.bf16.mxu1 %v2112_v35  ;;  %v2115_v38 = vld [vmem:[%s2885_s1 + $0x100] sm:$0xff]   ;;  %v2117_v40 = vld [vmem:[%s2886_s0 + $0x4c] ss:$36 sps:$4 sm:$0xff]   ;;  %v2127_v48 = vld [vmem:[%s2886_s0 + $0x94] ss:$36 sps:$4 sm:$0xff]  }
   0xf   :  { %v2116_v39 = vld [vmem:[%s2885_s1 + $0x180] sm:$0xff]   ;;  %v2121_v42 = vld [vmem:[%s2886_s0 + $0x48] ss:$36 sps:$4 sm:$0xff]   ;;  %v2122_v43 = vld [vmem:[%s2886_s0 + $0x50] ss:$36 sps:$4 sm:$0xff]  }
  0x10   :  { %1762 = vmatpush3.bf16.msra.mxu0 %v2089_v14  ;;  %v2123_v44 = vld [vmem:[%s2885_s1 + $0x148] sm:$0xff]   ;;  %v2129_v49 = vld [vmem:[%s2886_s0 + $0x9c] ss:$36 sps:$4 sm:$0xff]   ;;  %v2131_v50 = vld [vmem:[%s2886_s0 + $0x90] ss:$36 sps:$4 sm:$0xff]  }
  0x11   :  { %1826 = vmatpush3.bf16.msra.mxu1 %v2090_v15  ;;  %1763 = vmatprep.subr.bf16.mxu0 %v2091_v16  ;;  %v2124_v45 = vld [vmem:[%s2885_s1 + $0x1c8] sm:$0xff]   ;;  %v2132_v51 = vld [vmem:[%s2886_s0 + $0x98] ss:$36 sps:$4 sm:$0xff]   ;;  %v2133_v52 = vld [vmem:[%s2885_s1 + $0x150] sm:$0xff]  }
  0x12   :  { %1827 = vmatprep.subr.bf16.mxu1 %v2092_v17  ;;  %v2125_v46 = vld [vmem:[%s2885_s1 + $0x108] sm:$0xff]   ;;  %v2134_v53 = vld [vmem:[%s2885_s1 + $0x1d0] sm:$0xff]   ;;  %v2137_v56 = vld [vmem:[%s2886_s0 + $0xdc] ss:$36 sps:$4 sm:$0xff]  }
  0x13   :  { %v2126_v47 = vld [vmem:[%s2885_s1 + $0x188] sm:$0xff]   ;;  %v2135_v54 = vld [vmem:[%s2885_s1 + $0x110] sm:$0xff]   ;;  %v2141_v58 = vld [vmem:[%s2886_s0 + $0xd8] ss:$36 sps:$4 sm:$0xff]  }
  0x14   :  { %1764 = vmatpush3.bf16.msra.mxu0 %v2093_v18  ;;  %v2136_v55 = vld [vmem:[%s2885_s1 + $0x190] sm:$0xff]   ;;  %v2139_v57 = vld [vmem:[%s2886_s0 + $0xe4] ss:$36 sps:$4 sm:$0xff]   ;;  %v2143_v60 = vld [vmem:[%s2885_s1 + $0x158] sm:$0xff]  }
  0x15   :  { %1828 = vmatpush3.bf16.msra.mxu1 %v2094_v19  ;;  %1765 = vmatprep.subr.bf16.mxu0 %v2095_v20  ;;  %v2142_v59 = vld [vmem:[%s2886_s0 + $0xe0] ss:$36 sps:$4 sm:$0xff]   ;;  %v2144_v61 = vld [vmem:[%s2885_s1 + $0x1d8] sm:$0xff]   ;;  %v2149_v1 = vld [vmem:[%s2886_s0 + $0x12c] ss:$36 sps:$4 sm:$0xff]  }
  0x16   :  { %1829 = vmatprep.subr.bf16.mxu1 %v2096_v21  ;;  %v2145_v62 = vld [vmem:[%s2885_s1 + $0x118] sm:$0xff]   ;;  %v2147_v0 = vld [vmem:[%s2886_s0 + $0x124] ss:$36 sps:$4 sm:$0xff]   ;;  %v2157_v8 = vld [vmem:[%s2886_s0 + $0x16c] ss:$36 sps:$4 sm:$0xff]  }
  0x17   :  { %v2146_v63 = vld [vmem:[%s2885_s1 + $0x198] sm:$0xff]   ;;  %v2151_v2 = vld [vmem:[%s2886_s0 + $0x120] ss:$36 sps:$4 sm:$0xff]   ;;  %v2152_v4 = vld [vmem:[%s2886_s0 + $0x128] ss:$36 sps:$4 sm:$0xff]  }
  0x18   :  { %1766 = vmatpush3.bf16.msra.mxu0 %v2097_v22  ;;  %v2153_v3 = vld [vmem:[%s2885_s1 + $0x160] sm:$0xff]   ;;  %v2159_v9 = vld [vmem:[%s2886_s0 + $0x174] ss:$36 sps:$4 sm:$0xff]   ;;  %v2163_v10 = vld [vmem:[%s2885_s1 + $0x168] sm:$0xff]  }
  0x19   :  { %1830 = vmatpush3.bf16.msra.mxu1 %v2098_v23  ;;  %1767 = vmatprep.subr.bf16.mxu0 %v2099_v24  ;;  %v2154_v5 = vld [vmem:[%s2885_s1 + $0x1e0] sm:$0xff]   ;;  %v2164_v11 = vld [vmem:[%s2885_s1 + $0x1e8] sm:$0xff]   ;;  %v2162_v15 = vld [vmem:[%s2886_s0 + $0x170] ss:$36 sps:$4 sm:$0xff]  }
  0x1a   :  { %1831 = vmatprep.subr.bf16.mxu1 %v2100_v25  ;;  %v2155_v6 = vld [vmem:[%s2885_s1 + $0x120] sm:$0xff]   ;;  %v2161_v12 = vld [vmem:[%s2886_s0 + $0x168] ss:$36 sps:$4 sm:$0xff]   ;;  %v2167_v16 = vld [vmem:[%s2886_s0 + $0x1b4] ss:$36 sps:$4 sm:$0xff]  }
  0x1b   :  { %v2156_v7 = vld [vmem:[%s2885_s1 + $0x1a0] sm:$0xff]   ;;  %v2165_v13 = vld [vmem:[%s2885_s1 + $0x128] sm:$0xff]   ;;  %v2173_v18 = vld [vmem:[%s2885_s1 + $0x170] sm:$0xff]  }
  0x1c   :  { %1768 = vmatpush3.bf16.msra.mxu0 %v2101_v26  ;;  %v2166_v14 = vld [vmem:[%s2885_s1 + $0x1a8] sm:$0xff]   ;;  %v2169_v17 = vld [vmem:[%s2886_s0 + $0x1bc] ss:$36 sps:$4 sm:$0xff]   ;;  %v2174_v19 = vld [vmem:[%s2885_s1 + $0x1f0] sm:$0xff]  }
  0x1d   :  { %1832 = vmatpush3.bf16.msra.mxu1 %v2102_v27  ;;  %1769 = vmatprep.subr.bf16.mxu0 %v2103_v28  ;;  %v2175_v20 = vld [vmem:[%s2885_s1 + $0x130] sm:$0xff]   ;;  %v2172_v23 = vld [vmem:[%s2886_s0 + $0x1b8] ss:$36 sps:$4 sm:$0xff]   ;;  %v2179_v25 = vld [vmem:[%s2886_s0 + $0x204] ss:$36 sps:$4 sm:$0xff]  }
  0x1e   :  { %1833 = vmatprep.subr.bf16.mxu1 %v2104_v29  ;;  %v2176_v21 = vld [vmem:[%s2885_s1 + $0x1b0] sm:$0xff]   ;;  %v2177_v24 = vld [vmem:[%s2886_s0 + $0x1fc] ss:$36 sps:$4 sm:$0xff]  }
  0x1f   :  { %v2171_v22 = vld [vmem:[%s2886_s0 + $0x1b0] ss:$36 sps:$4 sm:$0xff]   ;;  %v2183_v26 = vld [vmem:[%s2885_s1 + $0x178] sm:$0xff]  }
  0x20   :  { %1770 = vmatpush3.bf16.msra.mxu0 %v2105_v30  ;;  %v2184_v27 = vld [vmem:[%s2885_s1 + $0x1f8] sm:$0xff]   ;;  %v2187_v35 = vld [vmem:[%s2886_s0 + $0x10] ss:$36 sps:$4 sm:$0xff]  }
  0x21   :  { %1834 = vmatpush3.bf16.msra.mxu1 %v2106_v31  ;;  %1883 = vmatprep.subr.bf16.mxu0 %v2113_v36  ;;  %v2185_v28 = vld [vmem:[%s2885_s1 + $0x138] sm:$0xff]   ;;  %v2182_v31 = vld [vmem:[%s2886_s0 + $0x200] ss:$36 sps:$4 sm:$0xff]  }
  0x22   :  { %1947 = vmatprep.subr.bf16.mxu1 %v2114_v37  ;;  %v2186_v29 = vld [vmem:[%s2885_s1 + $0x1b8] sm:$0xff]  }
  0x23   :  { %1075 = vmatmul.mubr.bf16.vlgmr.msra.gmra.mrb[0].mxu0 %v2107_v32  ;;  %v2181_v30 = vld [vmem:[%s2886_s0 + $0x1f8] ss:$36 sps:$4 sm:$0xff]   ;;  %v2193_v32 = vld [vmem:[%s2885_s1 + $0x200] sm:$0xff]  }
  0x24   :  { %1172 = vmatmul.mubr.bf16.vlgmr.msra.gmra.mrb[0].mxu1 %v2110_v34  ;;  %1884 = vmatpush3.bf16.msra.mxu0 %v2115_v38  ;;  %v2189_v33 = vld [vmem:[%s2886_s0 + $0x14] ss:$36 sps:$4 sm:$0xff]   ;;  %v2192_v34 = vld [vmem:[%s2886_s0 + $0x1c] ss:$36 sps:$4 sm:$0xff]   ;;  %v2196_v38 = vld [vmem:[%s2886_s0 + $0x64] ss:$36 sps:$4 sm:$0xff]  }
  0x25   :  { %1948 = vmatpush3.bf16.msra.mxu1 %v2116_v39  ;;  %1082 = vmatprep.mubr.bf16.mxu0 %v2117_v40  ;;  %v2190_v36 = vld [vmem:[%s2886_s0 + $0x18] ss:$36 sps:$4 sm:$0xff]   ;;  %v2200_v39 = vld [vmem:[%s2885_s1 + $0x208] sm:$0xff]   ;;  %v2207_v40 = vld [vmem:[%s2885_s1 + $0x210] sm:$0xff]  }
  0x26   :  { %1179 = vmatprep.mubr.bf16.mxu1 %v2119_v41  ;;  %1885 = vmatprep.subr.bf16.mxu0 %v2123_v44  ;;  %v2194_v37 = vld [vmem:[%s2886_s0 + $0x5c] ss:$36 sps:$4 sm:$0xff]   ;;  %v2203_v44 = vld [vmem:[%s2886_s0 + $0xac] ss:$36 sps:$4 sm:$0xff]  }
  0x27   :  { %1949 = vmatprep.subr.bf16.mxu1 %v2124_v45  ;;  %v2198_v41 = vld [vmem:[%s2886_s0 + $0x58] ss:$36 sps:$4 sm:$0xff]  }
  0x28   :  { %1886 = vmatpush3.bf16.msra.mxu0 %v2125_v46  ;;  %v2214_v45 = vld [vmem:[%s2885_s1 + $0x218] sm:$0xff]   ;;  %v2221_v46 = vld [vmem:[%s2885_s1 + $0x220] sm:$0xff]  }
  0x29   :  { %1950 = vmatpush3.bf16.msra.mxu1 %v2126_v47  ;;  %1887 = vmatprep.subr.bf16.mxu0 %v2133_v52  ;;  %v2205_v47 = vld [vmem:[%s2886_s0 + $0xa0] ss:$36 sps:$4 sm:$0xff]   ;;  %v2212_v52 = vld [vmem:[%s2886_s0 + $0xe8] ss:$36 sps:$4 sm:$0xff]  }
  0x2a   :  { %1951 = vmatprep.subr.bf16.mxu1 %v2134_v53  ;;  %v2235_v53 = vld [vmem:[%s2885_s1 + $0x230] sm:$0xff]  }
  0x2b   :  { %1083 = vmatmul.mubr.bf16.gmra.mrb[4].mxu0 %v2121_v42  ;;  %v2199_v42 = vld [vmem:[%s2886_s0 + $0x60] ss:$36 sps:$4 sm:$0xff]  }
  0x2c   :  { %1180 = vmatmul.mubr.bf16.gmra.mrb[4].mxu1 %v2122_v43  ;;  %1090 = vmatprep.mubr.bf16.mxu0 %v2127_v48  ;;  %v2201_v43 = vld [vmem:[%s2886_s0 + $0xa4] ss:$36 sps:$4 sm:$0xff]  }
  0x2d   :  { %1187 = vmatprep.mubr.bf16.mxu1 %v2129_v49  ;;  %1888 = vmatpush3.bf16.msra.mxu0 %v2135_v54  ;;  %v2206_v48 = vld [vmem:[%s2886_s0 + $0xa8] ss:$36 sps:$4 sm:$0xff]   ;;  %v2213_v54 = vld [vmem:[%s2886_s0 + $0xf0] ss:$36 sps:$4 sm:$0xff]  }
  0x2e   :  { %1952 = vmatpush3.bf16.msra.mxu1 %v2136_v55  ;;  %1889 = vmatprep.subr.bf16.mxu0 %v2143_v60  ;;  %v2208_v49 = vld [vmem:[%s2886_s0 + $0xec] ss:$36 sps:$4 sm:$0xff]   ;;  %v2215_v55 = vld [vmem:[%s2886_s0 + $0x134] ss:$36 sps:$4 sm:$0xff]   ;;  %v2222_v60 = vld [vmem:[%s2886_s0 + $0x17c] ss:$36 sps:$4 sm:$0xff]  }
  0x2f   :  { %1953 = vmatprep.subr.bf16.mxu1 %v2144_v61  ;;  %v2224_v61 = vld [vmem:[%s2886_s0 + $0x184] ss:$36 sps:$4 sm:$0xff]  }
  0x31   :  { %1890 = vmatpush3.bf16.msra.mxu0 %v2145_v62  ;;  %v2226_v62 = vld [vmem:[%s2886_s0 + $0x178] ss:$36 sps:$4 sm:$0xff]  }
  0x32   :  { %1954 = vmatpush3.bf16.msra.mxu1 %v2146_v63  ;;  %1891 = vmatprep.subr.bf16.mxu0 %v2153_v3  ;;  %v2227_v63 = vld [vmem:[%s2886_s0 + $0x180] ss:$36 sps:$4 sm:$0xff]   ;;  %v2234_v3 = vld [vmem:[%s2886_s0 + $0x1c8] ss:$36 sps:$4 sm:$0xff]  }
  0x33   :  { %1091 = vmatmul.mubr.bf16.gmra.mrb[8].mxu0 %v2131_v50  ;;  %1955 = vmatprep.subr.bf16.mxu1 %v2154_v5  ;;  %v2210_v50 = vld [vmem:[%s2886_s0 + $0xf4] ss:$36 sps:$4 sm:$0xff]  }
  0x34   :  { %1188 = vmatmul.mubr.bf16.gmra.mrb[8].mxu1 %v2132_v51  ;;  %1098 = vmatprep.mubr.bf16.mxu0 %v2137_v56  ;;  %v2228_v51 = vld [vmem:[%s2885_s1 + $0x228] sm:$0xff]   ;;  %v2217_v56 = vld [vmem:[%s2886_s0 + $0x13c] ss:$36 sps:$4 sm:$0xff]   ;;  %v2238_v5 = vld [vmem:[%s2886_s0 + $0x214] ss:$36 sps:$4 sm:$0xff]  }
  0x35   :  { %1195 = vmatprep.mubr.bf16.mxu1 %v2139_v57  ;;  %1892 = vmatpush3.bf16.msra.mxu0 %v2155_v6  ;;  %v2242_v57 = vld [vmem:[%s2885_s1 + $0x238] sm:$0xff]   ;;  %v2240_v6 = vld [vmem:[%s2886_s0 + $0x208] ss:$36 sps:$4 sm:$0xff]  }
  0x36   :  { %1956 = vmatpush3.bf16.msra.mxu1 %v2156_v7  ;;  %1893 = vmatprep.subr.bf16.mxu0 %v2163_v10  ;;  %v2241_v7 = vld [vmem:[%s2886_s0 + $0x210] ss:$36 sps:$4 sm:$0xff]   ;;  %v2245_v10 = vld [vmem:[%s2886_s0 + $0x68] ss:$36 sps:$4 sm:$0xff]  }
  0x37   :  { %1957 = vmatprep.subr.bf16.mxu1 %v2164_v11  ;;  %v2246_v11 = vld [vmem:[%s2886_s0 + $0x188] ss:$36 sps:$4 sm:$0xff]  }
  0x39   :  { %1894 = vmatpush3.bf16.msra.mxu0 %v2165_v13  ;;  %v2248_v13 = vld [vmem:[%s2886_s0 + $0x1d0] ss:$36 sps:$4 sm:$0xff]  }
  0x3a   :  { %1958 = vmatpush3.bf16.msra.mxu1 %v2166_v14  ;;  %1895 = vmatprep.subr.bf16.mxu0 %v2173_v18  ;;  %v2249_v14 = vld [vmem:[%s2886_s0 + $0xf8] ss:$36 sps:$4 sm:$0xff]  }
  0x3b   :  { %1099 = vmatmul.mubr.bf16.gmra.mrb[12].mxu0 %v2141_v58  ;;  %1959 = vmatprep.subr.bf16.mxu1 %v2174_v19  ;;  %v2219_v58 = vld [vmem:[%s2886_s0 + $0x130] ss:$36 sps:$4 sm:$0xff]  }
  0x3c   :  { %1196 = vmatmul.mubr.bf16.gmra.mrb[12].mxu1 %v2142_v59  ;;  %1106 = vmatprep.mubr.bf16.mxu0 %v2147_v0  ;;  %v2220_v59 = vld [vmem:[%s2886_s0 + $0x138] ss:$36 sps:$4 sm:$0xff]   ;;  %v2229_v0 = vld [vmem:[%s2886_s0 + $0x1c4] ss:$36 sps:$4 sm:$0xff]  }
  0x3d   :  { %1203 = vmatprep.mubr.bf16.mxu1 %v2149_v1  ;;  %1896 = vmatpush3.bf16.msra.mxu0 %v2175_v20  ;;  %v2231_v1 = vld [vmem:[%s2886_s0 + $0x1cc] ss:$36 sps:$4 sm:$0xff]  }
  0x3e   :  { %1960 = vmatpush3.bf16.msra.mxu1 %v2176_v21  ;;  %1897 = vmatprep.subr.bf16.mxu0 %v2183_v26 }
  0x3f   :  { %1961 = vmatprep.subr.bf16.mxu1 %v2184_v27 }
  0x41   :  { %1898 = vmatpush3.bf16.msra.mxu0 %v2185_v28 }
  0x42   :  { %1962 = vmatpush3.bf16.msra.mxu1 %v2186_v29  ;;  %2027 = vmatprep.subr.bf16.mxu0 %v2193_v32 }
  0x43   :  { %1107 = vmatmul.mubr.bf16.gmra.mrb[16].mxu0 %v2151_v2  ;;  %2059 = vmatprep.subr.bf16.mxu1 %v2193_v32  ;;  %v2233_v2 = vld [vmem:[%s2886_s0 + $0x1c0] ss:$36 sps:$4 sm:$0xff]  }
  0x44   :  { %1204 = vmatmul.mubr.bf16.gmra.mrb[16].mxu1 %v2152_v4  ;;  %1114 = vmatprep.mubr.bf16.mxu0 %v2157_v8  ;;  %v2236_v4 = vld [vmem:[%s2886_s0 + $0x20c] ss:$36 sps:$4 sm:$0xff]   ;;  %v2243_v8 = vld [vmem:[%s2886_s0 + $0x20] ss:$36 sps:$4 sm:$0xff]  }
  0x45   :  { %1211 = vmatprep.mubr.bf16.mxu1 %v2159_v9  ;;  %v2244_v9 = vld [vmem:[%s2886_s0 + $0x140] ss:$36 sps:$4 sm:$0xff]  }
  0x4b   :  { %1115 = vmatmul.mubr.bf16.gmra.mrb[20].mxu0 %v2161_v12  ;;  %v2247_v12 = vld [vmem:[%s2886_s0 + $0xb0] ss:$36 sps:$4 sm:$0xff]  }
  0x4c   :  { %1212 = vmatmul.mubr.bf16.gmra.mrb[20].mxu1 %v2162_v15  ;;  %1122 = vmatprep.mubr.bf16.mxu0 %v2167_v16  ;;  %v2250_v15 = vld [vmem:[%s2886_s0 + $0x218] ss:$36 sps:$4 sm:$0xff]  }
  0x4d   :  { %1219 = vmatprep.mubr.bf16.mxu1 %v2169_v17 }
  0x53   :  { %1123 = vmatmul.mubr.bf16.gmra.mrb[24].mxu0 %v2171_v22 }
  0x54   :  { %1220 = vmatmul.mubr.bf16.gmra.mrb[24].mxu1 %v2172_v23  ;;  %1130 = vmatprep.mubr.bf16.mxu0 %v2177_v24 }
  0x55   :  { %1227 = vmatprep.mubr.bf16.mxu1 %v2179_v25 }
  0x5b   :  { %1131 = vmatmul.mubr.bf16.gmra.mrb[28].mxu0 %v2181_v30 }
  0x5c   :  { %1228 = vmatmul.mubr.bf16.gmra.mrb[28].mxu1 %v2182_v31  ;;  %1268 = vmatprep.mubr.bf16.mxu0 %v2189_v33 }
  0x5d   :  { %1365 = vmatprep.mubr.bf16.mxu1 %v2192_v34 }
  0x63   :  { %1269 = vmatmul.mubr.bf16.vlgmr.msra.gmra.mrb[32].mxu0 %v2187_v35 }
  0x64   :  { %1366 = vmatmul.mubr.bf16.vlgmr.msra.gmra.mrb[32].mxu1 %v2190_v36  ;;  %2028 = vmatpush3.bf16.msra.mxu0 %v2193_v32 }
  0x65   :  { %2067 = vmatpush3.bf16.msra.mxu1 %v2193_v32  ;;  %1276 = vmatprep.mubr.bf16.mxu0 %v2194_v37 }
  0x66   :  { %1373 = vmatprep.mubr.bf16.mxu1 %v2196_v38  ;;  %2029 = vmatprep.subr.bf16.mxu0 %v2200_v39 }
  0x67   :  { %2060 = vmatprep.subr.bf16.mxu1 %v2200_v39 }
  0x68   :  { %2030 = vmatpush3.bf16.msra.mxu0 %v2200_v39 }
  0x69   :  { %2068 = vmatpush3.bf16.msra.mxu1 %v2200_v39  ;;  %2031 = vmatprep.subr.bf16.mxu0 %v2207_v40 }
  0x6a   :  { %2061 = vmatprep.subr.bf16.mxu1 %v2207_v40 }
  0x6b   :  { %1277 = vmatmul.mubr.bf16.gmra.mrb[36].mxu0 %v2198_v41 }
  0x6c   :  { %1374 = vmatmul.mubr.bf16.gmra.mrb[36].mxu1 %v2199_v42  ;;  %1284 = vmatprep.mubr.bf16.mxu0 %v2201_v43 }
  0x6d   :  { %1381 = vmatprep.mubr.bf16.mxu1 %v2203_v44  ;;  %2032 = vmatpush3.bf16.msra.mxu0 %v2207_v40 }
  0x6e   :  { %2069 = vmatpush3.bf16.msra.mxu1 %v2207_v40  ;;  %2033 = vmatprep.subr.bf16.mxu0 %v2214_v45 }
  0x6f   :  { %2062 = vmatprep.subr.bf16.mxu1 %v2214_v45 }
  0x71   :  { %2034 = vmatpush3.bf16.msra.mxu0 %v2214_v45 }
  0x72   :  { %2070 = vmatpush3.bf16.msra.mxu1 %v2214_v45  ;;  %2035 = vmatprep.subr.bf16.mxu0 %v2221_v46 }
  0x73   :  { %1285 = vmatmul.mubr.bf16.gmra.mrb[40].mxu0 %v2205_v47  ;;  %2063 = vmatprep.subr.bf16.mxu1 %v2221_v46 }
  0x74   :  { %1382 = vmatmul.mubr.bf16.gmra.mrb[40].mxu1 %v2206_v48  ;;  %1292 = vmatprep.mubr.bf16.mxu0 %v2208_v49 }
  0x75   :  { %1389 = vmatprep.mubr.bf16.mxu1 %v2210_v50  ;;  %2036 = vmatpush3.bf16.msra.mxu0 %v2221_v46 }
  0x76   :  { %2071 = vmatpush3.bf16.msra.mxu1 %v2221_v46  ;;  %2037 = vmatprep.subr.bf16.mxu0 %v2228_v51 }
  0x77   :  { %2064 = vmatprep.subr.bf16.mxu1 %v2228_v51 }
  0x79   :  { %2038 = vmatpush3.bf16.msra.mxu0 %v2228_v51 }
  0x7a   :  { %2072 = vmatpush3.bf16.msra.mxu1 %v2228_v51  ;;  %2039 = vmatprep.subr.bf16.mxu0 %v2235_v53 }
  0x7b   :  { %1293 = vmatmul.mubr.bf16.gmra.mrb[44].mxu0 %v2212_v52  ;;  %2065 = vmatprep.subr.bf16.mxu1 %v2235_v53 }
  0x7c   :  { %1390 = vmatmul.mubr.bf16.gmra.mrb[44].mxu1 %v2213_v54  ;;  %1300 = vmatprep.mubr.bf16.mxu0 %v2215_v55 }
  0x7d   :  { %1397 = vmatprep.mubr.bf16.mxu1 %v2217_v56  ;;  %2040 = vmatpush3.bf16.msra.mxu0 %v2235_v53 }
  0x7e   :  { %2073 = vmatpush3.bf16.msra.mxu1 %v2235_v53  ;;  %2041 = vmatprep.subr.bf16.mxu0 %v2242_v57 }
  0x7f   :  { %2066 = vmatprep.subr.bf16.mxu1 %v2242_v57 }
  0x81   :  { %2042 = vmatpush3.bf16.msra.mxu0 %v2242_v57 }
  0x82   :  { %2074 = vmatpush3.bf16.msra.mxu1 %v2242_v57 }
  0x83   :  { %1301 = vmatmul.mubr.bf16.gmra.mrb[48].mxu0 %v2219_v58 }
  0x84   :  { %1398 = vmatmul.mubr.bf16.gmra.mrb[48].mxu1 %v2220_v59  ;;  %1308 = vmatprep.mubr.bf16.mxu0 %v2222_v60 }
  0x85   :  { %1405 = vmatprep.mubr.bf16.mxu1 %v2224_v61 }
  0x8b   :  { %1309 = vmatmul.mubr.bf16.gmra.mrb[52].mxu0 %v2226_v62 }
  0x8c   :  { %1406 = vmatmul.mubr.bf16.gmra.mrb[52].mxu1 %v2227_v63  ;;  %1316 = vmatprep.mubr.bf16.mxu0 %v2229_v0 }
  0x8d   :  { %1413 = vmatprep.mubr.bf16.mxu1 %v2231_v1 }
  0x93   :  { %1317 = vmatmul.mubr.bf16.gmra.mrb[56].mxu0 %v2233_v2 }
  0x94   :  { %1414 = vmatmul.mubr.bf16.gmra.mrb[56].mxu1 %v2234_v3  ;;  %1324 = vmatprep.mubr.bf16.mxu0 %v2236_v4 }
  0x95   :  { %1421 = vmatprep.mubr.bf16.mxu1 %v2238_v5 }
  0x9b   :  { %1325 = vmatmul.mubr.bf16.gmra.mrb[60].mxu0 %v2240_v6 }
  0x9c   :  { %1422 = vmatmul.mubr.bf16.gmra.mrb[60].mxu1 %v2241_v7  ;;  %2043 = vmatprep.mubr.bf16.mxu0 %v2243_v8 }
  0x9d   :  { %2051 = vmatprep.mubr.bf16.mxu1 %v2244_v9 }
  0xa3   :  { %2044 = vmatmul.mubr.bf16.vlgmr.msra.gmra.mrb[64].mxu0 %v2245_v10 }
  0xa4   :  { %2052 = vmatmul.mubr.bf16.vlgmr.msra.gmra.mrb[64].mxu1 %v2246_v11  ;;  %2047 = vmatprep.mubr.bf16.mxu0 %v2247_v12 }
  0xa5   :  { %2055 = vmatprep.mubr.bf16.mxu1 %v2248_v13 }
  0xab   :  { %2048 = vmatmul.mubr.bf16.gmra.mrb[68].mxu0 %v2249_v14 }
  0xac   :  { %2056 = vmatmul.mubr.bf16.gmra.mrb[68].mxu1 %v2250_v15 }
  0xf6   :  { %v1771_v16 = vpop.f32.mrb[0].mxu0 }
  0xf7   :  { %v1835_v17 = vpop.f32.mrb[0].mxu1  ;;  %v1772_v18 = vpop.f32.mrb[1].mxu0 }
  0xf8   :  { %v1773_v19 = vadd.f32 %v1772_v18, %v1771_v16  ;;  %v1836_v20 = vpop.f32.mrb[1].mxu1  ;;  %v1774_v21 = vpop.f32.mrb[2].mxu0 }
  0xf9   :  { %v1837_v22 = vadd.f32 %v1836_v20, %v1835_v17  ;;  %v1838_v23 = vpop.f32.mrb[2].mxu1  ;;  %v1775_v24 = vpop.f32.mrb[3].mxu0 }
  0xfa   :  { %v1776_v25 = vadd.f32 %v1775_v24, %v1774_v21  ;;  %v1839_v26 = vpop.f32.mrb[3].mxu1 }
  0xfb   :  { %v2708_v27 = vadd.f32 %v1837_v22, %v1773_v19  ;;  %v1840_v28 = vadd.f32 %v1839_v26, %v1838_v23 }
  0xfd   :  { %v2710_v29 = vadd.f32 %v1840_v28, %v1776_v25 }
  0xfe   :  { %v1777_v30 = vpop.f32.mrb[4].mxu0 }
  0xff   :  { %v1841_v31 = vpop.f32.mrb[4].mxu1  ;;  %v1778_v32 = vpop.f32.mrb[5].mxu0 }
 0x100   :  { %v1779_v33 = vadd.f32 %v1778_v32, %v1777_v30  ;;  %v1842_v34 = vpop.f32.mrb[5].mxu1  ;;  %v1780_v35 = vpop.f32.mrb[6].mxu0 }
 0x101   :  { %v1843_v36 = vadd.f32 %v1842_v34, %v1841_v31  ;;  %v1844_v37 = vpop.f32.mrb[6].mxu1  ;;  %v1781_v38 = vpop.f32.mrb[7].mxu0 }
 0x102   :  { %v1782_v39 = vadd.f32 %v1781_v38, %v1780_v35  ;;  %v1845_v40 = vpop.f32.mrb[7].mxu1 }
 0x103   :  { %v2712_v41 = vadd.f32 %v1843_v36, %v1779_v33  ;;  %v1846_v42 = vadd.f32 %v1845_v40, %v1844_v37 }
 0x105   :  { %v2714_v43 = vadd.f32 %v1846_v42, %v1782_v39 }
 0x106   :  { %v1783_v44 = vpop.f32.mrb[8].mxu0 }
 0x107   :  { %v1847_v45 = vpop.f32.mrb[8].mxu1  ;;  %v1784_v46 = vpop.f32.mrb[9].mxu0 }
 0x108   :  { %v1785_v47 = vadd.f32 %v1784_v46, %v1783_v44  ;;  %v1848_v48 = vpop.f32.mrb[9].mxu1  ;;  %v1786_v49 = vpop.f32.mrb[10].mxu0 }
 0x109   :  { %v1849_v50 = vadd.f32 %v1848_v48, %v1847_v45  ;;  %v1850_v51 = vpop.f32.mrb[10].mxu1  ;;  %v1787_v52 = vpop.f32.mrb[11].mxu0 }
 0x10a   :  { %v1788_v53 = vadd.f32 %v1787_v52, %v1786_v49  ;;  %v1851_v54 = vpop.f32.mrb[11].mxu1 }
 0x10b   :  { %v2716_v55 = vadd.f32 %v1849_v50, %v1785_v47  ;;  %v1852_v56 = vadd.f32 %v1851_v54, %v1850_v51 }
 0x10d   :  { %v2718_v57 = vadd.f32 %v1852_v56, %v1788_v53 }
 0x10e   :  { %v1789_v58 = vpop.f32.mrb[12].mxu0 }
 0x10f   :  { %v1853_v59 = vpop.f32.mrb[12].mxu1  ;;  %v1790_v60 = vpop.f32.mrb[13].mxu0 }
 0x110   :  { %v1791_v61 = vadd.f32 %v1790_v60, %v1789_v58  ;;  %v1854_v62 = vpop.f32.mrb[13].mxu1  ;;  %v1792_v63 = vpop.f32.mrb[14].mxu0 }
 0x111   :  { %v1855_v0 = vadd.f32 %v1854_v62, %v1853_v59  ;;  %v1856_v1 = vpop.f32.mrb[14].mxu1  ;;  %v1793_v2 = vpop.f32.mrb[15].mxu0 }
 0x112   :  { %v1794_v3 = vadd.f32 %v1793_v2, %v1792_v63  ;;  %v1857_v4 = vpop.f32.mrb[15].mxu1 }
 0x113   :  { %v2720_v5 = vadd.f32 %v1855_v0, %v1791_v61  ;;  %v1858_v6 = vadd.f32 %v1857_v4, %v1856_v1 }
 0x115   :  { %v2722_v7 = vadd.f32 %v1858_v6, %v1794_v3 }
 0x116   :  { %v1795_v8 = vpop.f32.mrb[16].mxu0 }
 0x117   :  { %v1859_v9 = vpop.f32.mrb[16].mxu1  ;;  %v1796_v10 = vpop.f32.mrb[17].mxu0 }
 0x118   :  { %v1797_v11 = vadd.f32 %v1796_v10, %v1795_v8  ;;  %v1860_v12 = vpop.f32.mrb[17].mxu1  ;;  %v1798_v13 = vpop.f32.mrb[18].mxu0 }
 0x119   :  { %v1861_v14 = vadd.f32 %v1860_v12, %v1859_v9  ;;  %v1862_v15 = vpop.f32.mrb[18].mxu1  ;;  %v1799_v16 = vpop.f32.mrb[19].mxu0 }
 0x11a   :  { %v1800_v17 = vadd.f32 %v1799_v16, %v1798_v13  ;;  %v1863_v18 = vpop.f32.mrb[19].mxu1 }
 0x11b   :  { %v2724_v19 = vadd.f32 %v1861_v14, %v1797_v11  ;;  %v1864_v20 = vadd.f32 %v1863_v18, %v1862_v15 }
 0x11d   :  { %v2726_v21 = vadd.f32 %v1864_v20, %v1800_v17 }
 0x11e   :  { %v1801_v22 = vpop.f32.mrb[20].mxu0 }
 0x11f   :  { %v1865_v23 = vpop.f32.mrb[20].mxu1  ;;  %v1802_v24 = vpop.f32.mrb[21].mxu0 }
 0x120   :  { %v1803_v25 = vadd.f32 %v1802_v24, %v1801_v22  ;;  %v1866_v26 = vpop.f32.mrb[21].mxu1  ;;  %v1804_v28 = vpop.f32.mrb[22].mxu0 }
 0x121   :  { %v1867_v30 = vadd.f32 %v1866_v26, %v1865_v23  ;;  %v1868_v31 = vpop.f32.mrb[22].mxu1  ;;  %v1805_v32 = vpop.f32.mrb[23].mxu0 }
 0x122   :  { %v1806_v33 = vadd.f32 %v1805_v32, %v1804_v28  ;;  %v1869_v34 = vpop.f32.mrb[23].mxu1 }
 0x123   :  { %v2728_v35 = vadd.f32 %v1867_v30, %v1803_v25  ;;  %v1870_v36 = vadd.f32 %v1869_v34, %v1868_v31 }
 0x125   :  { %v2730_v37 = vadd.f32 %v1870_v36, %v1806_v33 }
 0x126   :  { %v1807_v38 = vpop.f32.mrb[24].mxu0 }
 0x127   :  { %v1871_v39 = vpop.f32.mrb[24].mxu1  ;;  %v1808_v40 = vpop.f32.mrb[25].mxu0 }
 0x128   :  { %v1809_v42 = vadd.f32 %v1808_v40, %v1807_v38  ;;  %v1872_v44 = vpop.f32.mrb[25].mxu1  ;;  %v1810_v45 = vpop.f32.mrb[26].mxu0 }
 0x129   :  { %v1873_v46 = vadd.f32 %v1872_v44, %v1871_v39  ;;  %v1874_v47 = vpop.f32.mrb[26].mxu1  ;;  %v1811_v48 = vpop.f32.mrb[27].mxu0 }
 0x12a   :  { %v1812_v49 = vadd.f32 %v1811_v48, %v1810_v45  ;;  %v1875_v50 = vpop.f32.mrb[27].mxu1 }
 0x12b   :  { %v2732_v51 = vadd.f32 %v1873_v46, %v1809_v42  ;;  %v1876_v52 = vadd.f32 %v1875_v50, %v1874_v47 }
 0x12d   :  { %v2734_v53 = vadd.f32 %v1876_v52, %v1812_v49 }
 0x12e   :  { %v1813_v54 = vpop.f32.mrb[28].mxu0 }
 0x12f   :  { %v1877_v56 = vpop.f32.mrb[28].mxu1  ;;  %v1814_v58 = vpop.f32.mrb[29].mxu0 }
 0x130   :  { %v1815_v59 = vadd.f32 %v1814_v58, %v1813_v54  ;;  %v1878_v60 = vpop.f32.mrb[29].mxu1  ;;  %v1816_v61 = vpop.f32.mrb[30].mxu0 }
 0x131   :  { %v1879_v62 = vadd.f32 %v1878_v60, %v1877_v56  ;;  %v1880_v63 = vpop.f32.mrb[30].mxu1  ;;  %v1817_v0 = vpop.f32.mrb[31].mxu0 }
 0x132   :  { %v1818_v1 = vadd.f32 %v1817_v0, %v1816_v61  ;;  %v1881_v2 = vpop.f32.mrb[31].mxu1 }
 0x133   :  { %v2736_v3 = vadd.f32 %v1879_v62, %v1815_v59  ;;  %v1882_v4 = vadd.f32 %v1881_v2, %v1880_v63 }
 0x135   :  { %v2738_v6 = vadd.f32 %v1882_v4, %v1818_v1 }
 0x136   :  { %v1899_v8 = vpop.f32.mrb[32].mxu0 }
 0x137   :  { %v1963_v9 = vpop.f32.mrb[32].mxu1  ;;  %v1900_v10 = vpop.f32.mrb[33].mxu0 }
 0x138   :  { %v1901_v11 = vadd.f32 %v1900_v10, %v1899_v8  ;;  %v1964_v12 = vpop.f32.mrb[33].mxu1  ;;  %v1902_v13 = vpop.f32.mrb[34].mxu0 }
 0x139   :  { %v1965_v14 = vadd.f32 %v1964_v12, %v1963_v9  ;;  %v1966_v15 = vpop.f32.mrb[34].mxu1  ;;  %v1903_v16 = vpop.f32.mrb[35].mxu0 }
 0x13a   :  { %v1271_v17 = vadd.f32 %v1901_v11, %v2708_v27  ;;  %v1904_v18 = vadd.f32 %v1903_v16, %v1902_v13  ;;  %v1967_v20 = vpop.f32.mrb[35].mxu1 }
 0x13b   :  { %v1968_v22 = vadd.f32 %v1967_v20, %v1966_v15 }
 0x13c   :  { %v1274_v23 = vadd.f32 %v1904_v18, %v2710_v29  ;;  %v2742_v24 = vadd.f32 %v1965_v14, %v1271_v17 }
 0x13e   :  { %v1905_v25 = vpop.f32.mrb[36].mxu0  ;;  %v2744_v26 = vadd.f32 %v1968_v22, %v1274_v23 }
 0x13f   :  { %v1969_v28 = vpop.f32.mrb[36].mxu1  ;;  %v1906_v30 = vpop.f32.mrb[37].mxu0 }
 0x140   :  { %v1907_v31 = vadd.f32 %v1906_v30, %v1905_v25  ;;  %v1970_v32 = vpop.f32.mrb[37].mxu1  ;;  %v1908_v33 = vpop.f32.mrb[38].mxu0 }
 0x141   :  { %v1971_v34 = vadd.f32 %v1970_v32, %v1969_v28  ;;  %v1972_v36 = vpop.f32.mrb[38].mxu1  ;;  %v1909_v38 = vpop.f32.mrb[39].mxu0 }
 0x142   :  { %v1279_v27 = vadd.f32 %v1907_v31, %v2712_v41  ;;  %v1910_v39 = vadd.f32 %v1909_v38, %v1908_v33  ;;  %v1973_v40 = vpop.f32.mrb[39].mxu1 }
 0x143   :  { %v1974_v42 = vadd.f32 %v1973_v40, %v1972_v36 }
 0x144   :  { %v1282_v29 = vadd.f32 %v1910_v39, %v2714_v43  ;;  %v2748_v44 = vadd.f32 %v1971_v34, %v1279_v27 }
 0x146   :  { %v1911_v45 = vpop.f32.mrb[40].mxu0  ;;  %v2750_v46 = vadd.f32 %v1974_v42, %v1282_v29 }
 0x147   :  { %v1975_v47 = vpop.f32.mrb[40].mxu1  ;;  %v1912_v48 = vpop.f32.mrb[41].mxu0 }
 0x148   :  { %v1913_v49 = vadd.f32 %v1912_v48, %v1911_v45  ;;  %v1976_v50 = vpop.f32.mrb[41].mxu1  ;;  %v1914_v52 = vpop.f32.mrb[42].mxu0 }
 0x149   :  { %v1977_v54 = vadd.f32 %v1976_v50, %v1975_v47  ;;  %v1978_v56 = vpop.f32.mrb[42].mxu1  ;;  %v1915_v58 = vpop.f32.mrb[43].mxu0 }
 0x14a   :  { %v1287_v41 = vadd.f32 %v1913_v49, %v2716_v55  ;;  %v1916_v59 = vadd.f32 %v1915_v58, %v1914_v52  ;;  %v1979_v60 = vpop.f32.mrb[43].mxu1 }
 0x14b   :  { %v1980_v61 = vadd.f32 %v1979_v60, %v1978_v56 }
 0x14c   :  { %v1290_v43 = vadd.f32 %v1916_v59, %v2718_v57  ;;  %v2754_v62 = vadd.f32 %v1977_v54, %v1287_v41 }
 0x14e   :  { %v1917_v63 = vpop.f32.mrb[44].mxu0  ;;  %v2756_v0 = vadd.f32 %v1980_v61, %v1290_v43 }
 0x14f   :  { %v1981_v1 = vpop.f32.mrb[44].mxu1  ;;  %v1918_v2 = vpop.f32.mrb[45].mxu0 }
 0x150   :  { %v1919_v4 = vadd.f32 %v1918_v2, %v1917_v63  ;;  %v1982_v8 = vpop.f32.mrb[45].mxu1  ;;  %v1920_v9 = vpop.f32.mrb[46].mxu0 }
 0x151   :  { %v1983_v10 = vadd.f32 %v1982_v8, %v1981_v1  ;;  %v1984_v11 = vpop.f32.mrb[46].mxu1  ;;  %v1921_v12 = vpop.f32.mrb[47].mxu0 }
 0x152   :  { %v1295_v55 = vadd.f32 %v1919_v4, %v2720_v5  ;;  %v1922_v13 = vadd.f32 %v1921_v12, %v1920_v9  ;;  %v1985_v14 = vpop.f32.mrb[47].mxu1 }
 0x153   :  { %v1986_v15 = vadd.f32 %v1985_v14, %v1984_v11 }
 0x154   :  { %v1298_v57 = vadd.f32 %v1922_v13, %v2722_v7  ;;  %v2760_v16 = vadd.f32 %v1983_v10, %v1295_v55 }
 0x156   :  { %v1923_v17 = vpop.f32.mrb[48].mxu0  ;;  %v2762_v18 = vadd.f32 %v1986_v15, %v1298_v57 }
 0x157   :  { %v1987_v20 = vpop.f32.mrb[48].mxu1  ;;  %v1924_v22 = vpop.f32.mrb[49].mxu0 }
 0x158   :  { %v1925_v23 = vadd.f32 %v1924_v22, %v1923_v17  ;;  %v1988_v25 = vpop.f32.mrb[49].mxu1  ;;  %v1926_v28 = vpop.f32.mrb[50].mxu0 }
 0x159   :  { %v1989_v30 = vadd.f32 %v1988_v25, %v1987_v20  ;;  %v1990_v31 = vpop.f32.mrb[50].mxu1  ;;  %v1927_v32 = vpop.f32.mrb[51].mxu0 }
 0x15a   :  { %v1303_v5 = vadd.f32 %v1925_v23, %v2724_v19  ;;  %v1928_v33 = vadd.f32 %v1927_v32, %v1926_v28  ;;  %v1991_v34 = vpop.f32.mrb[51].mxu1 }
 0x15b   :  { %v1992_v36 = vadd.f32 %v1991_v34, %v1990_v31 }
 0x15c   :  { %v1306_v7 = vadd.f32 %v1928_v33, %v2726_v21  ;;  %v2766_v38 = vadd.f32 %v1989_v30, %v1303_v5  ;;  %v2783_v33 = vld [vmem:[%s2887_s2] ss:$0 sm:$0xff] }
 0x15e   :  { %v1929_v27 = vpop.f32.mrb[52].mxu0  ;;  %v2768_v39 = vadd.f32 %v1992_v36, %v1306_v7 }
 0x15f   :  { %v1993_v40 = vpop.f32.mrb[52].mxu1  ;;  %v1930_v42 = vpop.f32.mrb[53].mxu0 }
 0x160   :  { %v1931_v29 = vadd.f32 %v1930_v42, %v1929_v27  ;;  %v1994_v45 = vpop.f32.mrb[53].mxu1  ;;  %v1932_v47 = vpop.f32.mrb[54].mxu0 }
 0x161   :  { %v1995_v48 = vadd.f32 %v1994_v45, %v1993_v40  ;;  %v1996_v49 = vpop.f32.mrb[54].mxu1  ;;  %v1933_v50 = vpop.f32.mrb[55].mxu0 }
 0x162   :  { %v1311_v19 = vadd.f32 %v1931_v29, %v2728_v35  ;;  %v1934_v52 = vadd.f32 %v1933_v50, %v1932_v47  ;;  %v1997_v54 = vpop.f32.mrb[55].mxu1 }
 0x163   :  { %v1998_v56 = vadd.f32 %v1997_v54, %v1996_v49 }
 0x164   :  { %v1314_v21 = vadd.f32 %v1934_v52, %v2730_v37  ;;  %v1408_v58 = vadd.f32 %v1995_v48, %v1311_v19 }
 0x166   :  { %v1935_v41 = vpop.f32.mrb[56].mxu0  ;;  %v1411_v59 = vadd.f32 %v1998_v56, %v1314_v21 }
 0x167   :  { %v1999_v60 = vpop.f32.mrb[56].mxu1  ;;  %v1936_v61 = vpop.f32.mrb[57].mxu0 }
 0x168   :  { %v1937_v43 = vadd.f32 %v1936_v61, %v1935_v41  ;;  %v2000_v63 = vpop.f32.mrb[57].mxu1  ;;  %v1938_v1 = vpop.f32.mrb[58].mxu0 }
 0x169   :  { %v2001_v2 = vadd.f32 %v2000_v63, %v1999_v60  ;;  %v2002_v4 = vpop.f32.mrb[58].mxu1  ;;  %v1939_v8 = vpop.f32.mrb[59].mxu0 }
 0x16a   :  { %v1319_v9 = vadd.f32 %v1937_v43, %v2732_v51  ;;  %v1940_v10 = vadd.f32 %v1939_v8, %v1938_v1  ;;  %v2003_v35 = vpop.f32.mrb[59].mxu1 }
 0x16b   :  { %v2004_v11 = vadd.f32 %v2003_v35, %v2002_v4 }
 0x16c   :  { %v1322_v12 = vadd.f32 %v1940_v10, %v2734_v53  ;;  %v2774_v55 = vadd.f32 %v2001_v2, %v1319_v9 }
 0x16e   :  { %v1941_v37 = vpop.f32.mrb[60].mxu0  ;;  %v2776_v13 = vadd.f32 %v2004_v11, %v1322_v12 }
 0x16f   :  { %v2005_v14 = vpop.f32.mrb[60].mxu1  ;;  %v1942_v15 = vpop.f32.mrb[61].mxu0 }
 0x170   :  { %v1943_v57 = vadd.f32 %v1942_v15, %v1941_v37  ;;  %v2006_v17 = vpop.f32.mrb[61].mxu1  ;;  %v1944_v20 = vpop.f32.mrb[62].mxu0 }
 0x171   :  { %v2007_v22 = vadd.f32 %v2006_v17, %v2005_v14  ;;  %v2008_v23 = vpop.f32.mrb[62].mxu1  ;;  %v1945_v25 = vpop.f32.mrb[63].mxu0 }
 0x172   :  { %v1327_v51 = vadd.f32 %v1943_v57, %v2736_v3  ;;  %v1946_v28 = vadd.f32 %v1945_v25, %v1944_v20  ;;  %v2009_v30 = vpop.f32.mrb[63].mxu1  ;;  %v2791_v3 = vld [vmem:[%s2888_s3] ss:$0 sm:$0xff] }
 0x173   :  { %v2010_v31 = vadd.f32 %v2009_v30, %v2008_v23 }
 0x174   :  { %v1330_v53 = vadd.f32 %v1946_v28, %v2738_v6  ;;  %v1424_v32 = vadd.f32 %v2007_v22, %v1327_v51 }
 0x176   :  { %v2045_v5 = vpop.f32.mrb[64].mxu0  ;;  %v2785_v34 = vadd.f32 %v2010_v31, %v1330_v53 }
 0x177   :  { %v1473_v36 = vadd.f32 %v2045_v5, %v2748_v44  ;;  %v2053_v7 = vpop.f32.mrb[64].mxu1  ;;  %v1464_v27 = vpop.f32.mrb[65].mxu0 }
 0x178   :  { %v1505_v40 = vadd.f32 %v2053_v7, %v1408_v58  ;;  %v1465_v6 = vadd.f32 %v1464_v27, %v2742_v24  ;;  %v1496_v42 = vpop.f32.mrb[65].mxu1  ;;  %v2046_v29 = vpop.f32.mrb[66].mxu0 }
 0x179   :  { %v1536_v45 = vmul.f32 %v2783_v33, %v1473_v36  ;;  %v1497_v47 = vadd.f32 %v1496_v42, %v2766_v38  ;;  %v1476_v48 = vadd.f32 %v2046_v29, %v2750_v46  ;;  %v2054_v49 = vpop.f32.mrb[66].mxu1  ;;  %v1467_v44 = vpop.f32.mrb[67].mxu0 }
 0x17a   :  { %v1544_v50 = vmul.f32 %v2783_v33, %v1505_v40  ;;  %v1534_v19 = vmul.f32 %v2783_v33, %v1465_v6  ;;  %v1508_v52 = vadd.f32 %v2054_v49, %v1411_v59  ;;  %v1468_v54 = vadd.f32 %v1467_v44, %v2744_v26  ;;  %v1499_v56 = vpop.f32.mrb[67].mxu1 }
 0x17b   :  { %v1559_v24 = vadd.f32 %v2791_v3, %v1536_v45  ;;  %v1542_v21 = vmul.f32 %v2783_v33, %v1497_v47  ;;  %v1537_v58 = vmul.f32 %v2783_v33, %v1476_v48  ;;  %v1500_v38 = vadd.f32 %v1499_v56, %v2768_v39 }
 0x17c   :  { %v1567_v46 = vadd.f32 %v2791_v3, %v1544_v50  ;;  %v1557_v41 = vadd.f32 %v2791_v3, %v1534_v19  ;;  %v1545_v60 = vmul.f32 %v2783_v33, %v1508_v52  ;;  %v1535_v61 = vmul.f32 %v2783_v33, %v1468_v54 }
 0x17d   :  { %v1575_v59 = vmax.f32 %v1559_v24, 0.0  ;;  %v1565_v26 = vadd.f32 %v2791_v3, %v1542_v21  ;;  %v1560_v43 = vadd.f32 %v2791_v3, %v1537_v58  ;;  %v1543_v63 = vmul.f32 %v2783_v33, %v1500_v38 }
 0x17e   :  { %v1583_v1 = vmax.f32 %v1567_v46, 0.0  ;;  %v1573_v2 = vmax.f32 %v1557_v41, 0.0  ;;  %v1568_v4 = vadd.f32 %v2791_v3, %v1545_v60  ;;  %v1558_v39 = vadd.f32 %v2791_v3, %v1535_v61  ;;  %v2049_v8 = vpop.f32.mrb[68].mxu0 }
 0x17f   :  { %1591 = vst [vmem:[%s2889_s4 + $0x10] sm:$0xff] %v1575_v59  ;;  %v1581_v9 = vmax.f32 %v1565_v26, 0.0  ;;  %v1576_v10 = vmax.f32 %v1560_v43, 0.0  ;;  %v1566_v35 = vadd.f32 %v2791_v3, %v1543_v63  ;;  %v1489_v11 = vadd.f32 %v2049_v8, %v2760_v16  ;;  %v2057_v12 = vpop.f32.mrb[68].mxu1  ;;  %v1480_v37 = vpop.f32.mrb[69].mxu0 }
 0x180   :  { %1599 = vst [vmem:[%s2889_s4 + $0x50] sm:$0xff] %v1583_v1  ;;  %1589 = vst [vmem:[%s2889_s4] sm:$0xff] %v1573_v2  ;;  %v1584_v14 = vmax.f32 %v1568_v4, 0.0  ;;  %v1574_v15 = vmax.f32 %v1558_v39, 0.0  ;;  %v1521_v57 = vadd.f32 %v2057_v12, %v1424_v32  ;;  %v1481_v17 = vadd.f32 %v1480_v37, %v2754_v62  ;;  %v1512_v20 = vpop.f32.mrb[69].mxu1  ;;  %v2050_v22 = vpop.f32.mrb[70].mxu0 }
 0x181   :  { %1597 = vst [vmem:[%s2889_s4 + $0x40] sm:$0xff] %v1581_v9  ;;  %1592 = vst [vmem:[%s2889_s4 + $0x18] sm:$0xff] %v1576_v10  ;;  %v1582_v16 = vmax.f32 %v1566_v35, 0.0  ;;  %v1540_v23 = vmul.f32 %v2783_v33, %v1489_v11  ;;  %v1513_v25 = vadd.f32 %v1512_v20, %v2774_v55  ;;  %v1492_v51 = vadd.f32 %v2050_v22, %v2762_v18  ;;  %v2058_v28 = vpop.f32.mrb[70].mxu1  ;;  %v1483_v30 = vpop.f32.mrb[71].mxu0 }
 0x182   :  { %1600 = vst [vmem:[%s2889_s4 + $0x58] sm:$0xff] %v1584_v14  ;;  %1590 = vst [vmem:[%s2889_s4 + $0x8] sm:$0xff] %v1574_v15  ;;  %v1548_v62 = vmul.f32 %v2783_v33, %v1521_v57  ;;  %v1538_v31 = vmul.f32 %v2783_v33, %v1481_v17  ;;  %v1524_v53 = vadd.f32 %v2058_v28, %v2785_v34  ;;  %v1515_v32 = vpop.f32.mrb[71].mxu1 }
 0x183   :  { %v1484_v55 = vadd.f32 %v1483_v30, %v2756_v0  ;;  %1598 = vst [vmem:[%s2889_s4 + $0x48] sm:$0xff] %v1582_v16  ;;  %v1563_v18 = vadd.f32 %v2791_v3, %v1540_v23  ;;  %v1546_v5 = vmul.f32 %v2783_v33, %v1513_v25  ;;  %v1541_v36 = vmul.f32 %v2783_v33, %v1492_v51 }
 0x184   :  { %v1516_v7 = vadd.f32 %v1515_v32, %v2776_v13  ;;  %v1571_v27 = vadd.f32 %v2791_v3, %v1548_v62  ;;  %v1561_v40 = vadd.f32 %v2791_v3, %v1538_v31  ;;  %v1549_v34 = vmul.f32 %v2783_v33, %v1524_v53 }
 0x185   :  { %v1539_v0 = vmul.f32 %v2783_v33, %v1484_v55  ;;  %v1579_v6 = vmax.f32 %v1563_v18, 0.0  ;;  %v1569_v42 = vadd.f32 %v2791_v3, %v1546_v5  ;;  %v1564_v29 = vadd.f32 %v2791_v3, %v1541_v36 }
 0x186   :  { %v1547_v45 = vmul.f32 %v2783_v33, %v1516_v7  ;;  %v1587_v47 = vmax.f32 %v1571_v27, 0.0  ;;  %v1577_v48 = vmax.f32 %v1561_v40, 0.0  ;;  %v1572_v49 = vadd.f32 %v2791_v3, %v1549_v34 }
 0x187   :  { %v1562_v13 = vadd.f32 %v2791_v3, %v1539_v0  ;;  %1595 = vst [vmem:[%s2889_s4 + $0x30] sm:$0xff] %v1579_v6  ;;  %v1585_v44 = vmax.f32 %v1569_v42, 0.0  ;;  %v1580_v50 = vmax.f32 %v1564_v29, 0.0 }
 0x188   :  { %v1570_v19 = vadd.f32 %v2791_v3, %v1547_v45  ;;  %1603 = vst [vmem:[%s2889_s4 + $0x70] sm:$0xff] %v1587_v47  ;;  %1593 = vst [vmem:[%s2889_s4 + $0x20] sm:$0xff] %v1577_v48  ;;  %v1588_v33 = vmax.f32 %v1572_v49, 0.0 }
 0x189   :  { %v1578_v52 = vmax.f32 %v1562_v13, 0.0  ;;  %1601 = vst [vmem:[%s2889_s4 + $0x60] sm:$0xff] %v1585_v44  ;;  %1596 = vst [vmem:[%s2889_s4 + $0x38] sm:$0xff] %v1580_v50 }
 0x18a   :  { %v1586_v54 = vmax.f32 %v1570_v19, 0.0  ;;  %1604 = vst [vmem:[%s2889_s4 + $0x78] sm:$0xff] %v1588_v33 }
 0x18b   :  { %1594 = vst [vmem:[%s2889_s4 + $0x28] sm:$0xff] %v1578_v52 }
 0x18c   :  { %1602 = vst [vmem:[%s2889_s4 + $0x68] sm:$0xff] %v1586_v54 }

// kernel: my_resnet_forward.37
= control target key start
LH: loop header
LB: loop body
LE: loop exit
PB: predicated region body
PF: predicated region fallthrough
CT: control target
= control target key end

     0   :  { %s256_s1 = inlined_call_operand.vmem [shape: bf16[128,128], index: 1, kind: input, shape index: {}]   ;;  %s257_s0 = inlined_call_operand.vmem [shape: bf16[32,128], index: 0, kind: input, shape index: {}]   ;;  %s258_s2 = inlined_call_operand.vmem [shape: f32[32,128], index: 2, kind: output, shape index: {}]  }
   0x1   :  { %v189_v0 = vld [vmem:[%s256_s1] sm:$0xff]   ;;  %v190_v1 = vld [vmem:[%s256_s1 + $0x8] sm:$0xff]   ;;  %v191_v2 = vld [vmem:[%s256_s1 + $0x10] sm:$0xff]  }
   0x2   :  { %169 = vmatprep.subr.bf16.mxu0 %v189_v0  ;;  %v192_v3 = vld [vmem:[%s256_s1 + $0x18] sm:$0xff]   ;;  %v197_v4 = vld [vmem:[%s257_s0] sm:$0xff]   ;;  %v194_v6 = vld [vmem:[%s256_s1 + $0x28] sm:$0xff]  }
   0x3   :  { %170 = vmatpush3.bf16.msra.mxu0 %v189_v0  ;;  %185 = vmatprep.mubr.bf16.mxu0 %v197_v4  ;;  %v193_v5 = vld [vmem:[%s256_s1 + $0x20] sm:$0xff]   ;;  %v195_v7 = vld [vmem:[%s256_s1 + $0x30] sm:$0xff]   ;;  %v196_v8 = vld [vmem:[%s256_s1 + $0x38] sm:$0xff]  }
   0x4   :  { %171 = vmatprep.subr.bf16.mxu0 %v190_v1  ;;  %v198_v9 = vld [vmem:[%s257_s0 + $0x8] sm:$0xff]  }
   0x7   :  { %172 = vmatpush3.bf16.msra.mxu0 %v190_v1 }
   0x8   :  { %173 = vmatprep.subr.bf16.mxu0 %v191_v2 }
   0xb   :  { %174 = vmatpush3.bf16.msra.mxu0 %v191_v2 }
   0xc   :  { %175 = vmatprep.subr.bf16.mxu0 %v192_v3 }
   0xf   :  { %176 = vmatpush3.bf16.msra.mxu0 %v192_v3 }
  0x10   :  { %177 = vmatprep.subr.bf16.mxu0 %v193_v5 }
  0x13   :  { %178 = vmatpush3.bf16.msra.mxu0 %v193_v5 }
  0x14   :  { %179 = vmatprep.subr.bf16.mxu0 %v194_v6 }
  0x17   :  { %180 = vmatpush3.bf16.msra.mxu0 %v194_v6 }
  0x18   :  { %181 = vmatprep.subr.bf16.mxu0 %v195_v7 }
  0x1b   :  { %182 = vmatpush3.bf16.msra.mxu0 %v195_v7 }
  0x1c   :  { %183 = vmatprep.subr.bf16.mxu0 %v196_v8 }
  0x1f   :  { %184 = vmatpush3.bf16.msra.mxu0 %v196_v8 }
  0x22   :  { %186 = vmatmul.mubr.bf16.vlgmr.msra.gmra.mrb[0].mxu0 %v198_v9 }
  0xf5   :  { %v187_v10 = vpop.f32.mrb[0].mxu0 }
  0xf6   :  { %143 = vst [vmem:[%s258_s2 + $0x10] sm:$0xff] %v187_v10  ;;  %v126_v11 = vpop.f32.mrb[1].mxu0 }
  0xf7   :  { %141 = vst [vmem:[%s258_s2] sm:$0xff] %v126_v11  ;;  %v188_v12 = vpop.f32.mrb[2].mxu0 }
  0xf8   :  { %144 = vst [vmem:[%s258_s2 + $0x18] sm:$0xff] %v188_v12  ;;  %v129_v13 = vpop.f32.mrb[3].mxu0 }
  0xf9   :  { %142 = vst [vmem:[%s258_s2 + $0x8] sm:$0xff] %v129_v13 }

// kernel: my_resnet_forward.38
= control target key start
LH: loop header
LB: loop body
LE: loop exit
PB: predicated region body
PF: predicated region fallthrough
CT: control target
= control target key end

     0   :  { %s1630_s1 = inlined_call_operand.vmem [shape: bf16[1152,128], index: 1, kind: input, shape index: {}]   ;;  %s1631_s0 = inlined_call_operand.vmem [shape: bf16[32,1152], index: 0, kind: input, shape index: {}]   ;;  %s1632_s2 = inlined_call_operand.vmem [shape: f32[1,128], index: 2, kind: input, shape index: {}]   ;;  %s1633_s3 = inlined_call_operand.vmem [shape: f32[1,128], index: 3, kind: input, shape index: {}]   ;;  %s1634_s4 = inlined_call_operand.vmem [shape: f32[32,128], index: 4, kind: output, shape index: {}]  }
   0x1   :  { %v1219_v0 = vld [vmem:[%s1630_s1 + $0x40] sm:$0xff]   ;;  %v1223_v4 = vld [vmem:[%s1630_s1 + $0x48] sm:$0xff]   ;;  %v1227_v8 = vld [vmem:[%s1630_s1 + $0x50] sm:$0xff]  }
   0x2   :  { %v1220_v1 = vld [vmem:[%s1630_s1 + $0xc0] sm:$0xff]   ;;  %1077 = vmatprep.subr.bf16.mxu0 %v1219_v0  ;;  %v1224_v5 = vld [vmem:[%s1630_s1 + $0xc8] sm:$0xff]   ;;  %v1228_v9 = vld [vmem:[%s1630_s1 + $0xd0] sm:$0xff]  }
   0x3   :  { %v1221_v2 = vld [vmem:[%s1630_s1] sm:$0xff]   ;;  %1105 = vmatprep.subr.bf16.mxu1 %v1220_v1  ;;  %v1225_v6 = vld [vmem:[%s1630_s1 + $0x8] sm:$0xff]   ;;  %v1229_v10 = vld [vmem:[%s1630_s1 + $0x10] sm:$0xff]  }
   0x4   :  { %v1222_v3 = vld [vmem:[%s1630_s1 + $0x80] sm:$0xff]   ;;  %1078 = vmatpush3.bf16.msra.mxu0 %v1221_v2  ;;  %v1226_v7 = vld [vmem:[%s1630_s1 + $0x88] sm:$0xff]   ;;  %v1230_v11 = vld [vmem:[%s1630_s1 + $0x90] sm:$0xff]  }
   0x5   :  { %1106 = vmatpush3.bf16.msra.mxu1 %v1222_v3  ;;  %1079 = vmatprep.subr.bf16.mxu0 %v1223_v4  ;;  %v1231_v12 = vld [vmem:[%s1630_s1 + $0x58] sm:$0xff]   ;;  %v1235_v16 = vld [vmem:[%s1630_s1 + $0x60] sm:$0xff]   ;;  %v1239_v20 = vld [vmem:[%s1630_s1 + $0x68] sm:$0xff]  }
   0x6   :  { %1107 = vmatprep.subr.bf16.mxu1 %v1224_v5  ;;  %v1232_v13 = vld [vmem:[%s1630_s1 + $0xd8] sm:$0xff]   ;;  %v1236_v17 = vld [vmem:[%s1630_s1 + $0xe0] sm:$0xff]   ;;  %v1240_v21 = vld [vmem:[%s1630_s1 + $0xe8] sm:$0xff]  }
   0x7   :  { %v1233_v14 = vld [vmem:[%s1630_s1 + $0x18] sm:$0xff]   ;;  %v1237_v18 = vld [vmem:[%s1630_s1 + $0x20] sm:$0xff]   ;;  %v1241_v22 = vld [vmem:[%s1630_s1 + $0x28] sm:$0xff]  }
   0x8   :  { %1080 = vmatpush3.bf16.msra.mxu0 %v1225_v6  ;;  %v1234_v15 = vld [vmem:[%s1630_s1 + $0x98] sm:$0xff]   ;;  %v1238_v19 = vld [vmem:[%s1630_s1 + $0xa0] sm:$0xff]   ;;  %v1242_v23 = vld [vmem:[%s1630_s1 + $0xa8] sm:$0xff]  }
   0x9   :  { %1108 = vmatpush3.bf16.msra.mxu1 %v1226_v7  ;;  %1081 = vmatprep.subr.bf16.mxu0 %v1227_v8  ;;  %v1243_v24 = vld [vmem:[%s1630_s1 + $0x70] sm:$0xff]   ;;  %v1247_v28 = vld [vmem:[%s1630_s1 + $0x78] sm:$0xff]   ;;  %v1251_v32 = vld [vmem:[%s1631_s0] ss:$36 sps:$4 sm:$0xff]  }
   0xa   :  { %1109 = vmatprep.subr.bf16.mxu1 %v1228_v9  ;;  %v1244_v25 = vld [vmem:[%s1630_s1 + $0xf0] sm:$0xff]   ;;  %v1248_v29 = vld [vmem:[%s1630_s1 + $0xf8] sm:$0xff]   ;;  %v1253_v33 = vld [vmem:[%s1631_s0 + $0x4] ss:$36 sps:$4 sm:$0xff]  }
   0xb   :  { %v1245_v26 = vld [vmem:[%s1630_s1 + $0x30] sm:$0xff]   ;;  %v1249_v30 = vld [vmem:[%s1630_s1 + $0x38] sm:$0xff]   ;;  %v1254_v34 = vld [vmem:[%s1631_s0 + $0x8] ss:$36 sps:$4 sm:$0xff]   ;;  %738 = vmatprep.mubr.bf16.mxu0 %v1253_v33 }
   0xc   :  { %1082 = vmatpush3.bf16.msra.mxu0 %v1229_v10  ;;  %v1246_v27 = vld [vmem:[%s1630_s1 + $0xb0] sm:$0xff]   ;;  %v1250_v31 = vld [vmem:[%s1630_s1 + $0xb8] sm:$0xff]   ;;  %v1257_v36 = vld [vmem:[%s1630_s1 + $0x140] sm:$0xff]  }
   0xd   :  { %1110 = vmatpush3.bf16.msra.mxu1 %v1230_v11  ;;  %1083 = vmatprep.subr.bf16.mxu0 %v1231_v12  ;;  %v1256_v35 = vld [vmem:[%s1631_s0 + $0xc] ss:$36 sps:$4 sm:$0xff]   ;;  %v1258_v37 = vld [vmem:[%s1630_s1 + $0x100] sm:$0xff]   ;;  %v1269_v48 = vld [vmem:[%s1630_s1 + $0x158] sm:$0xff]  }
   0xe   :  { %1111 = vmatprep.subr.bf16.mxu1 %v1232_v13  ;;  %787 = vmatprep.mubr.bf16.mxu1 %v1256_v35  ;;  %v1259_v38 = vld [vmem:[%s1630_s1 + $0x1c0] sm:$0xff]   ;;  %v1261_v40 = vld [vmem:[%s1630_s1 + $0x148] sm:$0xff]   ;;  %v1265_v44 = vld [vmem:[%s1630_s1 + $0x150] sm:$0xff]  }
   0xf   :  { %v1260_v39 = vld [vmem:[%s1630_s1 + $0x180] sm:$0xff]   ;;  %v1262_v41 = vld [vmem:[%s1630_s1 + $0x108] sm:$0xff]   ;;  %v1266_v45 = vld [vmem:[%s1630_s1 + $0x110] sm:$0xff]  }
  0x10   :  { %1084 = vmatpush3.bf16.msra.mxu0 %v1233_v14  ;;  %v1263_v42 = vld [vmem:[%s1630_s1 + $0x1c8] sm:$0xff]   ;;  %v1267_v46 = vld [vmem:[%s1630_s1 + $0x1d0] sm:$0xff]   ;;  %v1270_v49 = vld [vmem:[%s1630_s1 + $0x118] sm:$0xff]  }
  0x11   :  { %1112 = vmatpush3.bf16.msra.mxu1 %v1234_v15  ;;  %1085 = vmatprep.subr.bf16.mxu0 %v1235_v16  ;;  %v1264_v43 = vld [vmem:[%s1630_s1 + $0x188] sm:$0xff]   ;;  %v1268_v47 = vld [vmem:[%s1630_s1 + $0x190] sm:$0xff]   ;;  %v1271_v50 = vld [vmem:[%s1630_s1 + $0x1d8] sm:$0xff]  }
  0x12   :  { %1113 = vmatprep.subr.bf16.mxu1 %v1236_v17  ;;  %v1272_v51 = vld [vmem:[%s1630_s1 + $0x198] sm:$0xff]   ;;  %v1273_v52 = vld [vmem:[%s1630_s1 + $0x160] sm:$0xff]   ;;  %v1277_v56 = vld [vmem:[%s1630_s1 + $0x168] sm:$0xff]  }
  0x13   :  { %v1274_v53 = vld [vmem:[%s1630_s1 + $0x120] sm:$0xff]   ;;  %v1278_v57 = vld [vmem:[%s1631_s0 + $0x4c] ss:$36 sps:$4 sm:$0xff]   ;;  %v1280_v58 = vld [vmem:[%s1631_s0 + $0x54] ss:$36 sps:$4 sm:$0xff]  }
  0x14   :  { %1086 = vmatpush3.bf16.msra.mxu0 %v1237_v18  ;;  %v1275_v54 = vld [vmem:[%s1630_s1 + $0x1e0] sm:$0xff]   ;;  %v1282_v59 = vld [vmem:[%s1630_s1 + $0x128] sm:$0xff]   ;;  %v1284_v61 = vld [vmem:[%s1631_s0 + $0x50] ss:$36 sps:$4 sm:$0xff]  }
  0x15   :  { %1114 = vmatpush3.bf16.msra.mxu1 %v1238_v19  ;;  %1087 = vmatprep.subr.bf16.mxu0 %v1239_v20  ;;  %v1276_v55 = vld [vmem:[%s1630_s1 + $0x1a0] sm:$0xff]   ;;  %v1283_v60 = vld [vmem:[%s1631_s0 + $0x48] ss:$36 sps:$4 sm:$0xff]   ;;  %v1287_v0 = vld [vmem:[%s1630_s1 + $0x170] sm:$0xff]  }
  0x16   :  { %1115 = vmatprep.subr.bf16.mxu1 %v1240_v21  ;;  %v1285_v62 = vld [vmem:[%s1630_s1 + $0x1e8] sm:$0xff]   ;;  %v1288_v1 = vld [vmem:[%s1630_s1 + $0x130] sm:$0xff]   ;;  %v1291_v4 = vld [vmem:[%s1630_s1 + $0x178] sm:$0xff]  }
  0x17   :  { %v1286_v63 = vld [vmem:[%s1630_s1 + $0x1a8] sm:$0xff]   ;;  %v1289_v2 = vld [vmem:[%s1630_s1 + $0x1f0] sm:$0xff]   ;;  %v1292_v5 = vld [vmem:[%s1630_s1 + $0x138] sm:$0xff]  }
  0x18   :  { %1088 = vmatpush3.bf16.msra.mxu0 %v1241_v22  ;;  %v1290_v3 = vld [vmem:[%s1630_s1 + $0x1b0] sm:$0xff]   ;;  %v1293_v6 = vld [vmem:[%s1630_s1 + $0x1f8] sm:$0xff]   ;;  %v1298_v10 = vld [vmem:[%s1630_s1 + $0x200] sm:$0xff]  }
  0x19   :  { %1116 = vmatpush3.bf16.msra.mxu1 %v1242_v23  ;;  %1089 = vmatprep.subr.bf16.mxu0 %v1243_v24  ;;  %v1294_v7 = vld [vmem:[%s1631_s0 + $0x10] ss:$36 sps:$4 sm:$0xff]   ;;  %v1297_v9 = vld [vmem:[%s1630_s1 + $0x1b8] sm:$0xff]   ;;  %v1302_v13 = vld [vmem:[%s1630_s1 + $0x208] sm:$0xff]  }
  0x1a   :  { %1117 = vmatprep.subr.bf16.mxu1 %v1244_v25  ;;  %v1296_v8 = vld [vmem:[%s1631_s0 + $0x14] ss:$36 sps:$4 sm:$0xff]   ;;  %v1301_v12 = vld [vmem:[%s1631_s0 + $0x1c] ss:$36 sps:$4 sm:$0xff]   ;;  %v1307_v17 = vld [vmem:[%s1631_s0 + $0x64] ss:$36 sps:$4 sm:$0xff]  }
  0x1b   :  { %v1299_v11 = vld [vmem:[%s1631_s0 + $0x18] ss:$36 sps:$4 sm:$0xff]   ;;  %v1306_v16 = vld [vmem:[%s1630_s1 + $0x210] sm:$0xff]   ;;  %v1309_v18 = vld [vmem:[%s1631_s0 + $0x60] ss:$36 sps:$4 sm:$0xff]  }
  0x1c   :  { %1090 = vmatpush3.bf16.msra.mxu0 %v1245_v26  ;;  %v1303_v14 = vld [vmem:[%s1631_s0 + $0x5c] ss:$36 sps:$4 sm:$0xff]   ;;  %v1312_v22 = vld [vmem:[%s1630_s1 + $0x228] sm:$0xff]   ;;  %v1313_v23 = vld [vmem:[%s1630_s1 + $0x230] sm:$0xff]  }
  0x1d   :  { %1118 = vmatpush3.bf16.msra.mxu1 %v1246_v27  ;;  %1091 = vmatprep.subr.bf16.mxu0 %v1247_v28  ;;  %v1305_v15 = vld [vmem:[%s1631_s0 + $0x58] ss:$36 sps:$4 sm:$0xff]   ;;  %v1311_v20 = vld [vmem:[%s1630_s1 + $0x220] sm:$0xff]   ;;  %v1316_v25 = vld [vmem:[%s1631_s0 + $0x68] ss:$36 sps:$4 sm:$0xff]  }
  0x1e   :  { %1119 = vmatprep.subr.bf16.mxu1 %v1248_v29  ;;  %v1310_v19 = vld [vmem:[%s1630_s1 + $0x218] sm:$0xff]   ;;  %v1315_v21 = vld [vmem:[%s1631_s0 + $0x20] ss:$36 sps:$4 sm:$0xff]  }
  0x1f   :  { %v1314_v24 = vld [vmem:[%s1630_s1 + $0x238] sm:$0xff]  }
  0x20   :  { %1092 = vmatpush3.bf16.msra.mxu0 %v1249_v30 }
  0x21   :  { %1120 = vmatpush3.bf16.msra.mxu1 %v1250_v31  ;;  %1133 = vmatprep.subr.bf16.mxu0 %v1257_v36 }
  0x22   :  { %1161 = vmatprep.subr.bf16.mxu1 %v1259_v38 }
  0x23   :  { %739 = vmatmul.mubr.bf16.vlgmr.msra.gmra.mrb[0].mxu0 %v1251_v32 }
  0x24   :  { %788 = vmatmul.mubr.bf16.vlgmr.msra.gmra.mrb[0].mxu1 %v1254_v34  ;;  %1134 = vmatpush3.bf16.msra.mxu0 %v1258_v37 }
  0x25   :  { %1162 = vmatpush3.bf16.msra.mxu1 %v1260_v39  ;;  %1135 = vmatprep.subr.bf16.mxu0 %v1261_v40 }
  0x26   :  { %1163 = vmatprep.subr.bf16.mxu1 %v1263_v42  ;;  %746 = vmatprep.mubr.bf16.mxu0 %v1278_v57 }
  0x27   :  { %795 = vmatprep.mubr.bf16.mxu1 %v1280_v58 }
  0x28   :  { %1136 = vmatpush3.bf16.msra.mxu0 %v1262_v41 }
  0x29   :  { %1164 = vmatpush3.bf16.msra.mxu1 %v1264_v43  ;;  %1137 = vmatprep.subr.bf16.mxu0 %v1265_v44 }
  0x2a   :  { %1165 = vmatprep.subr.bf16.mxu1 %v1267_v46 }
  0x2b   :  { %747 = vmatmul.mubr.bf16.gmra.mrb[4].mxu0 %v1283_v60 }
  0x2c   :  { %1138 = vmatpush3.bf16.msra.mxu0 %v1266_v45  ;;  %796 = vmatmul.mubr.bf16.gmra.mrb[4].mxu1 %v1284_v61 }
  0x2d   :  { %1166 = vmatpush3.bf16.msra.mxu1 %v1268_v47  ;;  %1139 = vmatprep.subr.bf16.mxu0 %v1269_v48 }
  0x2e   :  { %1167 = vmatprep.subr.bf16.mxu1 %v1271_v50  ;;  %836 = vmatprep.mubr.bf16.mxu0 %v1296_v8 }
  0x2f   :  { %885 = vmatprep.mubr.bf16.mxu1 %v1301_v12 }
  0x30   :  { %1140 = vmatpush3.bf16.msra.mxu0 %v1270_v49 }
  0x31   :  { %1168 = vmatpush3.bf16.msra.mxu1 %v1272_v51  ;;  %1141 = vmatprep.subr.bf16.mxu0 %v1273_v52 }
  0x32   :  { %1169 = vmatprep.subr.bf16.mxu1 %v1275_v54 }
  0x34   :  { %1142 = vmatpush3.bf16.msra.mxu0 %v1274_v53 }
  0x35   :  { %1170 = vmatpush3.bf16.msra.mxu1 %v1276_v55  ;;  %1143 = vmatprep.subr.bf16.mxu0 %v1277_v56 }
  0x36   :  { %1171 = vmatprep.subr.bf16.mxu1 %v1285_v62 }
  0x38   :  { %1144 = vmatpush3.bf16.msra.mxu0 %v1282_v59 }
  0x39   :  { %1172 = vmatpush3.bf16.msra.mxu1 %v1286_v63  ;;  %1145 = vmatprep.subr.bf16.mxu0 %v1287_v0 }
  0x3a   :  { %1173 = vmatprep.subr.bf16.mxu1 %v1289_v2 }
  0x3c   :  { %1146 = vmatpush3.bf16.msra.mxu0 %v1288_v1 }
  0x3d   :  { %1174 = vmatpush3.bf16.msra.mxu1 %v1290_v3  ;;  %1147 = vmatprep.subr.bf16.mxu0 %v1291_v4 }
  0x3e   :  { %1175 = vmatprep.subr.bf16.mxu1 %v1293_v6 }
  0x40   :  { %1148 = vmatpush3.bf16.msra.mxu0 %v1292_v5 }
  0x41   :  { %1176 = vmatpush3.bf16.msra.mxu1 %v1297_v9  ;;  %1199 = vmatprep.subr.bf16.mxu0 %v1298_v10 }
  0x43   :  { %837 = vmatmul.mubr.bf16.vlgmr.msra.gmra.mrb[8].mxu0 %v1294_v7 }
  0x44   :  { %1200 = vmatpush3.bf16.msra.mxu0 %v1298_v10  ;;  %886 = vmatmul.mubr.bf16.vlgmr.msra.gmra.mrb[8].mxu1 %v1299_v11 }
  0x45   :  { %1201 = vmatprep.subr.bf16.mxu0 %v1302_v13  ;;  %844 = vmatprep.mubr.bf16.mxu0 %v1303_v14 }
  0x46   :  { %893 = vmatprep.mubr.bf16.mxu1 %v1307_v17 }
  0x48   :  { %1202 = vmatpush3.bf16.msra.mxu0 %v1302_v13 }
  0x49   :  { %1203 = vmatprep.subr.bf16.mxu0 %v1306_v16 }
  0x4b   :  { %845 = vmatmul.mubr.bf16.gmra.mrb[12].mxu0 %v1305_v15 }
  0x4c   :  { %1204 = vmatpush3.bf16.msra.mxu0 %v1306_v16  ;;  %894 = vmatmul.mubr.bf16.gmra.mrb[12].mxu1 %v1309_v18 }
  0x4d   :  { %1205 = vmatprep.subr.bf16.mxu0 %v1310_v19  ;;  %1215 = vmatprep.mubr.bf16.mxu0 %v1315_v21 }
  0x50   :  { %1206 = vmatpush3.bf16.msra.mxu0 %v1310_v19 }
  0x51   :  { %1207 = vmatprep.subr.bf16.mxu0 %v1311_v20 }
  0x54   :  { %1208 = vmatpush3.bf16.msra.mxu0 %v1311_v20 }
  0x55   :  { %1209 = vmatprep.subr.bf16.mxu0 %v1312_v22 }
  0x58   :  { %1210 = vmatpush3.bf16.msra.mxu0 %v1312_v22 }
  0x59   :  { %1211 = vmatprep.subr.bf16.mxu0 %v1313_v23 }
  0x5c   :  { %1212 = vmatpush3.bf16.msra.mxu0 %v1313_v23  ;;  %v1075_v23 = vld [vmem:[%s1632_s2] ss:$0 sm:$0xff] }
  0x5d   :  { %1213 = vmatprep.subr.bf16.mxu0 %v1314_v24 }
  0x60   :  { %1214 = vmatpush3.bf16.msra.mxu0 %v1314_v24 }
  0x63   :  { %1216 = vmatmul.mubr.bf16.vlgmr.msra.gmra.mrb[16].mxu0 %v1316_v25 }
  0xf6   :  { %v1093_v26 = vpop.f32.mrb[0].mxu0 }
  0xf7   :  { %v1121_v27 = vpop.f32.mrb[0].mxu1  ;;  %v1094_v28 = vpop.f32.mrb[1].mxu0 }
  0xf8   :  { %v1095_v29 = vadd.f32 %v1094_v28, %v1093_v26  ;;  %v1122_v30 = vpop.f32.mrb[1].mxu1  ;;  %v1096_v31 = vpop.f32.mrb[2].mxu0  ;;  %v1076_v26 = vld [vmem:[%s1633_s3] ss:$0 sm:$0xff] }
  0xf9   :  { %v1123_v32 = vadd.f32 %v1122_v30, %v1121_v27  ;;  %v1124_v33 = vpop.f32.mrb[2].mxu1  ;;  %v1097_v34 = vpop.f32.mrb[3].mxu0 }
  0xfa   :  { %v1098_v35 = vadd.f32 %v1097_v34, %v1096_v31  ;;  %v1125_v36 = vpop.f32.mrb[3].mxu1 }
  0xfb   :  { %v790_v37 = vadd.f32 %v1123_v32, %v1095_v29  ;;  %v1126_v38 = vadd.f32 %v1125_v36, %v1124_v33 }
  0xfd   :  { %v793_v39 = vadd.f32 %v1126_v38, %v1098_v35 }
  0xfe   :  { %v1099_v40 = vpop.f32.mrb[4].mxu0 }
  0xff   :  { %v1127_v41 = vpop.f32.mrb[4].mxu1  ;;  %v1100_v42 = vpop.f32.mrb[5].mxu0 }
 0x100   :  { %v1128_v43 = vpop.f32.mrb[5].mxu1  ;;  %v1101_v44 = vadd.f32 %v1100_v42, %v1099_v40  ;;  %v1102_v46 = vpop.f32.mrb[6].mxu0 }
 0x101   :  { %v1129_v45 = vadd.f32 %v1128_v43, %v1127_v41  ;;  %v1130_v47 = vpop.f32.mrb[6].mxu1  ;;  %v1103_v48 = vpop.f32.mrb[7].mxu0 }
 0x102   :  { %v1131_v49 = vpop.f32.mrb[7].mxu1  ;;  %v1104_v51 = vadd.f32 %v1103_v48, %v1102_v46 }
 0x103   :  { %v798_v50 = vadd.f32 %v1129_v45, %v1101_v44  ;;  %v1132_v52 = vadd.f32 %v1131_v49, %v1130_v47 }
 0x105   :  { %v801_v53 = vadd.f32 %v1132_v52, %v1104_v51 }
 0x116   :  { %v1149_v54 = vpop.f32.mrb[8].mxu0 }
 0x117   :  { %v1150_v55 = vpop.f32.mrb[9].mxu0  ;;  %v1177_v58 = vpop.f32.mrb[8].mxu1 }
 0x118   :  { %v1151_v56 = vadd.f32 %v1150_v55, %v1149_v54  ;;  %v1152_v57 = vpop.f32.mrb[10].mxu0  ;;  %v1178_v62 = vpop.f32.mrb[9].mxu1 }
 0x119   :  { %v1153_v59 = vpop.f32.mrb[11].mxu0  ;;  %v1179_v63 = vadd.f32 %v1178_v62, %v1177_v58  ;;  %v1180_v0 = vpop.f32.mrb[10].mxu1 }
 0x11a   :  { %v839_v60 = vadd.f32 %v1151_v56, %v790_v37  ;;  %v1154_v61 = vadd.f32 %v1153_v59, %v1152_v57  ;;  %v1181_v2 = vpop.f32.mrb[11].mxu1 }
 0x11b   :  { %v1182_v3 = vadd.f32 %v1181_v2, %v1180_v0 }
 0x11c   :  { %v842_v1 = vadd.f32 %v1154_v61, %v793_v39  ;;  %v888_v4 = vadd.f32 %v1179_v63, %v839_v60 }
 0x11e   :  { %v1155_v5 = vpop.f32.mrb[12].mxu0  ;;  %v891_v7 = vadd.f32 %v1182_v3, %v842_v1 }
 0x11f   :  { %v1156_v6 = vpop.f32.mrb[13].mxu0  ;;  %v1183_v10 = vpop.f32.mrb[12].mxu1 }
 0x120   :  { %v1157_v8 = vadd.f32 %v1156_v6, %v1155_v5  ;;  %v1158_v9 = vpop.f32.mrb[14].mxu0  ;;  %v1184_v14 = vpop.f32.mrb[13].mxu1 }
 0x121   :  { %v1159_v11 = vpop.f32.mrb[15].mxu0  ;;  %v1185_v15 = vadd.f32 %v1184_v14, %v1183_v10  ;;  %v1186_v16 = vpop.f32.mrb[14].mxu1 }
 0x122   :  { %v847_v12 = vadd.f32 %v1157_v8, %v798_v50  ;;  %v1160_v13 = vadd.f32 %v1159_v11, %v1158_v9  ;;  %v1187_v18 = vpop.f32.mrb[15].mxu1 }
 0x123   :  { %v1188_v19 = vadd.f32 %v1187_v18, %v1186_v16 }
 0x124   :  { %v850_v17 = vadd.f32 %v1160_v13, %v801_v53  ;;  %v896_v20 = vadd.f32 %v1185_v15, %v847_v12 }
 0x126   :  { %v899_v21 = vadd.f32 %v1188_v19, %v850_v17 }
 0x136   :  { %v1217_v22 = vpop.f32.mrb[16].mxu0 }
 0x137   :  { %v945_v24 = vadd.f32 %v1217_v22, %v896_v20  ;;  %v936_v25 = vpop.f32.mrb[17].mxu0 }
 0x138   :  { %v937_v27 = vadd.f32 %v936_v25, %v888_v4  ;;  %v1218_v28 = vpop.f32.mrb[18].mxu0 }
 0x139   :  { %v960_v29 = vmul.f32 %v1075_v23, %v945_v24  ;;  %v948_v30 = vadd.f32 %v1218_v28, %v899_v21  ;;  %v939_v31 = vpop.f32.mrb[19].mxu0 }
 0x13a   :  { %v958_v32 = vmul.f32 %v1075_v23, %v937_v27  ;;  %v940_v33 = vadd.f32 %v939_v31, %v891_v7 }
 0x13b   :  { %v971_v34 = vadd.f32 %v1076_v26, %v960_v29  ;;  %v961_v35 = vmul.f32 %v1075_v23, %v948_v30 }
 0x13c   :  { %v969_v36 = vadd.f32 %v1076_v26, %v958_v32  ;;  %v959_v37 = vmul.f32 %v1075_v23, %v940_v33 }
 0x13d   :  { %v975_v38 = vmax.f32 %v971_v34, 0.0  ;;  %v972_v39 = vadd.f32 %v1076_v26, %v961_v35 }
 0x13e   :  { %v973_v40 = vmax.f32 %v969_v36, 0.0  ;;  %v970_v41 = vadd.f32 %v1076_v26, %v959_v37 }
 0x13f   :  { %979 = vst [vmem:[%s1634_s4 + $0x10] sm:$0xff] %v975_v38  ;;  %v976_v42 = vmax.f32 %v972_v39, 0.0 }
 0x140   :  { %977 = vst [vmem:[%s1634_s4] sm:$0xff] %v973_v40  ;;  %v974_v43 = vmax.f32 %v970_v41, 0.0 }
 0x141   :  { %980 = vst [vmem:[%s1634_s4 + $0x18] sm:$0xff] %v976_v42 }
 0x142   :  { %978 = vst [vmem:[%s1634_s4 + $0x8] sm:$0xff] %v974_v43 }

// kernel: my_resnet_forward.40
= control target key start
LH: loop header
LB: loop body
LE: loop exit
PB: predicated region body
PF: predicated region fallthrough
CT: control target
= control target key end

     0   :  { %s104_s0 = inlined_call_operand.vmem [shape: f32[32,128], index: 0, kind: input, shape index: {}]   ;;  %s105_s1 = inlined_call_operand.vmem [shape: f32[1,128], index: 1, kind: input, shape index: {}]   ;;  %s106_s2 = inlined_call_operand.vmem [shape: f32[1,128], index: 2, kind: input, shape index: {}]   ;;  %s107_s3 = inlined_call_operand.vmem [shape: f32[32,128], index: 3, kind: output, shape index: {}]  }
   0x1   :  { %v14_v0 = vld [vmem:[%s104_s0] sm:$0xff]  ;;  %v15_v4 = vld [vmem:[%s104_s0 + $0x8] sm:$0xff]  ;;  %v16_v5 = vld [vmem:[%s104_s0 + $0x10] sm:$0xff] }
   0x2   :  { %v52_v1 = vld [vmem:[%s105_s1] ss:$0 sm:$0xff]  ;;  %v17_v6 = vld [vmem:[%s104_s0 + $0x18] sm:$0xff] }
   0x3   :  { %v53_v2 = vld [vmem:[%s106_s2] ss:$0 sm:$0xff]  ;;  %v25_v3 = vmul.f32 %v52_v1, %v14_v0  ;;  %v26_v7 = vmul.f32 %v52_v1, %v15_v4  ;;  %v27_v8 = vmul.f32 %v52_v1, %v16_v5  ;;  %v28_v9 = vmul.f32 %v52_v1, %v17_v6 }
   0x5   :  { %v36_v10 = vadd.f32 %v53_v2, %v25_v3  ;;  %v37_v11 = vadd.f32 %v53_v2, %v26_v7  ;;  %v38_v12 = vadd.f32 %v53_v2, %v27_v8  ;;  %v39_v13 = vadd.f32 %v53_v2, %v28_v9 }
   0x7   :  { %v40_v14 = vmax.f32 %v36_v10, 0.0  ;;  %v41_v15 = vmax.f32 %v37_v11, 0.0  ;;  %v42_v16 = vmax.f32 %v38_v12, 0.0  ;;  %v43_v17 = vmax.f32 %v39_v13, 0.0 }
   0x9   :  { %44 = vst [vmem:[%s107_s3] sm:$0xff] %v40_v14  ;;  %45 = vst [vmem:[%s107_s3 + $0x8] sm:$0xff] %v41_v15 }
   0xa   :  { %46 = vst [vmem:[%s107_s3 + $0x10] sm:$0xff] %v42_v16  ;;  %47 = vst [vmem:[%s107_s3 + $0x18] sm:$0xff] %v43_v17 }

// kernel: my_resnet_forward.39
= control target key start
LH: loop header
LB: loop body
LE: loop exit
PB: predicated region body
PF: predicated region fallthrough
CT: control target
= control target key end

     0   :  { %s1604_s1 = inlined_call_operand.vmem [shape: bf16[1152,128], index: 1, kind: input, shape index: {}]   ;;  %s1605_s0 = inlined_call_operand.vmem [shape: bf16[32,1152], index: 0, kind: input, shape index: {}]   ;;  %s1606_s2 = inlined_call_operand.vmem [shape: f32[32,128], index: 2, kind: input, shape index: {}]   ;;  %s1607_s3 = inlined_call_operand.vmem [shape: f32[32,128], index: 3, kind: output, shape index: {}]  }
   0x1   :  { %v1192_v0 = vld [vmem:[%s1604_s1 + $0x40] sm:$0xff]   ;;  %v1196_v4 = vld [vmem:[%s1604_s1 + $0x48] sm:$0xff]   ;;  %v1200_v8 = vld [vmem:[%s1604_s1 + $0x50] sm:$0xff]  }
   0x2   :  { %v1193_v1 = vld [vmem:[%s1604_s1] sm:$0xff]   ;;  %1050 = vmatprep.subr.bf16.mxu0 %v1192_v0  ;;  %v1197_v5 = vld [vmem:[%s1604_s1 + $0x8] sm:$0xff]   ;;  %v1201_v9 = vld [vmem:[%s1604_s1 + $0x10] sm:$0xff]  }
   0x3   :  { %v1194_v2 = vld [vmem:[%s1604_s1 + $0xc0] sm:$0xff]   ;;  %1051 = vmatpush3.bf16.msra.mxu0 %v1193_v1  ;;  %v1198_v6 = vld [vmem:[%s1604_s1 + $0xc8] sm:$0xff]   ;;  %v1202_v10 = vld [vmem:[%s1604_s1 + $0xd0] sm:$0xff]  }
   0x4   :  { %v1195_v3 = vld [vmem:[%s1604_s1 + $0x80] sm:$0xff]   ;;  %1078 = vmatprep.subr.bf16.mxu1 %v1194_v2  ;;  %1052 = vmatprep.subr.bf16.mxu0 %v1196_v4  ;;  %v1199_v7 = vld [vmem:[%s1604_s1 + $0x88] sm:$0xff]   ;;  %v1203_v11 = vld [vmem:[%s1604_s1 + $0x90] sm:$0xff]  }
   0x5   :  { %1079 = vmatpush3.bf16.msra.mxu1 %v1195_v3  ;;  %v1204_v12 = vld [vmem:[%s1604_s1 + $0x58] sm:$0xff]   ;;  %v1208_v16 = vld [vmem:[%s1604_s1 + $0x60] sm:$0xff]   ;;  %v1212_v20 = vld [vmem:[%s1604_s1 + $0x68] sm:$0xff]  }
   0x6   :  { %1080 = vmatprep.subr.bf16.mxu1 %v1198_v6  ;;  %v1205_v13 = vld [vmem:[%s1604_s1 + $0x18] sm:$0xff]   ;;  %v1209_v17 = vld [vmem:[%s1604_s1 + $0x20] sm:$0xff]   ;;  %v1213_v21 = vld [vmem:[%s1604_s1 + $0x28] sm:$0xff]  }
   0x7   :  { %1053 = vmatpush3.bf16.msra.mxu0 %v1197_v5  ;;  %v1206_v14 = vld [vmem:[%s1604_s1 + $0xd8] sm:$0xff]   ;;  %v1210_v18 = vld [vmem:[%s1604_s1 + $0xe0] sm:$0xff]   ;;  %v1214_v22 = vld [vmem:[%s1604_s1 + $0xe8] sm:$0xff]  }
   0x8   :  { %1054 = vmatprep.subr.bf16.mxu0 %v1200_v8  ;;  %v1207_v15 = vld [vmem:[%s1604_s1 + $0x98] sm:$0xff]   ;;  %v1211_v19 = vld [vmem:[%s1604_s1 + $0xa0] sm:$0xff]   ;;  %v1215_v23 = vld [vmem:[%s1604_s1 + $0xa8] sm:$0xff]  }
   0x9   :  { %1081 = vmatpush3.bf16.msra.mxu1 %v1199_v7  ;;  %v1216_v24 = vld [vmem:[%s1604_s1 + $0x70] sm:$0xff]   ;;  %v1220_v28 = vld [vmem:[%s1604_s1 + $0x78] sm:$0xff]   ;;  %v1223_v31 = vld [vmem:[%s1605_s0] ss:$36 sps:$4 sm:$0xff]  }
   0xa   :  { %1082 = vmatprep.subr.bf16.mxu1 %v1202_v10  ;;  %v1217_v25 = vld [vmem:[%s1604_s1 + $0x30] sm:$0xff]   ;;  %v1221_v29 = vld [vmem:[%s1604_s1 + $0x38] sm:$0xff]   ;;  %v1225_v32 = vld [vmem:[%s1605_s0 + $0x4] ss:$36 sps:$4 sm:$0xff]  }
   0xb   :  { %1055 = vmatpush3.bf16.msra.mxu0 %v1201_v9  ;;  %v1218_v26 = vld [vmem:[%s1604_s1 + $0xf0] sm:$0xff]   ;;  %v1222_v30 = vld [vmem:[%s1604_s1 + $0xf8] sm:$0xff]   ;;  %739 = vmatprep.mubr.bf16.mxu0 %v1225_v32  ;;  %v1227_v34 = vld [vmem:[%s1604_s1 + $0x140] sm:$0xff]  }
   0xc   :  { %1056 = vmatprep.subr.bf16.mxu0 %v1204_v12  ;;  %v1219_v27 = vld [vmem:[%s1604_s1 + $0xb0] sm:$0xff]   ;;  %v1226_v33 = vld [vmem:[%s1604_s1 + $0xb8] sm:$0xff]   ;;  %v1228_v35 = vld [vmem:[%s1605_s0 + $0x8] ss:$36 sps:$4 sm:$0xff]  }
   0xd   :  { %1083 = vmatpush3.bf16.msra.mxu1 %v1203_v11  ;;  %v1230_v36 = vld [vmem:[%s1605_s0 + $0xc] ss:$36 sps:$4 sm:$0xff]   ;;  %v1231_v37 = vld [vmem:[%s1604_s1 + $0x100] sm:$0xff]   ;;  %v1242_v48 = vld [vmem:[%s1604_s1 + $0x158] sm:$0xff]  }
   0xe   :  { %1084 = vmatprep.subr.bf16.mxu1 %v1206_v14  ;;  %788 = vmatprep.mubr.bf16.mxu1 %v1230_v36  ;;  %v1232_v38 = vld [vmem:[%s1604_s1 + $0x1c0] sm:$0xff]   ;;  %v1234_v40 = vld [vmem:[%s1604_s1 + $0x148] sm:$0xff]   ;;  %v1238_v44 = vld [vmem:[%s1604_s1 + $0x150] sm:$0xff]  }
   0xf   :  { %1057 = vmatpush3.bf16.msra.mxu0 %v1205_v13  ;;  %v1233_v39 = vld [vmem:[%s1604_s1 + $0x180] sm:$0xff]   ;;  %v1235_v41 = vld [vmem:[%s1604_s1 + $0x108] sm:$0xff]   ;;  %v1239_v45 = vld [vmem:[%s1604_s1 + $0x110] sm:$0xff]  }
  0x10   :  { %1058 = vmatprep.subr.bf16.mxu0 %v1208_v16  ;;  %v1236_v42 = vld [vmem:[%s1604_s1 + $0x1c8] sm:$0xff]   ;;  %v1240_v46 = vld [vmem:[%s1604_s1 + $0x1d0] sm:$0xff]   ;;  %v1243_v49 = vld [vmem:[%s1604_s1 + $0x118] sm:$0xff]  }
  0x11   :  { %1085 = vmatpush3.bf16.msra.mxu1 %v1207_v15  ;;  %v1237_v43 = vld [vmem:[%s1604_s1 + $0x188] sm:$0xff]   ;;  %v1241_v47 = vld [vmem:[%s1604_s1 + $0x190] sm:$0xff]   ;;  %v1244_v50 = vld [vmem:[%s1604_s1 + $0x1d8] sm:$0xff]  }
  0x12   :  { %1086 = vmatprep.subr.bf16.mxu1 %v1210_v18  ;;  %v1245_v51 = vld [vmem:[%s1604_s1 + $0x198] sm:$0xff]   ;;  %v1246_v52 = vld [vmem:[%s1604_s1 + $0x160] sm:$0xff]   ;;  %v1250_v56 = vld [vmem:[%s1604_s1 + $0x168] sm:$0xff]  }
  0x13   :  { %1059 = vmatpush3.bf16.msra.mxu0 %v1209_v17  ;;  %v1247_v53 = vld [vmem:[%s1604_s1 + $0x120] sm:$0xff]   ;;  %v1251_v57 = vld [vmem:[%s1605_s0 + $0x4c] ss:$36 sps:$4 sm:$0xff]   ;;  %v1256_v61 = vld [vmem:[%s1605_s0 + $0x54] ss:$36 sps:$4 sm:$0xff]  }
  0x14   :  { %1060 = vmatprep.subr.bf16.mxu0 %v1212_v20  ;;  %v1248_v54 = vld [vmem:[%s1604_s1 + $0x1e0] sm:$0xff]   ;;  %v1253_v58 = vld [vmem:[%s1604_s1 + $0x128] sm:$0xff]   ;;  %v1259_v63 = vld [vmem:[%s1605_s0 + $0x50] ss:$36 sps:$4 sm:$0xff]  }
  0x15   :  { %1087 = vmatpush3.bf16.msra.mxu1 %v1211_v19  ;;  %v1249_v55 = vld [vmem:[%s1604_s1 + $0x1a0] sm:$0xff]   ;;  %v1254_v59 = vld [vmem:[%s1605_s0 + $0x48] ss:$36 sps:$4 sm:$0xff]   ;;  %v1260_v0 = vld [vmem:[%s1604_s1 + $0x170] sm:$0xff]  }
  0x16   :  { %1088 = vmatprep.subr.bf16.mxu1 %v1214_v22  ;;  %v1255_v60 = vld [vmem:[%s1604_s1 + $0x1e8] sm:$0xff]   ;;  %v1261_v1 = vld [vmem:[%s1604_s1 + $0x130] sm:$0xff]   ;;  %v1264_v4 = vld [vmem:[%s1604_s1 + $0x178] sm:$0xff]  }
  0x17   :  { %1061 = vmatpush3.bf16.msra.mxu0 %v1213_v21  ;;  %v1258_v62 = vld [vmem:[%s1604_s1 + $0x1a8] sm:$0xff]   ;;  %v1262_v2 = vld [vmem:[%s1604_s1 + $0x1f0] sm:$0xff]   ;;  %v1265_v5 = vld [vmem:[%s1604_s1 + $0x138] sm:$0xff]  }
  0x18   :  { %1062 = vmatprep.subr.bf16.mxu0 %v1216_v24  ;;  %v1263_v3 = vld [vmem:[%s1604_s1 + $0x1b0] sm:$0xff]   ;;  %v1266_v6 = vld [vmem:[%s1604_s1 + $0x1f8] sm:$0xff]   ;;  %v1271_v10 = vld [vmem:[%s1604_s1 + $0x200] sm:$0xff]  }
  0x19   :  { %1089 = vmatpush3.bf16.msra.mxu1 %v1215_v23  ;;  %v1267_v7 = vld [vmem:[%s1605_s0 + $0x10] ss:$36 sps:$4 sm:$0xff]   ;;  %v1270_v9 = vld [vmem:[%s1604_s1 + $0x1b8] sm:$0xff]   ;;  %v1275_v13 = vld [vmem:[%s1604_s1 + $0x208] sm:$0xff]  }
  0x1a   :  { %1090 = vmatprep.subr.bf16.mxu1 %v1218_v26  ;;  %v1269_v8 = vld [vmem:[%s1605_s0 + $0x14] ss:$36 sps:$4 sm:$0xff]   ;;  %v1274_v12 = vld [vmem:[%s1605_s0 + $0x1c] ss:$36 sps:$4 sm:$0xff]   ;;  %v1280_v17 = vld [vmem:[%s1605_s0 + $0x64] ss:$36 sps:$4 sm:$0xff]  }
  0x1b   :  { %1063 = vmatpush3.bf16.msra.mxu0 %v1217_v25  ;;  %v1272_v11 = vld [vmem:[%s1605_s0 + $0x18] ss:$36 sps:$4 sm:$0xff]   ;;  %v1279_v16 = vld [vmem:[%s1604_s1 + $0x210] sm:$0xff]   ;;  %v1282_v18 = vld [vmem:[%s1605_s0 + $0x60] ss:$36 sps:$4 sm:$0xff]  }
  0x1c   :  { %1064 = vmatprep.subr.bf16.mxu0 %v1220_v28  ;;  %v1276_v14 = vld [vmem:[%s1605_s0 + $0x5c] ss:$36 sps:$4 sm:$0xff]   ;;  %v1285_v22 = vld [vmem:[%s1604_s1 + $0x228] sm:$0xff]   ;;  %v1286_v23 = vld [vmem:[%s1604_s1 + $0x230] sm:$0xff]  }
  0x1d   :  { %1091 = vmatpush3.bf16.msra.mxu1 %v1219_v27  ;;  %v1278_v15 = vld [vmem:[%s1605_s0 + $0x58] ss:$36 sps:$4 sm:$0xff]   ;;  %v1284_v20 = vld [vmem:[%s1604_s1 + $0x220] sm:$0xff]   ;;  %v1289_v25 = vld [vmem:[%s1605_s0 + $0x68] ss:$36 sps:$4 sm:$0xff]  }
  0x1e   :  { %1092 = vmatprep.subr.bf16.mxu1 %v1222_v30  ;;  %v1283_v19 = vld [vmem:[%s1604_s1 + $0x218] sm:$0xff]   ;;  %v1288_v21 = vld [vmem:[%s1605_s0 + $0x20] ss:$36 sps:$4 sm:$0xff]   ;;  %v180_v32 = vld [vmem:[%s1606_s2 + $0x8] sm:$0xff] }
  0x1f   :  { %1065 = vmatpush3.bf16.msra.mxu0 %v1221_v29  ;;  %v1287_v24 = vld [vmem:[%s1604_s1 + $0x238] sm:$0xff]   ;;  %v179_v27 = vld [vmem:[%s1606_s2] sm:$0xff] }
  0x20   :  { %1106 = vmatprep.subr.bf16.mxu0 %v1227_v34 }
  0x21   :  { %1093 = vmatpush3.bf16.msra.mxu1 %v1226_v33 }
  0x22   :  { %740 = vmatmul.mubr.bf16.vlgmr.msra.gmra.mrb[0].mxu0 %v1223_v31  ;;  %1134 = vmatprep.subr.bf16.mxu1 %v1232_v38 }
  0x23   :  { %1107 = vmatpush3.bf16.msra.mxu0 %v1231_v37  ;;  %747 = vmatprep.mubr.bf16.mxu0 %v1251_v57 }
  0x24   :  { %789 = vmatmul.mubr.bf16.vlgmr.msra.gmra.mrb[0].mxu1 %v1228_v35  ;;  %1108 = vmatprep.subr.bf16.mxu0 %v1234_v40 }
  0x25   :  { %1135 = vmatpush3.bf16.msra.mxu1 %v1233_v39  ;;  %796 = vmatprep.mubr.bf16.mxu1 %v1256_v61 }
  0x26   :  { %1136 = vmatprep.subr.bf16.mxu1 %v1236_v42 }
  0x27   :  { %1109 = vmatpush3.bf16.msra.mxu0 %v1235_v41 }
  0x28   :  { %1110 = vmatprep.subr.bf16.mxu0 %v1238_v44 }
  0x29   :  { %1137 = vmatpush3.bf16.msra.mxu1 %v1237_v43 }
  0x2a   :  { %1138 = vmatprep.subr.bf16.mxu1 %v1240_v46  ;;  %748 = vmatmul.mubr.bf16.gmra.mrb[4].mxu0 %v1254_v59 }
  0x2b   :  { %1111 = vmatpush3.bf16.msra.mxu0 %v1239_v45  ;;  %837 = vmatprep.mubr.bf16.mxu0 %v1269_v8  ;;  %v181_v45 = vld [vmem:[%s1606_s2 + $0x10] sm:$0xff] }
  0x2c   :  { %1112 = vmatprep.subr.bf16.mxu0 %v1242_v48  ;;  %797 = vmatmul.mubr.bf16.gmra.mrb[4].mxu1 %v1259_v63 }
  0x2d   :  { %1139 = vmatpush3.bf16.msra.mxu1 %v1241_v47  ;;  %886 = vmatprep.mubr.bf16.mxu1 %v1274_v12 }
  0x2e   :  { %1140 = vmatprep.subr.bf16.mxu1 %v1244_v50  ;;  %v182_v50 = vld [vmem:[%s1606_s2 + $0x18] sm:$0xff] }
  0x2f   :  { %1113 = vmatpush3.bf16.msra.mxu0 %v1243_v49 }
  0x30   :  { %1114 = vmatprep.subr.bf16.mxu0 %v1246_v52 }
  0x31   :  { %1141 = vmatpush3.bf16.msra.mxu1 %v1245_v51 }
  0x32   :  { %1142 = vmatprep.subr.bf16.mxu1 %v1248_v54 }
  0x33   :  { %1115 = vmatpush3.bf16.msra.mxu0 %v1247_v53 }
  0x34   :  { %1116 = vmatprep.subr.bf16.mxu0 %v1250_v56 }
  0x35   :  { %1143 = vmatpush3.bf16.msra.mxu1 %v1249_v55 }
  0x36   :  { %1144 = vmatprep.subr.bf16.mxu1 %v1255_v60 }
  0x37   :  { %1117 = vmatpush3.bf16.msra.mxu0 %v1253_v58 }
  0x38   :  { %1118 = vmatprep.subr.bf16.mxu0 %v1260_v0 }
  0x39   :  { %1145 = vmatpush3.bf16.msra.mxu1 %v1258_v62 }
  0x3a   :  { %1146 = vmatprep.subr.bf16.mxu1 %v1262_v2 }
  0x3b   :  { %1119 = vmatpush3.bf16.msra.mxu0 %v1261_v1 }
  0x3c   :  { %1120 = vmatprep.subr.bf16.mxu0 %v1264_v4 }
  0x3d   :  { %1147 = vmatpush3.bf16.msra.mxu1 %v1263_v3 }
  0x3e   :  { %1148 = vmatprep.subr.bf16.mxu1 %v1266_v6 }
  0x3f   :  { %1121 = vmatpush3.bf16.msra.mxu0 %v1265_v5 }
  0x40   :  { %1172 = vmatprep.subr.bf16.mxu0 %v1271_v10 }
  0x41   :  { %1149 = vmatpush3.bf16.msra.mxu1 %v1270_v9 }
  0x42   :  { %838 = vmatmul.mubr.bf16.vlgmr.msra.gmra.mrb[8].mxu0 %v1267_v7 }
  0x43   :  { %1173 = vmatpush3.bf16.msra.mxu0 %v1271_v10  ;;  %845 = vmatprep.mubr.bf16.mxu0 %v1276_v14 }
  0x44   :  { %887 = vmatmul.mubr.bf16.vlgmr.msra.gmra.mrb[8].mxu1 %v1272_v11  ;;  %1174 = vmatprep.subr.bf16.mxu0 %v1275_v13 }
  0x45   :  { %894 = vmatprep.mubr.bf16.mxu1 %v1280_v17 }
  0x47   :  { %1175 = vmatpush3.bf16.msra.mxu0 %v1275_v13 }
  0x48   :  { %1176 = vmatprep.subr.bf16.mxu0 %v1279_v16 }
  0x4a   :  { %846 = vmatmul.mubr.bf16.gmra.mrb[12].mxu0 %v1278_v15 }
  0x4b   :  { %1177 = vmatpush3.bf16.msra.mxu0 %v1279_v16  ;;  %1188 = vmatprep.mubr.bf16.mxu0 %v1288_v21 }
  0x4c   :  { %895 = vmatmul.mubr.bf16.gmra.mrb[12].mxu1 %v1282_v18  ;;  %1178 = vmatprep.subr.bf16.mxu0 %v1283_v19 }
  0x4f   :  { %1179 = vmatpush3.bf16.msra.mxu0 %v1283_v19 }
  0x50   :  { %1180 = vmatprep.subr.bf16.mxu0 %v1284_v20 }
  0x53   :  { %1181 = vmatpush3.bf16.msra.mxu0 %v1284_v20 }
  0x54   :  { %1182 = vmatprep.subr.bf16.mxu0 %v1285_v22 }
  0x57   :  { %1183 = vmatpush3.bf16.msra.mxu0 %v1285_v22 }
  0x58   :  { %1184 = vmatprep.subr.bf16.mxu0 %v1286_v23 }
  0x5b   :  { %1185 = vmatpush3.bf16.msra.mxu0 %v1286_v23 }
  0x5c   :  { %1186 = vmatprep.subr.bf16.mxu0 %v1287_v24 }
  0x5f   :  { %1187 = vmatpush3.bf16.msra.mxu0 %v1287_v24 }
  0x62   :  { %1189 = vmatmul.mubr.bf16.vlgmr.msra.gmra.mrb[16].mxu0 %v1289_v25 }
  0xf5   :  { %v1066_v26 = vpop.f32.mrb[0].mxu0 }
  0xf6   :  { %v1067_v28 = vpop.f32.mrb[1].mxu0 }
  0xf7   :  { %v1068_v29 = vadd.f32 %v1067_v28, %v1066_v26  ;;  %v1069_v30 = vpop.f32.mrb[2].mxu0  ;;  %v1094_v31 = vpop.f32.mrb[0].mxu1 }
  0xf8   :  { %v1070_v33 = vpop.f32.mrb[3].mxu0  ;;  %v1095_v36 = vpop.f32.mrb[1].mxu1 }
  0xf9   :  { %v742_v34 = vadd.f32 %v1068_v29, %v179_v27  ;;  %v1071_v35 = vadd.f32 %v1070_v33, %v1069_v30  ;;  %v1096_v37 = vadd.f32 %v1095_v36, %v1094_v31  ;;  %v1097_v38 = vpop.f32.mrb[2].mxu1 }
  0xfa   :  { %v1098_v40 = vpop.f32.mrb[3].mxu1 }
  0xfb   :  { %v745_v39 = vadd.f32 %v1071_v35, %v180_v32  ;;  %v791_v41 = vadd.f32 %v1096_v37, %v742_v34  ;;  %v1099_v42 = vadd.f32 %v1098_v40, %v1097_v38 }
  0xfd   :  { %v794_v43 = vadd.f32 %v1099_v42, %v745_v39  ;;  %v1072_v44 = vpop.f32.mrb[4].mxu0 }
  0xfe   :  { %v1073_v46 = vpop.f32.mrb[5].mxu0 }
  0xff   :  { %v1074_v47 = vadd.f32 %v1073_v46, %v1072_v44  ;;  %v1075_v48 = vpop.f32.mrb[6].mxu0  ;;  %v1100_v49 = vpop.f32.mrb[4].mxu1 }
 0x100   :  { %v1076_v51 = vpop.f32.mrb[7].mxu0  ;;  %v1101_v54 = vpop.f32.mrb[5].mxu1 }
 0x101   :  { %v750_v52 = vadd.f32 %v1074_v47, %v181_v45  ;;  %v1077_v53 = vadd.f32 %v1076_v51, %v1075_v48  ;;  %v1102_v55 = vadd.f32 %v1101_v54, %v1100_v49  ;;  %v1103_v56 = vpop.f32.mrb[6].mxu1 }
 0x102   :  { %v1104_v58 = vpop.f32.mrb[7].mxu1 }
 0x103   :  { %v753_v57 = vadd.f32 %v1077_v53, %v182_v50  ;;  %v799_v59 = vadd.f32 %v1102_v55, %v750_v52  ;;  %v1105_v60 = vadd.f32 %v1104_v58, %v1103_v56 }
 0x105   :  { %v802_v61 = vadd.f32 %v1105_v60, %v753_v57 }
 0x115   :  { %v1122_v62 = vpop.f32.mrb[8].mxu0 }
 0x116   :  { %v1123_v63 = vpop.f32.mrb[9].mxu0 }
 0x117   :  { %v1124_v0 = vadd.f32 %v1123_v63, %v1122_v62  ;;  %v1125_v1 = vpop.f32.mrb[10].mxu0  ;;  %v1150_v2 = vpop.f32.mrb[8].mxu1 }
 0x118   :  { %v1126_v3 = vpop.f32.mrb[11].mxu0  ;;  %v1151_v6 = vpop.f32.mrb[9].mxu1 }
 0x119   :  { %v840_v4 = vadd.f32 %v1124_v0, %v791_v41  ;;  %v1127_v5 = vadd.f32 %v1126_v3, %v1125_v1  ;;  %v1152_v7 = vadd.f32 %v1151_v6, %v1150_v2  ;;  %v1153_v8 = vpop.f32.mrb[10].mxu1 }
 0x11a   :  { %v1154_v10 = vpop.f32.mrb[11].mxu1 }
 0x11b   :  { %v843_v9 = vadd.f32 %v1127_v5, %v794_v43  ;;  %v1155_v11 = vadd.f32 %v1154_v10, %v1153_v8  ;;  %v889_v12 = vadd.f32 %v1152_v7, %v840_v4 }
 0x11d   :  { %v1128_v13 = vpop.f32.mrb[12].mxu0  ;;  %v892_v15 = vadd.f32 %v1155_v11, %v843_v9 }
 0x11e   :  { %v1129_v14 = vpop.f32.mrb[13].mxu0 }
 0x11f   :  { %v1130_v16 = vadd.f32 %v1129_v14, %v1128_v13  ;;  %v1131_v17 = vpop.f32.mrb[14].mxu0  ;;  %v1156_v18 = vpop.f32.mrb[12].mxu1 }
 0x120   :  { %v1132_v19 = vpop.f32.mrb[15].mxu0  ;;  %v1157_v22 = vpop.f32.mrb[13].mxu1 }
 0x121   :  { %v848_v20 = vadd.f32 %v1130_v16, %v799_v59  ;;  %v1133_v21 = vadd.f32 %v1132_v19, %v1131_v17  ;;  %v1158_v23 = vadd.f32 %v1157_v22, %v1156_v18  ;;  %v1159_v24 = vpop.f32.mrb[14].mxu1 }
 0x122   :  { %v1160_v26 = vpop.f32.mrb[15].mxu1 }
 0x123   :  { %v851_v25 = vadd.f32 %v1133_v21, %v802_v61  ;;  %v1161_v27 = vadd.f32 %v1160_v26, %v1159_v24  ;;  %v897_v28 = vadd.f32 %v1158_v23, %v848_v20 }
 0x125   :  { %v900_v29 = vadd.f32 %v1161_v27, %v851_v25 }
 0x135   :  { %v1190_v30 = vpop.f32.mrb[16].mxu0 }
 0x136   :  { %v946_v31 = vadd.f32 %v1190_v30, %v897_v28  ;;  %v937_v32 = vpop.f32.mrb[17].mxu0 }
 0x137   :  { %v938_v33 = vadd.f32 %v937_v32, %v889_v12  ;;  %v1191_v34 = vpop.f32.mrb[18].mxu0 }
 0x138   :  { %954 = vst [vmem:[%s1607_s3 + $0x10] sm:$0xff] %v946_v31  ;;  %v949_v35 = vadd.f32 %v1191_v34, %v900_v29  ;;  %v940_v36 = vpop.f32.mrb[19].mxu0 }
 0x139   :  { %952 = vst [vmem:[%s1607_s3] sm:$0xff] %v938_v33  ;;  %v941_v37 = vadd.f32 %v940_v36, %v892_v15 }
 0x13a   :  { %955 = vst [vmem:[%s1607_s3 + $0x18] sm:$0xff] %v949_v35 }
 0x13b   :  { %953 = vst [vmem:[%s1607_s3 + $0x8] sm:$0xff] %v941_v37 }

// kernel: my_resnet_forward.43
= control target key start
LH: loop header
LB: loop body
LE: loop exit
PB: predicated region body
PF: predicated region fallthrough
CT: control target
= control target key end

     0   :  { %v439_v3 = vmov 0.0|0.0   ;;  %vm440_vm0 = vmmov 0   ;;  %v441_v11 = vmov 0.0   ;;  %s607_s0 = inlined_call_operand.vmem [shape: f32[2,16,128], index: 0, kind: input, shape index: {}]   ;;  %s608_s1 = inlined_call_operand.vmem [shape: f32[128,10], index: 1, kind: input, shape index: {}]   ;;  %s609_s2 = inlined_call_operand.vmem [shape: f32[128,10], index: 2, kind: input, shape index: {}]   ;;  %s610_s3 = inlined_call_operand.vmem [shape: f32[1,10], index: 3, kind: input, shape index: {}]   ;;  %s611_s4 = inlined_call_operand.hbm [shape: f32[2,10], index: 4, kind: output, shape index: {}]  }
   0x1   :  { %v69_v0 = vld [vmem:[%s609_s2] sm:$0xff]  ;;  %v70_v1 = vld [vmem:[%s609_s2 + $0x8] sm:$0xff]  ;;  %363 = vmatprep.subr.bf16.mxu0 %v439_v3  ;;  %387 = vmatprep.subr.bf16.mxu1 %v439_v3  ;;  %v71_v6 = vld [vmem:[%s609_s2 + $0x10] sm:$0xff] }
   0x2   :  { %v53_v2 = vld [vmem:[%s608_s1] sm:$0xff]  ;;  %v364_v4 = vpack.c.bf16 %v70_v1, %v69_v0  ;;  %v54_v5 = vld [vmem:[%s608_s1 + $0x8] sm:$0xff]  ;;  %v72_v7 = vld [vmem:[%s609_s2 + $0x18] sm:$0xff]  ;;  %325 = vmatprep.mubr.msk.f32.mxu0 %vm440_vm0, %v441_v11  ;;  %360 = vmatprep.mubr.msk.f32.mxu1 %vm440_vm0, %v441_v11 }
   0x3   :  { %v388_v8 = vpack.c.bf16 %v54_v5, %v53_v2  ;;  %v55_v9 = vld [vmem:[%s608_s1 + $0x10] sm:$0xff]  ;;  %v56_v10 = vld [vmem:[%s608_s1 + $0x18] sm:$0xff]  ;;  %v367_v12 = vpack.c.bf16 %v72_v7, %v71_v6  ;;  %v73_v14 = vld [vmem:[%s609_s2 + $0x20] sm:$0xff] }
   0x4   :  { %365 = vmatpush3.bf16.msra.mxu0 %v364_v4  ;;  %v391_v13 = vpack.c.bf16 %v56_v10, %v55_v9  ;;  %v74_v15 = vld [vmem:[%s609_s2 + $0x28] sm:$0xff]  ;;  %v57_v16 = vld [vmem:[%s608_s1 + $0x20] sm:$0xff]  ;;  %v75_v19 = vld [vmem:[%s609_s2 + $0x30] sm:$0xff] }
   0x5   :  { %389 = vmatpush3.bf16.msra.mxu1 %v388_v8  ;;  %366 = vmatprep.subr.bf16.mxu0 %v439_v3  ;;  %v58_v17 = vld [vmem:[%s608_s1 + $0x28] sm:$0xff]  ;;  %v370_v18 = vpack.c.bf16 %v74_v15, %v73_v14  ;;  %v76_v21 = vld [vmem:[%s609_s2 + $0x38] sm:$0xff]  ;;  %v59_v22 = vld [vmem:[%s608_s1 + $0x30] sm:$0xff] }
   0x6   :  { %390 = vmatprep.subr.bf16.mxu1 %v439_v3  ;;  %v394_v20 = vpack.c.bf16 %v58_v17, %v57_v16  ;;  %v60_v23 = vld [vmem:[%s608_s1 + $0x38] sm:$0xff]  ;;  %v77_v24 = vld [vmem:[%s609_s2 + $0x40] sm:$0xff]  ;;  %v78_v25 = vld [vmem:[%s609_s2 + $0x48] sm:$0xff]  ;;  %v373_v27 = vpack.c.bf16 %v76_v21, %v75_v19 }
   0x7   :  { %v18_v26 = vld [vmem:[%s607_s0] sm:$0xff]  ;;  %v397_v28 = vpack.c.bf16 %v60_v23, %v59_v22  ;;  %v19_v29 = vld [vmem:[%s607_s0 + $0x8] sm:$0xff]  ;;  %v20_v30 = vld [vmem:[%s607_s0 + $0x10] sm:$0xff] }
   0x8   :  { %368 = vmatpush3.bf16.msra.mxu0 %v367_v12  ;;  %v21_v31 = vld [vmem:[%s607_s0 + $0x18] sm:$0xff]  ;;  %v61_v32 = vld [vmem:[%s608_s1 + $0x40] sm:$0xff]  ;;  %v62_v33 = vld [vmem:[%s608_s1 + $0x48] sm:$0xff]  ;;  %v39_v34 = vmax.f32 %v18_v26, %v19_v29  ;;  %v22_v36 = vadd.f32 %v19_v29, %v18_v26 }
   0x9   :  { %392 = vmatpush3.bf16.msra.mxu1 %v391_v13  ;;  %369 = vmatprep.subr.bf16.mxu0 %v439_v3  ;;  %v46_v35 = vmax.f32 %v20_v30, %v21_v31 }
   0xa   :  { %393 = vmatprep.subr.bf16.mxu1 %v439_v3 }
   0xc   :  { %371 = vmatpush3.bf16.msra.mxu0 %v370_v18 }
   0xd   :  { %395 = vmatpush3.bf16.msra.mxu1 %v394_v20  ;;  %372 = vmatprep.subr.bf16.mxu0 %v439_v3 }
   0xe   :  { %9 = vsyncpa [#allocation3], 0  ;;  %396 = vmatprep.subr.bf16.mxu1 %v439_v3  ;;  %v29_v37 = vadd.f32 %v21_v31, %v20_v30  ;;  %v40_v38 = vrot.slane %v39_v34, 4  ;;  %v47_v39 = vrot.slane %v46_v35, 4  ;;  %v23_v40 = vrot.slane %v22_v36, 4  ;;  %v79_v43 = vld [vmem:[%s609_s2 + $0x50] sm:$0xff] }
   0xf   :  { %v376_v41 = vpack.c.bf16 %v78_v25, %v77_v24  ;;  %v400_v42 = vpack.c.bf16 %v62_v33, %v61_v32  ;;  %v80_v45 = vld [vmem:[%s609_s2 + $0x58] sm:$0xff]  ;;  %v63_v46 = vld [vmem:[%s608_s1 + $0x50] sm:$0xff]  ;;  %v81_v58 = vld [vmem:[%s609_s2 + $0x60] sm:$0xff]  ;;  %vm87_vm1 = vcmask 1041409   ;;  %s442_s8 = smov [#allocation2]   ;;  %vm242_vm2 = vcmask 74752  }
  0x10   :  { %374 = vmatpush3.bf16.msra.mxu0 %v373_v27  ;;  %v30_v44 = vrot.slane %v29_v37, 4  ;;  %v64_v47 = vld [vmem:[%s608_s1 + $0x58] sm:$0xff]  ;;  %v41_v48 = vmax.f32 %v39_v34, %v40_v38  ;;  %v48_v49 = vmax.f32 %v46_v35, %v47_v39  ;;  %v24_v50 = vadd.f32 %v23_v40, %v22_v36  ;;  %v82_v59 = vld [vmem:[%s609_s2 + $0x68] sm:$0xff]  ;;  %v65_v63 = vld [vmem:[%s608_s1 + $0x60] sm:$0xff]  ;;  %s250_s9 = sshll.u32 %s442_s8, 4  ;;  %s251_s9 = int_to_ptr.vmem [resolvable:$true] %s250_s9 }
  0x11   :  { %398 = vmatpush3.bf16.msra.mxu1 %v397_v28  ;;  %375 = vmatprep.subr.bf16.mxu0 %v439_v3  ;;  %v379_v55 = vpack.c.bf16 %v80_v45, %v79_v43  ;;  %v403_v56 = vpack.c.bf16 %v64_v47, %v63_v46  ;;  %v66_v0 = vld [vmem:[%s608_s1 + $0x68] sm:$0xff]  ;;  %v382_v4 = vpack.c.bf16 %v82_v59, %v81_v58  ;;  %v83_v9 = vld [vmem:[%s609_s2 + $0x70] sm:$0xff]  ;;  %v84_v10 = vld [vmem:[%s609_s2 + $0x78] sm:$0xff]  ;;  %s415_s10 = scalar_lea.vmem %s251_s9, 32  ;;  %p420_p1 = scmp.lt.s32.totalorder %s251_s9, %s251_s9 }
  0x12   :  { %399 = vmatprep.subr.bf16.mxu1 %v439_v3  ;;  %v31_v51 = vadd.f32 %v30_v44, %v29_v37  ;;  %v42_v52 = vrot.slane %v41_v48, 2  ;;  %v49_v53 = vrot.slane %v48_v49, 2  ;;  %v25_v54 = vrot.slane %v24_v50, 2  ;;  %v67_v12 = vld [vmem:[%s608_s1 + $0x70] sm:$0xff]  ;;  %v68_v13 = vld [vmem:[%s608_s1 + $0x78] sm:$0xff]  ;;  %p416_p0 = scmp.ne.s32.totalorder %s251_s9, %s415_s10  ;;  %p421_p2 = scmp.lt.s32.totalorder %s415_s10, %s415_s10 }
  0x13   :  { %v406_v8 = vpack.c.bf16 %v66_v0, %v65_v63  ;;  %v385_v15 = vpack.c.bf16 %v84_v10, %v83_v9  ;;  %v409_v18 = vpack.c.bf16 %v68_v13, %v67_v12  ;;  %v258_v25 = vld [vmem:[%s610_s3] ss:$0 sm:$0xff] }
  0x14   :  { %377 = vmatpush3.bf16.msra.mxu0 %v376_v41  ;;  %v32_v57 = vrot.slane %v31_v51, 2  ;;  %v43_v60 = vmax.f32 %v41_v48, %v42_v52  ;;  %v50_v61 = vmax.f32 %v48_v49, %v49_v53  ;;  %v26_v62 = vadd.f32 %v25_v54, %v24_v50  ;;  %p422_p3 = por %p421_p2, %p420_p1 }
  0x15   :  { %401 = vmatpush3.bf16.msra.mxu1 %v400_v42  ;;  %378 = vmatprep.subr.bf16.mxu0 %v439_v3 }
  0x16   :  { %402 = vmatprep.subr.bf16.mxu1 %v439_v3  ;;  %v33_v1 = vadd.f32 %v32_v57, %v31_v51  ;;  %v27_v2 = vrot.slane %v26_v62, 1  ;;  %v44_v5 = vrot.slane %v43_v60, 1  ;;  %v51_v6 = vrot.slane %v50_v61, 1  ;;  %p423_p4 = pnand %p422_p3, %p416_p0 }
  0x18   :  { %380 = vmatpush3.bf16.msra.mxu0 %v379_v55  ;;  %v34_v7 = vrot.slane %v33_v1, 1  ;;  %v28_v11 = vadd.f32 %v27_v2, %v26_v62  ;;  %v45_v16 = vmax.f32 %v43_v60, %v44_v5  ;;  %v52_v17 = vmax.f32 %v50_v61, %v51_v6 }
  0x19   :  { %404 = vmatpush3.bf16.msra.mxu1 %v403_v56  ;;  %381 = vmatprep.subr.bf16.mxu0 %v439_v3 }
  0x1a   :  { %405 = vmatprep.subr.bf16.mxu1 %v439_v3  ;;  %v35_v14 = vadd.f32 %v34_v7, %v33_v1  ;;  %v37_v19 = vmul.f32 0.0625, %v28_v11  ;;  %v88_v21 = vsel %vm87_vm1, %v52_v17, %v45_v16 }
  0x1c   :  { %383 = vmatpush3.bf16.msra.mxu0 %v382_v4  ;;  %v38_v20 = vmul.f32 0.0625, %v35_v14 }
  0x1d   :  { %407 = vmatpush3.bf16.msra.mxu1 %v406_v8  ;;  %384 = vmatprep.subr.bf16.mxu0 %v439_v3 }
  0x1e   :  { %408 = vmatprep.subr.bf16.mxu1 %v439_v3  ;;  %v162_v22 = vsel %vm87_vm1, %v38_v20, %v37_v19 }
  0x20   :  { %386 = vmatpush3.bf16.msra.mxu0 %v385_v15 }
  0x21   :  { %410 = vmatpush3.bf16.msra.mxu1 %v409_v18 }
  0x23   :  { %326 = vmatmul.mubr.f32.vlgmr.msra.gmra.mrb[0].mxu0 %v88_v21 }
  0x24   :  { %361 = vmatmul.mubr.f32.vlgmr.msra.gmra.mrb[0].mxu1 %v162_v22 }
  0xf6   :  { %v156_v23 = vpop.f32.mrb[0].mxu0 }
  0xf7   :  { %v230_v24 = vpop.f32.mrb[0].mxu1  ;;  %v327_v26 = vpop.f32.mrb[1].mxu0 }
  0xf8   :  { %v231_v27 = vadd.f32 %v230_v24, %v156_v23  ;;  %v362_v28 = vpop.f32.mrb[1].mxu1 }
  0xfa   :  { %v241_v29 = vadd.f32 %v258_v25, %v231_v27 }
  0xfc   :  { %243 = vst.msk [vmem:[#allocation2] sm:$0x3] %vm242_vm2, %v241_v29 }
  0xfd   :  { %426 = shalt.err (!%p423_p4)
}
  0xfe   :  { %s427_s3 = scalar_lea.hbm %s611_s4, 32 }
  0xff   :  { %p428_p5 = scmp.ne.s32.totalorder %s611_s4, %s427_s3  ;;  %p431_p6 = scmp.lt.u32.totalorder %s427_s3, %s611_s4 }
 0x101   :  { %p433_p7 = pnand %p431_p6, %p428_p5 }
 0x103   :  { %436 = shalt.err (!%p433_p7)
}
 0x104   :  { %253 = dma.vmem_to_hbm [thread:$0]  %s251_s9, 32, %s611_s4, [#allocation3]  }
 0x105   :  { %437 = dma.done.wait [#allocation3], 32  }
 0x106   :  { %438 = vsyncadd [#allocation3], 4294967264 }
 0x107   :  { %257 = vsyncpa [#allocation3], 1 }

</bundles_post_ra>
